<compile_context>
chip_gen: v5e
topology: v5e:2x2
jax: 0.10.0
libtpu: 0.0.40
codegen_flags: <defaults>
</compile_context>

<pallas_src>
import functools

import jax
import jax.numpy as jnp
from jax.experimental import pallas as pl
from jax.experimental.pallas import tpu as pltpu


def _round_up(n, m):
    return ((n + m - 1) // m) * m


# ----------------------------- Pallas kernel ------------------------------ #

def _gru_kernel(x_ref,
                w_ih0_ref, w_hh0_ref, b_ih0_ref, b_hh0_ref,
                w_ih1_ref, w_hh1_ref, b_ih1_ref, b_hh1_ref,
                w_fc_ref, b_fc_ref,
                out_ref,
                *, seq_len, batch_pad, hidden_pad):
    S, Bp, H = seq_len, batch_pad, hidden_pad

    # ---- Phase 1: hoisted layer-0 input projection (one big MXU call). ----
    # x_ref: (S*Bp, F_pad)  ->  gi0_all: (S*Bp, 3*H)
    gi0_all = (jnp.dot(x_ref[...], w_ih0_ref[...],
                       preferred_element_type=jnp.float32)
               + b_ih0_ref[...])

    # ---- Hoist weight loads / bias broadcasts out of the time loop. ----
    w_hh0 = w_hh0_ref[...]
    w_ih1 = w_ih1_ref[...]
    w_hh1 = w_hh1_ref[...]
    b_hh0 = jnp.broadcast_to(b_hh0_ref[...], (Bp, 3 * H))
    b_ih1 = jnp.broadcast_to(b_ih1_ref[...], (Bp, 3 * H))
    b_hh1 = jnp.broadcast_to(b_hh1_ref[...], (Bp, 3 * H))

    def gru_update(gi, gh, h_prev):
        # gate order (r, z, n) like torch.nn.GRU; slices are 128-lane aligned.
        r = jax.nn.sigmoid(gi[:, 0:H] + gh[:, 0:H])
        z = jax.nn.sigmoid(gi[:, H:2 * H] + gh[:, H:2 * H])
        n = jnp.tanh(gi[:, 2 * H:3 * H] + r * gh[:, 2 * H:3 * H])
        return (1.0 - z) * n + z * h_prev

    h1 = jnp.zeros((Bp, H), jnp.float32)   # h0 = zeros (matches torch.zeros)
    h2 = jnp.zeros((Bp, H), jnp.float32)

    # ---- Phase 2: serial recurrence, statically unrolled (S is static). ----
    for t in range(S):
        gi0 = gi0_all[t * Bp:(t + 1) * Bp, :]            # tile-aligned view
        gh0 = jnp.dot(h1, w_hh0, preferred_element_type=jnp.float32) + b_hh0
        h1 = gru_update(gi0, gh0, h1)

        gi1 = jnp.dot(h1, w_ih1, preferred_element_type=jnp.float32) + b_ih1
        gh1 = jnp.dot(h2, w_hh1, preferred_element_type=jnp.float32) + b_hh1
        h2 = gru_update(gi1, gh1, h2)

    # ---- Phase 3: FC head on last hidden state (full-tile unmasked store). --
    out_ref[...] = (jnp.dot(h2, w_fc_ref[...],
                            preferred_element_type=jnp.float32)
                    + b_fc_ref[...]).astype(out_ref.dtype)


# ------------------------------- Wrapper ----------------------------------- #

def my_gru_forward(x, params, *, hidden_size):
    """x: (B, S, F) float32, batch_first like the PyTorch module."""
    B, S, F = x.shape
    H = hidden_size
    O = params["w_fc"].shape[1]

    # Hardware-friendly padded sizes: sublane multiple of 8, lane multiple 128.
    Bp = _round_up(max(B, 8), 8)
    Fp = _round_up(F, 128)
    Hp = _round_up(H, 128)
    Op = _round_up(O, 128)

    def pad_gates_w(w, in_dim, in_pad):
        # (in_dim, 3H) -> (in_pad, 3*Hp); each gate starts at a 128-aligned col.
        blocks = [jnp.pad(w[:, g * H:(g + 1) * H],
                          ((0, in_pad - in_dim), (0, Hp - H)))
                  for g in range(3)]
        return jnp.concatenate(blocks, axis=1)

    def pad_gates_b(b):
        blocks = [jnp.pad(b[:, g * H:(g + 1) * H], ((0, 0), (0, Hp - H)))
                  for g in range(3)]
        return jnp.concatenate(blocks, axis=1)

    w_ih0 = pad_gates_w(params["w_ih0"], F, Fp)
    w_hh0 = pad_gates_w(params["w_hh0"], H, Hp)
    w_ih1 = pad_gates_w(params["w_ih1"], H, Hp)
    w_hh1 = pad_gates_w(params["w_hh1"], H, Hp)
    b_ih0 = pad_gates_b(params["b_ih0"])
    b_hh0 = pad_gates_b(params["b_hh0"])
    b_ih1 = pad_gates_b(params["b_ih1"])
    b_hh1 = pad_gates_b(params["b_hh1"])
    w_fc = jnp.pad(params["w_fc"], ((0, Hp - H), (0, Op - O)))
    b_fc = jnp.pad(params["b_fc"], ((0, 0), (0, Op - O)))

    # (B,S,F) -> (S, Bp, Fp) -> (S*Bp, Fp): one lane/sublane-dense slab so the
    # hoisted layer-0 projection is a single well-shaped MXU matmul.
    x_sbf = jnp.transpose(x, (1, 0, 2))
    x_sbf = jnp.pad(x_sbf, ((0, 0), (0, Bp - B), (0, Fp - F)))
    x2d = x_sbf.reshape(S * Bp, Fp)

    kernel = functools.partial(_gru_kernel,
                               seq_len=S, batch_pad=Bp, hidden_pad=Hp)
    vmem = pl.BlockSpec(memory_space=pltpu.MemorySpace.VMEM)

    # Single invocation (no grid): whole problem is resident in VMEM, the time
    # loop lives inside the kernel, weights are single-buffered.
    # TODO(synk): for large batch on v7x, shard the batch across the 2 TCs.
    out = pl.pallas_call(
        kernel,
        out_shape=jax.ShapeDtypeStruct((Bp, Op), jnp.float32),
        in_specs=[vmem] * 11,
        out_specs=vmem,
    )(x2d,
      w_ih0, w_hh0, b_ih0, b_hh0,
      w_ih1, w_hh1, b_ih1, b_hh1,
      w_fc, b_fc)

    return out[:B, :O]


# ------------------------- Pure-JAX reference ------------------------------ #

def my_gru_reference(x, params, *, hidden_size):
    B, S, F = x.shape
    H = hidden_size

    def cell(x_t, h_prev, w_ih, w_hh, b_ih, b_hh):
        gi = x_t @ w_ih + b_ih
        gh = h_prev @ w_hh + b_hh
        r = jax.nn.sigmoid(gi[:, 0:H] + gh[:, 0:H])
        z = jax.nn.sigmoid(gi[:, H:2 * H] + gh[:, H:2 * H])
        n = jnp.tanh(gi[:, 2 * H:3 * H] + r * gh[:, 2 * H:3 * H])
        return (1.0 - z) * n + z * h_prev

    h1 = jnp.zeros((B, H), jnp.float32)
    h2 = jnp.zeros((B, H), jnp.float32)
    for t in range(S):
        x_t = x[:, t, :]
        h1 = cell(x_t, h1, params["w_ih0"], params["w_hh0"],
                  params["b_ih0"], params["b_hh0"])
        h2 = cell(h1, h2, params["w_ih1"], params["w_hh1"],
                  params["b_ih1"], params["b_hh1"])
    return h2 @ params["w_fc"] + params["b_fc"]


# ---------------------------------- Main ----------------------------------- #

def make_params(key, in_features, hidden_size, out_features):
    """Deterministic init mimicking torch's U(-1/sqrt(H), 1/sqrt(H))."""
    H = hidden_size
    bound = 1.0 / jnp.sqrt(jnp.float32(H))
    keys = jax.random.split(key, 11)
    u = lambda k, shape: jax.random.uniform(k, shape, jnp.float32, -bound, bound)
    return {
        # layer 0
        "w_ih0": u(keys[0], (in_features, 3 * H)),
        "w_hh0": u(keys[1], (H, 3 * H)),
        "b_ih0": u(keys[2], (1, 3 * H)),
        "b_hh0": u(keys[3], (1, 3 * H)),
        # layer 1
        "w_ih1": u(keys[4], (H, 3 * H)),
        "w_hh1": u(keys[5], (H, 3 * H)),
        "b_ih1": u(keys[6], (1, 3 * H)),
        "b_hh1": u(keys[7], (1, 3 * H)),
        # fc head
        "w_fc": u(keys[8], (H, out_features)),
        "b_fc": u(keys[9], (1, out_features)),
    }


if __name__ == "__main__":
    B, S, F = 2, 8, 16          # batch, seq, in_features
    H, O = 32, 4                # hidden_size, out_features
    NUM_LAYERS = 2              # matches the PyTorch module (hard-wired here)

    key = jax.random.PRNGKey(0)
    kx, kp = jax.random.split(key)
    x = jax.random.normal(kx, (B, S, F), jnp.float32)
    params = make_params(kp, F, H, O)

    out = my_gru_forward(x, params, hidden_size=H)
    out = jax.block_until_ready(out)

    ref = my_gru_reference(x, params, hidden_size=H)
    assert out.shape == (B, O)
    assert jnp.allclose(out, ref, atol=1e-4, rtol=1e-4), (out, ref)

    print("KERNEL_OK")
</pallas_src>

<mosaic_0001>
module attributes {stable_mosaic.version = 11 : i64} {
  func.func @_gru_kernel(%arg0: memref<64x128xf32, #tpu.memory_space<vmem>>, %arg1: memref<128x384xf32, #tpu.memory_space<vmem>>, %arg2: memref<128x384xf32, #tpu.memory_space<vmem>>, %arg3: memref<1x384xf32, #tpu.memory_space<vmem>>, %arg4: memref<1x384xf32, #tpu.memory_space<vmem>>, %arg5: memref<128x384xf32, #tpu.memory_space<vmem>>, %arg6: memref<128x384xf32, #tpu.memory_space<vmem>>, %arg7: memref<1x384xf32, #tpu.memory_space<vmem>>, %arg8: memref<1x384xf32, #tpu.memory_space<vmem>>, %arg9: memref<128x128xf32, #tpu.memory_space<vmem>>, %arg10: memref<1x128xf32, #tpu.memory_space<vmem>>, %arg11: memref<8x128xf32, #tpu.memory_space<vmem>>) attributes {dimension_semantics = [], scalar_prefetch = 0 : i64, scratch_operands = 0 : i64, tpu.core_type = #tpu.core_type<tc>} {
    %c0 = arith.constant 0 : index
    %c0_0 = arith.constant 0 : index
    %0 = vector.load %arg0[%c0, %c0_0] : memref<64x128xf32, #tpu.memory_space<vmem>>, vector<64x128xf32>
    %c0_1 = arith.constant 0 : index
    %c0_2 = arith.constant 0 : index
    %1 = vector.load %arg1[%c0_1, %c0_2] : memref<128x384xf32, #tpu.memory_space<vmem>>, vector<128x384xf32>
    %cst = arith.constant dense<0.000000e+00> : vector<64x384xf32>
    %2 = tpu.matmul %0, %1, %cst {dimension_numbers = #tpu.dot_dimension_numbers<[1], [0], [0], [1], [0, 0, 1, 1], [], []>} : vector<64x128xf32>, vector<128x384xf32>, vector<64x384xf32> -> vector<64x384xf32>
    %c0_3 = arith.constant 0 : index
    %c0_4 = arith.constant 0 : index
    %3 = vector.load %arg3[%c0_3, %c0_4] : memref<1x384xf32, #tpu.memory_space<vmem>>, vector<1x384xf32>
    %4 = vector.broadcast %3 : vector<1x384xf32> to vector<64x384xf32>
    %5 = arith.addf %2, %4 : vector<64x384xf32>
    %c0_5 = arith.constant 0 : index
    %c0_6 = arith.constant 0 : index
    %6 = vector.load %arg2[%c0_5, %c0_6] : memref<128x384xf32, #tpu.memory_space<vmem>>, vector<128x384xf32>
    %c0_7 = arith.constant 0 : index
    %c0_8 = arith.constant 0 : index
    %7 = vector.load %arg5[%c0_7, %c0_8] : memref<128x384xf32, #tpu.memory_space<vmem>>, vector<128x384xf32>
    %c0_9 = arith.constant 0 : index
    %c0_10 = arith.constant 0 : index
    %8 = vector.load %arg6[%c0_9, %c0_10] : memref<128x384xf32, #tpu.memory_space<vmem>>, vector<128x384xf32>
    %c0_11 = arith.constant 0 : index
    %c0_12 = arith.constant 0 : index
    %9 = vector.load %arg4[%c0_11, %c0_12] : memref<1x384xf32, #tpu.memory_space<vmem>>, vector<1x384xf32>
    %10 = vector.shape_cast %9 : vector<1x384xf32> to vector<1x384xf32>
    %11 = vector.broadcast %10 : vector<1x384xf32> to vector<8x384xf32>
    %c0_13 = arith.constant 0 : index
    %c0_14 = arith.constant 0 : index
    %12 = vector.load %arg7[%c0_13, %c0_14] : memref<1x384xf32, #tpu.memory_space<vmem>>, vector<1x384xf32>
    %13 = vector.shape_cast %12 : vector<1x384xf32> to vector<1x384xf32>
    %14 = vector.broadcast %13 : vector<1x384xf32> to vector<8x384xf32>
    %c0_15 = arith.constant 0 : index
    %c0_16 = arith.constant 0 : index
    %15 = vector.load %arg8[%c0_15, %c0_16] : memref<1x384xf32, #tpu.memory_space<vmem>>, vector<1x384xf32>
    %16 = vector.shape_cast %15 : vector<1x384xf32> to vector<1x384xf32>
    %17 = vector.broadcast %16 : vector<1x384xf32> to vector<8x384xf32>
    %cst_17 = arith.constant 0.000000e+00 : f32
    %18 = vector.broadcast %cst_17 : f32 to vector<8x128xf32>
    %cst_18 = arith.constant 0.000000e+00 : f32
    %19 = vector.broadcast %cst_18 : f32 to vector<8x128xf32>
    %20 = vector.extract_strided_slice %5 {offsets = [0, 0], sizes = [8, 384], strides = [1, 1]} : vector<64x384xf32> to vector<8x384xf32>
    %cst_19 = arith.constant dense<0.000000e+00> : vector<8x384xf32>
    %21 = tpu.matmul %18, %6, %cst_19 {dimension_numbers = #tpu.dot_dimension_numbers<[1], [0], [0], [1], [0, 0, 1, 1], [], []>} : vector<8x128xf32>, vector<128x384xf32>, vector<8x384xf32> -> vector<8x384xf32>
    %22 = arith.addf %21, %11 : vector<8x384xf32>
    %23 = vector.extract_strided_slice %20 {offsets = [0, 0], sizes = [8, 128], strides = [1, 1]} : vector<8x384xf32> to vector<8x128xf32>
    %24 = vector.extract_strided_slice %22 {offsets = [0, 0], sizes = [8, 128], strides = [1, 1]} : vector<8x384xf32> to vector<8x128xf32>
    %25 = arith.addf %23, %24 : vector<8x128xf32>
    %26 = arith.negf %25 : vector<8x128xf32>
    %27 = math.exp %26 : vector<8x128xf32>
    %cst_20 = arith.constant 1.000000e+00 : f32
    %28 = vector.broadcast %cst_20 : f32 to vector<8x128xf32>
    %29 = arith.addf %28, %27 : vector<8x128xf32>
    %30 = arith.divf %28, %29 : vector<8x128xf32>
    %31 = vector.extract_strided_slice %20 {offsets = [0, 128], sizes = [8, 128], strides = [1, 1]} : vector<8x384xf32> to vector<8x128xf32>
    %32 = vector.extract_strided_slice %22 {offsets = [0, 128], sizes = [8, 128], strides = [1, 1]} : vector<8x384xf32> to vector<8x128xf32>
    %33 = arith.addf %31, %32 : vector<8x128xf32>
    %34 = arith.negf %33 : vector<8x128xf32>
    %35 = math.exp %34 : vector<8x128xf32>
    %cst_21 = arith.constant 1.000000e+00 : f32
    %36 = vector.broadcast %cst_21 : f32 to vector<8x128xf32>
    %37 = arith.addf %36, %35 : vector<8x128xf32>
    %38 = arith.divf %36, %37 : vector<8x128xf32>
    %39 = vector.extract_strided_slice %20 {offsets = [0, 256], sizes = [8, 128], strides = [1, 1]} : vector<8x384xf32> to vector<8x128xf32>
    %40 = vector.extract_strided_slice %22 {offsets = [0, 256], sizes = [8, 128], strides = [1, 1]} : vector<8x384xf32> to vector<8x128xf32>
    %41 = arith.mulf %30, %40 : vector<8x128xf32>
    %42 = arith.addf %39, %41 : vector<8x128xf32>
    %43 = math.tanh %42 : vector<8x128xf32>
    %cst_22 = arith.constant 1.000000e+00 : f32
    %44 = vector.broadcast %cst_22 : f32 to vector<8x128xf32>
    %45 = arith.subf %44, %38 : vector<8x128xf32>
    %46 = arith.mulf %45, %43 : vector<8x128xf32>
    %47 = arith.mulf %38, %18 : vector<8x128xf32>
    %48 = arith.addf %46, %47 : vector<8x128xf32>
    %cst_23 = arith.constant dense<0.000000e+00> : vector<8x384xf32>
    %49 = tpu.matmul %48, %7, %cst_23 {dimension_numbers = #tpu.dot_dimension_numbers<[1], [0], [0], [1], [0, 0, 1, 1], [], []>} : vector<8x128xf32>, vector<128x384xf32>, vector<8x384xf32> -> vector<8x384xf32>
    %50 = arith.addf %49, %14 : vector<8x384xf32>
    %cst_24 = arith.constant dense<0.000000e+00> : vector<8x384xf32>
    %51 = tpu.matmul %19, %8, %cst_24 {dimension_numbers = #tpu.dot_dimension_numbers<[1], [0], [0], [1], [0, 0, 1, 1], [], []>} : vector<8x128xf32>, vector<128x384xf32>, vector<8x384xf32> -> vector<8x384xf32>
    %52 = arith.addf %51, %17 : vector<8x384xf32>
    %53 = vector.extract_strided_slice %50 {offsets = [0, 0], sizes = [8, 128], strides = [1, 1]} : vector<8x384xf32> to vector<8x128xf32>
    %54 = vector.extract_strided_slice %52 {offsets = [0, 0], sizes = [8, 128], strides = [1, 1]} : vector<8x384xf32> to vector<8x128xf32>
    %55 = arith.addf %53, %54 : vector<8x128xf32>
    %56 = arith.negf %55 : vector<8x128xf32>
    %57 = math.exp %56 : vector<8x128xf32>
    %cst_25 = arith.constant 1.000000e+00 : f32
    %58 = vector.broadcast %cst_25 : f32 to vector<8x128xf32>
    %59 = arith.addf %58, %57 : vector<8x128xf32>
    %60 = arith.divf %58, %59 : vector<8x128xf32>
    %61 = vector.extract_strided_slice %50 {offsets = [0, 128], sizes = [8, 128], strides = [1, 1]} : vector<8x384xf32> to vector<8x128xf32>
    %62 = vector.extract_strided_slice %52 {offsets = [0, 128], sizes = [8, 128], strides = [1, 1]} : vector<8x384xf32> to vector<8x128xf32>
    %63 = arith.addf %61, %62 : vector<8x128xf32>
    %64 = arith.negf %63 : vector<8x128xf32>
    %65 = math.exp %64 : vector<8x128xf32>
    %cst_26 = arith.constant 1.000000e+00 : f32
    %66 = vector.broadcast %cst_26 : f32 to vector<8x128xf32>
    %67 = arith.addf %66, %65 : vector<8x128xf32>
    %68 = arith.divf %66, %67 : vector<8x128xf32>
    %69 = vector.extract_strided_slice %50 {offsets = [0, 256], sizes = [8, 128], strides = [1, 1]} : vector<8x384xf32> to vector<8x128xf32>
    %70 = vector.extract_strided_slice %52 {offsets = [0, 256], sizes = [8, 128], strides = [1, 1]} : vector<8x384xf32> to vector<8x128xf32>
    %71 = arith.mulf %60, %70 : vector<8x128xf32>
    %72 = arith.addf %69, %71 : vector<8x128xf32>
    %73 = math.tanh %72 : vector<8x128xf32>
    %cst_27 = arith.constant 1.000000e+00 : f32
    %74 = vector.broadcast %cst_27 : f32 to vector<8x128xf32>
    %75 = arith.subf %74, %68 : vector<8x128xf32>
    %76 = arith.mulf %75, %73 : vector<8x128xf32>
    %77 = arith.mulf %68, %19 : vector<8x128xf32>
    %78 = arith.addf %76, %77 : vector<8x128xf32>
    %79 = vector.extract_strided_slice %5 {offsets = [8, 0], sizes = [8, 384], strides = [1, 1]} : vector<64x384xf32> to vector<8x384xf32>
    %cst_28 = arith.constant dense<0.000000e+00> : vector<8x384xf32>
    %80 = tpu.matmul %48, %6, %cst_28 {dimension_numbers = #tpu.dot_dimension_numbers<[1], [0], [0], [1], [0, 0, 1, 1], [], []>} : vector<8x128xf32>, vector<128x384xf32>, vector<8x384xf32> -> vector<8x384xf32>
    %81 = arith.addf %80, %11 : vector<8x384xf32>
    %82 = vector.extract_strided_slice %79 {offsets = [0, 0], sizes = [8, 128], strides = [1, 1]} : vector<8x384xf32> to vector<8x128xf32>
    %83 = vector.extract_strided_slice %81 {offsets = [0, 0], sizes = [8, 128], strides = [1, 1]} : vector<8x384xf32> to vector<8x128xf32>
    %84 = arith.addf %82, %83 : vector<8x128xf32>
    %85 = arith.negf %84 : vector<8x128xf32>
    %86 = math.exp %85 : vector<8x128xf32>
    %cst_29 = arith.constant 1.000000e+00 : f32
    %87 = vector.broadcast %cst_29 : f32 to vector<8x128xf32>
    %88 = arith.addf %87, %86 : vector<8x128xf32>
    %89 = arith.divf %87, %88 : vector<8x128xf32>
    %90 = vector.extract_strided_slice %79 {offsets = [0, 128], sizes = [8, 128], strides = [1, 1]} : vector<8x384xf32> to vector<8x128xf32>
    %91 = vector.extract_strided_slice %81 {offsets = [0, 128], sizes = [8, 128], strides = [1, 1]} : vector<8x384xf32> to vector<8x128xf32>
    %92 = arith.addf %90, %91 : vector<8x128xf32>
    %93 = arith.negf %92 : vector<8x128xf32>
    %94 = math.exp %93 : vector<8x128xf32>
    %cst_30 = arith.constant 1.000000e+00 : f32
    %95 = vector.broadcast %cst_30 : f32 to vector<8x128xf32>
    %96 = arith.addf %95, %94 : vector<8x128xf32>
    %97 = arith.divf %95, %96 : vector<8x128xf32>
    %98 = vector.extract_strided_slice %79 {offsets = [0, 256], sizes = [8, 128], strides = [1, 1]} : vector<8x384xf32> to vector<8x128xf32>
    %99 = vector.extract_strided_slice %81 {offsets = [0, 256], sizes = [8, 128], strides = [1, 1]} : vector<8x384xf32> to vector<8x128xf32>
    %100 = arith.mulf %89, %99 : vector<8x128xf32>
    %101 = arith.addf %98, %100 : vector<8x128xf32>
    %102 = math.tanh %101 : vector<8x128xf32>
    %cst_31 = arith.constant 1.000000e+00 : f32
    %103 = vector.broadcast %cst_31 : f32 to vector<8x128xf32>
    %104 = arith.subf %103, %97 : vector<8x128xf32>
    %105 = arith.mulf %104, %102 : vector<8x128xf32>
    %106 = arith.mulf %97, %48 : vector<8x128xf32>
    %107 = arith.addf %105, %106 : vector<8x128xf32>
    %cst_32 = arith.constant dense<0.000000e+00> : vector<8x384xf32>
    %108 = tpu.matmul %107, %7, %cst_32 {dimension_numbers = #tpu.dot_dimension_numbers<[1], [0], [0], [1], [0, 0, 1, 1], [], []>} : vector<8x128xf32>, vector<128x384xf32>, vector<8x384xf32> -> vector<8x384xf32>
    %109 = arith.addf %108, %14 : vector<8x384xf32>
    %cst_33 = arith.constant dense<0.000000e+00> : vector<8x384xf32>
    %110 = tpu.matmul %78, %8, %cst_33 {dimension_numbers = #tpu.dot_dimension_numbers<[1], [0], [0], [1], [0, 0, 1, 1], [], []>} : vector<8x128xf32>, vector<128x384xf32>, vector<8x384xf32> -> vector<8x384xf32>
    %111 = arith.addf %110, %17 : vector<8x384xf32>
    %112 = vector.extract_strided_slice %109 {offsets = [0, 0], sizes = [8, 128], strides = [1, 1]} : vector<8x384xf32> to vector<8x128xf32>
    %113 = vector.extract_strided_slice %111 {offsets = [0, 0], sizes = [8, 128], strides = [1, 1]} : vector<8x384xf32> to vector<8x128xf32>
    %114 = arith.addf %112, %113 : vector<8x128xf32>
    %115 = arith.negf %114 : vector<8x128xf32>
    %116 = math.exp %115 : vector<8x128xf32>
    %cst_34 = arith.constant 1.000000e+00 : f32
    %117 = vector.broadcast %cst_34 : f32 to vector<8x128xf32>
    %118 = arith.addf %117, %116 : vector<8x128xf32>
    %119 = arith.divf %117, %118 : vector<8x128xf32>
    %120 = vector.extract_strided_slice %109 {offsets = [0, 128], sizes = [8, 128], strides = [1, 1]} : vector<8x384xf32> to vector<8x128xf32>
    %121 = vector.extract_strided_slice %111 {offsets = [0, 128], sizes = [8, 128], strides = [1, 1]} : vector<8x384xf32> to vector<8x128xf32>
    %122 = arith.addf %120, %121 : vector<8x128xf32>
    %123 = arith.negf %122 : vector<8x128xf32>
    %124 = math.exp %123 : vector<8x128xf32>
    %cst_35 = arith.constant 1.000000e+00 : f32
    %125 = vector.broadcast %cst_35 : f32 to vector<8x128xf32>
    %126 = arith.addf %125, %124 : vector<8x128xf32>
    %127 = arith.divf %125, %126 : vector<8x128xf32>
    %128 = vector.extract_strided_slice %109 {offsets = [0, 256], sizes = [8, 128], strides = [1, 1]} : vector<8x384xf32> to vector<8x128xf32>
    %129 = vector.extract_strided_slice %111 {offsets = [0, 256], sizes = [8, 128], strides = [1, 1]} : vector<8x384xf32> to vector<8x128xf32>
    %130 = arith.mulf %119, %129 : vector<8x128xf32>
    %131 = arith.addf %128, %130 : vector<8x128xf32>
    %132 = math.tanh %131 : vector<8x128xf32>
    %cst_36 = arith.constant 1.000000e+00 : f32
    %133 = vector.broadcast %cst_36 : f32 to vector<8x128xf32>
    %134 = arith.subf %133, %127 : vector<8x128xf32>
    %135 = arith.mulf %134, %132 : vector<8x128xf32>
    %136 = arith.mulf %127, %78 : vector<8x128xf32>
    %137 = arith.addf %135, %136 : vector<8x128xf32>
    %138 = vector.extract_strided_slice %5 {offsets = [16, 0], sizes = [8, 384], strides = [1, 1]} : vector<64x384xf32> to vector<8x384xf32>
    %cst_37 = arith.constant dense<0.000000e+00> : vector<8x384xf32>
    %139 = tpu.matmul %107, %6, %cst_37 {dimension_numbers = #tpu.dot_dimension_numbers<[1], [0], [0], [1], [0, 0, 1, 1], [], []>} : vector<8x128xf32>, vector<128x384xf32>, vector<8x384xf32> -> vector<8x384xf32>
    %140 = arith.addf %139, %11 : vector<8x384xf32>
    %141 = vector.extract_strided_slice %138 {offsets = [0, 0], sizes = [8, 128], strides = [1, 1]} : vector<8x384xf32> to vector<8x128xf32>
    %142 = vector.extract_strided_slice %140 {offsets = [0, 0], sizes = [8, 128], strides = [1, 1]} : vector<8x384xf32> to vector<8x128xf32>
    %143 = arith.addf %141, %142 : vector<8x128xf32>
    %144 = arith.negf %143 : vector<8x128xf32>
    %145 = math.exp %144 : vector<8x128xf32>
    %cst_38 = arith.constant 1.000000e+00 : f32
    %146 = vector.broadcast %cst_38 : f32 to vector<8x128xf32>
    %147 = arith.addf %146, %145 : vector<8x128xf32>
    %148 = arith.divf %146, %147 : vector<8x128xf32>
    %149 = vector.extract_strided_slice %138 {offsets = [0, 128], sizes = [8, 128], strides = [1, 1]} : vector<8x384xf32> to vector<8x128xf32>
    %150 = vector.extract_strided_slice %140 {offsets = [0, 128], sizes = [8, 128], strides = [1, 1]} : vector<8x384xf32> to vector<8x128xf32>
    %151 = arith.addf %149, %150 : vector<8x128xf32>
    %152 = arith.negf %151 : vector<8x128xf32>
    %153 = math.exp %152 : vector<8x128xf32>
    %cst_39 = arith.constant 1.000000e+00 : f32
    %154 = vector.broadcast %cst_39 : f32 to vector<8x128xf32>
    %155 = arith.addf %154, %153 : vector<8x128xf32>
    %156 = arith.divf %154, %155 : vector<8x128xf32>
    %157 = vector.extract_strided_slice %138 {offsets = [0, 256], sizes = [8, 128], strides = [1, 1]} : vector<8x384xf32> to vector<8x128xf32>
    %158 = vector.extract_strided_slice %140 {offsets = [0, 256], sizes = [8, 128], strides = [1, 1]} : vector<8x384xf32> to vector<8x128xf32>
    %159 = arith.mulf %148, %158 : vector<8x128xf32>
    %160 = arith.addf %157, %159 : vector<8x128xf32>
    %161 = math.tanh %160 : vector<8x128xf32>
    %cst_40 = arith.constant 1.000000e+00 : f32
    %162 = vector.broadcast %cst_40 : f32 to vector<8x128xf32>
    %163 = arith.subf %162, %156 : vector<8x128xf32>
    %164 = arith.mulf %163, %161 : vector<8x128xf32>
    %165 = arith.mulf %156, %107 : vector<8x128xf32>
    %166 = arith.addf %164, %165 : vector<8x128xf32>
    %cst_41 = arith.constant dense<0.000000e+00> : vector<8x384xf32>
    %167 = tpu.matmul %166, %7, %cst_41 {dimension_numbers = #tpu.dot_dimension_numbers<[1], [0], [0], [1], [0, 0, 1, 1], [], []>} : vector<8x128xf32>, vector<128x384xf32>, vector<8x384xf32> -> vector<8x384xf32>
    %168 = arith.addf %167, %14 : vector<8x384xf32>
    %cst_42 = arith.constant dense<0.000000e+00> : vector<8x384xf32>
    %169 = tpu.matmul %137, %8, %cst_42 {dimension_numbers = #tpu.dot_dimension_numbers<[1], [0], [0], [1], [0, 0, 1, 1], [], []>} : vector<8x128xf32>, vector<128x384xf32>, vector<8x384xf32> -> vector<8x384xf32>
    %170 = arith.addf %169, %17 : vector<8x384xf32>
    %171 = vector.extract_strided_slice %168 {offsets = [0, 0], sizes = [8, 128], strides = [1, 1]} : vector<8x384xf32> to vector<8x128xf32>
    %172 = vector.extract_strided_slice %170 {offsets = [0, 0], sizes = [8, 128], strides = [1, 1]} : vector<8x384xf32> to vector<8x128xf32>
    %173 = arith.addf %171, %172 : vector<8x128xf32>
    %174 = arith.negf %173 : vector<8x128xf32>
    %175 = math.exp %174 : vector<8x128xf32>
    %cst_43 = arith.constant 1.000000e+00 : f32
    %176 = vector.broadcast %cst_43 : f32 to vector<8x128xf32>
    %177 = arith.addf %176, %175 : vector<8x128xf32>
    %178 = arith.divf %176, %177 : vector<8x128xf32>
    %179 = vector.extract_strided_slice %168 {offsets = [0, 128], sizes = [8, 128], strides = [1, 1]} : vector<8x384xf32> to vector<8x128xf32>
    %180 = vector.extract_strided_slice %170 {offsets = [0, 128], sizes = [8, 128], strides = [1, 1]} : vector<8x384xf32> to vector<8x128xf32>
    %181 = arith.addf %179, %180 : vector<8x128xf32>
    %182 = arith.negf %181 : vector<8x128xf32>
    %183 = math.exp %182 : vector<8x128xf32>
    %cst_44 = arith.constant 1.000000e+00 : f32
    %184 = vector.broadcast %cst_44 : f32 to vector<8x128xf32>
    %185 = arith.addf %184, %183 : vector<8x128xf32>
    %186 = arith.divf %184, %185 : vector<8x128xf32>
    %187 = vector.extract_strided_slice %168 {offsets = [0, 256], sizes = [8, 128], strides = [1, 1]} : vector<8x384xf32> to vector<8x128xf32>
    %188 = vector.extract_strided_slice %170 {offsets = [0, 256], sizes = [8, 128], strides = [1, 1]} : vector<8x384xf32> to vector<8x128xf32>
    %189 = arith.mulf %178, %188 : vector<8x128xf32>
    %190 = arith.addf %187, %189 : vector<8x128xf32>
    %191 = math.tanh %190 : vector<8x128xf32>
    %cst_45 = arith.constant 1.000000e+00 : f32
    %192 = vector.broadcast %cst_45 : f32 to vector<8x128xf32>
    %193 = arith.subf %192, %186 : vector<8x128xf32>
    %194 = arith.mulf %193, %191 : vector<8x128xf32>
    %195 = arith.mulf %186, %137 : vector<8x128xf32>
    %196 = arith.addf %194, %195 : vector<8x128xf32>
    %197 = vector.extract_strided_slice %5 {offsets = [24, 0], sizes = [8, 384], strides = [1, 1]} : vector<64x384xf32> to vector<8x384xf32>
    %cst_46 = arith.constant dense<0.000000e+00> : vector<8x384xf32>
    %198 = tpu.matmul %166, %6, %cst_46 {dimension_numbers = #tpu.dot_dimension_numbers<[1], [0], [0], [1], [0, 0, 1, 1], [], []>} : vector<8x128xf32>, vector<128x384xf32>, vector<8x384xf32> -> vector<8x384xf32>
    %199 = arith.addf %198, %11 : vector<8x384xf32>
    %200 = vector.extract_strided_slice %197 {offsets = [0, 0], sizes = [8, 128], strides = [1, 1]} : vector<8x384xf32> to vector<8x128xf32>
    %201 = vector.extract_strided_slice %199 {offsets = [0, 0], sizes = [8, 128], strides = [1, 1]} : vector<8x384xf32> to vector<8x128xf32>
    %202 = arith.addf %200, %201 : vector<8x128xf32>
    %203 = arith.negf %202 : vector<8x128xf32>
    %204 = math.exp %203 : vector<8x128xf32>
    %cst_47 = arith.constant 1.000000e+00 : f32
    %205 = vector.broadcast %cst_47 : f32 to vector<8x128xf32>
    %206 = arith.addf %205, %204 : vector<8x128xf32>
    %207 = arith.divf %205, %206 : vector<8x128xf32>
    %208 = vector.extract_strided_slice %197 {offsets = [0, 128], sizes = [8, 128], strides = [1, 1]} : vector<8x384xf32> to vector<8x128xf32>
    %209 = vector.extract_strided_slice %199 {offsets = [0, 128], sizes = [8, 128], strides = [1, 1]} : vector<8x384xf32> to vector<8x128xf32>
    %210 = arith.addf %208, %209 : vector<8x128xf32>
    %211 = arith.negf %210 : vector<8x128xf32>
    %212 = math.exp %211 : vector<8x128xf32>
    %cst_48 = arith.constant 1.000000e+00 : f32
    %213 = vector.broadcast %cst_48 : f32 to vector<8x128xf32>
    %214 = arith.addf %213, %212 : vector<8x128xf32>
    %215 = arith.divf %213, %214 : vector<8x128xf32>
    %216 = vector.extract_strided_slice %197 {offsets = [0, 256], sizes = [8, 128], strides = [1, 1]} : vector<8x384xf32> to vector<8x128xf32>
    %217 = vector.extract_strided_slice %199 {offsets = [0, 256], sizes = [8, 128], strides = [1, 1]} : vector<8x384xf32> to vector<8x128xf32>
    %218 = arith.mulf %207, %217 : vector<8x128xf32>
    %219 = arith.addf %216, %218 : vector<8x128xf32>
    %220 = math.tanh %219 : vector<8x128xf32>
    %cst_49 = arith.constant 1.000000e+00 : f32
    %221 = vector.broadcast %cst_49 : f32 to vector<8x128xf32>
    %222 = arith.subf %221, %215 : vector<8x128xf32>
    %223 = arith.mulf %222, %220 : vector<8x128xf32>
    %224 = arith.mulf %215, %166 : vector<8x128xf32>
    %225 = arith.addf %223, %224 : vector<8x128xf32>
    %cst_50 = arith.constant dense<0.000000e+00> : vector<8x384xf32>
    %226 = tpu.matmul %225, %7, %cst_50 {dimension_numbers = #tpu.dot_dimension_numbers<[1], [0], [0], [1], [0, 0, 1, 1], [], []>} : vector<8x128xf32>, vector<128x384xf32>, vector<8x384xf32> -> vector<8x384xf32>
    %227 = arith.addf %226, %14 : vector<8x384xf32>
    %cst_51 = arith.constant dense<0.000000e+00> : vector<8x384xf32>
    %228 = tpu.matmul %196, %8, %cst_51 {dimension_numbers = #tpu.dot_dimension_numbers<[1], [0], [0], [1], [0, 0, 1, 1], [], []>} : vector<8x128xf32>, vector<128x384xf32>, vector<8x384xf32> -> vector<8x384xf32>
    %229 = arith.addf %228, %17 : vector<8x384xf32>
    %230 = vector.extract_strided_slice %227 {offsets = [0, 0], sizes = [8, 128], strides = [1, 1]} : vector<8x384xf32> to vector<8x128xf32>
    %231 = vector.extract_strided_slice %229 {offsets = [0, 0], sizes = [8, 128], strides = [1, 1]} : vector<8x384xf32> to vector<8x128xf32>
    %232 = arith.addf %230, %231 : vector<8x128xf32>
    %233 = arith.negf %232 : vector<8x128xf32>
    %234 = math.exp %233 : vector<8x128xf32>
    %cst_52 = arith.constant 1.000000e+00 : f32
    %235 = vector.broadcast %cst_52 : f32 to vector<8x128xf32>
    %236 = arith.addf %235, %234 : vector<8x128xf32>
    %237 = arith.divf %235, %236 : vector<8x128xf32>
    %238 = vector.extract_strided_slice %227 {offsets = [0, 128], sizes = [8, 128], strides = [1, 1]} : vector<8x384xf32> to vector<8x128xf32>
    %239 = vector.extract_strided_slice %229 {offsets = [0, 128], sizes = [8, 128], strides = [1, 1]} : vector<8x384xf32> to vector<8x128xf32>
    %240 = arith.addf %238, %239 : vector<8x128xf32>
    %241 = arith.negf %240 : vector<8x128xf32>
    %242 = math.exp %241 : vector<8x128xf32>
    %cst_53 = arith.constant 1.000000e+00 : f32
    %243 = vector.broadcast %cst_53 : f32 to vector<8x128xf32>
    %244 = arith.addf %243, %242 : vector<8x128xf32>
    %245 = arith.divf %243, %244 : vector<8x128xf32>
    %246 = vector.extract_strided_slice %227 {offsets = [0, 256], sizes = [8, 128], strides = [1, 1]} : vector<8x384xf32> to vector<8x128xf32>
    %247 = vector.extract_strided_slice %229 {offsets = [0, 256], sizes = [8, 128], strides = [1, 1]} : vector<8x384xf32> to vector<8x128xf32>
    %248 = arith.mulf %237, %247 : vector<8x128xf32>
    %249 = arith.addf %246, %248 : vector<8x128xf32>
    %250 = math.tanh %249 : vector<8x128xf32>
    %cst_54 = arith.constant 1.000000e+00 : f32
    %251 = vector.broadcast %cst_54 : f32 to vector<8x128xf32>
    %252 = arith.subf %251, %245 : vector<8x128xf32>
    %253 = arith.mulf %252, %250 : vector<8x128xf32>
    %254 = arith.mulf %245, %196 : vector<8x128xf32>
    %255 = arith.addf %253, %254 : vector<8x128xf32>
    %256 = vector.extract_strided_slice %5 {offsets = [32, 0], sizes = [8, 384], strides = [1, 1]} : vector<64x384xf32> to vector<8x384xf32>
    %cst_55 = arith.constant dense<0.000000e+00> : vector<8x384xf32>
    %257 = tpu.matmul %225, %6, %cst_55 {dimension_numbers = #tpu.dot_dimension_numbers<[1], [0], [0], [1], [0, 0, 1, 1], [], []>} : vector<8x128xf32>, vector<128x384xf32>, vector<8x384xf32> -> vector<8x384xf32>
    %258 = arith.addf %257, %11 : vector<8x384xf32>
    %259 = vector.extract_strided_slice %256 {offsets = [0, 0], sizes = [8, 128], strides = [1, 1]} : vector<8x384xf32> to vector<8x128xf32>
    %260 = vector.extract_strided_slice %258 {offsets = [0, 0], sizes = [8, 128], strides = [1, 1]} : vector<8x384xf32> to vector<8x128xf32>
    %261 = arith.addf %259, %260 : vector<8x128xf32>
    %262 = arith.negf %261 : vector<8x128xf32>
    %263 = math.exp %262 : vector<8x128xf32>
    %cst_56 = arith.constant 1.000000e+00 : f32
    %264 = vector.broadcast %cst_56 : f32 to vector<8x128xf32>
    %265 = arith.addf %264, %263 : vector<8x128xf32>
    %266 = arith.divf %264, %265 : vector<8x128xf32>
    %267 = vector.extract_strided_slice %256 {offsets = [0, 128], sizes = [8, 128], strides = [1, 1]} : vector<8x384xf32> to vector<8x128xf32>
    %268 = vector.extract_strided_slice %258 {offsets = [0, 128], sizes = [8, 128], strides = [1, 1]} : vector<8x384xf32> to vector<8x128xf32>
    %269 = arith.addf %267, %268 : vector<8x128xf32>
    %270 = arith.negf %269 : vector<8x128xf32>
    %271 = math.exp %270 : vector<8x128xf32>
    %cst_57 = arith.constant 1.000000e+00 : f32
    %272 = vector.broadcast %cst_57 : f32 to vector<8x128xf32>
    %273 = arith.addf %272, %271 : vector<8x128xf32>
    %274 = arith.divf %272, %273 : vector<8x128xf32>
    %275 = vector.extract_strided_slice %256 {offsets = [0, 256], sizes = [8, 128], strides = [1, 1]} : vector<8x384xf32> to vector<8x128xf32>
    %276 = vector.extract_strided_slice %258 {offsets = [0, 256], sizes = [8, 128], strides = [1, 1]} : vector<8x384xf32> to vector<8x128xf32>
    %277 = arith.mulf %266, %276 : vector<8x128xf32>
    %278 = arith.addf %275, %277 : vector<8x128xf32>
    %279 = math.tanh %278 : vector<8x128xf32>
    %cst_58 = arith.constant 1.000000e+00 : f32
    %280 = vector.broadcast %cst_58 : f32 to vector<8x128xf32>
    %281 = arith.subf %280, %274 : vector<8x128xf32>
    %282 = arith.mulf %281, %279 : vector<8x128xf32>
    %283 = arith.mulf %274, %225 : vector<8x128xf32>
    %284 = arith.addf %282, %283 : vector<8x128xf32>
    %cst_59 = arith.constant dense<0.000000e+00> : vector<8x384xf32>
    %285 = tpu.matmul %284, %7, %cst_59 {dimension_numbers = #tpu.dot_dimension_numbers<[1], [0], [0], [1], [0, 0, 1, 1], [], []>} : vector<8x128xf32>, vector<128x384xf32>, vector<8x384xf32> -> vector<8x384xf32>
    %286 = arith.addf %285, %14 : vector<8x384xf32>
    %cst_60 = arith.constant dense<0.000000e+00> : vector<8x384xf32>
    %287 = tpu.matmul %255, %8, %cst_60 {dimension_numbers = #tpu.dot_dimension_numbers<[1], [0], [0], [1], [0, 0, 1, 1], [], []>} : vector<8x128xf32>, vector<128x384xf32>, vector<8x384xf32> -> vector<8x384xf32>
    %288 = arith.addf %287, %17 : vector<8x384xf32>
    %289 = vector.extract_strided_slice %286 {offsets = [0, 0], sizes = [8, 128], strides = [1, 1]} : vector<8x384xf32> to vector<8x128xf32>
    %290 = vector.extract_strided_slice %288 {offsets = [0, 0], sizes = [8, 128], strides = [1, 1]} : vector<8x384xf32> to vector<8x128xf32>
    %291 = arith.addf %289, %290 : vector<8x128xf32>
    %292 = arith.negf %291 : vector<8x128xf32>
    %293 = math.exp %292 : vector<8x128xf32>
    %cst_61 = arith.constant 1.000000e+00 : f32
    %294 = vector.broadcast %cst_61 : f32 to vector<8x128xf32>
    %295 = arith.addf %294, %293 : vector<8x128xf32>
    %296 = arith.divf %294, %295 : vector<8x128xf32>
    %297 = vector.extract_strided_slice %286 {offsets = [0, 128], sizes = [8, 128], strides = [1, 1]} : vector<8x384xf32> to vector<8x128xf32>
    %298 = vector.extract_strided_slice %288 {offsets = [0, 128], sizes = [8, 128], strides = [1, 1]} : vector<8x384xf32> to vector<8x128xf32>
    %299 = arith.addf %297, %298 : vector<8x128xf32>
    %300 = arith.negf %299 : vector<8x128xf32>
    %301 = math.exp %300 : vector<8x128xf32>
    %cst_62 = arith.constant 1.000000e+00 : f32
    %302 = vector.broadcast %cst_62 : f32 to vector<8x128xf32>
    %303 = arith.addf %302, %301 : vector<8x128xf32>
    %304 = arith.divf %302, %303 : vector<8x128xf32>
    %305 = vector.extract_strided_slice %286 {offsets = [0, 256], sizes = [8, 128], strides = [1, 1]} : vector<8x384xf32> to vector<8x128xf32>
    %306 = vector.extract_strided_slice %288 {offsets = [0, 256], sizes = [8, 128], strides = [1, 1]} : vector<8x384xf32> to vector<8x128xf32>
    %307 = arith.mulf %296, %306 : vector<8x128xf32>
    %308 = arith.addf %305, %307 : vector<8x128xf32>
    %309 = math.tanh %308 : vector<8x128xf32>
    %cst_63 = arith.constant 1.000000e+00 : f32
    %310 = vector.broadcast %cst_63 : f32 to vector<8x128xf32>
    %311 = arith.subf %310, %304 : vector<8x128xf32>
    %312 = arith.mulf %311, %309 : vector<8x128xf32>
    %313 = arith.mulf %304, %255 : vector<8x128xf32>
    %314 = arith.addf %312, %313 : vector<8x128xf32>
    %315 = vector.extract_strided_slice %5 {offsets = [40, 0], sizes = [8, 384], strides = [1, 1]} : vector<64x384xf32> to vector<8x384xf32>
    %cst_64 = arith.constant dense<0.000000e+00> : vector<8x384xf32>
    %316 = tpu.matmul %284, %6, %cst_64 {dimension_numbers = #tpu.dot_dimension_numbers<[1], [0], [0], [1], [0, 0, 1, 1], [], []>} : vector<8x128xf32>, vector<128x384xf32>, vector<8x384xf32> -> vector<8x384xf32>
    %317 = arith.addf %316, %11 : vector<8x384xf32>
    %318 = vector.extract_strided_slice %315 {offsets = [0, 0], sizes = [8, 128], strides = [1, 1]} : vector<8x384xf32> to vector<8x128xf32>
    %319 = vector.extract_strided_slice %317 {offsets = [0, 0], sizes = [8, 128], strides = [1, 1]} : vector<8x384xf32> to vector<8x128xf32>
    %320 = arith.addf %318, %319 : vector<8x128xf32>
    %321 = arith.negf %320 : vector<8x128xf32>
    %322 = math.exp %321 : vector<8x128xf32>
    %cst_65 = arith.constant 1.000000e+00 : f32
    %323 = vector.broadcast %cst_65 : f32 to vector<8x128xf32>
    %324 = arith.addf %323, %322 : vector<8x128xf32>
    %325 = arith.divf %323, %324 : vector<8x128xf32>
    %326 = vector.extract_strided_slice %315 {offsets = [0, 128], sizes = [8, 128], strides = [1, 1]} : vector<8x384xf32> to vector<8x128xf32>
    %327 = vector.extract_strided_slice %317 {offsets = [0, 128], sizes = [8, 128], strides = [1, 1]} : vector<8x384xf32> to vector<8x128xf32>
    %328 = arith.addf %326, %327 : vector<8x128xf32>
    %329 = arith.negf %328 : vector<8x128xf32>
    %330 = math.exp %329 : vector<8x128xf32>
    %cst_66 = arith.constant 1.000000e+00 : f32
    %331 = vector.broadcast %cst_66 : f32 to vector<8x128xf32>
    %332 = arith.addf %331, %330 : vector<8x128xf32>
    %333 = arith.divf %331, %332 : vector<8x128xf32>
    %334 = vector.extract_strided_slice %315 {offsets = [0, 256], sizes = [8, 128], strides = [1, 1]} : vector<8x384xf32> to vector<8x128xf32>
    %335 = vector.extract_strided_slice %317 {offsets = [0, 256], sizes = [8, 128], strides = [1, 1]} : vector<8x384xf32> to vector<8x128xf32>
    %336 = arith.mulf %325, %335 : vector<8x128xf32>
    %337 = arith.addf %334, %336 : vector<8x128xf32>
    %338 = math.tanh %337 : vector<8x128xf32>
    %cst_67 = arith.constant 1.000000e+00 : f32
    %339 = vector.broadcast %cst_67 : f32 to vector<8x128xf32>
    %340 = arith.subf %339, %333 : vector<8x128xf32>
    %341 = arith.mulf %340, %338 : vector<8x128xf32>
    %342 = arith.mulf %333, %284 : vector<8x128xf32>
    %343 = arith.addf %341, %342 : vector<8x128xf32>
    %cst_68 = arith.constant dense<0.000000e+00> : vector<8x384xf32>
    %344 = tpu.matmul %343, %7, %cst_68 {dimension_numbers = #tpu.dot_dimension_numbers<[1], [0], [0], [1], [0, 0, 1, 1], [], []>} : vector<8x128xf32>, vector<128x384xf32>, vector<8x384xf32> -> vector<8x384xf32>
    %345 = arith.addf %344, %14 : vector<8x384xf32>
    %cst_69 = arith.constant dense<0.000000e+00> : vector<8x384xf32>
    %346 = tpu.matmul %314, %8, %cst_69 {dimension_numbers = #tpu.dot_dimension_numbers<[1], [0], [0], [1], [0, 0, 1, 1], [], []>} : vector<8x128xf32>, vector<128x384xf32>, vector<8x384xf32> -> vector<8x384xf32>
    %347 = arith.addf %346, %17 : vector<8x384xf32>
    %348 = vector.extract_strided_slice %345 {offsets = [0, 0], sizes = [8, 128], strides = [1, 1]} : vector<8x384xf32> to vector<8x128xf32>
    %349 = vector.extract_strided_slice %347 {offsets = [0, 0], sizes = [8, 128], strides = [1, 1]} : vector<8x384xf32> to vector<8x128xf32>
    %350 = arith.addf %348, %349 : vector<8x128xf32>
    %351 = arith.negf %350 : vector<8x128xf32>
    %352 = math.exp %351 : vector<8x128xf32>
    %cst_70 = arith.constant 1.000000e+00 : f32
    %353 = vector.broadcast %cst_70 : f32 to vector<8x128xf32>
    %354 = arith.addf %353, %352 : vector<8x128xf32>
    %355 = arith.divf %353, %354 : vector<8x128xf32>
    %356 = vector.extract_strided_slice %345 {offsets = [0, 128], sizes = [8, 128], strides = [1, 1]} : vector<8x384xf32> to vector<8x128xf32>
    %357 = vector.extract_strided_slice %347 {offsets = [0, 128], sizes = [8, 128], strides = [1, 1]} : vector<8x384xf32> to vector<8x128xf32>
    %358 = arith.addf %356, %357 : vector<8x128xf32>
    %359 = arith.negf %358 : vector<8x128xf32>
    %360 = math.exp %359 : vector<8x128xf32>
    %cst_71 = arith.constant 1.000000e+00 : f32
    %361 = vector.broadcast %cst_71 : f32 to vector<8x128xf32>
    %362 = arith.addf %361, %360 : vector<8x128xf32>
    %363 = arith.divf %361, %362 : vector<8x128xf32>
    %364 = vector.extract_strided_slice %345 {offsets = [0, 256], sizes = [8, 128], strides = [1, 1]} : vector<8x384xf32> to vector<8x128xf32>
    %365 = vector.extract_strided_slice %347 {offsets = [0, 256], sizes = [8, 128], strides = [1, 1]} : vector<8x384xf32> to vector<8x128xf32>
    %366 = arith.mulf %355, %365 : vector<8x128xf32>
    %367 = arith.addf %364, %366 : vector<8x128xf32>
    %368 = math.tanh %367 : vector<8x128xf32>
    %cst_72 = arith.constant 1.000000e+00 : f32
    %369 = vector.broadcast %cst_72 : f32 to vector<8x128xf32>
    %370 = arith.subf %369, %363 : vector<8x128xf32>
    %371 = arith.mulf %370, %368 : vector<8x128xf32>
    %372 = arith.mulf %363, %314 : vector<8x128xf32>
    %373 = arith.addf %371, %372 : vector<8x128xf32>
    %374 = vector.extract_strided_slice %5 {offsets = [48, 0], sizes = [8, 384], strides = [1, 1]} : vector<64x384xf32> to vector<8x384xf32>
    %cst_73 = arith.constant dense<0.000000e+00> : vector<8x384xf32>
    %375 = tpu.matmul %343, %6, %cst_73 {dimension_numbers = #tpu.dot_dimension_numbers<[1], [0], [0], [1], [0, 0, 1, 1], [], []>} : vector<8x128xf32>, vector<128x384xf32>, vector<8x384xf32> -> vector<8x384xf32>
    %376 = arith.addf %375, %11 : vector<8x384xf32>
    %377 = vector.extract_strided_slice %374 {offsets = [0, 0], sizes = [8, 128], strides = [1, 1]} : vector<8x384xf32> to vector<8x128xf32>
    %378 = vector.extract_strided_slice %376 {offsets = [0, 0], sizes = [8, 128], strides = [1, 1]} : vector<8x384xf32> to vector<8x128xf32>
    %379 = arith.addf %377, %378 : vector<8x128xf32>
    %380 = arith.negf %379 : vector<8x128xf32>
    %381 = math.exp %380 : vector<8x128xf32>
    %cst_74 = arith.constant 1.000000e+00 : f32
    %382 = vector.broadcast %cst_74 : f32 to vector<8x128xf32>
    %383 = arith.addf %382, %381 : vector<8x128xf32>
    %384 = arith.divf %382, %383 : vector<8x128xf32>
    %385 = vector.extract_strided_slice %374 {offsets = [0, 128], sizes = [8, 128], strides = [1, 1]} : vector<8x384xf32> to vector<8x128xf32>
    %386 = vector.extract_strided_slice %376 {offsets = [0, 128], sizes = [8, 128], strides = [1, 1]} : vector<8x384xf32> to vector<8x128xf32>
    %387 = arith.addf %385, %386 : vector<8x128xf32>
    %388 = arith.negf %387 : vector<8x128xf32>
    %389 = math.exp %388 : vector<8x128xf32>
    %cst_75 = arith.constant 1.000000e+00 : f32
    %390 = vector.broadcast %cst_75 : f32 to vector<8x128xf32>
    %391 = arith.addf %390, %389 : vector<8x128xf32>
    %392 = arith.divf %390, %391 : vector<8x128xf32>
    %393 = vector.extract_strided_slice %374 {offsets = [0, 256], sizes = [8, 128], strides = [1, 1]} : vector<8x384xf32> to vector<8x128xf32>
    %394 = vector.extract_strided_slice %376 {offsets = [0, 256], sizes = [8, 128], strides = [1, 1]} : vector<8x384xf32> to vector<8x128xf32>
    %395 = arith.mulf %384, %394 : vector<8x128xf32>
    %396 = arith.addf %393, %395 : vector<8x128xf32>
    %397 = math.tanh %396 : vector<8x128xf32>
    %cst_76 = arith.constant 1.000000e+00 : f32
    %398 = vector.broadcast %cst_76 : f32 to vector<8x128xf32>
    %399 = arith.subf %398, %392 : vector<8x128xf32>
    %400 = arith.mulf %399, %397 : vector<8x128xf32>
    %401 = arith.mulf %392, %343 : vector<8x128xf32>
    %402 = arith.addf %400, %401 : vector<8x128xf32>
    %cst_77 = arith.constant dense<0.000000e+00> : vector<8x384xf32>
    %403 = tpu.matmul %402, %7, %cst_77 {dimension_numbers = #tpu.dot_dimension_numbers<[1], [0], [0], [1], [0, 0, 1, 1], [], []>} : vector<8x128xf32>, vector<128x384xf32>, vector<8x384xf32> -> vector<8x384xf32>
    %404 = arith.addf %403, %14 : vector<8x384xf32>
    %cst_78 = arith.constant dense<0.000000e+00> : vector<8x384xf32>
    %405 = tpu.matmul %373, %8, %cst_78 {dimension_numbers = #tpu.dot_dimension_numbers<[1], [0], [0], [1], [0, 0, 1, 1], [], []>} : vector<8x128xf32>, vector<128x384xf32>, vector<8x384xf32> -> vector<8x384xf32>
    %406 = arith.addf %405, %17 : vector<8x384xf32>
    %407 = vector.extract_strided_slice %404 {offsets = [0, 0], sizes = [8, 128], strides = [1, 1]} : vector<8x384xf32> to vector<8x128xf32>
    %408 = vector.extract_strided_slice %406 {offsets = [0, 0], sizes = [8, 128], strides = [1, 1]} : vector<8x384xf32> to vector<8x128xf32>
    %409 = arith.addf %407, %408 : vector<8x128xf32>
    %410 = arith.negf %409 : vector<8x128xf32>
    %411 = math.exp %410 : vector<8x128xf32>
    %cst_79 = arith.constant 1.000000e+00 : f32
    %412 = vector.broadcast %cst_79 : f32 to vector<8x128xf32>
    %413 = arith.addf %412, %411 : vector<8x128xf32>
    %414 = arith.divf %412, %413 : vector<8x128xf32>
    %415 = vector.extract_strided_slice %404 {offsets = [0, 128], sizes = [8, 128], strides = [1, 1]} : vector<8x384xf32> to vector<8x128xf32>
    %416 = vector.extract_strided_slice %406 {offsets = [0, 128], sizes = [8, 128], strides = [1, 1]} : vector<8x384xf32> to vector<8x128xf32>
    %417 = arith.addf %415, %416 : vector<8x128xf32>
    %418 = arith.negf %417 : vector<8x128xf32>
    %419 = math.exp %418 : vector<8x128xf32>
    %cst_80 = arith.constant 1.000000e+00 : f32
    %420 = vector.broadcast %cst_80 : f32 to vector<8x128xf32>
    %421 = arith.addf %420, %419 : vector<8x128xf32>
    %422 = arith.divf %420, %421 : vector<8x128xf32>
    %423 = vector.extract_strided_slice %404 {offsets = [0, 256], sizes = [8, 128], strides = [1, 1]} : vector<8x384xf32> to vector<8x128xf32>
    %424 = vector.extract_strided_slice %406 {offsets = [0, 256], sizes = [8, 128], strides = [1, 1]} : vector<8x384xf32> to vector<8x128xf32>
    %425 = arith.mulf %414, %424 : vector<8x128xf32>
    %426 = arith.addf %423, %425 : vector<8x128xf32>
    %427 = math.tanh %426 : vector<8x128xf32>
    %cst_81 = arith.constant 1.000000e+00 : f32
    %428 = vector.broadcast %cst_81 : f32 to vector<8x128xf32>
    %429 = arith.subf %428, %422 : vector<8x128xf32>
    %430 = arith.mulf %429, %427 : vector<8x128xf32>
    %431 = arith.mulf %422, %373 : vector<8x128xf32>
    %432 = arith.addf %430, %431 : vector<8x128xf32>
    %433 = vector.extract_strided_slice %5 {offsets = [56, 0], sizes = [8, 384], strides = [1, 1]} : vector<64x384xf32> to vector<8x384xf32>
    %cst_82 = arith.constant dense<0.000000e+00> : vector<8x384xf32>
    %434 = tpu.matmul %402, %6, %cst_82 {dimension_numbers = #tpu.dot_dimension_numbers<[1], [0], [0], [1], [0, 0, 1, 1], [], []>} : vector<8x128xf32>, vector<128x384xf32>, vector<8x384xf32> -> vector<8x384xf32>
    %435 = arith.addf %434, %11 : vector<8x384xf32>
    %436 = vector.extract_strided_slice %433 {offsets = [0, 0], sizes = [8, 128], strides = [1, 1]} : vector<8x384xf32> to vector<8x128xf32>
    %437 = vector.extract_strided_slice %435 {offsets = [0, 0], sizes = [8, 128], strides = [1, 1]} : vector<8x384xf32> to vector<8x128xf32>
    %438 = arith.addf %436, %437 : vector<8x128xf32>
    %439 = arith.negf %438 : vector<8x128xf32>
    %440 = math.exp %439 : vector<8x128xf32>
    %cst_83 = arith.constant 1.000000e+00 : f32
    %441 = vector.broadcast %cst_83 : f32 to vector<8x128xf32>
    %442 = arith.addf %441, %440 : vector<8x128xf32>
    %443 = arith.divf %441, %442 : vector<8x128xf32>
    %444 = vector.extract_strided_slice %433 {offsets = [0, 128], sizes = [8, 128], strides = [1, 1]} : vector<8x384xf32> to vector<8x128xf32>
    %445 = vector.extract_strided_slice %435 {offsets = [0, 128], sizes = [8, 128], strides = [1, 1]} : vector<8x384xf32> to vector<8x128xf32>
    %446 = arith.addf %444, %445 : vector<8x128xf32>
    %447 = arith.negf %446 : vector<8x128xf32>
    %448 = math.exp %447 : vector<8x128xf32>
    %cst_84 = arith.constant 1.000000e+00 : f32
    %449 = vector.broadcast %cst_84 : f32 to vector<8x128xf32>
    %450 = arith.addf %449, %448 : vector<8x128xf32>
    %451 = arith.divf %449, %450 : vector<8x128xf32>
    %452 = vector.extract_strided_slice %433 {offsets = [0, 256], sizes = [8, 128], strides = [1, 1]} : vector<8x384xf32> to vector<8x128xf32>
    %453 = vector.extract_strided_slice %435 {offsets = [0, 256], sizes = [8, 128], strides = [1, 1]} : vector<8x384xf32> to vector<8x128xf32>
    %454 = arith.mulf %443, %453 : vector<8x128xf32>
    %455 = arith.addf %452, %454 : vector<8x128xf32>
    %456 = math.tanh %455 : vector<8x128xf32>
    %cst_85 = arith.constant 1.000000e+00 : f32
    %457 = vector.broadcast %cst_85 : f32 to vector<8x128xf32>
    %458 = arith.subf %457, %451 : vector<8x128xf32>
    %459 = arith.mulf %458, %456 : vector<8x128xf32>
    %460 = arith.mulf %451, %402 : vector<8x128xf32>
    %461 = arith.addf %459, %460 : vector<8x128xf32>
    %cst_86 = arith.constant dense<0.000000e+00> : vector<8x384xf32>
    %462 = tpu.matmul %461, %7, %cst_86 {dimension_numbers = #tpu.dot_dimension_numbers<[1], [0], [0], [1], [0, 0, 1, 1], [], []>} : vector<8x128xf32>, vector<128x384xf32>, vector<8x384xf32> -> vector<8x384xf32>
    %463 = arith.addf %462, %14 : vector<8x384xf32>
    %cst_87 = arith.constant dense<0.000000e+00> : vector<8x384xf32>
    %464 = tpu.matmul %432, %8, %cst_87 {dimension_numbers = #tpu.dot_dimension_numbers<[1], [0], [0], [1], [0, 0, 1, 1], [], []>} : vector<8x128xf32>, vector<128x384xf32>, vector<8x384xf32> -> vector<8x384xf32>
    %465 = arith.addf %464, %17 : vector<8x384xf32>
    %466 = vector.extract_strided_slice %463 {offsets = [0, 0], sizes = [8, 128], strides = [1, 1]} : vector<8x384xf32> to vector<8x128xf32>
    %467 = vector.extract_strided_slice %465 {offsets = [0, 0], sizes = [8, 128], strides = [1, 1]} : vector<8x384xf32> to vector<8x128xf32>
    %468 = arith.addf %466, %467 : vector<8x128xf32>
    %469 = arith.negf %468 : vector<8x128xf32>
    %470 = math.exp %469 : vector<8x128xf32>
    %cst_88 = arith.constant 1.000000e+00 : f32
    %471 = vector.broadcast %cst_88 : f32 to vector<8x128xf32>
    %472 = arith.addf %471, %470 : vector<8x128xf32>
    %473 = arith.divf %471, %472 : vector<8x128xf32>
    %474 = vector.extract_strided_slice %463 {offsets = [0, 128], sizes = [8, 128], strides = [1, 1]} : vector<8x384xf32> to vector<8x128xf32>
    %475 = vector.extract_strided_slice %465 {offsets = [0, 128], sizes = [8, 128], strides = [1, 1]} : vector<8x384xf32> to vector<8x128xf32>
    %476 = arith.addf %474, %475 : vector<8x128xf32>
    %477 = arith.negf %476 : vector<8x128xf32>
    %478 = math.exp %477 : vector<8x128xf32>
    %cst_89 = arith.constant 1.000000e+00 : f32
    %479 = vector.broadcast %cst_89 : f32 to vector<8x128xf32>
    %480 = arith.addf %479, %478 : vector<8x128xf32>
    %481 = arith.divf %479, %480 : vector<8x128xf32>
    %482 = vector.extract_strided_slice %463 {offsets = [0, 256], sizes = [8, 128], strides = [1, 1]} : vector<8x384xf32> to vector<8x128xf32>
    %483 = vector.extract_strided_slice %465 {offsets = [0, 256], sizes = [8, 128], strides = [1, 1]} : vector<8x384xf32> to vector<8x128xf32>
    %484 = arith.mulf %473, %483 : vector<8x128xf32>
    %485 = arith.addf %482, %484 : vector<8x128xf32>
    %486 = math.tanh %485 : vector<8x128xf32>
    %cst_90 = arith.constant 1.000000e+00 : f32
    %487 = vector.broadcast %cst_90 : f32 to vector<8x128xf32>
    %488 = arith.subf %487, %481 : vector<8x128xf32>
    %489 = arith.mulf %488, %486 : vector<8x128xf32>
    %490 = arith.mulf %481, %432 : vector<8x128xf32>
    %491 = arith.addf %489, %490 : vector<8x128xf32>
    %c0_91 = arith.constant 0 : index
    %c0_92 = arith.constant 0 : index
    %492 = vector.load %arg9[%c0_91, %c0_92] : memref<128x128xf32, #tpu.memory_space<vmem>>, vector<128x128xf32>
    %cst_93 = arith.constant dense<0.000000e+00> : vector<8x128xf32>
    %493 = tpu.matmul %491, %492, %cst_93 {dimension_numbers = #tpu.dot_dimension_numbers<[1], [0], [0], [1], [0, 0, 1, 1], [], []>} : vector<8x128xf32>, vector<128x128xf32>, vector<8x128xf32> -> vector<8x128xf32>
    %c0_94 = arith.constant 0 : index
    %c0_95 = arith.constant 0 : index
    %494 = vector.load %arg10[%c0_94, %c0_95] : memref<1x128xf32, #tpu.memory_space<vmem>>, vector<1x128xf32>
    %495 = vector.broadcast %494 : vector<1x128xf32> to vector<8x128xf32>
    %496 = arith.addf %493, %495 : vector<8x128xf32>
    %c0_96 = arith.constant 0 : index
    %c0_97 = arith.constant 0 : index
    %497 = vector.load %arg11[%c0_96, %c0_97] : memref<8x128xf32, #tpu.memory_space<vmem>>, vector<8x128xf32>
    tpu.vector_store %arg11[%c0_96, %c0_97], %496 {strides = array<i32>} : memref<8x128xf32, #tpu.memory_space<vmem>>, vector<8x128xf32>,
    return
  }
}

</mosaic_0001>

<bundles_post_ra>
// kernel: tpu_custom_call.1
= control target key start
LH: loop header
LB: loop body
LE: loop exit
PB: predicated region body
PF: predicated region fallthrough
CT: control target
= control target key end

     0   :  { %16 = vsyncpa [#allocation3], 0  ;;  %s6471_s0 = inlined_call_operand.hbm [shape: f32[64,128], index: 0, kind: input, shape index: {}]   ;;  %s6472_s1 = inlined_call_operand.hbm [shape: f32[128,384], index: 1, kind: input, shape index: {}]   ;;  %s6473_s2 = inlined_call_operand.hbm [shape: f32[128,384], index: 2, kind: input, shape index: {}]   ;;  %s6474_s3 = inlined_call_operand.hbm [shape: f32[1,384], index: 3, kind: input, shape index: {}]   ;;  %s6475_s4 = inlined_call_operand.vmem [shape: f32[1,384], index: 4, kind: input, shape index: {}]   ;;  %s6476_s5 = inlined_call_operand.hbm [shape: f32[128,384], index: 5, kind: input, shape index: {}]   ;;  %s6477_s6 = inlined_call_operand.hbm [shape: f32[128,384], index: 6, kind: input, shape index: {}]   ;;  %s6478_s7 = inlined_call_operand.vmem [shape: f32[1,384], index: 7, kind: input, shape index: {}]   ;;  %s6479_s8 = inlined_call_operand.hbm [shape: f32[1,384], index: 8, kind: input, shape index: {}]   ;;  %s6480_s9 = inlined_call_operand.hbm [shape: f32[128,128], index: 9, kind: input, shape index: {}]   ;;  %s6481_s10 = inlined_call_operand.vmem [shape: f32[1,128], index: 10, kind: input, shape index: {}]   ;;  %s6482_s11 = inlined_call_operand.hbm [shape: f32[8,128], index: 11, kind: output, shape index: {}]  }
   0x1   :  { %17 = vsyncpa [#allocation6], 0 }
   0x2   :  { %18 = vsyncpa [#allocation9], 0 }
   0x3   :  { %19 = vsyncpa [#allocation12], 0 }
   0x4   :  { %20 = vsyncpa [#allocation15], 0  ;;  %s39_s19 = sshll.u32 %s6472_s1, 4  ;;  %s40_s19 = int_to_ptr.hbm [resolvable:$true] %s39_s19 }
   0x5   :  { %21 = vsyncpa [#allocation4], 0  ;;  %s3636_s20 = smov [#allocation5]   ;;  %s66_s24 = sshll.u32 %s6474_s3, 4  ;;  %s67_s24 = int_to_ptr.hbm [resolvable:$true] %s66_s24 }
   0x6   :  { %s41_s21 = sshll.u32 %s3636_s20, 4  ;;  %s3637_s25 = smov 384   ;;  %s42_s21 = int_to_ptr.vmem [resolvable:$true] %s41_s21 }
   0x7   :  { %s3638_s26 = smov 24   ;;  %s3639_s27 = smov [#allocation8]  }
   0x8   :  { %47 = dma.hbm_to_vmem [thread:$0]  %s40_s19, 6144, %s42_s21, [#allocation6], %s3637_s25, %s3637_s25, %s3638_s26  }
   0x9   :  { %s68_s28 = sshll.u32 %s3639_s27, 4  ;;  %s91_s30 = sshll.u32 %s6477_s6, 4  ;;  %s69_s28 = int_to_ptr.vmem [resolvable:$true] %s68_s28  ;;  %s92_s30 = int_to_ptr.hbm [resolvable:$true] %s91_s30 }
   0xa   :  { %71 = dma.hbm_to_vmem [thread:$0]  %s67_s24, 48, %s69_s28, [#allocation9]  }
   0xb   :  { %s26_s3 = sshll.u32 %s6471_s0, 4  ;;  %s3640_s14 = smov [#allocation11]   ;;  %s27_s3 = int_to_ptr.hbm [resolvable:$true] %s26_s3 }
   0xc   :  { %s93_s15 = sshll.u32 %s3640_s14, 4  ;;  %s3641_s16 = smov [#allocation2]   ;;  %s94_s15 = int_to_ptr.vmem [resolvable:$true] %s93_s15 }
   0xd   :  { %99 = dma.hbm_to_vmem [thread:$0]  %s92_s30, 6144, %s94_s15, [#allocation12], %s3637_s25, %s3637_s25, %s3638_s26  }
   0xe   :  { %s28_s17 = sshll.u32 %s3641_s16, 4  ;;  %s3642_s18 = smov 128   ;;  %s29_s17 = int_to_ptr.vmem [resolvable:$true] %s28_s17 }
   0xf   :  { %s3643_s6 = smov 8   ;;  %s52_s21 = sshll.u32 %s6473_s2, 4  ;;  %s53_s21 = int_to_ptr.hbm [resolvable:$true] %s52_s21 }
  0x10   :  { %34 = dma.hbm_to_vmem [thread:$0]  %s27_s3, 1024, %s29_s17, [#allocation3], %s3642_s18, %s3642_s18, %s3643_s6  }
  0x11   :  { %s3644_s0 = smov [#allocation7]   ;;  %s78_s27 = sshll.u32 %s6476_s5, 4  ;;  %s79_s27 = int_to_ptr.hbm [resolvable:$true] %s78_s27 }
  0x12   :  { %s54_s22 = sshll.u32 %s3644_s0, 4  ;;  %s3645_s28 = smov [#allocation10]   ;;  %s55_s22 = int_to_ptr.vmem [resolvable:$true] %s54_s22 }
  0x13   :  { %60 = dma.hbm_to_vmem [thread:$0]  %s53_s21, 6144, %s55_s22, [#allocation6], %s3637_s25, %s3637_s25, %s3638_s26  }
  0x14   :  { %s80_s29 = sshll.u32 %s3645_s28, 4  ;;  %s107_s12 = sshll.u32 %s6479_s8, 4  ;;  %s81_s29 = int_to_ptr.vmem [resolvable:$true] %s80_s29  ;;  %s108_s12 = int_to_ptr.hbm [resolvable:$true] %s107_s12 }
  0x15   :  { %86 = dma.hbm_to_vmem [thread:$0]  %s79_s27, 6144, %s81_s29, [#allocation9], %s3637_s25, %s3637_s25, %s3638_s26  }
  0x16   :  { %s117_s5 = sshll.u32 %s6480_s9, 4  ;;  %s3646_s3 = smov [#allocation13]   ;;  %s118_s5 = int_to_ptr.hbm [resolvable:$true] %s117_s5 }
  0x17   :  { %s109_s14 = sshll.u32 %s3646_s3, 4  ;;  %s3647_s15 = smov [#allocation14]   ;;  %s110_s14 = int_to_ptr.vmem [resolvable:$true] %s109_s14 }
  0x18   :  { %112 = dma.hbm_to_vmem [thread:$0]  %s108_s12, 48, %s110_s14, [#allocation12]  }
  0x19   :  { %s119_s16 = sshll.u32 %s3647_s15, 4  ;;  %s120_s16 = int_to_ptr.vmem [resolvable:$true] %s119_s16 }
  0x1a   :  { %125 = dma.hbm_to_vmem [thread:$0]  %s118_s5, 2048, %s120_s16, [#allocation15], %s3642_s18, %s3642_s18, %s3643_s6  }
  0x1b   :  { %3624 = dma.done.wait [#allocation3], 1024  }
  0x1c   :  { %3625 = vsyncadd [#allocation3], 4294966272 }
  0x1d   :  { %3626 = dma.done.wait [#allocation6], 12288  }
  0x1e   :  { %3627 = vsyncadd [#allocation6], 4294955008 }
  0x1f   :  { %3628 = dma.done.wait [#allocation9], 6192  }
  0x20   :  { %3629 = vsyncadd [#allocation9], 4294961104 }
  0x21   :  { %3630 = dma.done.wait [#allocation12], 6192  }
  0x22   :  { %3631 = vsyncadd [#allocation12], 4294961104 }
  0x23   :  { %3632 = dma.done.wait [#allocation15], 2048  }
  0x24   :  { %3633 = vsyncadd [#allocation15], 4294965248  ;;  %v213_v0 = vld [vmem:[#allocation5 + $0x168] sm:$0xff]  ;;  %v210_v2 = vld [vmem:[#allocation5 + $0x150] sm:$0xff]  ;;  %v6483_v47 = vmov 0.0   ;;  %s3649_s17 = smov [#allocation16]  }
  0x25   :  { %v3746_v1 = vld [vmem:[#allocation7 + $0x168] sm:$0xff]  ;;  %224 = vmatpush.msra.mxu0 %v213_v0  ;;  %v3749_v3 = vld [vmem:[#allocation7 + $0x150] sm:$0xff]  ;;  %v207_v4 = vld [vmem:[#allocation5 + $0x138] sm:$0xff]  ;;  %s2753_s18 = sshll.u32 %s3649_s17, 4  ;;  %s2755_s20 = sshll.u32 %s6482_s11, 4  ;;  %s2754_s18 = int_to_ptr.vmem [resolvable:$true] %s2753_s18  ;;  %s2756_s20 = int_to_ptr.hbm [resolvable:$true] %s2755_s20 }
  0x26   :  { %515 = vmatpush.msra.mxu3 %v3746_v1  ;;  %v3751_v5 = vld [vmem:[#allocation7 + $0x138] sm:$0xff]  ;;  %v204_v6 = vld [vmem:[#allocation5 + $0x120] sm:$0xff]  ;;  %v201_v8 = vld [vmem:[#allocation5 + $0x108] sm:$0xff] }
  0x27   :  { %225 = vmatpush.msra.mxu0 %v210_v2  ;;  %v3754_v7 = vld [vmem:[#allocation7 + $0x120] sm:$0xff]  ;;  %v3757_v9 = vld [vmem:[#allocation7 + $0x108] sm:$0xff]  ;;  %v198_v10 = vld [vmem:[#allocation5 + $0xf0] sm:$0xff] }
  0x28   :  { %516 = vmatpush.msra.mxu3 %v3749_v3  ;;  %v3760_v11 = vld [vmem:[#allocation7 + $0xf0] sm:$0xff]  ;;  %v195_v12 = vld [vmem:[#allocation5 + $0xd8] sm:$0xff]  ;;  %v192_v14 = vld [vmem:[#allocation5 + $0xc0] sm:$0xff] }
  0x29   :  { %226 = vmatpush.msra.mxu0 %v207_v4  ;;  %v3763_v13 = vld [vmem:[#allocation7 + $0xd8] sm:$0xff]  ;;  %v3766_v15 = vld [vmem:[#allocation7 + $0xc0] sm:$0xff]  ;;  %v214_v16 = vld [vmem:[#allocation5 + $0x170] sm:$0xff] }
  0x2a   :  { %517 = vmatpush.msra.mxu3 %v3751_v5  ;;  %v211_v17 = vld [vmem:[#allocation5 + $0x158] sm:$0xff]  ;;  %v189_v18 = vld [vmem:[#allocation5 + $0xa8] sm:$0xff]  ;;  %265 = vmatpush.msra.mxu1 %v214_v16  ;;  %v208_v20 = vld [vmem:[#allocation5 + $0x140] sm:$0xff] }
  0x2b   :  { %227 = vmatpush.msra.mxu0 %v204_v6  ;;  %v3769_v19 = vld [vmem:[#allocation7 + $0xa8] sm:$0xff]  ;;  %v186_v21 = vld [vmem:[#allocation5 + $0x90] sm:$0xff]  ;;  %v183_v24 = vld [vmem:[#allocation5 + $0x78] sm:$0xff] }
  0x2c   :  { %518 = vmatpush.msra.mxu3 %v3754_v7  ;;  %v3772_v22 = vld [vmem:[#allocation7 + $0x90] sm:$0xff]  ;;  %266 = vmatpush.msra.mxu1 %v211_v17  ;;  %v205_v23 = vld [vmem:[#allocation5 + $0x128] sm:$0xff]  ;;  %v3775_v25 = vld [vmem:[#allocation7 + $0x78] sm:$0xff] }
  0x2d   :  { %228 = vmatpush.msra.mxu0 %v201_v8  ;;  %v202_v26 = vld [vmem:[#allocation5 + $0x110] sm:$0xff]  ;;  %v180_v27 = vld [vmem:[#allocation5 + $0x60] sm:$0xff]  ;;  %v199_v29 = vld [vmem:[#allocation5 + $0xf8] sm:$0xff] }
  0x2e   :  { %519 = vmatpush.msra.mxu3 %v3757_v9  ;;  %267 = vmatpush.msra.mxu1 %v208_v20  ;;  %v3778_v28 = vld [vmem:[#allocation7 + $0x60] sm:$0xff]  ;;  %v177_v30 = vld [vmem:[#allocation5 + $0x48] sm:$0xff]  ;;  %v174_v33 = vld [vmem:[#allocation5 + $0x30] sm:$0xff] }
  0x2f   :  { %229 = vmatpush.msra.mxu0 %v198_v10  ;;  %v3781_v31 = vld [vmem:[#allocation7 + $0x48] sm:$0xff]  ;;  %v196_v32 = vld [vmem:[#allocation5 + $0xe0] sm:$0xff]  ;;  %v3784_v34 = vld [vmem:[#allocation7 + $0x30] sm:$0xff] }
  0x30   :  { %520 = vmatpush.msra.mxu3 %v3760_v11  ;;  %268 = vmatpush.msra.mxu1 %v205_v23  ;;  %v193_v35 = vld [vmem:[#allocation5 + $0xc8] sm:$0xff]  ;;  %v171_v36 = vld [vmem:[#allocation5 + $0x18] sm:$0xff]  ;;  %v190_v38 = vld [vmem:[#allocation5 + $0xb0] sm:$0xff] }
  0x31   :  { %230 = vmatpush.msra.mxu0 %v195_v12  ;;  %v3787_v37 = vld [vmem:[#allocation7 + $0x18] sm:$0xff]  ;;  %v168_v39 = vld [vmem:[#allocation5] sm:$0xff]  ;;  %v3795_v43 = vld [vmem:[#allocation7 + $0x170] sm:$0xff] }
  0x32   :  { %521 = vmatpush.msra.mxu3 %v3763_v13  ;;  %269 = vmatpush.msra.mxu1 %v202_v26  ;;  %v3790_v40 = vld [vmem:[#allocation7] sm:$0xff]  ;;  %v215_v42 = vld [vmem:[#allocation5 + $0x178] sm:$0xff]  ;;  %v209_v51 = vld [vmem:[#allocation5 + $0x148] sm:$0xff] }
  0x33   :  { %231 = vmatpush.msra.mxu0 %v192_v14  ;;  %v3793_v41 = vld [vmem:[#allocation2] sm:$0xff]  ;;  %v3797_v44 = vld [vmem:[#allocation7 + $0x178] sm:$0xff]  ;;  %306 = vmatpush.msra.mxu2 %v215_v42  ;;  %v3810_v53 = vld [vmem:[#allocation7 + $0x148] sm:$0xff] }
  0x34   :  { %522 = vmatpush.msra.mxu3 %v3766_v15  ;;  %270 = vmatpush.msra.mxu1 %v199_v29  ;;  %v187_v45 = vld [vmem:[#allocation5 + $0x98] sm:$0xff]  ;;  %v212_v46 = vld [vmem:[#allocation5 + $0x160] sm:$0xff]  ;;  %v181_v54 = vld [vmem:[#allocation5 + $0x68] sm:$0xff] }
  0x35   :  { %232 = vmatpush.msra.mxu0 %v189_v18  ;;  %v3802_v48 = vld [vmem:[#allocation7 + $0x158] sm:$0xff]  ;;  %v3804_v49 = vld [vmem:[#allocation7 + $0x160] sm:$0xff]  ;;  %307 = vmatpush.msra.mxu2 %v212_v46  ;;  %v206_v55 = vld [vmem:[#allocation5 + $0x130] sm:$0xff] }
  0x36   :  { %523 = vmatpush.msra.mxu3 %v3769_v19  ;;  %271 = vmatpush.msra.mxu1 %v196_v32  ;;  %v184_v50 = vld [vmem:[#allocation5 + $0x80] sm:$0xff]  ;;  %v3814_v56 = vld [vmem:[#allocation7 + $0x128] sm:$0xff]  ;;  %v3816_v57 = vld [vmem:[#allocation7 + $0x130] sm:$0xff] }
  0x37   :  { %233 = vmatpush.msra.mxu0 %v186_v21  ;;  %v3808_v52 = vld [vmem:[#allocation7 + $0x140] sm:$0xff]  ;;  %6802 = vst [vmem:[#allocation23_spill] sm:$0xff] %v3816_v57  ;;  %308 = vmatpush.msra.mxu2 %v209_v51  ;;  %v3819_v58 = vld [vmem:[#allocation2 + $0x8] sm:$0xff]  ;;  %v178_v59 = vld [vmem:[#allocation5 + $0x50] sm:$0xff] }
  0x38   :  { %524 = vmatpush.msra.mxu3 %v3772_v22  ;;  %272 = vmatpush.msra.mxu1 %v193_v35  ;;  %v3822_v60 = vld [vmem:[#allocation7 + $0x110] sm:$0xff]  ;;  %v3824_v61 = vld [vmem:[#allocation7 + $0x118] sm:$0xff]  ;;  %v3831_v2 = vld [vmem:[#allocation7 + $0x100] sm:$0xff] }
  0x39   :  { %234 = vmatpush.msra.mxu0 %v183_v24  ;;  %6803 = vst [vmem:[#allocation24_spill] sm:$0xff] %v3824_v61  ;;  %309 = vmatpush.msra.mxu2 %v206_v55  ;;  %v175_v62 = vld [vmem:[#allocation5 + $0x38] sm:$0xff]  ;;  %v172_v4 = vld [vmem:[#allocation5 + $0x20] sm:$0xff]  ;;  %v3837_v10 = vld [vmem:[#allocation7 + $0xe8] sm:$0xff] }
  0x3a   :  { %525 = vmatpush.msra.mxu3 %v3775_v25  ;;  %273 = vmatpush.msra.mxu1 %v190_v38  ;;  %v203_v63 = vld [vmem:[#allocation5 + $0x118] sm:$0xff]  ;;  %6804 = vst [vmem:[#allocation25_spill] sm:$0xff] %v3831_v2  ;;  %v200_v6 = vld [vmem:[#allocation5 + $0x100] sm:$0xff]  ;;  %v169_v12 = vld [vmem:[#allocation5 + $0x8] sm:$0xff] }
  0x3b   :  { %235 = vmatpush.msra.mxu0 %v180_v27  ;;  %v3829_v0 = vld [vmem:[#allocation7 + $0xf8] sm:$0xff]  ;;  %v3835_v8 = vld [vmem:[#allocation7 + $0xe0] sm:$0xff]  ;;  %6805 = vst [vmem:[#allocation26_spill] sm:$0xff] %v3837_v10  ;;  %310 = vmatpush.msra.mxu2 %v203_v63  ;;  %v197_v14 = vld [vmem:[#allocation5 + $0xe8] sm:$0xff] }
  0x3c   :  { %526 = vmatpush.msra.mxu3 %v3778_v28  ;;  %274 = vmatpush.msra.mxu1 %v187_v45  ;;  %v3841_v16 = vld [vmem:[#allocation7 + $0xc8] sm:$0xff]  ;;  %v3843_v17 = vld [vmem:[#allocation7 + $0xd0] sm:$0xff]  ;;  %v3851_v21 = vld [vmem:[#allocation7 + $0xb8] sm:$0xff] }
  0x3d   :  { %236 = vmatpush.msra.mxu0 %v177_v30  ;;  %6806 = vst [vmem:[#allocation27_spill] sm:$0xff] %v3843_v17  ;;  %311 = vmatpush.msra.mxu2 %v200_v6  ;;  %v3846_v18 = vld [vmem:[#allocation2 + $0x10] sm:$0xff]  ;;  %v3856_v24 = vld [vmem:[#allocation7 + $0x98] sm:$0xff]  ;;  %v3858_v26 = vld [vmem:[#allocation7 + $0xa0] sm:$0xff] }
  0x3e   :  { %527 = vmatpush.msra.mxu3 %v3781_v31  ;;  %275 = vmatpush.msra.mxu1 %v184_v50  ;;  %v3849_v20 = vld [vmem:[#allocation7 + $0xb0] sm:$0xff]  ;;  %6807 = vst [vmem:[#allocation28_spill] sm:$0xff] %v3851_v21  ;;  %v191_v27 = vld [vmem:[#allocation5 + $0xb8] sm:$0xff]  ;;  %v3863_v29 = vld [vmem:[#allocation7 + $0x80] sm:$0xff] }
  0x3f   :  { %237 = vmatpush.msra.mxu0 %v174_v33  ;;  %312 = vmatpush.msra.mxu2 %v197_v14  ;;  %v194_v23 = vld [vmem:[#allocation5 + $0xd0] sm:$0xff]  ;;  %6808 = vst [vmem:[#allocation29_spill] sm:$0xff] %v3858_v26  ;;  %v3865_v30 = vld [vmem:[#allocation7 + $0x88] sm:$0xff]  ;;  %v188_v32 = vld [vmem:[#allocation5 + $0xa0] sm:$0xff] }
  0x40   :  { %528 = vmatpush.msra.mxu3 %v3784_v34  ;;  %276 = vmatpush.msra.mxu1 %v181_v54  ;;  %6809 = vst [vmem:[#allocation30_spill] sm:$0xff] %v3865_v30  ;;  %v3869_v33 = vld [vmem:[#allocation7 + $0x68] sm:$0xff]  ;;  %v3871_v35 = vld [vmem:[#allocation7 + $0x70] sm:$0xff]  ;;  %v3877_v42 = vld [vmem:[#allocation7 + $0x58] sm:$0xff] }
  0x41   :  { %238 = vmatpush.msra.mxu0 %v171_v36  ;;  %313 = vmatpush.msra.mxu2 %v194_v23  ;;  %6810 = vst [vmem:[#allocation31_spill] sm:$0xff] %v3871_v35  ;;  %v163_v36 = vld [vmem:[#allocation2 + $0x18] sm:$0xff]  ;;  %v185_v38 = vld [vmem:[#allocation5 + $0x88] sm:$0xff]  ;;  %v182_v45 = vld [vmem:[#allocation5 + $0x70] sm:$0xff] }
  0x42   :  { %529 = vmatpush.msra.mxu3 %v3787_v37  ;;  %277 = vmatpush.msra.mxu1 %v178_v59  ;;  %6811 = vst [vmem:[#allocation32_spill] sm:$0xff] %v3877_v42  ;;  %v3881_v46 = vld [vmem:[#allocation7 + $0x38] sm:$0xff]  ;;  %v3883_v50 = vld [vmem:[#allocation7 + $0x40] sm:$0xff]  ;;  %v3889_v55 = vld [vmem:[#allocation7 + $0x28] sm:$0xff] }
  0x43   :  { %239 = vmatpush.msra.mxu0 %v168_v39  ;;  %314 = vmatpush.msra.mxu2 %v191_v27  ;;  %v3875_v39 = vld [vmem:[#allocation7 + $0x50] sm:$0xff]  ;;  %6812 = vst [vmem:[#allocation33_spill] sm:$0xff] %v3881_v46  ;;  %v179_v51 = vld [vmem:[#allocation5 + $0x58] sm:$0xff]  ;;  %v3887_v54 = vld [vmem:[#allocation7 + $0x20] sm:$0xff] }
  0x44   :  { %530 = vmatpush.msra.mxu3 %v3790_v40  ;;  %240 = vmatmul.f32.vlgmr.msra.gmra.mxu0 %v3793_v41  ;;  %6813 = vst [vmem:[#allocation34_spill] sm:$0xff] %v3883_v50  ;;  %v176_v59 = vld [vmem:[#allocation5 + $0x40] sm:$0xff]  ;;  %v3896_v63 = vld [vmem:[#allocation7 + $0x10] sm:$0xff]  ;;  %v173_v6 = vld [vmem:[#allocation5 + $0x28] sm:$0xff] }
  0x45   :  { %531 = vmatmul.f32.vlgmr.msra.gmra.mxu3 %v6483_v47  ;;  %555 = vmatpush.msrb.mxu0 %v3797_v44  ;;  %6814 = vst [vmem:[#allocation35_spill] sm:$0xff] %v3887_v54  ;;  %v165_v14 = vld [vmem:[#allocation2 + $0x28] sm:$0xff]  ;;  %v166_v23 = vld [vmem:[#allocation2 + $0x30] sm:$0xff]  ;;  %v167_v27 = vld [vmem:[#allocation2 + $0x38] sm:$0xff] }
  0x46   :  { %535 = vmatpush.msrb.mxu3 %v3795_v43  ;;  %278 = vmatpush.msra.mxu1 %v175_v62  ;;  %6815 = vst [vmem:[#allocation36_spill] sm:$0xff] %v3889_v55  ;;  %v3894_v62 = vld [vmem:[#allocation7 + $0x8] sm:$0xff] }
  0x47   :  { %556 = vmatpush.msrb.mxu0 %v3804_v49  ;;  %315 = vmatpush.msra.mxu2 %v188_v32  ;;  %6816 = vst [vmem:[#allocation37_spill] sm:$0xff] %v3894_v62  ;;  %v3916_v32 = vld [vmem:[#allocation11 + $0x150] sm:$0xff] }
  0x48   :  { %536 = vmatpush.msrb.mxu3 %v3802_v48  ;;  %279 = vmatpush.msra.mxu1 %v172_v4  ;;  %6817 = vst [vmem:[#allocation38_spill] sm:$0xff] %v3896_v63  ;;  %v164_v4 = vld [vmem:[#allocation2 + $0x20] sm:$0xff] }
  0x49   :  { %557 = vmatpush.msrb.mxu0 %v3810_v53  ;;  %316 = vmatpush.msra.mxu2 %v185_v38  ;;  %6819 = vst [vmem:[#allocation40_spill] sm:$0xff] %v3916_v32  ;;  %v3922_v38 = vld [vmem:[#allocation11 + $0x138] sm:$0xff] }
  0x4a   :  { %537 = vmatpush.msrb.mxu3 %v3808_v52  ;;  %280 = vmatpush.msra.mxu1 %v169_v12  ;;  %v170_v12 = vld [vmem:[#allocation5 + $0x10] sm:$0xff]  ;;  %6821 = vst [vmem:[#allocation42_spill] sm:$0xff] %v3922_v38 }
  0x4b   :  { %558 = vmatpush.msrb.mxu0 %v3816_v57  ;;  %281 = vmatmul.f32.vlgmr.msra.gmra.mxu1 %v3793_v41  ;;  %v4062_v57 = vld [vmem:[#allocation10 + $0x128] sm:$0xff] }
  0x4c   :  { %538 = vmatpush.msrb.mxu3 %v3814_v56  ;;  %243 = vmatmul.f32.gmra.mxu0 %v3819_v58  ;;  %6851 = vst [vmem:[#allocation72_spill] sm:$0xff] %v4062_v57 }
  0x4d   :  { %559 = vmatpush.msrb.mxu0 %v3824_v61  ;;  %317 = vmatpush.msra.mxu2 %v182_v45  ;;  %v3926_v45 = vld [vmem:[#allocation10 + $0x120] sm:$0xff] }
  0x4e   :  { %539 = vmatpush.msrb.mxu3 %v3822_v60  ;;  %6822 = vst [vmem:[#allocation43_spill] sm:$0xff] %v3926_v45 }
  0x4f   :  { %560 = vmatpush.msrb.mxu0 %v3831_v2  ;;  %318 = vmatpush.msra.mxu2 %v179_v51  ;;  %v3928_v51 = vld [vmem:[#allocation11 + $0x120] sm:$0xff] }
  0x50   :  { %540 = vmatpush.msrb.mxu3 %v3829_v0  ;;  %6823 = vst [vmem:[#allocation44_spill] sm:$0xff] %v3928_v51 }
  0x51   :  { %561 = vmatpush.msrb.mxu0 %v3837_v10  ;;  %319 = vmatpush.msra.mxu2 %v176_v59  ;;  %v3930_v59 = vld [vmem:[#allocation10 + $0x108] sm:$0xff] }
  0x52   :  { %541 = vmatpush.msrb.mxu3 %v3835_v8  ;;  %6824 = vst [vmem:[#allocation45_spill] sm:$0xff] %v3930_v59  ;;  %v4028_v10 = vld [vmem:[#allocation11 + $0x48] sm:$0xff] }
  0x53   :  { %562 = vmatpush.msrb.mxu0 %v3843_v17  ;;  %284 = vmatmul.f32.gmra.mxu1 %v3819_v58  ;;  %v4021_v17 = vld [vmem:[#allocation10 + $0x170] sm:$0xff]  ;;  %6844 = vst [vmem:[#allocation65_spill] sm:$0xff] %v4028_v10 }
  0x54   :  { %542 = vmatpush.msrb.mxu3 %v3841_v16  ;;  %246 = vmatmul.f32.gmra.mxu0 %v3846_v18 }
  0x55   :  { %563 = vmatpush.msrb.mxu0 %v3851_v21  ;;  %320 = vmatpush.msra.mxu2 %v173_v6  ;;  %v3934_v6 = vld [vmem:[#allocation11 + $0x108] sm:$0xff]  ;;  %v4007_v21 = vld [vmem:[#allocation10 + $0x60] sm:$0xff] }
  0x56   :  { %543 = vmatpush.msrb.mxu3 %v3849_v20  ;;  %6825 = vst [vmem:[#allocation46_spill] sm:$0xff] %v3934_v6 }
  0x57   :  { %564 = vmatpush.msrb.mxu0 %v3858_v26  ;;  %321 = vmatpush.msra.mxu2 %v170_v12  ;;  %v3938_v12 = vld [vmem:[#allocation10 + $0x160] sm:$0xff]  ;;  %v3997_v26 = vld [vmem:[#allocation10 + $0xe8] sm:$0xff]  ;;  %6840 = vst [vmem:[#allocation61_spill] sm:$0xff] %v4007_v21 }
  0x58   :  { %544 = vmatpush.msrb.mxu3 %v3856_v24  ;;  %322 = vmatmul.f32.vlgmr.msra.gmra.mxu2 %v3793_v41  ;;  %v3908_v41 = vld [vmem:[#allocation10 + $0x168] sm:$0xff] }
  0x59   :  { %565 = vmatpush.msrb.mxu0 %v3865_v30  ;;  %622 = vmatpush.msrb.mxu1 %v3908_v41  ;;  %v3988_v30 = vld [vmem:[#allocation8] sm:$0x7] }
  0x5a   :  { %545 = vmatpush.msrb.mxu3 %v3863_v29  ;;  %642 = vmatpush.msrb.mxu2 %v4021_v17 }
  0x5b   :  { %566 = vmatpush.msrb.mxu0 %v3871_v35  ;;  %287 = vmatmul.f32.gmra.mxu1 %v3846_v18  ;;  %v3986_v35 = vld [vmem:[#allocation11 + $0x90] sm:$0xff] }
  0x5c   :  { %546 = vmatpush.msrb.mxu3 %v3869_v33  ;;  %249 = vmatmul.f32.gmra.mxu0 %v163_v36  ;;  %6835 = vst [vmem:[#allocation56_spill] sm:$0xff] %v3986_v35 }
  0x5d   :  { %567 = vmatpush.msrb.mxu0 %v3877_v42  ;;  %v3984_v42 = vld [vmem:[#allocation10 + $0x100] sm:$0xff] }
  0x5e   :  { %547 = vmatpush.msrb.mxu3 %v3875_v39 }
  0x5f   :  { %568 = vmatpush.msrb.mxu0 %v3883_v50  ;;  %v3977_v50 = vld [vmem:[%s6475_s4] sm:$0x7] }
  0x60   :  { %548 = vmatpush.msrb.mxu3 %v3881_v46  ;;  %325 = vmatmul.f32.gmra.mxu2 %v3819_v58  ;;  %v3910_v58 = vld [vmem:[#allocation11 + $0x168] sm:$0xff] }
  0x61   :  { %569 = vmatpush.msrb.mxu0 %v3889_v55  ;;  %6818 = vst [vmem:[#allocation39_spill] sm:$0xff] %v3910_v58  ;;  %v3971_v55 = vld [vmem:[#allocation11 + $0xa8] sm:$0xff] }
  0x62   :  { %549 = vmatpush.msrb.mxu3 %v3887_v54  ;;  %6833 = vst [vmem:[#allocation54_spill] sm:$0xff] %v3971_v55 }
  0x63   :  { %570 = vmatpush.msrb.mxu0 %v3896_v63  ;;  %290 = vmatmul.f32.gmra.mxu1 %v163_v36  ;;  %v3967_v63 = vld [vmem:[#allocation10 + $0x118] sm:$0xff] }
  0x64   :  { %550 = vmatpush.msrb.mxu3 %v3894_v62  ;;  %252 = vmatmul.f32.gmra.mxu0 %v164_v4 }
  0x65   :  { %551 = vmatmul.f32.vlgmr.msrb.gmra.mxu3 %v6483_v47  ;;  %682 = vmatpush.msra.mxu0 %v3910_v58  ;;  %v3962_v58 = vld [vmem:[#allocation11 + $0xc0] sm:$0xff] }
  0x66   :  { %6831 = vst [vmem:[#allocation52_spill] sm:$0xff] %v3962_v58 }
  0x67   :  { %683 = vmatpush.msra.mxu0 %v3916_v32  ;;  %v3958_v32 = vld [vmem:[#allocation10 + $0xc0] sm:$0xff] }
  0x68   :  { %328 = vmatmul.f32.gmra.mxu2 %v3846_v18  ;;  %v3914_v18 = vld [vmem:[#allocation10 + $0x150] sm:$0xff]  ;;  %6830 = vst [vmem:[#allocation51_spill] sm:$0xff] %v3958_v32 }
  0x69   :  { %623 = vmatpush.msrb.mxu1 %v3914_v18  ;;  %684 = vmatpush.msra.mxu0 %v3922_v38  ;;  %v3954_v38 = vld [vmem:[#allocation11 + $0xd8] sm:$0xff] }
  0x6a   :  { %6829 = vst [vmem:[#allocation50_spill] sm:$0xff] %v3954_v38 }
  0x6b   :  { %293 = vmatmul.f32.gmra.mxu1 %v164_v4  ;;  %685 = vmatpush.msra.mxu0 %v3928_v51  ;;  %v3952_v51 = vld [vmem:[#allocation10 + $0x148] sm:$0xff] }
  0x6c   :  { %255 = vmatmul.f32.gmra.mxu0 %v165_v14 }
  0x6d   :  { %686 = vmatpush.msra.mxu0 %v3934_v6  ;;  %v3960_v6 = vld [vmem:[#allocation10 + $0x130] sm:$0xff] }
  0x70   :  { %331 = vmatmul.f32.gmra.mxu2 %v163_v36  ;;  %v3920_v36 = vld [vmem:[#allocation10 + $0x138] sm:$0xff] }
  0x71   :  { %6820 = vst [vmem:[#allocation41_spill] sm:$0xff] %v3920_v36  ;;  %624 = vmatpush.msrb.mxu1 %v3920_v36  ;;  %v4064_v36 = vld [vmem:[#allocation10 + $0x70] sm:$0xff] }
  0x73   :  { %296 = vmatmul.f32.gmra.mxu1 %v165_v14 }
  0x74   :  { %258 = vmatmul.f32.gmra.mxu0 %v166_v23  ;;  %625 = vmatpush.msrb.mxu1 %v3926_v45  ;;  %v4049_v45 = vld [vmem:[#allocation10 + $0x88] sm:$0xff] }
  0x76   :  { %626 = vmatpush.msrb.mxu1 %v3930_v59  ;;  %v4036_v59 = vld [vmem:[#allocation10 + $0xa0] sm:$0xff] }
  0x78   :  { %334 = vmatmul.f32.gmra.mxu2 %v164_v4  ;;  %v3932_v4 = vld [vmem:[#allocation10 + $0x178] sm:$0xff] }
  0x79   :  { %662 = vmatpush.msra.mxu3 %v3932_v4 }
  0x7b   :  { %299 = vmatmul.f32.gmra.mxu1 %v166_v23  ;;  %663 = vmatpush.msra.mxu3 %v3938_v12 }
  0x7c   :  { %261 = vmatmul.f32.gmra.mxu0 %v167_v27 }
  0x7d   :  { %664 = vmatpush.msra.mxu3 %v3952_v51 }
  0x7f   :  { %665 = vmatpush.msra.mxu3 %v3960_v6 }
  0x80   :  { %337 = vmatmul.f32.gmra.mxu2 %v165_v14  ;;  %v3941_v14 = vld [vmem:[#allocation10 + $0xf0] sm:$0xff] }
  0x81   :  { %6826 = vst [vmem:[#allocation47_spill] sm:$0xff] %v3941_v14  ;;  %627 = vmatpush.msrb.mxu1 %v3941_v14  ;;  %666 = vmatpush.msra.mxu3 %v3967_v63 }
  0x83   :  { %302 = vmatmul.f32.gmra.mxu1 %v167_v27  ;;  %667 = vmatpush.msra.mxu3 %v3984_v42 }
  0x84   :  { %571 = vmatmul.f32.vlgmr.msrb.gmra.mxu0 %v6483_v47  ;;  %v3950_v47 = vld [vmem:[#allocation10 + $0xd8] sm:$0xff] }
  0x85   :  { %6828 = vst [vmem:[#allocation49_spill] sm:$0xff] %v3950_v47  ;;  %628 = vmatpush.msrb.mxu1 %v3950_v47  ;;  %668 = vmatpush.msra.mxu3 %v3997_v26  ;;  %v4014_v47 = vperm.slane %v3988_v30, 0 }
  0x87   :  { %629 = vmatpush.msrb.mxu1 %v3958_v32  ;;  %v4002_v32 = vperm.slane %v3977_v50, 0  ;;  %6842 = vst [vmem:[#allocation63_spill] sm:$0xff] %v4014_v47 }
  0x88   :  { %340 = vmatmul.f32.gmra.mxu2 %v166_v23  ;;  %v3943_v23 = vld [vmem:[#allocation11 + $0xf0] sm:$0xff] }
  0x89   :  { %6827 = vst [vmem:[#allocation48_spill] sm:$0xff] %v3943_v23  ;;  %687 = vmatpush.msra.mxu0 %v3943_v23  ;;  %v3965_v23 = vld [vmem:[#allocation10 + $0xa8] sm:$0xff] }
  0x8a   :  { %6832 = vst [vmem:[#allocation53_spill] sm:$0xff] %v3965_v23  ;;  %630 = vmatpush.msrb.mxu1 %v3965_v23  ;;  %v3995_v23 = vld [vmem:[#allocation10 + $0x78] sm:$0xff] }
  0x8b   :  { %688 = vmatpush.msra.mxu0 %v3954_v38  ;;  %v3982_v38 = vld [vmem:[#allocation10 + $0x90] sm:$0xff]  ;;  %6837 = vst [vmem:[#allocation58_spill] sm:$0xff] %v3995_v23 }
  0x8c   :  { %6834 = vst [vmem:[#allocation55_spill] sm:$0xff] %v3982_v38  ;;  %631 = vmatpush.msrb.mxu1 %v3982_v38 }
  0x8d   :  { %689 = vmatpush.msra.mxu0 %v3962_v58  ;;  %6839 = vst [vmem:[#allocation60_spill] sm:$0xff] %v4002_v32 }
  0x8e   :  { %632 = vmatpush.msrb.mxu1 %v3995_v23  ;;  %v4019_v23 = vld [vmem:[#allocation10 + $0x48] sm:$0xff] }
  0x8f   :  { %690 = vmatpush.msra.mxu0 %v3971_v55  ;;  %v3999_v55 = vld [vmem:[#allocation11 + $0x78] sm:$0xff]  ;;  %6843 = vst [vmem:[#allocation64_spill] sm:$0xff] %v4019_v23 }
  0x90   :  { %343 = vmatmul.f32.gmra.mxu2 %v167_v27  ;;  %6838 = vst [vmem:[#allocation59_spill] sm:$0xff] %v3999_v55  ;;  %633 = vmatpush.msrb.mxu1 %v4007_v21  ;;  %v4032_v21 = vld [vmem:[#allocation10 + $0x30] sm:$0xff] }
  0x91   :  { %691 = vmatpush.msra.mxu0 %v3986_v35  ;;  %v4011_v35 = vld [vmem:[#allocation11 + $0x60] sm:$0xff]  ;;  %6845 = vst [vmem:[#allocation66_spill] sm:$0xff] %v4032_v21 }
  0x92   :  { %6841 = vst [vmem:[#allocation62_spill] sm:$0xff] %v4011_v35  ;;  %634 = vmatpush.msrb.mxu1 %v4019_v23  ;;  %v4047_v23 = vld [vmem:[#allocation10 + $0x140] sm:$0xff] }
  0x93   :  { %692 = vmatpush.msra.mxu0 %v3999_v55  ;;  %v4023_v55 = vld [vmem:[#allocation10 + $0xb8] sm:$0xff] }
  0x94   :  { %635 = vmatpush.msrb.mxu1 %v4032_v21  ;;  %v4056_v21 = vld [vmem:[#allocation11 + $0x18] sm:$0xff] }
  0x95   :  { %693 = vmatpush.msra.mxu0 %v4011_v35  ;;  %v4034_v35 = vld [vmem:[#allocation10 + $0x158] sm:$0xff]  ;;  %6849 = vst [vmem:[#allocation70_spill] sm:$0xff] %v4056_v21 }
  0x96   :  { %643 = vmatpush.msrb.mxu2 %v4034_v35 }
  0x97   :  { %694 = vmatpush.msra.mxu0 %v4028_v10  ;;  %v4045_v10 = vld [vmem:[#allocation10 + $0x18] sm:$0xff] }
  0x98   :  { %6847 = vst [vmem:[#allocation68_spill] sm:$0xff] %v4045_v10  ;;  %636 = vmatpush.msrb.mxu1 %v4045_v10  ;;  %644 = vmatpush.msrb.mxu2 %v4047_v23  ;;  %v4084_v10 = vld [vmem:[#allocation10 + $0xf8] sm:$0xff] }
  0x99   :  { %6856 = vst [vmem:[#allocation77_spill] sm:$0xff] %v4084_v10 }
  0x9a   :  { %645 = vmatpush.msrb.mxu2 %v4062_v57  ;;  %v4086_v57 = vld [vmem:[#allocation10 + $0x40] sm:$0xff] }
  0xc1   :  { %v241_v27 = vpop.f32.mrf.mxu0 }
  0xc2   :  { %v242_v2 = vadd.f32 %v241_v27, %v4014_v47 }
  0xc8   :  { %v532_v38 = vpop.f32.mrf.mxu3 }
  0xc9   :  { %v3992_v58 = vpop.f32.mrf.mxu0  ;;  %v533_v14 = vadd.f32 %v532_v38, %v4002_v32  ;;  %v4041_v38 = vld [vmem:[#allocation11 + $0x30] sm:$0xff] }
  0xca   :  { %6836 = vst [vmem:[#allocation57_spill] sm:$0xff] %v3992_v58  ;;  %v4009_v58 = vld [vmem:[#allocation10 + $0xd0] sm:$0xff]  ;;  %695 = vmatpush.msra.mxu0 %v4041_v38 }
  0xcb   :  { %669 = vmatpush.msra.mxu3 %v4009_v58  ;;  %6846 = vst [vmem:[#allocation67_spill] sm:$0xff] %v4041_v38  ;;  %v575_v61 = vadd.f32 %v533_v14, %v242_v2  ;;  %v4060_v38 = vld [vmem:[#allocation10] sm:$0xff]  ;;  %v4074_v14 = vld [vmem:[#allocation10 + $0x110] sm:$0xff] }
  0xcc   :  { %696 = vmatpush.msra.mxu0 %v4056_v21  ;;  %6850 = vst [vmem:[#allocation71_spill] sm:$0xff] %v4060_v38  ;;  %637 = vmatpush.msrb.mxu1 %v4060_v38  ;;  %v4068_v2 = vld [vmem:[#allocation11] sm:$0xff]  ;;  %v4080_v38 = vld [vmem:[#allocation11 + $0x158] sm:$0xff] }
  0xcd   :  { %670 = vmatpush.msra.mxu3 %v4023_v55  ;;  %6852 = vst [vmem:[#allocation73_spill] sm:$0xff] %v4068_v2  ;;  %v2769_v21 = vmul.f32 -1.442695, %v575_v61  ;;  %646 = vmatpush.msrb.mxu2 %v4074_v14 }
  0xce   :  { %697 = vmatpush.msra.mxu0 %v4068_v2  ;;  %6854 = vst [vmem:[#allocation75_spill] sm:$0xff] %v4074_v14  ;;  %v4090_v2 = vld [vmem:[#allocation11 + $0x140] sm:$0xff] }
  0xcf   :  { %671 = vmatpush.msra.mxu3 %v4036_v59  ;;  %6855 = vst [vmem:[#allocation76_spill] sm:$0xff] %v4080_v38  ;;  %647 = vmatpush.msrb.mxu2 %v4084_v10  ;;  %2816 = vpow2.f32 %v2769_v21  ;;  %v4109_v10 = vld [vmem:[#allocation10 + $0x10] sm:$0xff] }
  0xd0   :  { %809 = vmatpush.msrb.mxu0 %v3795_v43  ;;  %6857 = vst [vmem:[#allocation78_spill] sm:$0xff] %v4090_v2  ;;  %v4094_v43 = vld [vmem:[#allocation10 + $0xe0] sm:$0xff]  ;;  %v4113_v21 = vld [vmem:[#allocation11 + $0x110] sm:$0xff] }
  0xd1   :  { %v247_v32 = vpop.f32.mrf.mxu0  ;;  %672 = vmatpush.msra.mxu3 %v4049_v45  ;;  %648 = vmatpush.msrb.mxu2 %v4094_v43  ;;  %6860 = vst [vmem:[#allocation81_spill] sm:$0xff] %v4113_v21 }
  0xd2   :  { %v4052_v27 = vadd.f32 %v247_v32, %v4014_v47  ;;  %v4070_v32 = vld [vmem:[#allocation11 + $0x170] sm:$0xff]  ;;  %810 = vmatpush.msrb.mxu0 %v3802_v48  ;;  %v4103_v48 = vld [vmem:[#allocation11 + $0x128] sm:$0xff] }
  0xd3   :  { %6853 = vst [vmem:[#allocation74_spill] sm:$0xff] %v4070_v32  ;;  %673 = vmatpush.msra.mxu3 %v4064_v36  ;;  %702 = vmatpush.msra.mxu1 %v4070_v32  ;;  %v4096_v32 = vld [vmem:[#allocation10 + $0x28] sm:$0xff] }
  0xd4   :  { %6848 = vst [vmem:[#allocation69_spill] sm:$0xff] %v4052_v27  ;;  %v4076_v27 = vld [vmem:[#allocation10 + $0x58] sm:$0xff]  ;;  %811 = vmatpush.msrb.mxu0 %v3808_v52  ;;  %v4117_v52 = vld [vmem:[#allocation10 + $0xb0] sm:$0xff] }
  0xd5   :  { %674 = vmatpush.msra.mxu3 %v4076_v27  ;;  %703 = vmatpush.msra.mxu1 %v4080_v38  ;;  %6859 = vst [vmem:[#allocation80_spill] sm:$0xff] %v4103_v48  ;;  %v4107_v38 = vld [vmem:[#allocation10 + $0xc8] sm:$0xff] }
  0xd6   :  { %812 = vmatpush.msrb.mxu0 %v3814_v56  ;;  %649 = vmatpush.msrb.mxu2 %v4107_v38  ;;  %6861 = vst [vmem:[#allocation82_spill] sm:$0xff] %v4117_v52  ;;  %v2817_v56 = vpop.eup %2816 }
  0xd7   :  { %675 = vmatpush.msra.mxu3 %v4086_v57  ;;  %704 = vmatpush.msra.mxu1 %v4090_v2 }
  0xd8   :  { %813 = vmatpush.msrb.mxu0 %v3822_v60  ;;  %650 = vmatpush.msrb.mxu2 %v4117_v52  ;;  %v282_v52 = vpop.f32.mrf.mxu1 }
  0xd9   :  { %v250_v61 = vpop.f32.mrf.mxu0  ;;  %676 = vmatpush.msra.mxu3 %v4096_v32  ;;  %705 = vmatpush.msra.mxu1 %v4103_v48  ;;  %v4129_v48 = vld [vmem:[#allocation11 + $0xe0] sm:$0xff] }
  0xda   :  { %v4099_v14 = vadd.f32 %v250_v61, %v4014_v47  ;;  %v4121_v61 = vld [vmem:[#allocation11 + $0xf8] sm:$0xff]  ;;  %814 = vmatpush.msrb.mxu0 %v3829_v0  ;;  %v4149_v0 = vld [vmem:[#allocation10 + $0x68] sm:$0xff] }
  0xdb   :  { %677 = vmatpush.msra.mxu3 %v4109_v10  ;;  %706 = vmatpush.msra.mxu1 %v4113_v21  ;;  %6862 = vst [vmem:[#allocation83_spill] sm:$0xff] %v4121_v61  ;;  %v4139_v21 = vperm.slane %v3988_v30, 1 }
  0xdc   :  { %6858 = vst [vmem:[#allocation79_spill] sm:$0xff] %v4099_v14  ;;  %v4125_v14 = vld [vmem:[#allocation10 + $0x98] sm:$0xff]  ;;  %815 = vmatpush.msrb.mxu0 %v3835_v8 }
  0xdd   :  { %789 = vmatpush.msrb.mxu3 %v3746_v1  ;;  %707 = vmatpush.msra.mxu1 %v4121_v61  ;;  %v4133_v1 = vld [vmem:[#allocation10 + $0x80] sm:$0xff]  ;;  %6864 = vst [vmem:[#allocation85_spill] sm:$0xff] %v4139_v21  ;;  %v4145_v61 = vadd.f32 1.0, %v2817_v56  ;;  %v283_v8 = vadd.f32 %v282_v52, %v4139_v21  ;;  %v4165_v56 = vld [vmem:[#allocation11 + $0x98] sm:$0xff] }
  0xde   :  { %651 = vmatpush.msrb.mxu2 %v4125_v14  ;;  %816 = vmatpush.msrb.mxu0 %v3841_v16  ;;  %v4175_v52 = vld [vmem:[#allocation11 + $0x80] sm:$0xff] }
  0xdf   :  { %790 = vmatpush.msrb.mxu3 %v3749_v3  ;;  %708 = vmatpush.msra.mxu1 %v4129_v48  ;;  %v4143_v3 = vld [vmem:[#allocation11 + $0xc8] sm:$0xff]  ;;  %2818 = vrcp.f32 %v4145_v61  ;;  %v4179_v21 = vld [vmem:[#allocation10 + $0x20] sm:$0xff]  ;;  %vm585_vm1 = vweird.f32 %v4145_v61 }
  0xe0   :  { %6865 = vst [vmem:[#allocation86_spill] sm:$0xff] %v4143_v3  ;;  %652 = vmatpush.msrb.mxu2 %v4133_v1  ;;  %817 = vmatpush.msrb.mxu0 %v3849_v20 }
  0xe1   :  { %v253_v2 = vpop.f32.mrf.mxu0  ;;  %791 = vmatpush.msrb.mxu3 %v3751_v5  ;;  %709 = vmatpush.msra.mxu1 %v4143_v3  ;;  %v4160_v5 = vld [vmem:[#allocation10 + $0x50] sm:$0xff] }
  0xe2   :  { %v4136_v60 = vadd.f32 %v253_v2, %v4014_v47  ;;  %v4152_v2 = vperm.slane %v3977_v50, 1  ;;  %653 = vmatpush.msrb.mxu2 %v4149_v0  ;;  %818 = vmatpush.msrb.mxu0 %v3856_v24 }
  0xe3   :  { %792 = vmatpush.msrb.mxu3 %v3754_v7  ;;  %v4170_v7 = vld [vmem:[#allocation10 + $0x38] sm:$0xff] }
  0xe4   :  { %6863 = vst [vmem:[#allocation84_spill] sm:$0xff] %v4136_v60  ;;  %v4156_v60 = vld [vmem:[#allocation11 + $0xb0] sm:$0xff]  ;;  %654 = vmatpush.msrb.mxu2 %v4160_v5  ;;  %819 = vmatpush.msrb.mxu0 %v3863_v29  ;;  %v4204_v29 = vld [vmem:[#allocation11 + $0x38] sm:$0xff] }
  0xe5   :  { %6866 = vst [vmem:[#allocation87_spill] sm:$0xff] %v4152_v2  ;;  %710 = vmatpush.msra.mxu1 %v4156_v60  ;;  %793 = vmatpush.msrb.mxu3 %v3757_v9 }
  0xe6   :  { %6867 = vst [vmem:[#allocation88_spill] sm:$0xff] %v4156_v60  ;;  %655 = vmatpush.msrb.mxu2 %v4170_v7  ;;  %820 = vmatpush.msrb.mxu0 %v3869_v33  ;;  %v4214_v33 = vld [vmem:[#allocation11 + $0x20] sm:$0xff] }
  0xe7   :  { %711 = vmatpush.msra.mxu1 %v4165_v56  ;;  %794 = vmatpush.msrb.mxu3 %v3760_v11  ;;  %v4190_v11 = vld [vmem:[#allocation10 + $0x8] sm:$0xff]  ;;  %6871 = vst [vmem:[#allocation91_spill] sm:$0xff] %v4204_v29 }
  0xe8   :  { %v552_v3 = vpop.f32.mrf.mxu3  ;;  %656 = vmatpush.msrb.mxu2 %v4179_v21  ;;  %821 = vmatpush.msrb.mxu0 %v3875_v39  ;;  %v4227_v39 = vld [vmem:[#allocation11 + $0x130] sm:$0xff] }
  0xe9   :  { %v553_v16 = vadd.f32 %v552_v3, %v4152_v2  ;;  %v256_v9 = vpop.f32.mrf.mxu0  ;;  %712 = vmatpush.msra.mxu1 %v4175_v52  ;;  %795 = vmatpush.msrb.mxu3 %v3763_v13  ;;  %v4186_v3 = vld [vmem:[#allocation11 + $0x68] sm:$0xff]  ;;  %v6870_v13 = vmov 0.0  }
  0xea   :  { %v4182_v60 = vadd.f32 %v256_v9, %v4014_v47  ;;  %v4198_v9 = vpop.eup %2818  ;;  %657 = vmatpush.msrb.mxu2 %v4190_v11  ;;  %698 = vmatmul.f32.vlgmr.msra.gmra.mxu0 %v6870_v13  ;;  %v4220_v2 = vld [vmem:[#allocation11 + $0x8] sm:$0xff] }
  0xeb   :  { %v595_v20 = vadd.f32 %v553_v16, %v283_v8  ;;  %713 = vmatpush.msra.mxu1 %v4186_v3  ;;  %796 = vmatpush.msrb.mxu3 %v3766_v15  ;;  %v4194_v8 = vld [vmem:[#allocation11 + $0x50] sm:$0xff]  ;;  %v4196_v16 = vld [vmem:[#allocation11 + $0x178] sm:$0xff]  ;;  %v581_v15 = vmul.f32 %v4198_v9, %v4145_v61  ;;  %6872 = vst [vmem:[#allocation92_spill] sm:$0xff] %v4220_v2  ;;  %vm586_vm0 = vweird.f32 %v4198_v9 }
  0xec   :  { %6868 = vst [vmem:[#allocation89_spill] sm:$0xff] %v4182_v60  ;;  %722 = vmatpush.msra.mxu2 %v4196_v16  ;;  %822 = vmatpush.msrb.mxu0 %v3881_v46  ;;  %vm4277_vm2 = vmor %vm585_vm1, %vm586_vm0 }
  0xed   :  { %v2770_v24 = vmul.f32 -1.442695, %v595_v20  ;;  %6869 = vst [vmem:[#allocation90_spill] sm:$0xff] %v4194_v8  ;;  %714 = vmatpush.msra.mxu1 %v4194_v8  ;;  %v4206_v20 = vld [vmem:[#allocation11 + $0x160] sm:$0xff]  ;;  %797 = vmatpush.msrb.mxu3 %v3769_v19  ;;  %v582_v8 = vsub.f32 1.0, %v581_v15 }
  0xee   :  { %723 = vmatpush.msra.mxu2 %v4206_v20  ;;  %823 = vmatpush.msrb.mxu0 %v3887_v54 }
  0xef   :  { %2820 = vpow2.f32 %v2770_v24  ;;  %715 = vmatpush.msra.mxu1 %v4204_v29  ;;  %v4216_v24 = vld [vmem:[#allocation11 + $0x148] sm:$0xff]  ;;  %798 = vmatpush.msrb.mxu3 %v3772_v22  ;;  %v583_v15 = vmul.f32 %v4198_v9, %v582_v8  ;;  %v591_v8 = vand.u32 2147483648, %v4145_v61 }
  0xf0   :  { %724 = vmatpush.msra.mxu2 %v4216_v24  ;;  %824 = vmatpush.msrb.mxu0 %v3894_v62 }
  0xf1   :  { %v259_v60 = vpop.f32.mrf.mxu0  ;;  %716 = vmatpush.msra.mxu1 %v4214_v33  ;;  %799 = vmatpush.msrb.mxu3 %v3775_v25  ;;  %v4243_v25 = vld [vmem:[#allocation11 + $0x100] sm:$0xff] }
  0xf2   :  { %v4223_v19 = vadd.f32 %v259_v60, %v4014_v47  ;;  %725 = vmatpush.msra.mxu2 %v4227_v39  ;;  %v4237_v60 = vld [vmem:[#allocation11 + $0x118] sm:$0xff]  ;;  %936 = vmatpush.msra.mxu0 %v3932_v4  ;;  %v584_v4 = vadd.f32 %v4198_v9, %v583_v15  ;;  %v589_v15 = vand.u32 2147483647, %v4145_v61  ;;  %v592_v61 = vor.u32 1.1754944e-38, %v591_v8 }
  0xf3   :  { %717 = vmatpush.msra.mxu1 %v4220_v2  ;;  %800 = vmatpush.msrb.mxu3 %v3778_v28  ;;  %v4249_v28 = vld [vmem:[#allocation11 + $0xe8] sm:$0xff] }
  0xf4   :  { %6873 = vst [vmem:[#allocation93_spill] sm:$0xff] %v4223_v19  ;;  %726 = vmatpush.msra.mxu2 %v4237_v60  ;;  %937 = vmatpush.msra.mxu0 %v3938_v12  ;;  %v4266_v12 = vld [vmem:[#allocation11 + $0xb8] sm:$0xff]  ;;  %vm590_vm3 = vcmp.eq.f32.partialorder %v589_v15, 8.507059e+37  ;;  %v4306_v15 = vld [vmem:[#allocation11 + $0x40] sm:$0xff] }
  0xf5   :  { %v2821_v29 = vpop.eup %2820  ;;  %801 = vmatpush.msrb.mxu3 %v3781_v31  ;;  %v4257_v31 = vld [vmem:[#allocation11 + $0xd0] sm:$0xff]  ;;  %6879 = vst [vmem:[#allocation97_spill] sm:$0xff] %v4306_v15 }
  0xf6   :  { %v4233_v22 = vadd.f32 1.0, %v2821_v29  ;;  %727 = vmatpush.msra.mxu2 %v4243_v25  ;;  %938 = vmatpush.msra.mxu0 %v3952_v51  ;;  %v4274_v51 = vperm.slane %v3988_v30, 2 }
  0xf7   :  { %802 = vmatpush.msrb.mxu3 %v3784_v34 }
  0xf8   :  { %2822 = vrcp.f32 %v4233_v22  ;;  %728 = vmatpush.msra.mxu2 %v4249_v28  ;;  %939 = vmatpush.msra.mxu0 %v3960_v6  ;;  %v4289_v6 = vld [vmem:[#allocation11 + $0x88] sm:$0xff]  ;;  %vm605_vm4 = vweird.f32 %v4233_v22 }
  0xf9   :  { %v262_v29 = vpop.f32.mrf.mxu0  ;;  %803 = vmatpush.msrb.mxu3 %v3787_v37 }
  0xfa   :  { %v4252_v19 = vadd.f32 %v262_v29, %v4014_v47  ;;  %729 = vmatpush.msra.mxu2 %v4257_v31  ;;  %v4270_v29 = vperm.slane %v3977_v50, 2  ;;  %v323_v47 = vpop.f32.mrf.mxu2  ;;  %v588_v50 = vsel %vm4277_vm2, %v4198_v9, %v584_v4  ;;  %940 = vmatpush.msra.mxu0 %v3967_v63  ;;  %v4296_v63 = vld [vmem:[#allocation11 + $0x70] sm:$0xff]  ;;  %v611_v9 = vand.u32 2147483648, %v4233_v22 }
  0xfb   :  { %804 = vmatpush.msrb.mxu3 %v3790_v40  ;;  %v4282_v40 = vld [vmem:[#allocation11 + $0xa0] sm:$0xff]  ;;  %v324_v2 = vadd.f32 %v323_v47, %v4274_v51  ;;  %6877 = vst [vmem:[#allocation95_spill] sm:$0xff] %v4296_v63  ;;  %v4302_v47 = vld [vmem:[#allocation11 + $0x58] sm:$0xff] }
  0xfc   :  { %6874 = vst [vmem:[#allocation94_spill] sm:$0xff] %v4252_v19  ;;  %730 = vmatpush.msra.mxu2 %v4266_v12  ;;  %941 = vmatpush.msra.mxu0 %v3984_v42  ;;  %v593_v19 = vsel %vm590_vm3, %v592_v61, %v588_v50  ;;  %v612_v50 = vor.u32 1.1754944e-38, %v611_v9  ;;  %v4366_v61 = vld [vmem:[#allocation7 + $0x108] sm:$0xff]  ;;  %v6896_v9 = vld [vmem:[#allocation51_spill] sm:$0xff] }
  0xfd   :  { %6878 = vst [vmem:[#allocation96_spill] sm:$0xff] %v4302_v47 }
  0xfe   :  { %v2823_v34 = vpop.eup %2822  ;;  %731 = vmatpush.msra.mxu2 %v4282_v40  ;;  %942 = vmatpush.msra.mxu0 %v3997_v26  ;;  %v4310_v26 = vld [vmem:[#allocation11 + $0x28] sm:$0xff] }
  0xff   :  { %v601_v37 = vmul.f32 %v2823_v34, %v4233_v22  ;;  %vm606_vm5 = vweird.f32 %v2823_v34  ;;  %6880 = vst [vmem:[#allocation98_spill] sm:$0xff] %v4310_v26 }
 0x100   :  { %732 = vmatpush.msra.mxu2 %v4289_v6  ;;  %vm607_vm6 = vmor %vm605_vm4, %vm606_vm5  ;;  %943 = vmatpush.msra.mxu0 %v4009_v58 }
 0x101   :  { %v602_v62 = vsub.f32 1.0, %v601_v37  ;;  %v572_v30 = vpop.f32.mrf.mxu0 }
 0x102   :  { %v573_v46 = vadd.f32 %v572_v30, %v4270_v29  ;;  %733 = vmatpush.msra.mxu2 %v4296_v63  ;;  %944 = vmatpush.msra.mxu0 %v4023_v55  ;;  %v6894_v30 = vld [vmem:[#allocation49_spill] sm:$0xff] }
 0x103   :  { %v603_v54 = vmul.f32 %v2823_v34, %v602_v62  ;;  %v609_v62 = vand.u32 2147483647, %v4233_v22 }
 0x104   :  { %v615_v4 = vmul.f32 %v593_v19, %v573_v46  ;;  %734 = vmatpush.msra.mxu2 %v4302_v47  ;;  %945 = vmatpush.msra.mxu0 %v4036_v59  ;;  %v6890_v59 = vld [vmem:[#allocation26_spill] sm:$0xff]  ;;  %v6895_v19 = vld [vmem:[#allocation28_spill] sm:$0xff] }
 0x105   :  { %v604_v8 = vadd.f32 %v2823_v34, %v603_v54  ;;  %vm610_vm7 = vcmp.eq.f32.partialorder %v609_v62, 8.507059e+37  ;;  %v4314_v54 = vld [vmem:[#allocation11 + $0x10] sm:$0xff]  ;;  %v6898_v62 = vld [vmem:[#allocation53_spill] sm:$0xff] }
 0x106   :  { %v616_v42 = vadd.f32 %v615_v4, %v324_v2  ;;  %735 = vmatpush.msra.mxu2 %v4306_v15  ;;  %6881 = vst [vmem:[#allocation99_spill] sm:$0xff] %v4314_v54  ;;  %946 = vmatpush.msra.mxu0 %v4049_v45  ;;  %v4354_v45 = vld [vmem:[#allocation7 + $0x138] sm:$0xff]  ;;  %v4372_v4 = vld [vmem:[#allocation7 + $0xf0] sm:$0xff] }
 0x107   :  { %v608_v37 = vsel %vm607_vm6, %v2823_v34, %v604_v8  ;;  %v6897_v8 = vld [vmem:[#allocation29_spill] sm:$0xff] }
 0x108   :  { %2824 = vtanh.f32 %v616_v42  ;;  %v613_v46 = vsel %vm610_vm7, %v612_v50, %v608_v37  ;;  %736 = vmatpush.msra.mxu2 %v4310_v26  ;;  %947 = vmatpush.msra.mxu0 %v4064_v36  ;;  %v6889_v36 = vld [vmem:[#allocation75_spill] sm:$0xff]  ;;  %v6899_v42 = vld [vmem:[#allocation82_spill] sm:$0xff] }
 0x109   :  { %v618_v58 = vsub.f32 1.0, %v613_v46  ;;  %v620_v22 = vmul.f32 0.0, %v613_v46  ;;  %v6900_v37 = vld [vmem:[#allocation30_spill] sm:$0xff]  ;;  %v6901_v50 = vld [vmem:[#allocation55_spill] sm:$0xff]  ;;  %v4384_v46 = vld [vmem:[#allocation7 + $0xc0] sm:$0xff] }
 0x10a   :  { %737 = vmatpush.msra.mxu2 %v4314_v54  ;;  %948 = vmatpush.msra.mxu0 %v4076_v27  ;;  %v6892_v27 = vld [vmem:[#allocation77_spill] sm:$0xff] }
 0x10c   :  { %949 = vmatpush.msra.mxu0 %v4086_v57  ;;  %v6882_v57 = vld [vmem:[#allocation41_spill] sm:$0xff] }
 0x10e   :  { %v2825_v2 = vpop.eup %2824  ;;  %950 = vmatpush.msra.mxu0 %v4096_v32  ;;  %v4360_v32 = vld [vmem:[#allocation7 + $0x120] sm:$0xff] }
 0x10f   :  { %v619_v55 = vmul.f32 %v2825_v2, %v618_v58  ;;  %v6902_v58 = vld [vmem:[#allocation31_spill] sm:$0xff]  ;;  %v6903_v2 = vld [vmem:[#allocation58_spill] sm:$0xff] }
 0x110   :  { %951 = vmatpush.msra.mxu0 %v4109_v10  ;;  %v6885_v10 = vld [vmem:[#allocation43_spill] sm:$0xff] }
 0x111   :  { %v4320_v34 = vadd.f32 %v620_v22, %v619_v55  ;;  %v4390_v55 = vld [vmem:[#allocation7 + $0xa8] sm:$0xff]  ;;  %v6904_v22 = vld [vmem:[#allocation32_spill] sm:$0xff] }
 0x113   :  { %638 = vmatmul.f32.vlgmr.msrb.gmra.mxu1 %v4320_v34  ;;  %658 = vmatmul.f32.vlgmr.msrb.gmra.mxu2 %v4320_v34 }
 0x114   :  { %678 = vmatmul.f32.vlgmr.msra.gmra.mxu3 %v4320_v34  ;;  %825 = vmatmul.f32.vlgmr.msrb.gmra.mxu0 %v4320_v34 }
 0x115   :  { %829 = vmatpush.msrb.mxu1 %v3797_v44  ;;  %896 = vmatpush.msrb.mxu2 %v3908_v41  ;;  %v4338_v44 = vld [vmem:[#allocation7 + $0x168] sm:$0xff]  ;;  %v6887_v41 = vld [vmem:[#allocation25_spill] sm:$0xff] }
 0x116   :  { %916 = vmatpush.msra.mxu3 %v4021_v17  ;;  %1063 = vmatpush.msrb.mxu0 %v4338_v44  ;;  %v6883_v17 = vld [vmem:[#allocation23_spill] sm:$0xff] }
 0x117   :  { %830 = vmatpush.msrb.mxu1 %v3804_v49  ;;  %897 = vmatpush.msrb.mxu2 %v3914_v18  ;;  %v6884_v49 = vld [vmem:[#allocation24_spill] sm:$0xff]  ;;  %v6888_v18 = vld [vmem:[#allocation45_spill] sm:$0xff] }
 0x118   :  { %917 = vmatpush.msra.mxu3 %v4034_v35  ;;  %v4348_v35 = vld [vmem:[#allocation7 + $0x150] sm:$0xff] }
 0x119   :  { %831 = vmatpush.msrb.mxu1 %v3810_v53  ;;  %898 = vmatpush.msrb.mxu2 %v6882_v57  ;;  %v6886_v53 = vld [vmem:[#allocation72_spill] sm:$0xff]  ;;  %v6905_v57 = vld [vmem:[#allocation61_spill] sm:$0xff] }
 0x11a   :  { %918 = vmatpush.msra.mxu3 %v4047_v23  ;;  %1064 = vmatpush.msrb.mxu0 %v4348_v35  ;;  %v6891_v23 = vld [vmem:[#allocation47_spill] sm:$0xff] }
 0x11b   :  { %832 = vmatpush.msrb.mxu1 %v6883_v17  ;;  %738 = vmatmul.f32.vlgmr.msra.gmra.mxu2 %v6870_v13  ;;  %v4396_v17 = vld [vmem:[#allocation7 + $0x90] sm:$0xff] }
 0x11c   :  { %718 = vmatmul.f32.vlgmr.msra.gmra.mxu1 %v6870_v13  ;;  %805 = vmatmul.f32.vlgmr.msrb.gmra.mxu3 %v4320_v34  ;;  %v6893_v13 = vld [vmem:[#allocation27_spill] sm:$0xff] }
 0x11d   :  { %833 = vmatpush.msrb.mxu1 %v6884_v49  ;;  %899 = vmatpush.msrb.mxu2 %v6885_v10  ;;  %v6906_v49 = vld [vmem:[#allocation34_spill] sm:$0xff]  ;;  %v6907_v10 = vld [vmem:[#allocation64_spill] sm:$0xff] }
 0x11e   :  { %919 = vmatpush.msra.mxu3 %v6886_v53  ;;  %1065 = vmatpush.msrb.mxu0 %v4354_v45  ;;  %v4402_v53 = vld [vmem:[#allocation7 + $0x78] sm:$0xff] }
 0x11f   :  { %834 = vmatpush.msrb.mxu1 %v6887_v41  ;;  %900 = vmatpush.msrb.mxu2 %v6888_v18  ;;  %v6908_v41 = vld [vmem:[#allocation36_spill] sm:$0xff]  ;;  %v6909_v18 = vld [vmem:[#allocation66_spill] sm:$0xff] }
 0x120   :  { %920 = vmatpush.msra.mxu3 %v6889_v36  ;;  %1066 = vmatpush.msrb.mxu0 %v4360_v32  ;;  %v4408_v36 = vld [vmem:[#allocation7 + $0x60] sm:$0xff] }
 0x121   :  { %835 = vmatpush.msrb.mxu1 %v6890_v59  ;;  %901 = vmatpush.msrb.mxu2 %v6891_v23  ;;  %v6910_v59 = vld [vmem:[#allocation38_spill] sm:$0xff]  ;;  %v6911_v23 = vld [vmem:[#allocation68_spill] sm:$0xff] }
 0x122   :  { %921 = vmatpush.msra.mxu3 %v6892_v27  ;;  %1067 = vmatpush.msrb.mxu0 %v4366_v61  ;;  %v6912_v27 = vld [vmem:[#allocation39_spill] sm:$0xff] }
 0x123   :  { %836 = vmatpush.msrb.mxu1 %v6893_v13  ;;  %902 = vmatpush.msrb.mxu2 %v6894_v30  ;;  %v6913_v13 = vld [vmem:[#allocation71_spill] sm:$0xff]  ;;  %v6914_v30 = vld [vmem:[#allocation74_spill] sm:$0xff] }
 0x124   :  { %922 = vmatpush.msra.mxu3 %v4094_v43  ;;  %1068 = vmatpush.msrb.mxu0 %v4372_v4  ;;  %v4378_v43 = vld [vmem:[#allocation7 + $0xd8] sm:$0xff] }
 0x125   :  { %837 = vmatpush.msrb.mxu1 %v6895_v19  ;;  %903 = vmatpush.msrb.mxu2 %v6896_v9  ;;  %v6915_v19 = vld [vmem:[#allocation40_spill] sm:$0xff] }
 0x126   :  { %923 = vmatpush.msra.mxu3 %v4107_v38  ;;  %1069 = vmatpush.msrb.mxu0 %v4378_v43  ;;  %v6916_v9 = vld [vmem:[#allocation76_spill] sm:$0xff] }
 0x127   :  { %838 = vmatpush.msrb.mxu1 %v6897_v8  ;;  %904 = vmatpush.msrb.mxu2 %v6898_v62  ;;  %v4422_v8 = vld [vmem:[#allocation7 + $0x48] sm:$0xff] }
 0x128   :  { %924 = vmatpush.msra.mxu3 %v6899_v42  ;;  %1070 = vmatpush.msrb.mxu0 %v4384_v46  ;;  %v6917_v62 = vld [vmem:[#allocation42_spill] sm:$0xff] }
 0x129   :  { %839 = vmatpush.msrb.mxu1 %v6900_v37  ;;  %905 = vmatpush.msrb.mxu2 %v6901_v50  ;;  %v6918_v37 = vld [vmem:[#allocation78_spill] sm:$0xff]  ;;  %v4428_v50 = vld [vmem:[#allocation7 + $0x30] sm:$0xff] }
 0x12a   :  { %925 = vmatpush.msra.mxu3 %v4125_v14  ;;  %1071 = vmatpush.msrb.mxu0 %v4390_v55 }
 0x12b   :  { %840 = vmatpush.msrb.mxu1 %v6902_v58  ;;  %906 = vmatpush.msrb.mxu2 %v6903_v2  ;;  %v6919_v58 = vld [vmem:[#allocation44_spill] sm:$0xff] }
 0x12c   :  { %926 = vmatpush.msra.mxu3 %v4133_v1  ;;  %1072 = vmatpush.msrb.mxu0 %v4396_v17  ;;  %v6920_v2 = vld [vmem:[#allocation80_spill] sm:$0xff] }
 0x12d   :  { %841 = vmatpush.msrb.mxu1 %v6904_v22  ;;  %907 = vmatpush.msrb.mxu2 %v6905_v57  ;;  %v4434_v22 = vld [vmem:[#allocation7 + $0x18] sm:$0xff]  ;;  %v6921_v57 = vld [vmem:[#allocation46_spill] sm:$0xff] }
 0x12e   :  { %927 = vmatpush.msra.mxu3 %v4149_v0  ;;  %1073 = vmatpush.msrb.mxu0 %v4402_v53 }
 0x12f   :  { %842 = vmatpush.msrb.mxu1 %v6906_v49  ;;  %908 = vmatpush.msrb.mxu2 %v6907_v10  ;;  %v6922_v49 = vld [vmem:[#allocation81_spill] sm:$0xff] }
 0x130   :  { %928 = vmatpush.msra.mxu3 %v4160_v5  ;;  %1074 = vmatpush.msrb.mxu0 %v4408_v36  ;;  %v4440_v10 = vld [vmem:[#allocation7] sm:$0xff] }
 0x131   :  { %843 = vmatpush.msrb.mxu1 %v6908_v41  ;;  %909 = vmatpush.msrb.mxu2 %v6909_v18  ;;  %6923 = vst [vmem:[#allocation41_spill] sm:$0xff] %v4440_v10  ;;  %v6924_v41 = vld [vmem:[#allocation48_spill] sm:$0xff]  ;;  %v6925_v18 = vld [vmem:[#allocation83_spill] sm:$0xff] }
 0x132   :  { %929 = vmatpush.msra.mxu3 %v4170_v7  ;;  %1075 = vmatpush.msrb.mxu0 %v4422_v8 }
 0x133   :  { %844 = vmatpush.msrb.mxu1 %v6910_v59  ;;  %910 = vmatpush.msrb.mxu2 %v6911_v23  ;;  %v6926_v59 = vld [vmem:[#allocation50_spill] sm:$0xff]  ;;  %v6927_v23 = vld [vmem:[#allocation52_spill] sm:$0xff] }
 0x134   :  { %845 = vmatmul.f32.vlgmr.msrb.gmra.mxu1 %v4320_v34  ;;  %930 = vmatpush.msra.mxu3 %v4179_v21 }
 0x135   :  { %956 = vmatpush.msra.mxu1 %v6912_v27  ;;  %911 = vmatpush.msrb.mxu2 %v6913_v13  ;;  %v6928_v27 = vld [vmem:[#allocation86_spill] sm:$0xff] }
 0x136   :  { %931 = vmatpush.msra.mxu3 %v4190_v11  ;;  %1076 = vmatpush.msrb.mxu0 %v4428_v50  ;;  %v6929_v13 = vld [vmem:[#allocation54_spill] sm:$0xff] }
 0x137   :  { %976 = vmatpush.msra.mxu2 %v6914_v30  ;;  %957 = vmatpush.msra.mxu1 %v6915_v19  ;;  %v6930_v30 = vld [vmem:[#allocation88_spill] sm:$0xff] }
 0x138   :  { %996 = vmatpush.msrb.mxu3 %v4196_v16  ;;  %1077 = vmatpush.msrb.mxu0 %v4434_v22  ;;  %v6931_v19 = vld [vmem:[#allocation56_spill] sm:$0xff] }
 0x139   :  { %977 = vmatpush.msra.mxu2 %v6916_v9  ;;  %958 = vmatpush.msra.mxu1 %v6917_v62  ;;  %v6932_v9 = vld [vmem:[#allocation59_spill] sm:$0xff]  ;;  %v6933_v62 = vld [vmem:[#allocation62_spill] sm:$0xff] }
 0x13a   :  { %997 = vmatpush.msrb.mxu3 %v4206_v20  ;;  %1078 = vmatpush.msrb.mxu0 %v4440_v10 }
 0x13b   :  { %978 = vmatpush.msra.mxu2 %v6918_v37  ;;  %959 = vmatpush.msra.mxu1 %v6919_v58  ;;  %v6934_v37 = vld [vmem:[#allocation65_spill] sm:$0xff]  ;;  %v6935_v58 = vld [vmem:[#allocation90_spill] sm:$0xff] }
 0x13c   :  { %998 = vmatpush.msrb.mxu3 %v4216_v24 }
 0x13d   :  { %979 = vmatpush.msra.mxu2 %v6920_v2  ;;  %960 = vmatpush.msra.mxu1 %v6921_v57  ;;  %v6937_v2 = vld [vmem:[#allocation91_spill] sm:$0xff]  ;;  %v4472_v57 = vpop.f32.mrf.mxu2 }
 0x13e   :  { %999 = vmatpush.msrb.mxu3 %v4227_v39 }
 0x13f   :  { %980 = vmatpush.msra.mxu2 %v6922_v49  ;;  %961 = vmatpush.msra.mxu1 %v6924_v41  ;;  %v4481_v41 = vld [vmem:[#allocation7 + $0x170] sm:$0xff] }
 0x140   :  { %1000 = vmatpush.msrb.mxu3 %v4237_v60  ;;  %6941 = vst [vmem:[#allocation24_spill] sm:$0xff] %v4481_v41 }
 0x141   :  { %981 = vmatpush.msra.mxu2 %v6925_v18  ;;  %962 = vmatpush.msra.mxu1 %v6926_v59  ;;  %v6942_v18 = vld [vmem:[#allocation92_spill] sm:$0xff] }
 0x142   :  { %1001 = vmatpush.msrb.mxu3 %v4243_v25  ;;  %v4486_v59 = vld [vmem:[#allocation7 + $0x158] sm:$0xff] }
 0x143   :  { %982 = vmatpush.msra.mxu2 %v4129_v48  ;;  %963 = vmatpush.msra.mxu1 %v6927_v23  ;;  %v4460_v48 = vpop.f32.mrf.mxu1  ;;  %6943 = vst [vmem:[#allocation43_spill] sm:$0xff] %v4486_v59  ;;  %v4489_v23 = vld [vmem:[#allocation7 + $0x140] sm:$0xff] }
 0x144   :  { %1002 = vmatpush.msrb.mxu3 %v4249_v28  ;;  %6944 = vst [vmem:[#allocation72_spill] sm:$0xff] %v4489_v23 }
 0x145   :  { %983 = vmatpush.msra.mxu2 %v6928_v27  ;;  %964 = vmatpush.msra.mxu1 %v6929_v13  ;;  %v4495_v27 = vpop.f32.mrf.mxu2  ;;  %v4497_v13 = vld [vmem:[#allocation7 + $0x110] sm:$0xff] }
 0x146   :  { %1003 = vmatpush.msrb.mxu3 %v4257_v31  ;;  %6946 = vst [vmem:[#allocation45_spill] sm:$0xff] %v4495_v27  ;;  %v6961_v27 = vld [vmem:[#allocation35_spill] sm:$0xff] }
 0x147   :  { %984 = vmatpush.msra.mxu2 %v6930_v30  ;;  %965 = vmatpush.msra.mxu1 %v6931_v19  ;;  %6947 = vst [vmem:[#allocation75_spill] sm:$0xff] %v4497_v13  ;;  %v4502_v19 = vld [vmem:[#allocation7 + $0xf8] sm:$0xff] }
 0x148   :  { %1004 = vmatpush.msrb.mxu3 %v4266_v12  ;;  %6949 = vst [vmem:[#allocation47_spill] sm:$0xff] %v4502_v19 }
 0x149   :  { %985 = vmatpush.msra.mxu2 %v4165_v56  ;;  %966 = vmatpush.msra.mxu1 %v6932_v9  ;;  %v6936_v56 = vld [vmem:[#allocation67_spill] sm:$0xff]  ;;  %v4505_v9 = vld [vmem:[#allocation7 + $0xe0] sm:$0xff] }
 0x14a   :  { %1005 = vmatpush.msrb.mxu3 %v4282_v40  ;;  %6950 = vst [vmem:[#allocation77_spill] sm:$0xff] %v4505_v9 }
 0x14b   :  { %986 = vmatpush.msra.mxu2 %v4175_v52  ;;  %967 = vmatpush.msra.mxu1 %v6933_v62  ;;  %v6938_v52 = vld [vmem:[#allocation70_spill] sm:$0xff]  ;;  %v4479_v49 = vpop.f32.mrf.mxu1 }
 0x14c   :  { %1006 = vmatpush.msrb.mxu3 %v4289_v6  ;;  %6940 = vst [vmem:[#allocation23_spill] sm:$0xff] %v4479_v49  ;;  %v4508_v62 = vld [vmem:[#allocation7 + $0xc8] sm:$0xff] }
 0x14d   :  { %987 = vmatpush.msra.mxu2 %v4186_v3  ;;  %968 = vmatpush.msra.mxu1 %v6934_v37  ;;  %v6939_v3 = vld [vmem:[#allocation73_spill] sm:$0xff]  ;;  %6951 = vst [vmem:[#allocation27_spill] sm:$0xff] %v4508_v62  ;;  %v4511_v37 = vld [vmem:[#allocation7 + $0xb0] sm:$0xff] }
 0x14e   :  { %1007 = vmatpush.msrb.mxu3 %v4296_v63  ;;  %6952 = vst [vmem:[#allocation49_spill] sm:$0xff] %v4511_v37 }
 0x14f   :  { %988 = vmatpush.msra.mxu2 %v6935_v58  ;;  %969 = vmatpush.msra.mxu1 %v6936_v56  ;;  %v4514_v58 = vpop.f32.mrf.mxu2  ;;  %v4516_v56 = vld [vmem:[#allocation7 + $0x98] sm:$0xff] }
 0x150   :  { %1008 = vmatpush.msrb.mxu3 %v4302_v47  ;;  %6953 = vst [vmem:[#allocation28_spill] sm:$0xff] %v4514_v58 }
 0x151   :  { %989 = vmatpush.msra.mxu2 %v6937_v2  ;;  %970 = vmatpush.msra.mxu1 %v6938_v52  ;;  %6954 = vst [vmem:[#allocation51_spill] sm:$0xff] %v4516_v56  ;;  %v4521_v52 = vld [vmem:[#allocation7 + $0x80] sm:$0xff] }
 0x152   :  { %1009 = vmatpush.msrb.mxu3 %v4306_v15  ;;  %6956 = vst [vmem:[#allocation53_spill] sm:$0xff] %v4521_v52 }
 0x153   :  { %990 = vmatpush.msra.mxu2 %v4214_v33  ;;  %971 = vmatpush.msra.mxu1 %v6939_v3  ;;  %v4492_v33 = vld [vmem:[#allocation7 + $0x128] sm:$0xff]  ;;  %v4500_v30 = vpop.f32.mrf.mxu1 }
 0x154   :  { %1010 = vmatpush.msrb.mxu3 %v4310_v26  ;;  %6945 = vst [vmem:[#allocation25_spill] sm:$0xff] %v4492_v33  ;;  %v4524_v3 = vld [vmem:[#allocation7 + $0x68] sm:$0xff] }
 0x155   :  { %1083 = vmatpush.msrb.mxu1 %v4481_v41  ;;  %991 = vmatpush.msra.mxu2 %v6942_v18  ;;  %6948 = vst [vmem:[#allocation26_spill] sm:$0xff] %v4500_v30  ;;  %v4527_v18 = vld [vmem:[#allocation7 + $0x50] sm:$0xff]  ;;  %v6959_v30 = vld [vmem:[#allocation33_spill] sm:$0xff] }
 0x156   :  { %1011 = vmatpush.msrb.mxu3 %v4314_v54  ;;  %6957 = vst [vmem:[#allocation82_spill] sm:$0xff] %v4524_v3 }
 0x157   :  { %1084 = vmatpush.msrb.mxu1 %v4486_v59  ;;  %6958 = vst [vmem:[#allocation30_spill] sm:$0xff] %v4527_v18  ;;  %v4531_v58 = vpop.f32.mrf.mxu2 }
 0x158   :  { %6960 = vst [vmem:[#allocation55_spill] sm:$0xff] %v4531_v58 }
 0x159   :  { %1085 = vmatpush.msrb.mxu1 %v4489_v23 }
 0x15b   :  { %1086 = vmatpush.msrb.mxu1 %v4492_v33  ;;  %v4519_v2 = vpop.f32.mrf.mxu1 }
 0x15c   :  { %6955 = vst [vmem:[#allocation29_spill] sm:$0xff] %v4519_v2  ;;  %v6963_v2 = vld [vmem:[#allocation37_spill] sm:$0xff] }
 0x15d   :  { %1087 = vmatpush.msrb.mxu1 %v4497_v13 }
 0x15f   :  { %1088 = vmatpush.msrb.mxu1 %v4502_v19  ;;  %v6972_v19 = vld [vmem:[#allocation85_spill] sm:$0xff] }
 0x160   :  { %v286_v13 = vadd.f32 %v4460_v48, %v6972_v19  ;;  %v6977_v19 = vld [vmem:[#allocation60_spill] sm:$0xff] }
 0x161   :  { %1089 = vmatpush.msrb.mxu1 %v4505_v9  ;;  %v6971_v9 = vld [vmem:[#allocation87_spill] sm:$0xff] }
 0x163   :  { %1090 = vmatpush.msrb.mxu1 %v4508_v62  ;;  %v4534_v49 = vpop.f32.mrf.mxu1 }
 0x164   :  { %6962 = vst [vmem:[#allocation31_spill] sm:$0xff] %v4534_v49 }
 0x165   :  { %1091 = vmatpush.msrb.mxu1 %v4511_v37 }
 0x167   :  { %1092 = vmatpush.msrb.mxu1 %v4516_v56  ;;  %v4537_v56 = vpop.f32.mrf.mxu2  ;;  %v699_v62 = vpop.f32.mrf.mxu0 }
 0x168   :  { %6964 = vst [vmem:[#allocation58_spill] sm:$0xff] %v4537_v56 }
 0x169   :  { %1093 = vmatpush.msrb.mxu1 %v4521_v52 }
 0x16b   :  { %1094 = vmatpush.msrb.mxu1 %v4524_v3  ;;  %v4539_v52 = vpop.f32.mrf.mxu1 }
 0x16c   :  { %6965 = vst [vmem:[#allocation32_spill] sm:$0xff] %v4539_v52 }
 0x16d   :  { %1095 = vmatpush.msrb.mxu1 %v4527_v18  ;;  %v507_v18 = vld [vmem:[#allocation13] sm:$0x7] }
 0x16e   :  { %v4548_v58 = vperm.slane %v507_v18, 0  ;;  %v4561_v41 = vperm.slane %v507_v18, 1 }
 0x16f   :  { %1096 = vmatpush.msrb.mxu1 %v6959_v30  ;;  %v4541_v37 = vpop.f32.mrf.mxu2  ;;  %v499_v30 = vld [vmem:[%s6478_s7] sm:$0x7] }
 0x170   :  { %6966 = vst [vmem:[#allocation61_spill] sm:$0xff] %v4541_v37  ;;  %v4552_v49 = vperm.slane %v499_v30, 0  ;;  %v4559_v54 = vperm.slane %v499_v30, 1 }
 0x171   :  { %1097 = vmatpush.msrb.mxu1 %v6961_v27  ;;  %6968 = vst [vmem:[#allocation64_spill] sm:$0xff] %v4548_v58 }
 0x172   :  { %6970 = vst [vmem:[#allocation66_spill] sm:$0xff] %v4552_v49 }
 0x173   :  { %1098 = vmatpush.msrb.mxu1 %v6963_v2  ;;  %v4543_v3 = vpop.f32.mrf.mxu1  ;;  %v700_v2 = vadd.f32 %v699_v62, %v4548_v58  ;;  %6973 = vst [vmem:[#allocation38_spill] sm:$0xff] %v4559_v54 }
 0x174   :  { %6967 = vst [vmem:[#allocation34_spill] sm:$0xff] %v4543_v3 }
 0x175   :  { %6974 = vst [vmem:[#allocation68_spill] sm:$0xff] %v4561_v41 }
 0x177   :  { %v4550_v27 = vpop.f32.mrf.mxu2 }
 0x178   :  { %6969 = vst [vmem:[#allocation36_spill] sm:$0xff] %v4550_v27 }
 0x190   :  { %v639_v56 = vpop.f32.mrf.mxu1 }
 0x191   :  { %v640_v52 = vadd.f32 %v639_v56, %v4552_v49  ;;  %v826_v37 = vpop.f32.mrf.mxu0 }
 0x192   :  { %v827_v3 = vadd.f32 %v826_v37, %v6971_v9 }
 0x193   :  { %v742_v33 = vadd.f32 %v700_v2, %v640_v52 }
 0x194   :  { %v869_v59 = vadd.f32 %v827_v3, %v286_v13  ;;  %v6975_v13 = vld [vmem:[#allocation63_spill] sm:$0xff]  ;;  %v6976_v3 = vld [vmem:[#allocation57_spill] sm:$0xff] }
 0x195   :  { %v2771_v23 = vmul.f32 -1.442695, %v742_v33  ;;  %v245_v2 = vadd.f32 %v6976_v3, %v6975_v13 }
 0x196   :  { %v659_v27 = vpop.f32.mrf.mxu2  ;;  %v2774_v62 = vmul.f32 -1.442695, %v869_v59 }
 0x197   :  { %2826 = vpow2.f32 %v2771_v23  ;;  %v679_v26 = vpop.f32.mrf.mxu3  ;;  %v660_v56 = vadd.f32 %v659_v27, %v4559_v54 }
 0x198   :  { %2828 = vpow2.f32 %v2774_v62 }
 0x199   :  { %v719_v58 = vpop.f32.mrf.mxu1 }
 0x19a   :  { %v720_v49 = vadd.f32 %v719_v58, %v4561_v41 }
 0x19c   :  { %v762_v37 = vadd.f32 %v720_v49, %v660_v56 }
 0x19d   :  { %v2827_v9 = vpop.eup %2826 }
 0x19e   :  { %v746_v48 = vadd.f32 1.0, %v2827_v9  ;;  %v2772_v52 = vmul.f32 -1.442695, %v762_v37  ;;  %v2829_v59 = vpop.eup %2828  ;;  %v4570_v9 = vperm.slane %v507_v18, 2  ;;  %v739_v37 = vpop.f32.mrf.mxu2 }
 0x19f   :  { %v806_v33 = vpop.f32.mrf.mxu3  ;;  %v4568_v27 = vadd.f32 1.0, %v2829_v59 }
 0x1a0   :  { %2830 = vrcp.f32 %v746_v48  ;;  %v807_v23 = vadd.f32 %v806_v33, %v6977_v19  ;;  %6978 = vst [vmem:[#allocation39_spill] sm:$0xff] %v4570_v9  ;;  %v758_v13 = vand.u32 2147483648, %v746_v48  ;;  %vm752_vm9 = vweird.f32 %v746_v48 }
 0x1a1   :  { %2832 = vpow2.f32 %v2772_v52  ;;  %v756_v52 = vand.u32 2147483647, %v746_v48  ;;  %vm879_vm5 = vweird.f32 %v4568_v27 }
 0x1a2   :  { %v849_v15 = vadd.f32 %v807_v23, %v245_v2  ;;  %v759_v18 = vor.u32 1.1754944e-38, %v758_v13 }
 0x1a3   :  { %vm757_vm11 = vcmp.eq.f32.partialorder %v756_v52, 8.507059e+37 }
 0x1a4   :  { %v2773_v47 = vmul.f32 -1.442695, %v849_v15  ;;  %v4573_v15 = vperm.slane %v499_v30, 2 }
 0x1a6   :  { %v2831_v10 = vpop.eup %2830  ;;  %2834 = vpow2.f32 %v2773_v47  ;;  %6979 = vst [vmem:[#allocation71_spill] sm:$0xff] %v4573_v15  ;;  %v740_v47 = vadd.f32 %v739_v37, %v4570_v9 }
 0x1a7   :  { %v748_v49 = vmul.f32 %v2831_v10, %v746_v48  ;;  %v2833_v58 = vpop.eup %2832  ;;  %2836 = vrcp.f32 %v4568_v27  ;;  %vm753_vm8 = vweird.f32 %v2831_v10 }
 0x1a8   :  { %v766_v62 = vadd.f32 1.0, %v2833_v58  ;;  %vm754_vm10 = vmor %vm752_vm9, %vm753_vm8 }
 0x1a9   :  { %v749_v56 = vsub.f32 1.0, %v748_v49 }
 0x1aa   :  { %2838 = vrcp.f32 %v766_v62  ;;  %v778_v48 = vand.u32 2147483648, %v766_v62  ;;  %vm772_vm13 = vweird.f32 %v766_v62 }
 0x1ab   :  { %v750_v33 = vmul.f32 %v2831_v10, %v749_v56  ;;  %v680_v56 = vadd.f32 %v679_v26, %v4573_v15 }
 0x1ac   :  { %v2835_v3 = vpop.eup %2834 }
 0x1ad   :  { %v853_v2 = vadd.f32 1.0, %v2835_v3  ;;  %v751_v23 = vadd.f32 %v2831_v10, %v750_v33  ;;  %v4576_v49 = vpop.eup %2836 }
 0x1ae   :  { %v875_v30 = vmul.f32 %v4576_v49, %v4568_v27  ;;  %vm880_vm4 = vweird.f32 %v4576_v49 }
 0x1af   :  { %2840 = vrcp.f32 %v853_v2  ;;  %v755_v59 = vsel %vm754_vm10, %v2831_v10, %v751_v23  ;;  %v776_v10 = vand.u32 2147483647, %v766_v62  ;;  %v865_v26 = vand.u32 2147483648, %v853_v2  ;;  %vm881_vm6 = vmor %vm879_vm5, %vm880_vm4 }
 0x1b0   :  { %v760_v58 = vsel %vm757_vm11, %v759_v18, %v755_v59  ;;  %v2839_v41 = vpop.eup %2838  ;;  %v876_v52 = vsub.f32 1.0, %v875_v30  ;;  %v863_v59 = vand.u32 2147483647, %v853_v2  ;;  %vm859_vm1 = vweird.f32 %v853_v2 }
 0x1b1   :  { %v782_v54 = vmul.f32 %v760_v58, %v740_v47  ;;  %v768_v19 = vmul.f32 %v2839_v41, %v766_v62  ;;  %vm773_vm12 = vweird.f32 %v2839_v41  ;;  %v779_v47 = vor.u32 1.1754944e-38, %v778_v48 }
 0x1b2   :  { %vm774_vm14 = vmor %vm772_vm13, %vm773_vm12  ;;  %vm777_vm0 = vcmp.eq.f32.partialorder %v776_v10, 8.507059e+37  ;;  %vm864_vm3 = vcmp.eq.f32.partialorder %v863_v59, 8.507059e+37  ;;  %v4594_v59 = vld [vmem:[#allocation10 + $0x178] sm:$0xff] }
 0x1b3   :  { %v783_v3 = vadd.f32 %v782_v54, %v680_v56  ;;  %v769_v37 = vsub.f32 1.0, %v768_v19  ;;  %v877_v19 = vmul.f32 %v4576_v49, %v876_v52  ;;  %v846_v56 = vpop.f32.mrf.mxu1  ;;  %v327_v52 = vadd.f32 %v4472_v57, %v4274_v51 }
 0x1b4   :  { %v847_v62 = vadd.f32 %v846_v56, %v4270_v29 }
 0x1b5   :  { %v2841_v33 = vpop.eup %2840  ;;  %2842 = vtanh.f32 %v783_v3  ;;  %v770_v9 = vmul.f32 %v2839_v41, %v769_v37  ;;  %v878_v10 = vadd.f32 %v4576_v49, %v877_v19 }
 0x1b6   :  { %v855_v13 = vmul.f32 %v2841_v33, %v853_v2  ;;  %vm860_vm15 = vweird.f32 %v2841_v33 }
 0x1b7   :  { %v771_v18 = vadd.f32 %v2839_v41, %v770_v9  ;;  %vm861_vm2 = vmor %vm859_vm1, %vm860_vm15  ;;  %v866_v9 = vor.u32 1.1754944e-38, %v865_v26  ;;  %v4597_v26 = vld [vmem:[#allocation10 + $0x160] sm:$0xff] }
 0x1b8   :  { %v856_v23 = vsub.f32 1.0, %v855_v13 }
 0x1b9   :  { %v775_v15 = vsel %vm774_vm14, %v2839_v41, %v771_v18  ;;  %v883_v18 = vand.u32 2147483647, %v4568_v27 }
 0x1ba   :  { %v857_v58 = vmul.f32 %v2841_v33, %v856_v23  ;;  %v780_v3 = vsel %vm777_vm0, %v779_v47, %v775_v15  ;;  %v885_v15 = vand.u32 2147483648, %v4568_v27 }
 0x1bb   :  { %v2843_v54 = vpop.eup %2842  ;;  %v785_v63 = vsub.f32 1.0, %v780_v3  ;;  %v787_v48 = vmul.f32 0.0, %v780_v3  ;;  %vm884_vm7 = vcmp.eq.f32.partialorder %v883_v18, 8.507059e+37  ;;  %v4607_v3 = vld [vmem:[#allocation10 + $0x118] sm:$0xff]  ;;  %v4649_v18 = vld [vmem:[#allocation10 + $0x140] sm:$0xff] }
 0x1bc   :  { %v858_v37 = vadd.f32 %v2841_v33, %v857_v58  ;;  %v886_v57 = vor.u32 1.1754944e-38, %v885_v15  ;;  %v4600_v58 = vld [vmem:[#allocation10 + $0x148] sm:$0xff]  ;;  %6980 = vst [vmem:[#allocation74_spill] sm:$0xff] %v4607_v3 }
 0x1bd   :  { %v786_v13 = vmul.f32 %v2843_v54, %v785_v63  ;;  %v4603_v54 = vld [vmem:[#allocation10 + $0x130] sm:$0xff]  ;;  %v4643_v15 = vld [vmem:[#allocation7 + $0x148] sm:$0xff] }
 0x1be   :  { %v862_v30 = vsel %vm861_vm2, %v2841_v33, %v858_v37  ;;  %v882_v33 = vsel %vm881_vm6, %v4576_v49, %v878_v10  ;;  %v4637_v10 = vld [vmem:[#allocation10 + $0x158] sm:$0xff] }
 0x1bf   :  { %v867_v41 = vsel %vm864_vm3, %v866_v9, %v862_v30  ;;  %v4588_v23 = vadd.f32 %v787_v48, %v786_v13  ;;  %v887_v47 = vsel %vm884_vm7, %v886_v57, %v882_v33  ;;  %v4612_v9 = vld [vmem:[#allocation10 + $0x100] sm:$0xff]  ;;  %v4625_v30 = vld [vmem:[#allocation10 + $0x170] sm:$0xff]  ;;  %v4628_v13 = vld [vmem:[#allocation10 + $0xe8] sm:$0xff] }
 0x1c0   :  { %v889_v2 = vmul.f32 %v867_v41, %v847_v62  ;;  %v892_v27 = vsub.f32 1.0, %v887_v47  ;;  %v894_v56 = vmul.f32 %v887_v47, %v4320_v34  ;;  %6981 = vst [vmem:[#allocation40_spill] sm:$0xff] %v4612_v9  ;;  %v4619_v62 = vld [vmem:[#allocation7 + $0x178] sm:$0xff]  ;;  %v4622_v34 = vld [vmem:[#allocation10 + $0x168] sm:$0xff]  ;;  %v4631_v48 = vld [vmem:[#allocation7 + $0x160] sm:$0xff] }
 0x1c1   :  { %972 = vmatmul.f32.vlgmr.msra.gmra.mxu1 %v4588_v23  ;;  %6982 = vst [vmem:[#allocation76_spill] sm:$0xff] %v4628_v13  ;;  %v4634_v41 = vld [vmem:[#allocation10 + $0x150] sm:$0xff]  ;;  %v4664_v47 = vld [vmem:[#allocation10 + $0x120] sm:$0xff] }
 0x1c2   :  { %v890_v63 = vadd.f32 %v889_v2, %v327_v52  ;;  %1210 = vmatpush.msra.mxu1 %v4594_v59  ;;  %v4640_v52 = vld [vmem:[#allocation10 + $0xd0] sm:$0xff]  ;;  %v4646_v2 = vld [vmem:[#allocation10 + $0x138] sm:$0xff] }
 0x1c3   :  { %6983 = vst [vmem:[#allocation42_spill] sm:$0xff] %v4640_v52  ;;  %v4655_v33 = vld [vmem:[#allocation7 + $0x130] sm:$0xff]  ;;  %v4661_v57 = vld [vmem:[#allocation7 + $0x118] sm:$0xff] }
 0x1c4   :  { %2844 = vtanh.f32 %v890_v63  ;;  %1211 = vmatpush.msra.mxu1 %v4597_v26  ;;  %v4652_v63 = vld [vmem:[#allocation10 + $0xb8] sm:$0xff] }
 0x1c5   :  { %6984 = vst [vmem:[#allocation78_spill] sm:$0xff] %v4652_v63 }
 0x1c6   :  { %1212 = vmatpush.msra.mxu1 %v4600_v58 }
 0x1c8   :  { %1213 = vmatpush.msra.mxu1 %v4603_v54 }
 0x1ca   :  { %v2845_v49 = vpop.eup %2844  ;;  %1214 = vmatpush.msra.mxu1 %v4607_v3  ;;  %v4694_v3 = vld [vmem:[#allocation10 + $0x70] sm:$0xff] }
 0x1cb   :  { %v893_v19 = vmul.f32 %v2845_v49, %v892_v27  ;;  %v4667_v27 = vld [vmem:[#allocation10 + $0x128] sm:$0xff]  ;;  %v4670_v49 = vld [vmem:[#allocation10 + $0xa0] sm:$0xff]  ;;  %6991 = vst [vmem:[#allocation50_spill] sm:$0xff] %v4694_v3 }
 0x1cc   :  { %1215 = vmatpush.msra.mxu1 %v4612_v9  ;;  %6985 = vst [vmem:[#allocation44_spill] sm:$0xff] %v4670_v49  ;;  %v4691_v9 = vld [vmem:[#allocation10 + $0xf8] sm:$0xff] }
 0x1cd   :  { %v4610_v37 = vadd.f32 %v894_v56, %v893_v19  ;;  %v4673_v19 = vld [vmem:[#allocation7 + $0x100] sm:$0xff]  ;;  %v4676_v56 = vld [vmem:[#allocation10 + $0x108] sm:$0xff]  ;;  %6990 = vst [vmem:[#allocation83_spill] sm:$0xff] %v4691_v9 }
 0x1ce   :  { %1216 = vmatpush.msra.mxu1 %v4628_v13  ;;  %v4685_v13 = vld [vmem:[#allocation7 + $0xe8] sm:$0xff] }
 0x1cf   :  { %912 = vmatmul.f32.vlgmr.msrb.gmra.mxu2 %v4610_v37  ;;  %932 = vmatmul.f32.vlgmr.msra.gmra.mxu3 %v4610_v37  ;;  %6988 = vst [vmem:[#allocation81_spill] sm:$0xff] %v4685_v13 }
 0x1d0   :  { %952 = vmatmul.f32.vlgmr.msra.gmra.mxu0 %v4610_v37  ;;  %1099 = vmatmul.f32.vlgmr.msrb.gmra.mxu1 %v4610_v37 }
 0x1d1   :  { %1103 = vmatpush.msrb.mxu2 %v4619_v62  ;;  %1170 = vmatpush.msra.mxu3 %v4622_v34 }
 0x1d2   :  { %1190 = vmatpush.msra.mxu0 %v4625_v30  ;;  %1217 = vmatpush.msra.mxu1 %v4640_v52  ;;  %v4682_v52 = vld [vmem:[#allocation10 + $0x88] sm:$0xff] }
 0x1d3   :  { %1104 = vmatpush.msrb.mxu2 %v4631_v48  ;;  %1171 = vmatpush.msra.mxu3 %v4634_v41  ;;  %6987 = vst [vmem:[#allocation46_spill] sm:$0xff] %v4682_v52 }
 0x1d4   :  { %1191 = vmatpush.msra.mxu0 %v4637_v10  ;;  %1218 = vmatpush.msra.mxu1 %v4652_v63  ;;  %v4679_v63 = vld [vmem:[#allocation10 + $0x110] sm:$0xff] }
 0x1d5   :  { %1105 = vmatpush.msrb.mxu2 %v4643_v15  ;;  %1172 = vmatpush.msra.mxu3 %v4646_v2  ;;  %6986 = vst [vmem:[#allocation80_spill] sm:$0xff] %v4679_v63 }
 0x1d6   :  { %1192 = vmatpush.msra.mxu0 %v4649_v18  ;;  %1219 = vmatpush.msra.mxu1 %v4670_v49  ;;  %v4688_v49 = vld [vmem:[#allocation10 + $0xf0] sm:$0xff] }
 0x1d7   :  { %1106 = vmatpush.msrb.mxu2 %v4655_v33  ;;  %1012 = vmatmul.f32.vlgmr.msrb.gmra.mxu3 %v4588_v23  ;;  %6989 = vst [vmem:[#allocation48_spill] sm:$0xff] %v4688_v49 }
 0x1d8   :  { %992 = vmatmul.f32.vlgmr.msra.gmra.mxu2 %v4588_v23  ;;  %1079 = vmatmul.f32.vlgmr.msrb.gmra.mxu0 %v4610_v37 }
 0x1d9   :  { %1107 = vmatpush.msrb.mxu2 %v4661_v57  ;;  %1173 = vmatpush.msra.mxu3 %v4664_v47 }
 0x1da   :  { %1193 = vmatpush.msra.mxu0 %v4667_v27  ;;  %1220 = vmatpush.msra.mxu1 %v4682_v52  ;;  %v4700_v52 = vld [vmem:[#allocation10 + $0xd8] sm:$0xff] }
 0x1db   :  { %1108 = vmatpush.msrb.mxu2 %v4673_v19  ;;  %1174 = vmatpush.msra.mxu3 %v4676_v56  ;;  %6993 = vst [vmem:[#allocation86_spill] sm:$0xff] %v4700_v52 }
 0x1dc   :  { %1194 = vmatpush.msra.mxu0 %v4679_v63  ;;  %1221 = vmatpush.msra.mxu1 %v4694_v3  ;;  %v4697_v63 = vld [vmem:[#allocation7 + $0xd0] sm:$0xff]  ;;  %v4712_v3 = vld [vmem:[#allocation10 + $0xc0] sm:$0xff] }
 0x1dd   :  { %1109 = vmatpush.msrb.mxu2 %v4685_v13  ;;  %1175 = vmatpush.msra.mxu3 %v4688_v49  ;;  %6992 = vst [vmem:[#allocation52_spill] sm:$0xff] %v4697_v63  ;;  %v4703_v13 = vld [vmem:[#allocation10 + $0xe0] sm:$0xff]  ;;  %v4706_v49 = vld [vmem:[#allocation10 + $0x58] sm:$0xff] }
 0x1de   :  { %1195 = vmatpush.msra.mxu0 %v4691_v9  ;;  %6994 = vst [vmem:[#allocation54_spill] sm:$0xff] %v4703_v13  ;;  %1222 = vmatpush.msra.mxu1 %v4706_v49  ;;  %v4709_v9 = vld [vmem:[#allocation7 + $0xb8] sm:$0xff] }
 0x1df   :  { %1110 = vmatpush.msrb.mxu2 %v4697_v63  ;;  %1176 = vmatpush.msra.mxu3 %v4700_v52  ;;  %6995 = vst [vmem:[#allocation88_spill] sm:$0xff] %v4706_v49  ;;  %v4716_v63 = vld [vmem:[#allocation10 + $0x40] sm:$0xff]  ;;  %v4726_v49 = vld [vmem:[#allocation10 + $0x28] sm:$0xff] }
 0x1e0   :  { %1196 = vmatpush.msra.mxu0 %v4703_v13  ;;  %6996 = vst [vmem:[#allocation56_spill] sm:$0xff] %v4712_v3  ;;  %1223 = vmatpush.msra.mxu1 %v4716_v63  ;;  %v4719_v52 = vld [vmem:[#allocation7 + $0xa0] sm:$0xff]  ;;  %v4722_v13 = vld [vmem:[#allocation10 + $0xa8] sm:$0xff] }
 0x1e1   :  { %1111 = vmatpush.msrb.mxu2 %v4709_v9  ;;  %1177 = vmatpush.msra.mxu3 %v4712_v3  ;;  %6997 = vst [vmem:[#allocation59_spill] sm:$0xff] %v4716_v63  ;;  %v4729_v3 = vld [vmem:[#allocation7 + $0x88] sm:$0xff]  ;;  %v4736_v63 = vld [vmem:[#allocation10 + $0x10] sm:$0xff] }
 0x1e2   :  { %1197 = vmatpush.msra.mxu0 %v4107_v38  ;;  %6998 = vst [vmem:[#allocation62_spill] sm:$0xff] %v4722_v13  ;;  %1224 = vmatpush.msra.mxu1 %v4726_v49  ;;  %v4732_v38 = vld [vmem:[#allocation10 + $0x90] sm:$0xff] }
 0x1e3   :  { %1112 = vmatpush.msrb.mxu2 %v4719_v52  ;;  %1178 = vmatpush.msra.mxu3 %v4722_v13  ;;  %6999 = vst [vmem:[#allocation65_spill] sm:$0xff] %v4726_v49  ;;  %v4739_v13 = vld [vmem:[#allocation7 + $0x70] sm:$0xff]  ;;  %v4747_v49 = vld [vmem:[#allocation7 + $0x58] sm:$0xff] }
 0x1e4   :  { %1198 = vmatpush.msra.mxu0 %v6899_v42  ;;  %7000 = vst [vmem:[#allocation90_spill] sm:$0xff] %v4736_v63  ;;  %1225 = vmatpush.msra.mxu1 %v4736_v63  ;;  %v4742_v42 = vld [vmem:[#allocation10 + $0x78] sm:$0xff] }
 0x1e5   :  { %1113 = vmatpush.msrb.mxu2 %v4729_v3  ;;  %1179 = vmatpush.msra.mxu3 %v4732_v38  ;;  %7001 = vst [vmem:[#allocation67_spill] sm:$0xff] %v4742_v42  ;;  %v4755_v63 = vld [vmem:[#allocation7 + $0x40] sm:$0xff] }
 0x1e6   :  { %1199 = vmatpush.msra.mxu0 %v4125_v14  ;;  %1337 = vmatpush.msrb.mxu1 %v4338_v44  ;;  %v4750_v14 = vld [vmem:[#allocation10 + $0x60] sm:$0xff]  ;;  %v4766_v44 = vld [vmem:[#allocation10 + $0x30] sm:$0xff] }
 0x1e7   :  { %1114 = vmatpush.msrb.mxu2 %v4739_v13  ;;  %1180 = vmatpush.msra.mxu3 %v4742_v42  ;;  %v4758_v42 = vld [vmem:[#allocation10 + $0x48] sm:$0xff] }
 0x1e8   :  { %1200 = vmatpush.msra.mxu0 %v4133_v1  ;;  %1338 = vmatpush.msrb.mxu1 %v4348_v35  ;;  %v4763_v1 = vld [vmem:[#allocation7 + $0x28] sm:$0xff]  ;;  %v4774_v35 = vld [vmem:[#allocation10 + $0x18] sm:$0xff] }
 0x1e9   :  { %1115 = vmatpush.msrb.mxu2 %v4747_v49  ;;  %1181 = vmatpush.msra.mxu3 %v4750_v14  ;;  %7002 = vst [vmem:[#allocation91_spill] sm:$0xff] %v4774_v35 }
 0x1ea   :  { %1201 = vmatpush.msra.mxu0 %v4149_v0  ;;  %1339 = vmatpush.msrb.mxu1 %v4354_v45  ;;  %v4771_v0 = vld [vmem:[#allocation7 + $0x10] sm:$0xff]  ;;  %v4782_v45 = vld [vmem:[#allocation10] sm:$0xff] }
 0x1eb   :  { %1116 = vmatpush.msrb.mxu2 %v4755_v63  ;;  %1182 = vmatpush.msra.mxu3 %v4758_v42  ;;  %7004 = vst [vmem:[#allocation73_spill] sm:$0xff] %v4782_v45 }
 0x1ec   :  { %1202 = vmatpush.msra.mxu0 %v4160_v5  ;;  %1340 = vmatpush.msrb.mxu1 %v4360_v32  ;;  %v4779_v5 = vld [vmem:[#allocation11 + $0x168] sm:$0xff]  ;;  %v4789_v32 = vld [vmem:[#allocation11 + $0x150] sm:$0xff] }
 0x1ed   :  { %1117 = vmatpush.msrb.mxu2 %v4763_v1  ;;  %1183 = vmatpush.msra.mxu3 %v4766_v44  ;;  %7003 = vst [vmem:[#allocation70_spill] sm:$0xff] %v4779_v5 }
 0x1ee   :  { %1203 = vmatpush.msra.mxu0 %v4170_v7  ;;  %v4785_v7 = vld [vmem:[#allocation11 + $0x170] sm:$0xff]  ;;  %7006 = vst [vmem:[#allocation33_spill] sm:$0xff] %v4789_v32  ;;  %1341 = vmatpush.msrb.mxu1 %v4366_v61  ;;  %v4813_v61 = vld [vmem:[#allocation11 + $0x108] sm:$0xff] }
 0x1ef   :  { %1118 = vmatpush.msrb.mxu2 %v4771_v0  ;;  %1184 = vmatpush.msra.mxu3 %v4774_v35  ;;  %7005 = vst [vmem:[#allocation92_spill] sm:$0xff] %v4785_v7 }
 0x1f0   :  { %1119 = vmatmul.f32.vlgmr.msrb.gmra.mxu2 %v4610_v37  ;;  %1204 = vmatpush.msra.mxu0 %v4179_v21  ;;  %v4793_v21 = vld [vmem:[#allocation11 + $0x158] sm:$0xff]  ;;  %7012 = vst [vmem:[#allocation101_spill] sm:$0xff] %v4813_v61 }
 0x1f1   :  { %1230 = vmatpush.msra.mxu2 %v4779_v5  ;;  %1185 = vmatpush.msra.mxu3 %v4782_v45  ;;  %7007 = vst [vmem:[#allocation35_spill] sm:$0xff] %v4793_v21  ;;  %v4797_v5 = vld [vmem:[#allocation11 + $0x138] sm:$0xff]  ;;  %v7069_v45 = vld [vmem:[#allocation71_spill] sm:$0xff] }
 0x1f2   :  { %1205 = vmatpush.msra.mxu0 %v4190_v11  ;;  %7008 = vst [vmem:[#allocation37_spill] sm:$0xff] %v4797_v5  ;;  %1342 = vmatpush.msrb.mxu1 %v4372_v4  ;;  %v4805_v11 = vld [vmem:[#allocation11 + $0x120] sm:$0xff]  ;;  %v4821_v4 = vld [vmem:[#allocation11 + $0xf0] sm:$0xff] }
 0x1f3   :  { %1250 = vmatpush.msrb.mxu3 %v4785_v7  ;;  %1231 = vmatpush.msra.mxu2 %v4789_v32  ;;  %v4801_v7 = vld [vmem:[#allocation11 + $0x140] sm:$0xff]  ;;  %7010 = vst [vmem:[#allocation57_spill] sm:$0xff] %v4805_v11 }
 0x1f4   :  { %1270 = vmatpush.msrb.mxu0 %v4196_v16  ;;  %7009 = vst [vmem:[#allocation63_spill] sm:$0xff] %v4801_v7  ;;  %v4809_v16 = vld [vmem:[#allocation11 + $0x128] sm:$0xff]  ;;  %1343 = vmatpush.msrb.mxu1 %v4378_v43  ;;  %v4829_v43 = vld [vmem:[#allocation11 + $0xd8] sm:$0xff] }
 0x1f5   :  { %1251 = vmatpush.msrb.mxu3 %v4793_v21  ;;  %1232 = vmatpush.msra.mxu2 %v4797_v5  ;;  %7011 = vst [vmem:[#allocation100_spill] sm:$0xff] %v4809_v16  ;;  %v7068_v5 = vld [vmem:[#allocation39_spill] sm:$0xff] }
 0x1f6   :  { %1271 = vmatpush.msrb.mxu0 %v4206_v20  ;;  %v4817_v20 = vld [vmem:[#allocation11 + $0x110] sm:$0xff]  ;;  %1344 = vmatpush.msrb.mxu1 %v4384_v46  ;;  %7014 = vst [vmem:[#allocation103_spill] sm:$0xff] %v4821_v4  ;;  %v4837_v46 = vld [vmem:[#allocation11 + $0xc0] sm:$0xff] }
 0x1f7   :  { %1252 = vmatpush.msrb.mxu3 %v4801_v7  ;;  %1233 = vmatpush.msra.mxu2 %v4805_v11  ;;  %7013 = vst [vmem:[#allocation102_spill] sm:$0xff] %v4817_v20 }
 0x1f8   :  { %1272 = vmatpush.msrb.mxu0 %v4216_v24  ;;  %v4825_v24 = vld [vmem:[#allocation11 + $0xf8] sm:$0xff]  ;;  %1345 = vmatpush.msrb.mxu1 %v4390_v55  ;;  %7016 = vst [vmem:[#allocation105_spill] sm:$0xff] %v4829_v43  ;;  %v4845_v55 = vld [vmem:[#allocation11 + $0xa8] sm:$0xff] }
 0x1f9   :  { %1253 = vmatpush.msrb.mxu3 %v4809_v16  ;;  %1234 = vmatpush.msra.mxu2 %v4813_v61  ;;  %7015 = vst [vmem:[#allocation104_spill] sm:$0xff] %v4825_v24  ;;  %v7064_v16 = vld [vmem:[#allocation69_spill] sm:$0xff] }
 0x1fa   :  { %1273 = vmatpush.msrb.mxu0 %v4227_v39  ;;  %v4833_v39 = vld [vmem:[#allocation11 + $0xe0] sm:$0xff]  ;;  %1346 = vmatpush.msrb.mxu1 %v4396_v17  ;;  %7018 = vst [vmem:[#allocation107_spill] sm:$0xff] %v4837_v46  ;;  %v4853_v17 = vld [vmem:[#allocation11 + $0x90] sm:$0xff] }
 0x1fb   :  { %1254 = vmatpush.msrb.mxu3 %v4817_v20  ;;  %1235 = vmatpush.msra.mxu2 %v4821_v4  ;;  %7017 = vst [vmem:[#allocation106_spill] sm:$0xff] %v4833_v39 }
 0x1fc   :  { %1274 = vmatpush.msrb.mxu0 %v4237_v60  ;;  %v4841_v60 = vld [vmem:[#allocation11 + $0xc8] sm:$0xff]  ;;  %1347 = vmatpush.msrb.mxu1 %v4402_v53  ;;  %7020 = vst [vmem:[#allocation109_spill] sm:$0xff] %v4845_v55  ;;  %v4861_v53 = vld [vmem:[#allocation11 + $0x78] sm:$0xff] }
 0x1fd   :  { %1255 = vmatpush.msrb.mxu3 %v4825_v24  ;;  %1236 = vmatpush.msra.mxu2 %v4829_v43  ;;  %7019 = vst [vmem:[#allocation108_spill] sm:$0xff] %v4841_v60 }
 0x1fe   :  { %1275 = vmatpush.msrb.mxu0 %v4243_v25  ;;  %v4849_v25 = vld [vmem:[#allocation11 + $0xb0] sm:$0xff]  ;;  %1348 = vmatpush.msrb.mxu1 %v4408_v36  ;;  %7022 = vst [vmem:[#allocation111_spill] sm:$0xff] %v4853_v17  ;;  %v4869_v36 = vld [vmem:[#allocation11 + $0x60] sm:$0xff] }
 0x1ff   :  { %1256 = vmatpush.msrb.mxu3 %v4833_v39  ;;  %1237 = vmatpush.msra.mxu2 %v4837_v46  ;;  %7021 = vst [vmem:[#allocation110_spill] sm:$0xff] %v4849_v25  ;;  %v7062_v46 = vld [vmem:[#allocation66_spill] sm:$0xff] }
 0x200   :  { %1276 = vmatpush.msrb.mxu0 %v4249_v28  ;;  %v4857_v28 = vld [vmem:[#allocation11 + $0x98] sm:$0xff]  ;;  %1349 = vmatpush.msrb.mxu1 %v4422_v8  ;;  %7024 = vst [vmem:[#allocation113_spill] sm:$0xff] %v4861_v53  ;;  %v4877_v8 = vld [vmem:[#allocation11 + $0x48] sm:$0xff] }
 0x201   :  { %1257 = vmatpush.msrb.mxu3 %v4841_v60  ;;  %1238 = vmatpush.msra.mxu2 %v4845_v55  ;;  %7023 = vst [vmem:[#allocation112_spill] sm:$0xff] %v4857_v28  ;;  %v7061_v55 = vld [vmem:[#allocation64_spill] sm:$0xff] }
 0x202   :  { %1277 = vmatpush.msrb.mxu0 %v4257_v31  ;;  %v4865_v31 = vld [vmem:[#allocation11 + $0x80] sm:$0xff]  ;;  %1350 = vmatpush.msrb.mxu1 %v4428_v50  ;;  %7026 = vst [vmem:[#allocation115_spill] sm:$0xff] %v4869_v36 }
 0x203   :  { %1258 = vmatpush.msrb.mxu3 %v4849_v25  ;;  %1239 = vmatpush.msra.mxu2 %v4853_v17  ;;  %7025 = vst [vmem:[#allocation114_spill] sm:$0xff] %v4865_v31  ;;  %v7031_v50 = vld [vmem:[#allocation41_spill] sm:$0xff]  ;;  %v7051_v25 = vld [vmem:[#allocation51_spill] sm:$0xff] }
 0x204   :  { %1278 = vmatpush.msrb.mxu0 %v4266_v12  ;;  %v4873_v12 = vld [vmem:[#allocation11 + $0x68] sm:$0xff]  ;;  %1351 = vmatpush.msrb.mxu1 %v4434_v22  ;;  %7028 = vst [vmem:[#allocation117_spill] sm:$0xff] %v4877_v8  ;;  %v4892_v22 = vld [vmem:[#allocation11 + $0x18] sm:$0xff] }
 0x205   :  { %1259 = vmatpush.msrb.mxu3 %v4857_v28  ;;  %1240 = vmatpush.msra.mxu2 %v4861_v53  ;;  %7027 = vst [vmem:[#allocation116_spill] sm:$0xff] %v4873_v12  ;;  %v7045_v28 = vld [vmem:[#allocation25_spill] sm:$0xff]  ;;  %v7047_v53 = vld [vmem:[#allocation47_spill] sm:$0xff] }
 0x206   :  { %1279 = vmatpush.msrb.mxu0 %v4282_v40  ;;  %v7029_v40 = vld [vmem:[#allocation95_spill] sm:$0xff]  ;;  %1352 = vmatpush.msrb.mxu1 %v7031_v50  ;;  %7035 = vst [vmem:[#allocation118_spill] sm:$0xff] %v4892_v22  ;;  %v4899_v50 = vld [vmem:[#allocation11] sm:$0xff] }
 0x207   :  { %1260 = vmatpush.msrb.mxu3 %v4865_v31  ;;  %1241 = vmatpush.msra.mxu2 %v4869_v36  ;;  %v4881_v31 = vld [vmem:[#allocation11 + $0x50] sm:$0xff]  ;;  %7038 = vst [vmem:[#allocation119_spill] sm:$0xff] %v4899_v50 }
 0x208   :  { %1280 = vmatpush.msrb.mxu0 %v4289_v6  ;;  %7030 = vst [vmem:[#allocation95_spill] sm:$0xff] %v4881_v31  ;;  %v4885_v36 = vld [vmem:[#allocation11 + $0x30] sm:$0xff] }
 0x209   :  { %1261 = vmatpush.msrb.mxu3 %v4873_v12  ;;  %1242 = vmatpush.msra.mxu2 %v4877_v8  ;;  %7032 = vst [vmem:[#allocation41_spill] sm:$0xff] %v4885_v36  ;;  %v7033_v6 = vld [vmem:[#allocation96_spill] sm:$0xff]  ;;  %v4896_v8 = vld [vmem:[#allocation11 + $0x20] sm:$0xff] }
 0x20a   :  { %1281 = vmatpush.msrb.mxu0 %v7029_v40  ;;  %v4889_v12 = vld [vmem:[#allocation11 + $0x38] sm:$0xff] }
 0x20b   :  { %1262 = vmatpush.msrb.mxu3 %v4881_v31  ;;  %1243 = vmatpush.msra.mxu2 %v4885_v36  ;;  %7034 = vst [vmem:[#allocation96_spill] sm:$0xff] %v4889_v12  ;;  %v7036_v40 = vld [vmem:[#allocation97_spill] sm:$0xff]  ;;  %v7039_v31 = vld [vmem:[#allocation98_spill] sm:$0xff] }
 0x20c   :  { %1282 = vmatpush.msrb.mxu0 %v7033_v6  ;;  %7037 = vst [vmem:[#allocation97_spill] sm:$0xff] %v4896_v8  ;;  %v7040_v6 = vld [vmem:[#allocation24_spill] sm:$0xff]  ;;  %v4904_v36 = vld [vmem:[#allocation11 + $0x8] sm:$0xff] }
 0x20d   :  { %1263 = vmatpush.msrb.mxu3 %v4889_v12  ;;  %1244 = vmatpush.msra.mxu2 %v4892_v22  ;;  %7041 = vst [vmem:[#allocation98_spill] sm:$0xff] %v4904_v36  ;;  %v7042_v12 = vld [vmem:[#allocation99_spill] sm:$0xff] }
 0x20e   :  { %1283 = vmatpush.msrb.mxu0 %v7036_v40  ;;  %v7043_v22 = vld [vmem:[#allocation43_spill] sm:$0xff]  ;;  %v7044_v40 = vld [vmem:[#allocation72_spill] sm:$0xff] }
 0x20f   :  { %1264 = vmatpush.msrb.mxu3 %v4896_v8  ;;  %1245 = vmatpush.msra.mxu2 %v4899_v50  ;;  %v7046_v8 = vld [vmem:[#allocation75_spill] sm:$0xff]  ;;  %v7048_v50 = vld [vmem:[#allocation77_spill] sm:$0xff] }
 0x210   :  { %1284 = vmatpush.msrb.mxu0 %v7039_v31  ;;  %v7049_v31 = vld [vmem:[#allocation27_spill] sm:$0xff] }
 0x211   :  { %1357 = vmatpush.msrb.mxu2 %v7040_v6  ;;  %1265 = vmatpush.msrb.mxu3 %v4904_v36  ;;  %v7050_v6 = vld [vmem:[#allocation49_spill] sm:$0xff] }
 0x212   :  { %1285 = vmatpush.msrb.mxu0 %v7042_v12  ;;  %v7052_v36 = vld [vmem:[#allocation53_spill] sm:$0xff]  ;;  %v7053_v12 = vld [vmem:[#allocation82_spill] sm:$0xff] }
 0x213   :  { %1358 = vmatpush.msrb.mxu2 %v7043_v22  ;;  %v7054_v22 = vld [vmem:[#allocation30_spill] sm:$0xff] }
 0x215   :  { %1359 = vmatpush.msrb.mxu2 %v7044_v40  ;;  %v4920_v40 = vld [vmem:[#allocation7 + $0x38] sm:$0xff] }
 0x216   :  { %7055 = vst [vmem:[#allocation24_spill] sm:$0xff] %v4920_v40 }
 0x217   :  { %1360 = vmatpush.msrb.mxu2 %v7045_v28  ;;  %v4923_v28 = vld [vmem:[#allocation7 + $0x20] sm:$0xff] }
 0x218   :  { %7056 = vst [vmem:[#allocation99_spill] sm:$0xff] %v4923_v28 }
 0x219   :  { %1361 = vmatpush.msrb.mxu2 %v7046_v8 }
 0x21b   :  { %1362 = vmatpush.msrb.mxu2 %v7047_v53  ;;  %v4926_v53 = vld [vmem:[#allocation7 + $0x8] sm:$0xff] }
 0x21c   :  { %7057 = vst [vmem:[#allocation43_spill] sm:$0xff] %v4926_v53 }
 0x21d   :  { %1363 = vmatpush.msrb.mxu2 %v7048_v50  ;;  %v7058_v50 = vld [vmem:[#allocation85_spill] sm:$0xff] }
 0x21f   :  { %1364 = vmatpush.msrb.mxu2 %v7049_v31  ;;  %v7059_v31 = vld [vmem:[#allocation23_spill] sm:$0xff] }
 0x221   :  { %1365 = vmatpush.msrb.mxu2 %v7050_v6  ;;  %v289_v6 = vadd.f32 %v7059_v31, %v7058_v50 }
 0x223   :  { %1366 = vmatpush.msrb.mxu2 %v7051_v25 }
 0x225   :  { %1367 = vmatpush.msrb.mxu2 %v7052_v36 }
 0x227   :  { %1368 = vmatpush.msrb.mxu2 %v7053_v12  ;;  %v7060_v12 = vld [vmem:[#allocation87_spill] sm:$0xff] }
 0x229   :  { %1369 = vmatpush.msrb.mxu2 %v7054_v22 }
 0x22b   :  { %1370 = vmatpush.msrb.mxu2 %v4920_v40 }
 0x22d   :  { %1371 = vmatpush.msrb.mxu2 %v4923_v28 }
 0x22f   :  { %1372 = vmatpush.msrb.mxu2 %v4926_v53  ;;  %v7063_v53 = vld [vmem:[#allocation60_spill] sm:$0xff] }
 0x23e   :  { %v973_v8 = vpop.f32.mrf.mxu1 }
 0x23f   :  { %v974_v39 = vadd.f32 %v973_v8, %v7061_v55  ;;  %v7066_v8 = vld [vmem:[#allocation68_spill] sm:$0xff] }
 0x24d   :  { %v4929_v25 = vpop.f32.mrf.mxu0  ;;  %v1100_v36 = vpop.f32.mrf.mxu1 }
 0x24e   :  { %v1101_v22 = vadd.f32 %v1100_v36, %v7060_v12  ;;  %v7067_v12 = vld [vmem:[#allocation45_spill] sm:$0xff] }
 0x250   :  { %v1143_v17 = vadd.f32 %v1101_v22, %v289_v6 }
 0x252   :  { %v2778_v60 = vmul.f32 -1.442695, %v1143_v17  ;;  %v913_v40 = vpop.f32.mrf.mxu2  ;;  %v933_v7 = vpop.f32.mrf.mxu3  ;;  %v7065_v17 = vld [vmem:[#allocation38_spill] sm:$0xff] }
 0x253   :  { %v914_v28 = vadd.f32 %v913_v40, %v7062_v46  ;;  %v934_v22 = vadd.f32 %v933_v7, %v7065_v17 }
 0x254   :  { %2846 = vpow2.f32 %v2778_v60 }
 0x255   :  { %v1016_v24 = vadd.f32 %v974_v39, %v914_v28  ;;  %v1080_v43 = vpop.f32.mrf.mxu0 }
 0x256   :  { %v1081_v20 = vadd.f32 %v1080_v43, %v7063_v53  ;;  %v330_v53 = vadd.f32 %v7067_v12, %v4274_v51 }
 0x257   :  { %v2775_v4 = vmul.f32 -1.442695, %v1016_v24 }
 0x258   :  { %v1123_v61 = vadd.f32 %v1081_v20, %v7064_v16 }
 0x259   :  { %2848 = vpow2.f32 %v2775_v4 }
 0x25a   :  { %v2847_v31 = vpop.eup %2846  ;;  %v2777_v50 = vmul.f32 -1.442695, %v1123_v61 }
 0x25b   :  { %v993_v36 = vpop.f32.mrf.mxu2  ;;  %v4938_v6 = vadd.f32 1.0, %v2847_v31 }
 0x25c   :  { %2850 = vpow2.f32 %v2777_v50  ;;  %v994_v40 = vadd.f32 %v993_v36, %v7066_v8  ;;  %v1013_v8 = vpop.f32.mrf.mxu3 }
 0x25d   :  { %2852 = vrcp.f32 %v4938_v6  ;;  %vm1153_vm14 = vweird.f32 %v4938_v6 }
 0x25e   :  { %v1036_v60 = vadd.f32 %v994_v40, %v934_v22 }
 0x25f   :  { %v2849_v39 = vpop.eup %2848 }
 0x260   :  { %v1020_v43 = vadd.f32 1.0, %v2849_v39  ;;  %v2776_v24 = vmul.f32 -1.442695, %v1036_v60 }
 0x262   :  { %v2851_v28 = vpop.eup %2850  ;;  %2854 = vrcp.f32 %v1020_v43  ;;  %v1032_v40 = vand.u32 2147483648, %v1020_v43  ;;  %vm1026_vm9 = vweird.f32 %v1020_v43 }
 0x263   :  { %v1127_v16 = vadd.f32 1.0, %v2851_v28  ;;  %2856 = vpow2.f32 %v2776_v24  ;;  %v4943_v61 = vpop.eup %2852  ;;  %v1030_v24 = vand.u32 2147483647, %v1020_v43 }
 0x264   :  { %v1149_v7 = vmul.f32 %v4943_v61, %v4938_v6  ;;  %vm1154_vm0 = vweird.f32 %v4943_v61 }
 0x265   :  { %2858 = vrcp.f32 %v1127_v16  ;;  %v1139_v55 = vand.u32 2147483648, %v1127_v16  ;;  %vm1031_vm12 = vcmp.eq.f32.partialorder %v1030_v24, 8.507059e+37  ;;  %vm1133_vm13 = vweird.f32 %v1127_v16  ;;  %vm1155_vm3 = vmor %vm1153_vm14, %vm1154_vm0 }
 0x266   :  { %v1150_v39 = vsub.f32 1.0, %v1149_v7  ;;  %v1014_v7 = vadd.f32 %v1013_v8, %v7068_v5  ;;  %v1157_v24 = vand.u32 2147483647, %v4938_v6 }
 0x268   :  { %v2855_v20 = vpop.eup %2854  ;;  %v1151_v21 = vmul.f32 %v4943_v61, %v1150_v39  ;;  %v1140_v39 = vor.u32 1.1754944e-38, %v1139_v55  ;;  %vm1158_vm6 = vcmp.eq.f32.partialorder %v1157_v24, 8.507059e+37  ;;  %v7098_v24 = vld [vmem:[#allocation35_spill] sm:$0xff] }
 0x269   :  { %v2857_v4 = vpop.eup %2856  ;;  %v1022_v50 = vmul.f32 %v2855_v20, %v1020_v43  ;;  %vm1027_vm8 = vweird.f32 %v2855_v20 }
 0x26a   :  { %v4947_v31 = vadd.f32 1.0, %v2857_v4  ;;  %vm1028_vm10 = vmor %vm1026_vm9, %vm1027_vm8  ;;  %v1033_v4 = vor.u32 1.1754944e-38, %v1032_v40 }
 0x26b   :  { %v2859_v36 = vpop.eup %2858  ;;  %v1023_v22 = vsub.f32 1.0, %v1022_v50  ;;  %v1137_v50 = vand.u32 2147483647, %v1127_v16 }
 0x26c   :  { %2860 = vrcp.f32 %v4947_v31  ;;  %v1129_v60 = vmul.f32 %v2859_v36, %v1127_v16  ;;  %vm1134_vm11 = vweird.f32 %v2859_v36  ;;  %v1159_v16 = vand.u32 2147483648, %v4938_v6 }
 0x26d   :  { %v1024_v28 = vmul.f32 %v2855_v20, %v1023_v22  ;;  %vm1135_vm15 = vmor %vm1133_vm13, %vm1134_vm11  ;;  %vm1138_vm1 = vcmp.eq.f32.partialorder %v1137_v50, 8.507059e+37  ;;  %vm1046_vm4 = vweird.f32 %v4947_v31 }
 0x26e   :  { %v1130_v17 = vsub.f32 1.0, %v1129_v60  ;;  %v954_v60 = vadd.f32 %v4929_v25, %v7069_v45 }
 0x26f   :  { %v1025_v46 = vadd.f32 %v2855_v20, %v1024_v28 }
 0x270   :  { %v1131_v11 = vmul.f32 %v2859_v36, %v1130_v17 }
 0x271   :  { %v1029_v22 = vsel %vm1028_vm10, %v2855_v20, %v1025_v46 }
 0x272   :  { %v2861_v32 = vpop.eup %2860  ;;  %v1034_v35 = vsel %vm1031_vm12, %v1033_v4, %v1029_v22  ;;  %v1132_v12 = vadd.f32 %v2859_v36, %v1131_v11  ;;  %v1152_v11 = vadd.f32 %v4943_v61, %v1151_v21  ;;  %v1052_v4 = vand.u32 2147483648, %v4947_v31 }
 0x273   :  { %v1042_v43 = vmul.f32 %v2861_v32, %v4947_v31  ;;  %v1056_v17 = vmul.f32 %v1034_v35, %v1014_v7  ;;  %v1120_v40 = vpop.f32.mrf.mxu2  ;;  %vm1047_vm2 = vweird.f32 %v2861_v32  ;;  %v1050_v7 = vand.u32 2147483647, %v4947_v31 }
 0x274   :  { %v1121_v46 = vadd.f32 %v1120_v40, %v4270_v29  ;;  %v1136_v8 = vsel %vm1135_vm15, %v2859_v36, %v1132_v12  ;;  %v1156_v21 = vsel %vm1155_vm3, %v4943_v61, %v1152_v11  ;;  %v1160_v22 = vor.u32 1.1754944e-38, %v1159_v16  ;;  %vm1048_vm5 = vmor %vm1046_vm4, %vm1047_vm2  ;;  %v7096_v11 = vld [vmem:[#allocation90_spill] sm:$0xff]  ;;  %v7097_v16 = vld [vmem:[#allocation37_spill] sm:$0xff] }
 0x275   :  { %v1043_v20 = vsub.f32 1.0, %v1042_v43  ;;  %v1057_v25 = vadd.f32 %v1056_v17, %v954_v60  ;;  %v1141_v28 = vsel %vm1138_vm1, %v1140_v39, %v1136_v8  ;;  %v1053_v60 = vor.u32 1.1754944e-38, %v1052_v4  ;;  %v5077_v4 = vld [vmem:[#allocation7 + $0x168] sm:$0xff] }
 0x276   :  { %v1163_v35 = vmul.f32 %v1141_v28, %v1121_v46  ;;  %vm1051_vm7 = vcmp.eq.f32.partialorder %v1050_v7, 8.507059e+37  ;;  %v1161_v43 = vsel %vm1158_vm6, %v1160_v22, %v1156_v21  ;;  %v7095_v28 = vld [vmem:[#allocation92_spill] sm:$0xff]  ;;  %v7100_v7 = vld [vmem:[#allocation63_spill] sm:$0xff] }
 0x277   :  { %2862 = vtanh.f32 %v1057_v25  ;;  %v1044_v55 = vmul.f32 %v2861_v32, %v1043_v20  ;;  %v1166_v46 = vsub.f32 1.0, %v1161_v43  ;;  %v1168_v20 = vmul.f32 %v1161_v43, %v4610_v37  ;;  %v7074_v37 = vld [vmem:[#allocation83_spill] sm:$0xff]  ;;  %v7102_v22 = vld [vmem:[#allocation100_spill] sm:$0xff] }
 0x278   :  { %v1164_v36 = vadd.f32 %v1163_v35, %v330_v53  ;;  %v5074_v35 = vld [vmem:[#allocation11 + $0x178] sm:$0xff]  ;;  %v5085_v21 = vld [vmem:[#allocation7 + $0x150] sm:$0xff] }
 0x279   :  { %v1045_v50 = vadd.f32 %v2861_v32, %v1044_v55  ;;  %v7099_v55 = vld [vmem:[#allocation57_spill] sm:$0xff]  ;;  %v7103_v43 = vld [vmem:[#allocation103_spill] sm:$0xff] }
 0x27a   :  { %2864 = vtanh.f32 %v1164_v36  ;;  %v5082_v36 = vld [vmem:[#allocation11 + $0x160] sm:$0xff] }
 0x27b   :  { %v1049_v12 = vsel %vm1048_vm5, %v2861_v32, %v1045_v50  ;;  %v7094_v32 = vld [vmem:[#allocation33_spill] sm:$0xff] }
 0x27c   :  { %v1054_v17 = vsel %vm1051_vm7, %v1053_v60, %v1049_v12  ;;  %v7101_v50 = vld [vmem:[#allocation101_spill] sm:$0xff]  ;;  %v5090_v60 = vld [vmem:[#allocation11 + $0x148] sm:$0xff]  ;;  %v5093_v12 = vld [vmem:[#allocation7 + $0x138] sm:$0xff] }
 0x27d   :  { %v2863_v40 = vpop.eup %2862  ;;  %v1059_v39 = vsub.f32 1.0, %v1054_v17  ;;  %v1061_v53 = vmul.f32 %v1054_v17, %v4588_v23  ;;  %v7070_v23 = vld [vmem:[#allocation80_spill] sm:$0xff]  ;;  %v7104_v17 = vld [vmem:[#allocation102_spill] sm:$0xff] }
 0x27f   :  { %v1060_v6 = vmul.f32 %v2863_v40, %v1059_v39  ;;  %v5098_v40 = vld [vmem:[#allocation11 + $0x130] sm:$0xff]  ;;  %v5101_v39 = vld [vmem:[#allocation7 + $0x120] sm:$0xff] }
 0x280   :  { %v2865_v8 = vpop.eup %2864 }
 0x281   :  { %v1167_v61 = vmul.f32 %v2865_v8, %v1166_v46  ;;  %v4974_v31 = vadd.f32 %v1061_v53, %v1060_v6  ;;  %v7105_v46 = vld [vmem:[#allocation105_spill] sm:$0xff]  ;;  %v7106_v6 = vld [vmem:[#allocation104_spill] sm:$0xff]  ;;  %v5109_v8 = vld [vmem:[#allocation7 + $0x108] sm:$0xff] }
 0x282   :  { %v5106_v53 = vld [vmem:[#allocation11 + $0x118] sm:$0xff] }
 0x283   :  { %v4976_v25 = vadd.f32 %v1168_v20, %v1167_v61  ;;  %1246 = vmatmul.f32.vlgmr.msra.gmra.mxu2 %v4974_v31  ;;  %v7107_v61 = vld [vmem:[#allocation107_spill] sm:$0xff]  ;;  %v7108_v20 = vld [vmem:[#allocation106_spill] sm:$0xff] }
 0x284   :  { %1484 = vmatpush.msra.mxu2 %v4594_v59  ;;  %v7071_v59 = vld [vmem:[#allocation81_spill] sm:$0xff] }
 0x285   :  { %1186 = vmatmul.f32.vlgmr.msra.gmra.mxu3 %v4976_v25  ;;  %1206 = vmatmul.f32.vlgmr.msra.gmra.mxu0 %v4976_v25 }
 0x286   :  { %1226 = vmatmul.f32.vlgmr.msra.gmra.mxu1 %v4976_v25  ;;  %1377 = vmatpush.msra.mxu3 %v4619_v62  ;;  %v7075_v62 = vld [vmem:[#allocation52_spill] sm:$0xff] }
 0x287   :  { %1444 = vmatpush.msra.mxu0 %v4622_v34  ;;  %1464 = vmatpush.msra.mxu1 %v4625_v30  ;;  %v7076_v34 = vld [vmem:[#allocation40_spill] sm:$0xff]  ;;  %v7077_v30 = vld [vmem:[#allocation86_spill] sm:$0xff] }
 0x288   :  { %1378 = vmatpush.msra.mxu3 %v4631_v48  ;;  %1485 = vmatpush.msra.mxu2 %v4597_v26  ;;  %v7072_v26 = vld [vmem:[#allocation74_spill] sm:$0xff] }
 0x289   :  { %1445 = vmatpush.msra.mxu0 %v4634_v41  ;;  %1465 = vmatpush.msra.mxu1 %v4637_v10  ;;  %v7078_v48 = vld [vmem:[#allocation54_spill] sm:$0xff]  ;;  %v7080_v41 = vld [vmem:[#allocation56_spill] sm:$0xff] }
 0x28a   :  { %1379 = vmatpush.msra.mxu3 %v4643_v15  ;;  %1486 = vmatpush.msra.mxu2 %v4600_v58  ;;  %v7073_v58 = vld [vmem:[#allocation48_spill] sm:$0xff]  ;;  %v5017_v10 = vld [vmem:[#allocation10 + $0xc8] sm:$0xff] }
 0x28b   :  { %1373 = vmatmul.f32.vlgmr.msrb.gmra.mxu2 %v4976_v25  ;;  %1446 = vmatpush.msra.mxu0 %v4646_v2  ;;  %v7081_v15 = vld [vmem:[#allocation42_spill] sm:$0xff] }
 0x28c   :  { %1380 = vmatpush.msra.mxu3 %v4655_v33  ;;  %1466 = vmatpush.msra.mxu1 %v4649_v18  ;;  %v7082_v2 = vld [vmem:[#allocation62_spill] sm:$0xff]  ;;  %v5023_v18 = vld [vmem:[#allocation10 + $0xb0] sm:$0xff]  ;;  %v5029_v33 = vld [vmem:[#allocation10 + $0x98] sm:$0xff] }
 0x28d   :  { %1266 = vmatmul.f32.vlgmr.msrb.gmra.mxu3 %v4974_v31  ;;  %1286 = vmatmul.f32.vlgmr.msrb.gmra.mxu0 %v4974_v31 }
 0x28e   :  { %1353 = vmatmul.f32.vlgmr.msrb.gmra.mxu1 %v4976_v25  ;;  %1381 = vmatpush.msra.mxu3 %v4661_v57  ;;  %v7085_v57 = vld [vmem:[#allocation67_spill] sm:$0xff] }
 0x28f   :  { %1447 = vmatpush.msra.mxu0 %v4664_v47  ;;  %1467 = vmatpush.msra.mxu1 %v4667_v27  ;;  %v5035_v47 = vld [vmem:[#allocation10 + $0x80] sm:$0xff]  ;;  %v5041_v27 = vld [vmem:[#allocation10 + $0x68] sm:$0xff] }
 0x290   :  { %1382 = vmatpush.msra.mxu3 %v4673_v19  ;;  %1487 = vmatpush.msra.mxu2 %v4603_v54  ;;  %v7079_v54 = vld [vmem:[#allocation76_spill] sm:$0xff] }
 0x291   :  { %1448 = vmatpush.msra.mxu0 %v4676_v56  ;;  %1468 = vmatpush.msra.mxu1 %v7070_v23  ;;  %v5047_v19 = vld [vmem:[#allocation10 + $0x50] sm:$0xff]  ;;  %v5053_v56 = vld [vmem:[#allocation10 + $0x38] sm:$0xff]  ;;  %v5114_v23 = vld [vmem:[#allocation11 + $0x100] sm:$0xff] }
 0x292   :  { %1383 = vmatpush.msra.mxu3 %v7071_v59  ;;  %1488 = vmatpush.msra.mxu2 %v7072_v26  ;;  %v5117_v59 = vld [vmem:[#allocation7 + $0xf0] sm:$0xff]  ;;  %v7109_v26 = vld [vmem:[#allocation109_spill] sm:$0xff] }
 0x293   :  { %1449 = vmatpush.msra.mxu0 %v7073_v58  ;;  %1469 = vmatpush.msra.mxu1 %v7074_v37  ;;  %v7110_v58 = vld [vmem:[#allocation108_spill] sm:$0xff]  ;;  %v5122_v37 = vld [vmem:[#allocation11 + $0xe8] sm:$0xff] }
 0x294   :  { %1384 = vmatpush.msra.mxu3 %v7075_v62  ;;  %1489 = vmatpush.msra.mxu2 %v7076_v34  ;;  %v5125_v62 = vld [vmem:[#allocation7 + $0xd8] sm:$0xff]  ;;  %v7111_v34 = vld [vmem:[#allocation111_spill] sm:$0xff] }
 0x295   :  { %1450 = vmatpush.msra.mxu0 %v7077_v30  ;;  %1470 = vmatpush.msra.mxu1 %v7078_v48  ;;  %v7112_v30 = vld [vmem:[#allocation110_spill] sm:$0xff]  ;;  %v5130_v48 = vld [vmem:[#allocation11 + $0xd0] sm:$0xff] }
 0x296   :  { %1385 = vmatpush.msra.mxu3 %v4709_v9  ;;  %1490 = vmatpush.msra.mxu2 %v7079_v54  ;;  %v7083_v9 = vld [vmem:[#allocation78_spill] sm:$0xff]  ;;  %v5133_v54 = vld [vmem:[#allocation7 + $0xc0] sm:$0xff] }
 0x297   :  { %1451 = vmatpush.msra.mxu0 %v7080_v41  ;;  %1471 = vmatpush.msra.mxu1 %v5017_v10  ;;  %v7113_v41 = vld [vmem:[#allocation113_spill] sm:$0xff] }
 0x298   :  { %1386 = vmatpush.msra.mxu3 %v4719_v52  ;;  %1491 = vmatpush.msra.mxu2 %v7081_v15  ;;  %v7084_v52 = vld [vmem:[#allocation44_spill] sm:$0xff] }
 0x299   :  { %1452 = vmatpush.msra.mxu0 %v7082_v2  ;;  %1472 = vmatpush.msra.mxu1 %v5023_v18  ;;  %v7114_v15 = vld [vmem:[#allocation112_spill] sm:$0xff] }
 0x29a   :  { %1387 = vmatpush.msra.mxu3 %v4729_v3  ;;  %1492 = vmatpush.msra.mxu2 %v7083_v9  ;;  %v7086_v3 = vld [vmem:[#allocation46_spill] sm:$0xff]  ;;  %v5138_v2 = vld [vmem:[#allocation11 + $0xb8] sm:$0xff] }
 0x29b   :  { %1453 = vmatpush.msra.mxu0 %v4732_v38  ;;  %1473 = vmatpush.msra.mxu1 %v5029_v33  ;;  %v7090_v38 = vld [vmem:[#allocation91_spill] sm:$0xff]  ;;  %v5141_v9 = vld [vmem:[#allocation7 + $0xa8] sm:$0xff] }
 0x29c   :  { %1388 = vmatpush.msra.mxu3 %v4739_v13  ;;  %1493 = vmatpush.msra.mxu2 %v7084_v52  ;;  %v7087_v13 = vld [vmem:[#allocation50_spill] sm:$0xff]  ;;  %v7115_v52 = vld [vmem:[#allocation115_spill] sm:$0xff] }
 0x29d   :  { %1454 = vmatpush.msra.mxu0 %v7085_v57  ;;  %1474 = vmatpush.msra.mxu1 %v5035_v47  ;;  %v7116_v57 = vld [vmem:[#allocation114_spill] sm:$0xff] }
 0x29e   :  { %1389 = vmatpush.msra.mxu3 %v4747_v49  ;;  %1494 = vmatpush.msra.mxu2 %v7086_v3  ;;  %v7088_v49 = vld [vmem:[#allocation88_spill] sm:$0xff]  ;;  %v5146_v3 = vld [vmem:[#allocation11 + $0xa0] sm:$0xff] }
 0x29f   :  { %1455 = vmatpush.msra.mxu0 %v4750_v14  ;;  %1475 = vmatpush.msra.mxu1 %v5041_v27  ;;  %v5061_v14 = vld [vmem:[#allocation10 + $0x20] sm:$0xff] }
 0x2a0   :  { %1390 = vmatpush.msra.mxu3 %v4755_v63  ;;  %1495 = vmatpush.msra.mxu2 %v7087_v13  ;;  %v7089_v63 = vld [vmem:[#allocation59_spill] sm:$0xff] }
 0x2a1   :  { %1456 = vmatpush.msra.mxu0 %v4758_v42  ;;  %1476 = vmatpush.msra.mxu1 %v5047_v19  ;;  %v7091_v42 = vld [vmem:[#allocation70_spill] sm:$0xff]  ;;  %v5149_v13 = vld [vmem:[#allocation7 + $0x90] sm:$0xff] }
 0x2a2   :  { %1391 = vmatpush.msra.mxu3 %v4763_v1  ;;  %1496 = vmatpush.msra.mxu2 %v7088_v49  ;;  %v7092_v1 = vld [vmem:[#allocation73_spill] sm:$0xff] }
 0x2a3   :  { %1457 = vmatpush.msra.mxu0 %v4766_v44  ;;  %1477 = vmatpush.msra.mxu1 %v5053_v56  ;;  %v7093_v44 = vld [vmem:[#allocation65_spill] sm:$0xff] }
 0x2a4   :  { %1392 = vmatpush.msra.mxu3 %v4771_v0  ;;  %1497 = vmatpush.msra.mxu2 %v7089_v63  ;;  %v5068_v0 = vld [vmem:[#allocation10 + $0x8] sm:$0xff]  ;;  %v7117_v49 = vld [vmem:[#allocation117_spill] sm:$0xff]  ;;  %v7118_v63 = vld [vmem:[#allocation116_spill] sm:$0xff] }
 0x2a5   :  { %1393 = vmatmul.f32.vlgmr.msra.gmra.mxu3 %v4976_v25  ;;  %1458 = vmatpush.msra.mxu0 %v7090_v38  ;;  %v5154_v38 = vld [vmem:[#allocation11 + $0x88] sm:$0xff] }
 0x2a6   :  { %1504 = vmatpush.msrb.mxu3 %v7091_v42  ;;  %1478 = vmatpush.msra.mxu1 %v5061_v14  ;;  %v5157_v42 = vld [vmem:[#allocation7 + $0x78] sm:$0xff] }
 0x2a7   :  { %1459 = vmatpush.msra.mxu0 %v7092_v1  ;;  %1498 = vmatpush.msra.mxu2 %v7093_v44  ;;  %v7119_v1 = vld [vmem:[#allocation41_spill] sm:$0xff]  ;;  %v7120_v44 = vld [vmem:[#allocation95_spill] sm:$0xff] }
 0x2a8   :  { %1505 = vmatpush.msrb.mxu3 %v7094_v32  ;;  %1479 = vmatpush.msra.mxu1 %v5068_v0  ;;  %v5162_v32 = vld [vmem:[#allocation11 + $0x70] sm:$0xff] }
 0x2a9   :  { %1524 = vmatpush.msrb.mxu0 %v7095_v28  ;;  %1499 = vmatpush.msra.mxu2 %v7096_v11  ;;  %v5165_v28 = vld [vmem:[#allocation7 + $0x60] sm:$0xff]  ;;  %v7122_v11 = vld [vmem:[#allocation118_spill] sm:$0xff] }
 0x2aa   :  { %1506 = vmatpush.msrb.mxu3 %v7097_v16  ;;  %1544 = vmatpush.msrb.mxu1 %v5074_v35  ;;  %7121 = vst [vmem:[#allocation72_spill] sm:$0xff] %v5165_v28  ;;  %v7123_v16 = vld [vmem:[#allocation96_spill] sm:$0xff] }
 0x2ab   :  { %1525 = vmatpush.msrb.mxu0 %v7098_v24  ;;  %1611 = vmatpush.msrb.mxu2 %v5077_v4  ;;  %v5170_v24 = vld [vmem:[#allocation11 + $0x58] sm:$0xff] }
 0x2ac   :  { %1507 = vmatpush.msrb.mxu3 %v7099_v55  ;;  %1545 = vmatpush.msrb.mxu1 %v5082_v36  ;;  %7124 = vst [vmem:[#allocation25_spill] sm:$0xff] %v5170_v24  ;;  %v5173_v55 = vld [vmem:[#allocation7 + $0x48] sm:$0xff] }
 0x2ad   :  { %1526 = vmatpush.msrb.mxu0 %v7100_v7  ;;  %1612 = vmatpush.msrb.mxu2 %v5085_v21  ;;  %7125 = vst [vmem:[#allocation75_spill] sm:$0xff] %v5173_v55  ;;  %v7126_v7 = vld [vmem:[#allocation119_spill] sm:$0xff] }
 0x2ae   :  { %1508 = vmatpush.msrb.mxu3 %v7101_v50  ;;  %1546 = vmatpush.msrb.mxu1 %v5090_v60  ;;  %v7127_v50 = vld [vmem:[#allocation97_spill] sm:$0xff] }
 0x2af   :  { %1527 = vmatpush.msrb.mxu0 %v7102_v22  ;;  %1613 = vmatpush.msrb.mxu2 %v5093_v12  ;;  %v5178_v22 = vld [vmem:[#allocation7 + $0x170] sm:$0xff] }
 0x2b0   :  { %1509 = vmatpush.msrb.mxu3 %v7103_v43  ;;  %1547 = vmatpush.msrb.mxu1 %v5098_v40  ;;  %7128 = vst [vmem:[#allocation47_spill] sm:$0xff] %v5178_v22  ;;  %v5181_v43 = vld [vmem:[#allocation11 + $0x40] sm:$0xff] }
 0x2b1   :  { %1528 = vmatpush.msrb.mxu0 %v7104_v17  ;;  %1614 = vmatpush.msrb.mxu2 %v5101_v39  ;;  %7129 = vst [vmem:[#allocation77_spill] sm:$0xff] %v5181_v43  ;;  %v7130_v17 = vld [vmem:[#allocation98_spill] sm:$0xff] }
 0x2b2   :  { %1510 = vmatpush.msrb.mxu3 %v7105_v46  ;;  %1548 = vmatpush.msrb.mxu1 %v5106_v53  ;;  %v5185_v46 = vld [vmem:[#allocation7 + $0x30] sm:$0xff] }
 0x2b3   :  { %1529 = vmatpush.msrb.mxu0 %v7106_v6  ;;  %1615 = vmatpush.msrb.mxu2 %v5109_v8  ;;  %7131 = vst [vmem:[#allocation27_spill] sm:$0xff] %v5185_v46  ;;  %v5188_v6 = vld [vmem:[#allocation7 + $0x158] sm:$0xff] }
 0x2b4   :  { %1511 = vmatpush.msrb.mxu3 %v7107_v61  ;;  %1549 = vmatpush.msrb.mxu1 %v5114_v23  ;;  %7132 = vst [vmem:[#allocation49_spill] sm:$0xff] %v5188_v6  ;;  %v5191_v61 = vld [vmem:[#allocation11 + $0x28] sm:$0xff] }
 0x2b5   :  { %1530 = vmatpush.msrb.mxu0 %v7108_v20  ;;  %1616 = vmatpush.msrb.mxu2 %v5117_v59  ;;  %7133 = vst [vmem:[#allocation51_spill] sm:$0xff] %v5191_v61  ;;  %v5194_v20 = vld [vmem:[#allocation7 + $0x18] sm:$0xff] }
 0x2b6   :  { %1512 = vmatpush.msrb.mxu3 %v7109_v26  ;;  %1550 = vmatpush.msrb.mxu1 %v5122_v37  ;;  %7134 = vst [vmem:[#allocation53_spill] sm:$0xff] %v5194_v20  ;;  %v5197_v26 = vld [vmem:[#allocation7 + $0x140] sm:$0xff] }
 0x2b7   :  { %1531 = vmatpush.msrb.mxu0 %v7110_v58  ;;  %1617 = vmatpush.msrb.mxu2 %v5125_v62  ;;  %7135 = vst [vmem:[#allocation82_spill] sm:$0xff] %v5197_v26  ;;  %v5200_v58 = vld [vmem:[#allocation11 + $0x10] sm:$0xff] }
 0x2b8   :  { %1513 = vmatpush.msrb.mxu3 %v7111_v34  ;;  %1551 = vmatpush.msrb.mxu1 %v5130_v48  ;;  %7136 = vst [vmem:[#allocation30_spill] sm:$0xff] %v5200_v58  ;;  %v5203_v34 = vld [vmem:[#allocation7] sm:$0xff] }
 0x2b9   :  { %1532 = vmatpush.msrb.mxu0 %v7112_v30  ;;  %1618 = vmatpush.msrb.mxu2 %v5133_v54  ;;  %7137 = vst [vmem:[#allocation23_spill] sm:$0xff] %v5203_v34  ;;  %v5206_v30 = vld [vmem:[#allocation7 + $0x128] sm:$0xff] }
 0x2ba   :  { %1514 = vmatpush.msrb.mxu3 %v7113_v41  ;;  %1552 = vmatpush.msrb.mxu1 %v5138_v2  ;;  %7138 = vst [vmem:[#allocation69_spill] sm:$0xff] %v5206_v30  ;;  %v5209_v41 = vld [vmem:[#allocation7 + $0x110] sm:$0xff] }
 0x2bb   :  { %1533 = vmatpush.msrb.mxu0 %v7114_v15  ;;  %1619 = vmatpush.msrb.mxu2 %v5141_v9  ;;  %7139 = vst [vmem:[#allocation45_spill] sm:$0xff] %v5209_v41  ;;  %v5212_v15 = vld [vmem:[#allocation7 + $0xf8] sm:$0xff] }
 0x2bc   :  { %1515 = vmatpush.msrb.mxu3 %v7115_v52  ;;  %1553 = vmatpush.msrb.mxu1 %v5146_v3  ;;  %7140 = vst [vmem:[#allocation80_spill] sm:$0xff] %v5212_v15  ;;  %v5215_v52 = vld [vmem:[#allocation7 + $0xe0] sm:$0xff] }
 0x2bd   :  { %1534 = vmatpush.msrb.mxu0 %v7116_v57  ;;  %1620 = vmatpush.msrb.mxu2 %v5149_v13  ;;  %7141 = vst [vmem:[#allocation81_spill] sm:$0xff] %v5215_v52  ;;  %v5218_v57 = vld [vmem:[#allocation7 + $0xc8] sm:$0xff] }
 0x2be   :  { %1516 = vmatpush.msrb.mxu3 %v7117_v49  ;;  %1554 = vmatpush.msrb.mxu1 %v5154_v38  ;;  %7142 = vst [vmem:[#allocation74_spill] sm:$0xff] %v5218_v57  ;;  %v5221_v49 = vld [vmem:[#allocation7 + $0xb0] sm:$0xff] }
 0x2bf   :  { %1535 = vmatpush.msrb.mxu0 %v7118_v63  ;;  %1621 = vmatpush.msrb.mxu2 %v5157_v42  ;;  %7143 = vst [vmem:[#allocation48_spill] sm:$0xff] %v5221_v49  ;;  %v5224_v63 = vld [vmem:[#allocation7 + $0x98] sm:$0xff] }
 0x2c0   :  { %1517 = vmatpush.msrb.mxu3 %v7119_v1  ;;  %1555 = vmatpush.msrb.mxu1 %v5162_v32  ;;  %7144 = vst [vmem:[#allocation83_spill] sm:$0xff] %v5224_v63  ;;  %v5227_v1 = vld [vmem:[#allocation7 + $0x80] sm:$0xff] }
 0x2c1   :  { %1536 = vmatpush.msrb.mxu0 %v7120_v44  ;;  %1622 = vmatpush.msrb.mxu2 %v5165_v28  ;;  %7145 = vst [vmem:[#allocation52_spill] sm:$0xff] %v5227_v1  ;;  %v5230_v44 = vld [vmem:[#allocation7 + $0x68] sm:$0xff] }
 0x2c2   :  { %1518 = vmatpush.msrb.mxu3 %v7122_v11  ;;  %1556 = vmatpush.msrb.mxu1 %v5170_v24  ;;  %7146 = vst [vmem:[#allocation40_spill] sm:$0xff] %v5230_v44  ;;  %v5233_v11 = vld [vmem:[#allocation7 + $0x50] sm:$0xff] }
 0x2c3   :  { %1537 = vmatpush.msrb.mxu0 %v7123_v16  ;;  %1623 = vmatpush.msrb.mxu2 %v5173_v55  ;;  %7147 = vst [vmem:[#allocation86_spill] sm:$0xff] %v5233_v11  ;;  %v7148_v16 = vld [vmem:[#allocation24_spill] sm:$0xff] }
 0x2c4   :  { %1519 = vmatpush.msrb.mxu3 %v7126_v7  ;;  %1557 = vmatpush.msrb.mxu1 %v5181_v43  ;;  %v7149_v7 = vld [vmem:[#allocation99_spill] sm:$0xff] }
 0x2c5   :  { %1538 = vmatpush.msrb.mxu0 %v7127_v50  ;;  %1624 = vmatpush.msrb.mxu2 %v5185_v46  ;;  %v7150_v50 = vld [vmem:[#allocation43_spill] sm:$0xff] }
 0x2c6   :  { %1631 = vmatpush.msra.mxu3 %v5178_v22  ;;  %1558 = vmatpush.msrb.mxu1 %v5191_v61  ;;  %v7155_v61 = vld [vmem:[#allocation85_spill] sm:$0xff] }
 0x2c7   :  { %1539 = vmatpush.msrb.mxu0 %v7130_v17  ;;  %1625 = vmatpush.msrb.mxu2 %v5194_v20 }
 0x2c8   :  { %1632 = vmatpush.msra.mxu3 %v5188_v6  ;;  %1559 = vmatpush.msrb.mxu1 %v5200_v58 }
 0x2c9   :  { %1626 = vmatpush.msrb.mxu2 %v5203_v34 }
 0x2ca   :  { %1633 = vmatpush.msra.mxu3 %v5197_v26 }
 0x2cc   :  { %1634 = vmatpush.msra.mxu3 %v5206_v30 }
 0x2ce   :  { %1635 = vmatpush.msra.mxu3 %v5209_v41 }
 0x2d0   :  { %1636 = vmatpush.msra.mxu3 %v5212_v15 }
 0x2d2   :  { %1637 = vmatpush.msra.mxu3 %v5215_v52 }
 0x2d4   :  { %1638 = vmatpush.msra.mxu3 %v5218_v57  ;;  %v7151_v57 = vld [vmem:[#allocation64_spill] sm:$0xff] }
 0x2d6   :  { %1639 = vmatpush.msra.mxu3 %v5221_v49 }
 0x2d8   :  { %1640 = vmatpush.msra.mxu3 %v5224_v63 }
 0x2da   :  { %1641 = vmatpush.msra.mxu3 %v5227_v1  ;;  %v7152_v1 = vld [vmem:[#allocation66_spill] sm:$0xff] }
 0x2dc   :  { %1642 = vmatpush.msra.mxu3 %v5230_v44  ;;  %v7153_v44 = vld [vmem:[#allocation60_spill] sm:$0xff] }
 0x2de   :  { %1643 = vmatpush.msra.mxu3 %v5233_v11  ;;  %v7154_v11 = vld [vmem:[#allocation79_spill] sm:$0xff] }
 0x2e0   :  { %1644 = vmatpush.msra.mxu3 %v7148_v16 }
 0x2e2   :  { %1645 = vmatpush.msra.mxu3 %v7149_v7  ;;  %v7156_v7 = vld [vmem:[#allocation26_spill] sm:$0xff] }
 0x2e3   :  { %v292_v6 = vadd.f32 %v7156_v7, %v7155_v61 }
 0x2e4   :  { %1646 = vmatpush.msra.mxu3 %v7150_v50  ;;  %v7157_v50 = vld [vmem:[#allocation87_spill] sm:$0xff] }
 0x302   :  { %v1207_v26 = vpop.f32.mrf.mxu0 }
 0x303   :  { %v1227_v17 = vpop.f32.mrf.mxu1 }
 0x306   :  { %v1247_v63 = vpop.f32.mrf.mxu2 }
 0x307   :  { %v1248_v52 = vadd.f32 %v1247_v63, %v7151_v57  ;;  %v7158_v63 = vld [vmem:[#allocation38_spill] sm:$0xff] }
 0x308   :  { %v1187_v49 = vpop.f32.mrf.mxu3  ;;  %v1208_v57 = vadd.f32 %v1207_v26, %v7158_v63 }
 0x309   :  { %v1188_v15 = vadd.f32 %v1187_v49, %v7152_v1 }
 0x30b   :  { %v1290_v41 = vadd.f32 %v1248_v52, %v1188_v15  ;;  %v1354_v30 = vpop.f32.mrf.mxu1  ;;  %v7159_v15 = vld [vmem:[#allocation68_spill] sm:$0xff] }
 0x30c   :  { %v1355_v34 = vadd.f32 %v1354_v30, %v7153_v44 }
 0x30d   :  { %v2779_v58 = vmul.f32 -1.442695, %v1290_v41 }
 0x30e   :  { %v1397_v20 = vadd.f32 %v1355_v34, %v7154_v11  ;;  %v1374_v16 = vpop.f32.mrf.mxu2 }
 0x30f   :  { %2866 = vpow2.f32 %v2779_v58  ;;  %v1375_v46 = vadd.f32 %v1374_v16, %v7157_v50 }
 0x310   :  { %v2781_v43 = vmul.f32 -1.442695, %v1397_v20  ;;  %v1267_v22 = vpop.f32.mrf.mxu3 }
 0x311   :  { %v1417_v49 = vadd.f32 %v1375_v46, %v292_v6  ;;  %v1268_v52 = vadd.f32 %v1267_v22, %v7159_v15  ;;  %v1287_v6 = vpop.f32.mrf.mxu0 }
 0x312   :  { %2868 = vpow2.f32 %v2781_v43 }
 0x313   :  { %v2782_v30 = vmul.f32 -1.442695, %v1417_v49  ;;  %v1310_v41 = vadd.f32 %v1268_v52, %v1208_v57 }
 0x315   :  { %v2867_v44 = vpop.eup %2866  ;;  %2870 = vpow2.f32 %v2782_v30  ;;  %v2780_v34 = vmul.f32 -1.442695, %v1310_v41 }
 0x316   :  { %v1294_v11 = vadd.f32 1.0, %v2867_v44 }
 0x317   :  { %2872 = vpow2.f32 %v2780_v34  ;;  %v1228_v34 = vadd.f32 %v1227_v17, %v7069_v45 }
 0x318   :  { %v2869_v1 = vpop.eup %2868  ;;  %2874 = vrcp.f32 %v1294_v11  ;;  %v1304_v44 = vand.u32 2147483647, %v1294_v11  ;;  %v1306_v49 = vand.u32 2147483648, %v1294_v11  ;;  %vm1300_vm9 = vweird.f32 %v1294_v11 }
 0x319   :  { %v1401_v58 = vadd.f32 1.0, %v2869_v1 }
 0x31a   :  { %vm1305_vm10 = vcmp.eq.f32.partialorder %v1304_v44, 8.507059e+37 }
 0x31b   :  { %v2871_v7 = vpop.eup %2870  ;;  %2876 = vrcp.f32 %v1401_v58  ;;  %v1411_v30 = vand.u32 2147483647, %v1401_v58  ;;  %vm1407_vm12 = vweird.f32 %v1401_v58 }
 0x31c   :  { %v5248_v20 = vadd.f32 1.0, %v2871_v7  ;;  %v1288_v7 = vadd.f32 %v1287_v6, %v7068_v5 }
 0x31d   :  { %v2873_v16 = vpop.eup %2872  ;;  %vm5258_vm14 = vcmp.eq.f32.partialorder %v1411_v30, 8.507059e+37 }
 0x31e   :  { %v2875_v26 = vpop.eup %2874  ;;  %2878 = vrcp.f32 %v5248_v20  ;;  %v5251_v22 = vadd.f32 1.0, %v2873_v16  ;;  %v1413_v16 = vand.u32 2147483648, %v1401_v58  ;;  %vm1427_vm2 = vweird.f32 %v5248_v20 }
 0x31f   :  { %v1296_v43 = vmul.f32 %v2875_v26, %v1294_v11  ;;  %vm1301_vm8 = vweird.f32 %v2875_v26 }
 0x320   :  { %2880 = vrcp.f32 %v5251_v22  ;;  %vm1302_vm11 = vmor %vm1300_vm9, %vm1301_vm8  ;;  %v1414_v44 = vor.u32 1.1754944e-38, %v1413_v16  ;;  %vm1320_vm4 = vweird.f32 %v5251_v22 }
 0x321   :  { %v2877_v46 = vpop.eup %2876  ;;  %v1297_v57 = vsub.f32 1.0, %v1296_v43  ;;  %v1307_v43 = vor.u32 1.1754944e-38, %v1306_v49 }
 0x322   :  { %v1403_v52 = vmul.f32 %v2877_v46, %v1401_v58  ;;  %vm1408_vm13 = vweird.f32 %v2877_v46  ;;  %v5322_v58 = vld [vmem:[#allocation10 + $0x140] sm:$0xff] }
 0x323   :  { %v1298_v1 = vmul.f32 %v2875_v26, %v1297_v57  ;;  %vm1409_vm15 = vmor %vm1407_vm12, %vm1408_vm13 }
 0x324   :  { %v2879_v41 = vpop.eup %2878  ;;  %v1404_v50 = vsub.f32 1.0, %v1403_v52 }
 0x325   :  { %v1299_v61 = vadd.f32 %v2875_v26, %v1298_v1  ;;  %v1423_v15 = vmul.f32 %v2879_v41, %v5248_v20  ;;  %v1324_v1 = vand.u32 2147483647, %v5251_v22  ;;  %vm1428_vm0 = vweird.f32 %v2879_v41 }
 0x326   :  { %v2881_v63 = vpop.eup %2880  ;;  %v1405_v55 = vmul.f32 %v2877_v46, %v1404_v50  ;;  %vm5272_vm3 = vmor %vm1427_vm2, %vm1428_vm0 }
 0x327   :  { %v1303_v57 = vsel %vm1302_vm11, %v2875_v26, %v1299_v61  ;;  %v1424_v24 = vsub.f32 1.0, %v1423_v15  ;;  %v1316_v28 = vmul.f32 %v2881_v63, %v5251_v22  ;;  %vm1321_vm1 = vweird.f32 %v2881_v63 }
 0x328   :  { %v1308_v6 = vsel %vm1305_vm10, %v1307_v43, %v1303_v57  ;;  %v1394_v52 = vpop.f32.mrf.mxu3  ;;  %v1406_v11 = vadd.f32 %v2877_v46, %v1405_v55  ;;  %v1326_v15 = vand.u32 2147483648, %v5251_v22  ;;  %v7162_v43 = vld [vmem:[#allocation28_spill] sm:$0xff]  ;;  %vm1322_vm5 = vmor %vm1320_vm4, %vm1321_vm1  ;;  %vm1325_vm6 = vcmp.eq.f32.partialorder %v1324_v1, 8.507059e+37  ;;  %v5297_v1 = vld [vmem:[#allocation10 + $0x168] sm:$0xff] }
 0x329   :  { %v1330_v45 = vmul.f32 %v1308_v6, %v1288_v7  ;;  %v1425_v5 = vmul.f32 %v2879_v41, %v1424_v24  ;;  %v1317_v49 = vsub.f32 1.0, %v1316_v28  ;;  %v1395_v50 = vadd.f32 %v1394_v52, %v4270_v29 }
 0x32a   :  { %v1410_v61 = vsel %vm1409_vm15, %v2877_v46, %v1406_v11  ;;  %v333_v7 = vadd.f32 %v7162_v43, %v4274_v51  ;;  %v1433_v28 = vand.u32 2147483648, %v5248_v20  ;;  %v5309_v43 = vld [vmem:[#allocation10 + $0x150] sm:$0xff] }
 0x32b   :  { %v1331_v26 = vadd.f32 %v1330_v45, %v1228_v34  ;;  %v1415_v30 = vsel %vm5258_vm14, %v1414_v44, %v1410_v61  ;;  %v1426_v55 = vadd.f32 %v2879_v41, %v1425_v5  ;;  %v1318_v16 = vmul.f32 %v2881_v63, %v1317_v49 }
 0x32c   :  { %v1437_v24 = vmul.f32 %v1415_v30, %v1395_v50  ;;  %v1431_v45 = vand.u32 2147483647, %v5248_v20  ;;  %v1327_v34 = vor.u32 1.1754944e-38, %v1326_v15  ;;  %v1434_v6 = vor.u32 1.1754944e-38, %v1433_v28  ;;  %v5315_v28 = vld [vmem:[#allocation7 + $0x148] sm:$0xff] }
 0x32d   :  { %2882 = vtanh.f32 %v1331_v26  ;;  %v1319_v46 = vadd.f32 %v2881_v63, %v1318_v16  ;;  %v1430_v57 = vsel %vm5272_vm3, %v2879_v41, %v1426_v55  ;;  %v5288_v41 = vld [vmem:[#allocation10 + $0x178] sm:$0xff]  ;;  %v5306_v16 = vld [vmem:[#allocation10 + $0x160] sm:$0xff] }
 0x32e   :  { %v1438_v5 = vadd.f32 %v1437_v24, %v333_v7  ;;  %vm1432_vm7 = vcmp.eq.f32.partialorder %v1431_v45, 8.507059e+37  ;;  %v5303_v55 = vld [vmem:[#allocation7 + $0x160] sm:$0xff]  ;;  %v5325_v45 = vld [vmem:[#allocation7 + $0x130] sm:$0xff] }
 0x32f   :  { %v1323_v17 = vsel %vm1322_vm5, %v2881_v63, %v1319_v46  ;;  %v1435_v44 = vsel %vm1432_vm7, %v1434_v6, %v1430_v57  ;;  %v5312_v7 = vld [vmem:[#allocation10 + $0x158] sm:$0xff]  ;;  %v5328_v46 = vld [vmem:[#allocation10 + $0x148] sm:$0xff]  ;;  %v5346_v6 = vld [vmem:[#allocation10 + $0x130] sm:$0xff] }
 0x330   :  { %2884 = vtanh.f32 %v1438_v5  ;;  %v1328_v52 = vsel %vm1325_vm6, %v1327_v34, %v1323_v17  ;;  %v1440_v22 = vsub.f32 1.0, %v1435_v44  ;;  %v1442_v30 = vmul.f32 %v1435_v44, %v4976_v25  ;;  %v5300_v25 = vld [vmem:[#allocation10 + $0x170] sm:$0xff]  ;;  %v5319_v24 = vld [vmem:[#allocation10 + $0x138] sm:$0xff]  ;;  %v5337_v34 = vld [vmem:[#allocation10 + $0x120] sm:$0xff] }
 0x331   :  { %v1333_v11 = vsub.f32 1.0, %v1328_v52  ;;  %v1335_v50 = vmul.f32 %v1328_v52, %v4974_v31  ;;  %v5294_v31 = vld [vmem:[#allocation7 + $0x178] sm:$0xff]  ;;  %v5340_v57 = vld [vmem:[#allocation10 + $0x128] sm:$0xff]  ;;  %v5343_v17 = vld [vmem:[#allocation7 + $0x100] sm:$0xff] }
 0x332   :  { %v5334_v5 = vld [vmem:[#allocation7 + $0x118] sm:$0xff]  ;;  %v5349_v52 = vld [vmem:[#allocation10 + $0x108] sm:$0xff] }
 0x333   :  { %v2883_v49 = vpop.eup %2882  ;;  %v5355_v44 = vld [vmem:[#allocation7 + $0xe8] sm:$0xff] }
 0x334   :  { %v1334_v20 = vmul.f32 %v2883_v49, %v1333_v11  ;;  %v5352_v11 = vld [vmem:[#allocation10 + $0x110] sm:$0xff]  ;;  %7165 = vst [vmem:[#allocation54_spill] sm:$0xff] %v5355_v44  ;;  %v5358_v49 = vld [vmem:[#allocation10 + $0x118] sm:$0xff] }
 0x336   :  { %v2885_v61 = vpop.eup %2884  ;;  %v5282_v26 = vadd.f32 %v1335_v50, %v1334_v20  ;;  %v5361_v20 = vld [vmem:[#allocation10 + $0xf0] sm:$0xff]  ;;  %v5364_v50 = vld [vmem:[#allocation10 + $0xf8] sm:$0xff] }
 0x337   :  { %v1441_v15 = vmul.f32 %v2885_v61, %v1440_v22  ;;  %7166 = vst [vmem:[#allocation76_spill] sm:$0xff] %v5361_v20  ;;  %v5367_v22 = vld [vmem:[#allocation7 + $0xd0] sm:$0xff]  ;;  %v5370_v61 = vld [vmem:[#allocation10 + $0x100] sm:$0xff] }
 0x338   :  { %1520 = vmatmul.f32.vlgmr.msrb.gmra.mxu3 %v5282_v26  ;;  %7167 = vst [vmem:[#allocation56_spill] sm:$0xff] %v5364_v50 }
 0x339   :  { %v5286_v63 = vadd.f32 %v1442_v30, %v1441_v15  ;;  %1758 = vmatpush.msrb.mxu3 %v5288_v41  ;;  %7168 = vst [vmem:[#allocation42_spill] sm:$0xff] %v5367_v22  ;;  %v5373_v15 = vld [vmem:[#allocation10 + $0xd8] sm:$0xff]  ;;  %v5376_v30 = vld [vmem:[#allocation10 + $0xe0] sm:$0xff] }
 0x33a   :  { %7169 = vst [vmem:[#allocation62_spill] sm:$0xff] %v5373_v15 }
 0x33b   :  { %1460 = vmatmul.f32.vlgmr.msra.gmra.mxu0 %v5286_v63  ;;  %1480 = vmatmul.f32.vlgmr.msra.gmra.mxu1 %v5286_v63  ;;  %7170 = vst [vmem:[#allocation78_spill] sm:$0xff] %v5376_v30 }
 0x33c   :  { %1500 = vmatmul.f32.vlgmr.msra.gmra.mxu2 %v5286_v63  ;;  %1651 = vmatpush.msra.mxu0 %v5294_v31 }
 0x33d   :  { %1718 = vmatpush.msra.mxu1 %v5297_v1  ;;  %1738 = vmatpush.msra.mxu2 %v5300_v25 }
 0x33e   :  { %1652 = vmatpush.msra.mxu0 %v5303_v55  ;;  %1759 = vmatpush.msrb.mxu3 %v5306_v16 }
 0x33f   :  { %1719 = vmatpush.msra.mxu1 %v5309_v43  ;;  %1739 = vmatpush.msra.mxu2 %v5312_v7 }
 0x340   :  { %1653 = vmatpush.msra.mxu0 %v5315_v28  ;;  %1647 = vmatmul.f32.vlgmr.msra.gmra.mxu3 %v5286_v63 }
 0x341   :  { %1720 = vmatpush.msra.mxu1 %v5319_v24  ;;  %1740 = vmatpush.msra.mxu2 %v5322_v58 }
 0x342   :  { %1654 = vmatpush.msra.mxu0 %v5325_v45  ;;  %1760 = vmatpush.msrb.mxu3 %v5328_v46 }
 0x343   :  { %1540 = vmatmul.f32.vlgmr.msrb.gmra.mxu0 %v5282_v26  ;;  %1560 = vmatmul.f32.vlgmr.msrb.gmra.mxu1 %v5282_v26 }
 0x344   :  { %1627 = vmatmul.f32.vlgmr.msrb.gmra.mxu2 %v5286_v63  ;;  %1655 = vmatpush.msra.mxu0 %v5334_v5 }
 0x345   :  { %1721 = vmatpush.msra.mxu1 %v5337_v34  ;;  %1741 = vmatpush.msra.mxu2 %v5340_v57 }
 0x346   :  { %1656 = vmatpush.msra.mxu0 %v5343_v17  ;;  %1761 = vmatpush.msrb.mxu3 %v5346_v6 }
 0x347   :  { %1722 = vmatpush.msra.mxu1 %v5349_v52  ;;  %1742 = vmatpush.msra.mxu2 %v5352_v11 }
 0x348   :  { %1657 = vmatpush.msra.mxu0 %v5355_v44  ;;  %1762 = vmatpush.msrb.mxu3 %v5358_v49  ;;  %v5389_v44 = vld [vmem:[#allocation7 + $0xa0] sm:$0xff] }
 0x349   :  { %1723 = vmatpush.msra.mxu1 %v5361_v20  ;;  %1743 = vmatpush.msra.mxu2 %v5364_v50  ;;  %v5379_v20 = vld [vmem:[#allocation7 + $0xb8] sm:$0xff]  ;;  %v5382_v50 = vld [vmem:[#allocation10 + $0xe8] sm:$0xff]  ;;  %7173 = vst [vmem:[#allocation46_spill] sm:$0xff] %v5389_v44 }
 0x34a   :  { %1658 = vmatpush.msra.mxu0 %v5367_v22  ;;  %1763 = vmatpush.msrb.mxu3 %v5370_v61  ;;  %7171 = vst [vmem:[#allocation44_spill] sm:$0xff] %v5379_v20  ;;  %v5385_v22 = vld [vmem:[#allocation10 + $0xc0] sm:$0xff] }
 0x34b   :  { %1724 = vmatpush.msra.mxu1 %v5373_v15  ;;  %1744 = vmatpush.msra.mxu2 %v5376_v30  ;;  %7172 = vst [vmem:[#allocation67_spill] sm:$0xff] %v5385_v22  ;;  %v5392_v15 = vld [vmem:[#allocation10 + $0xd0] sm:$0xff]  ;;  %v5395_v30 = vld [vmem:[#allocation10 + $0xa8] sm:$0xff] }
 0x34c   :  { %1659 = vmatpush.msra.mxu0 %v5379_v20  ;;  %1764 = vmatpush.msrb.mxu3 %v5382_v50  ;;  %7174 = vst [vmem:[#allocation50_spill] sm:$0xff] %v5395_v30  ;;  %v5399_v20 = vld [vmem:[#allocation7 + $0x88] sm:$0xff] }
 0x34d   :  { %1725 = vmatpush.msra.mxu1 %v5385_v22  ;;  %1745 = vmatpush.msra.mxu2 %v5017_v10  ;;  %7175 = vst [vmem:[#allocation88_spill] sm:$0xff] %v5399_v20  ;;  %v5402_v22 = vld [vmem:[#allocation10 + $0xb8] sm:$0xff]  ;;  %v5405_v10 = vld [vmem:[#allocation10 + $0x90] sm:$0xff] }
 0x34e   :  { %1660 = vmatpush.msra.mxu0 %v5389_v44  ;;  %1765 = vmatpush.msrb.mxu3 %v5392_v15  ;;  %7176 = vst [vmem:[#allocation59_spill] sm:$0xff] %v5405_v10  ;;  %v5409_v44 = vld [vmem:[#allocation7 + $0x70] sm:$0xff] }
 0x34f   :  { %1726 = vmatpush.msra.mxu1 %v5395_v30  ;;  %1746 = vmatpush.msra.mxu2 %v5023_v18  ;;  %7177 = vst [vmem:[#allocation91_spill] sm:$0xff] %v5409_v44  ;;  %v5412_v30 = vld [vmem:[#allocation10 + $0xa0] sm:$0xff]  ;;  %v5415_v18 = vld [vmem:[#allocation10 + $0x78] sm:$0xff] }
 0x350   :  { %1661 = vmatpush.msra.mxu0 %v5399_v20  ;;  %1766 = vmatpush.msrb.mxu3 %v5402_v22  ;;  %7178 = vst [vmem:[#allocation70_spill] sm:$0xff] %v5415_v18  ;;  %v5419_v20 = vld [vmem:[#allocation7 + $0x58] sm:$0xff] }
 0x351   :  { %1727 = vmatpush.msra.mxu1 %v5405_v10  ;;  %1747 = vmatpush.msra.mxu2 %v5029_v33  ;;  %7179 = vst [vmem:[#allocation73_spill] sm:$0xff] %v5419_v20  ;;  %v5422_v10 = vld [vmem:[#allocation10 + $0x88] sm:$0xff]  ;;  %v5425_v33 = vld [vmem:[#allocation10 + $0x60] sm:$0xff] }
 0x352   :  { %1662 = vmatpush.msra.mxu0 %v5409_v44  ;;  %1767 = vmatpush.msrb.mxu3 %v5412_v30  ;;  %7180 = vst [vmem:[#allocation65_spill] sm:$0xff] %v5425_v33  ;;  %v5429_v44 = vld [vmem:[#allocation7 + $0x40] sm:$0xff] }
 0x353   :  { %1728 = vmatpush.msra.mxu1 %v5415_v18  ;;  %1748 = vmatpush.msra.mxu2 %v5035_v47  ;;  %7181 = vst [vmem:[#allocation33_spill] sm:$0xff] %v5429_v44  ;;  %v5432_v18 = vld [vmem:[#allocation10 + $0x70] sm:$0xff]  ;;  %v5435_v47 = vld [vmem:[#allocation10 + $0x48] sm:$0xff] }
 0x354   :  { %1663 = vmatpush.msra.mxu0 %v5419_v20  ;;  %1768 = vmatpush.msrb.mxu3 %v5422_v10  ;;  %7182 = vst [vmem:[#allocation92_spill] sm:$0xff] %v5435_v47  ;;  %v5439_v20 = vld [vmem:[#allocation7 + $0x28] sm:$0xff] }
 0x355   :  { %1729 = vmatpush.msra.mxu1 %v5425_v33  ;;  %1749 = vmatpush.msra.mxu2 %v5041_v27  ;;  %7183 = vst [vmem:[#allocation90_spill] sm:$0xff] %v5439_v20  ;;  %v5442_v33 = vld [vmem:[#allocation10 + $0x58] sm:$0xff]  ;;  %v5445_v27 = vld [vmem:[#allocation10 + $0x30] sm:$0xff] }
 0x356   :  { %1664 = vmatpush.msra.mxu0 %v5429_v44  ;;  %1769 = vmatpush.msrb.mxu3 %v5432_v18  ;;  %7184 = vst [vmem:[#allocation37_spill] sm:$0xff] %v5445_v27  ;;  %v5449_v44 = vld [vmem:[#allocation7 + $0x10] sm:$0xff] }
 0x357   :  { %1730 = vmatpush.msra.mxu1 %v5435_v47  ;;  %1750 = vmatpush.msra.mxu2 %v5047_v19  ;;  %7185 = vst [vmem:[#allocation35_spill] sm:$0xff] %v5449_v44  ;;  %v5452_v47 = vld [vmem:[#allocation10 + $0x40] sm:$0xff]  ;;  %v5456_v19 = vld [vmem:[#allocation10 + $0x18] sm:$0xff] }
 0x358   :  { %1665 = vmatpush.msra.mxu0 %v5439_v20  ;;  %1770 = vmatpush.msrb.mxu3 %v5442_v33  ;;  %7186 = vst [vmem:[#allocation57_spill] sm:$0xff] %v5452_v47  ;;  %v5459_v20 = vld [vmem:[#allocation11 + $0x168] sm:$0xff] }
 0x359   :  { %1731 = vmatpush.msra.mxu1 %v5445_v27  ;;  %1751 = vmatpush.msra.mxu2 %v5053_v56  ;;  %7187 = vst [vmem:[#allocation63_spill] sm:$0xff] %v5459_v20  ;;  %v5463_v56 = vld [vmem:[#allocation10] sm:$0xff]  ;;  %v5469_v27 = vld [vmem:[#allocation11 + $0x150] sm:$0xff] }
 0x35a   :  { %1666 = vmatpush.msra.mxu0 %v5449_v44  ;;  %1771 = vmatpush.msrb.mxu3 %v5452_v47  ;;  %7188 = vst [vmem:[#allocation101_spill] sm:$0xff] %v5463_v56  ;;  %v5466_v44 = vld [vmem:[#allocation10 + $0x28] sm:$0xff]  ;;  %v5472_v47 = vld [vmem:[#allocation11 + $0x170] sm:$0xff] }
 0x35b   :  { %1667 = vmatmul.f32.vlgmr.msra.gmra.mxu0 %v5286_v63  ;;  %1732 = vmatpush.msra.mxu1 %v5456_v19  ;;  %7189 = vst [vmem:[#allocation100_spill] sm:$0xff] %v5469_v27 }
 0x35c   :  { %1778 = vmatpush.msrb.mxu0 %v5459_v20  ;;  %1752 = vmatpush.msra.mxu2 %v5061_v14  ;;  %v5476_v20 = vld [vmem:[#allocation10 + $0x10] sm:$0xff]  ;;  %v5479_v14 = vld [vmem:[#allocation11 + $0x138] sm:$0xff] }
 0x35d   :  { %1733 = vmatpush.msra.mxu1 %v5463_v56  ;;  %1772 = vmatpush.msrb.mxu3 %v5466_v44  ;;  %7190 = vst [vmem:[#allocation103_spill] sm:$0xff] %v5479_v14  ;;  %v5482_v56 = vld [vmem:[#allocation11 + $0x158] sm:$0xff] }
 0x35e   :  { %1779 = vmatpush.msrb.mxu0 %v5469_v27  ;;  %1753 = vmatpush.msra.mxu2 %v5068_v0  ;;  %7191 = vst [vmem:[#allocation102_spill] sm:$0xff] %v5482_v56  ;;  %v5487_v27 = vld [vmem:[#allocation11 + $0x120] sm:$0xff] }
 0x35f   :  { %1798 = vmatpush.msrb.mxu1 %v5472_v47  ;;  %1773 = vmatpush.msrb.mxu3 %v5476_v20  ;;  %7192 = vst [vmem:[#allocation105_spill] sm:$0xff] %v5487_v27  ;;  %v5490_v0 = vld [vmem:[#allocation11 + $0x140] sm:$0xff] }
 0x360   :  { %1780 = vmatpush.msrb.mxu0 %v5479_v14  ;;  %1818 = vmatpush.msrb.mxu2 %v5074_v35  ;;  %7193 = vst [vmem:[#allocation104_spill] sm:$0xff] %v5490_v0  ;;  %v5495_v14 = vld [vmem:[#allocation11 + $0x108] sm:$0xff]  ;;  %v5503_v35 = vld [vmem:[#allocation11 + $0xf0] sm:$0xff] }
 0x361   :  { %1799 = vmatpush.msrb.mxu1 %v5482_v56  ;;  %1885 = vmatpush.msra.mxu3 %v5077_v4  ;;  %7194 = vst [vmem:[#allocation107_spill] sm:$0xff] %v5495_v14  ;;  %v5498_v56 = vld [vmem:[#allocation11 + $0x128] sm:$0xff]  ;;  %v5506_v4 = vld [vmem:[#allocation11 + $0x110] sm:$0xff] }
 0x362   :  { %1781 = vmatpush.msrb.mxu0 %v5487_v27  ;;  %1819 = vmatpush.msrb.mxu2 %v5082_v36  ;;  %7195 = vst [vmem:[#allocation106_spill] sm:$0xff] %v5498_v56  ;;  %v5511_v36 = vld [vmem:[#allocation11 + $0xd8] sm:$0xff] }
 0x363   :  { %1800 = vmatpush.msrb.mxu1 %v5490_v0  ;;  %1886 = vmatpush.msra.mxu3 %v5085_v21  ;;  %7196 = vst [vmem:[#allocation109_spill] sm:$0xff] %v5503_v35  ;;  %v5514_v21 = vld [vmem:[#allocation11 + $0xf8] sm:$0xff] }
 0x364   :  { %1782 = vmatpush.msrb.mxu0 %v5495_v14  ;;  %1820 = vmatpush.msrb.mxu2 %v5090_v60  ;;  %7197 = vst [vmem:[#allocation108_spill] sm:$0xff] %v5506_v4  ;;  %v5519_v60 = vld [vmem:[#allocation11 + $0xc0] sm:$0xff] }
 0x365   :  { %1801 = vmatpush.msrb.mxu1 %v5498_v56  ;;  %1887 = vmatpush.msra.mxu3 %v5093_v12  ;;  %7198 = vst [vmem:[#allocation111_spill] sm:$0xff] %v5511_v36  ;;  %v5522_v12 = vld [vmem:[#allocation11 + $0xe0] sm:$0xff] }
 0x366   :  { %1783 = vmatpush.msrb.mxu0 %v5503_v35  ;;  %1821 = vmatpush.msrb.mxu2 %v5098_v40  ;;  %7199 = vst [vmem:[#allocation110_spill] sm:$0xff] %v5514_v21  ;;  %v5527_v40 = vld [vmem:[#allocation11 + $0xa8] sm:$0xff] }
 0x367   :  { %1802 = vmatpush.msrb.mxu1 %v5506_v4  ;;  %1888 = vmatpush.msra.mxu3 %v5101_v39  ;;  %7200 = vst [vmem:[#allocation113_spill] sm:$0xff] %v5519_v60  ;;  %v5530_v39 = vld [vmem:[#allocation11 + $0xc8] sm:$0xff] }
 0x368   :  { %1784 = vmatpush.msrb.mxu0 %v5511_v36  ;;  %1822 = vmatpush.msrb.mxu2 %v5106_v53  ;;  %7201 = vst [vmem:[#allocation112_spill] sm:$0xff] %v5522_v12  ;;  %v5535_v53 = vld [vmem:[#allocation11 + $0x90] sm:$0xff] }
 0x369   :  { %1803 = vmatpush.msrb.mxu1 %v5514_v21  ;;  %1889 = vmatpush.msra.mxu3 %v5109_v8  ;;  %7202 = vst [vmem:[#allocation115_spill] sm:$0xff] %v5527_v40  ;;  %v5538_v8 = vld [vmem:[#allocation11 + $0xb0] sm:$0xff] }
 0x36a   :  { %1785 = vmatpush.msrb.mxu0 %v5519_v60  ;;  %1823 = vmatpush.msrb.mxu2 %v5114_v23  ;;  %7203 = vst [vmem:[#allocation114_spill] sm:$0xff] %v5530_v39  ;;  %v5543_v23 = vld [vmem:[#allocation11 + $0x78] sm:$0xff]  ;;  %v7250_v21 = vld [vmem:[#allocation87_spill] sm:$0xff] }
 0x36b   :  { %1804 = vmatpush.msrb.mxu1 %v5522_v12  ;;  %1890 = vmatpush.msra.mxu3 %v5117_v59  ;;  %7204 = vst [vmem:[#allocation117_spill] sm:$0xff] %v5535_v53  ;;  %v5546_v59 = vld [vmem:[#allocation11 + $0x98] sm:$0xff] }
 0x36c   :  { %1786 = vmatpush.msrb.mxu0 %v5527_v40  ;;  %1824 = vmatpush.msrb.mxu2 %v5122_v37  ;;  %7205 = vst [vmem:[#allocation116_spill] sm:$0xff] %v5538_v8  ;;  %v5551_v37 = vld [vmem:[#allocation11 + $0x60] sm:$0xff]  ;;  %v7247_v40 = vld [vmem:[#allocation68_spill] sm:$0xff] }
 0x36d   :  { %1805 = vmatpush.msrb.mxu1 %v5530_v39  ;;  %1891 = vmatpush.msra.mxu3 %v5125_v62  ;;  %7206 = vst [vmem:[#allocation41_spill] sm:$0xff] %v5543_v23  ;;  %v5554_v62 = vld [vmem:[#allocation11 + $0x80] sm:$0xff] }
 0x36e   :  { %1787 = vmatpush.msrb.mxu0 %v5535_v53  ;;  %1825 = vmatpush.msrb.mxu2 %v5130_v48  ;;  %7207 = vst [vmem:[#allocation95_spill] sm:$0xff] %v5546_v59  ;;  %v5559_v48 = vld [vmem:[#allocation11 + $0x48] sm:$0xff]  ;;  %v7248_v12 = vld [vmem:[#allocation85_spill] sm:$0xff] }
 0x36f   :  { %1806 = vmatpush.msrb.mxu1 %v5538_v8  ;;  %1892 = vmatpush.msra.mxu3 %v5133_v54  ;;  %7208 = vst [vmem:[#allocation118_spill] sm:$0xff] %v5551_v37  ;;  %v5562_v54 = vld [vmem:[#allocation11 + $0x68] sm:$0xff] }
 0x370   :  { %1788 = vmatpush.msrb.mxu0 %v5543_v23  ;;  %1826 = vmatpush.msrb.mxu2 %v5138_v2  ;;  %7209 = vst [vmem:[#allocation96_spill] sm:$0xff] %v5554_v62  ;;  %v5567_v2 = vld [vmem:[#allocation11 + $0x30] sm:$0xff] }
 0x371   :  { %1807 = vmatpush.msrb.mxu1 %v5546_v59  ;;  %1893 = vmatpush.msra.mxu3 %v5141_v9  ;;  %7210 = vst [vmem:[#allocation119_spill] sm:$0xff] %v5559_v48  ;;  %v5570_v9 = vld [vmem:[#allocation11 + $0x50] sm:$0xff] }
 0x372   :  { %1789 = vmatpush.msrb.mxu0 %v5551_v37  ;;  %1827 = vmatpush.msrb.mxu2 %v5146_v3  ;;  %7211 = vst [vmem:[#allocation97_spill] sm:$0xff] %v5562_v54  ;;  %v7214_v3 = vld [vmem:[#allocation72_spill] sm:$0xff]  ;;  %v7229_v37 = vld [vmem:[#allocation30_spill] sm:$0xff] }
 0x373   :  { %1808 = vmatpush.msrb.mxu1 %v5554_v62  ;;  %1894 = vmatpush.msra.mxu3 %v5149_v13  ;;  %7212 = vst [vmem:[#allocation98_spill] sm:$0xff] %v5567_v2  ;;  %v5575_v13 = vld [vmem:[#allocation11 + $0x18] sm:$0xff] }
 0x374   :  { %1790 = vmatpush.msrb.mxu0 %v5559_v48  ;;  %1828 = vmatpush.msrb.mxu2 %v5154_v38  ;;  %7213 = vst [vmem:[#allocation24_spill] sm:$0xff] %v5570_v9  ;;  %v5578_v48 = vld [vmem:[#allocation11 + $0x38] sm:$0xff] }
 0x375   :  { %1809 = vmatpush.msrb.mxu1 %v5562_v54  ;;  %1895 = vmatpush.msra.mxu3 %v5157_v42  ;;  %7215 = vst [vmem:[#allocation99_spill] sm:$0xff] %v5575_v13  ;;  %v7217_v38 = vld [vmem:[#allocation25_spill] sm:$0xff]  ;;  %v7218_v42 = vld [vmem:[#allocation75_spill] sm:$0xff]  ;;  %v7233_v62 = vld [vmem:[#allocation80_spill] sm:$0xff] }
 0x376   :  { %1791 = vmatpush.msrb.mxu0 %v5567_v2  ;;  %1829 = vmatpush.msrb.mxu2 %v5162_v32  ;;  %7216 = vst [vmem:[#allocation43_spill] sm:$0xff] %v5578_v48  ;;  %v5583_v2 = vld [vmem:[#allocation11] sm:$0xff]  ;;  %v7221_v32 = vld [vmem:[#allocation47_spill] sm:$0xff] }
 0x377   :  { %1810 = vmatpush.msrb.mxu1 %v5570_v9  ;;  %1896 = vmatpush.msra.mxu3 %v7214_v3  ;;  %7219 = vst [vmem:[#allocation79_spill] sm:$0xff] %v5583_v2  ;;  %v5586_v9 = vld [vmem:[#allocation11 + $0x20] sm:$0xff] }
 0x378   :  { %1792 = vmatpush.msrb.mxu0 %v5575_v13  ;;  %1830 = vmatpush.msrb.mxu2 %v7217_v38  ;;  %7220 = vst [vmem:[#allocation26_spill] sm:$0xff] %v5586_v9  ;;  %v7222_v3 = vld [vmem:[#allocation77_spill] sm:$0xff]  ;;  %v5591_v13 = vld [vmem:[#allocation11 + $0x8] sm:$0xff] }
 0x379   :  { %1811 = vmatpush.msrb.mxu1 %v5578_v48  ;;  %1897 = vmatpush.msra.mxu3 %v7218_v42  ;;  %7223 = vst [vmem:[#allocation28_spill] sm:$0xff] %v5591_v13  ;;  %v7224_v48 = vld [vmem:[#allocation27_spill] sm:$0xff]  ;;  %v7225_v38 = vld [vmem:[#allocation49_spill] sm:$0xff] }
 0x37a   :  { %1793 = vmatpush.msrb.mxu0 %v5583_v2  ;;  %1831 = vmatpush.msrb.mxu2 %v7222_v3  ;;  %v7226_v42 = vld [vmem:[#allocation51_spill] sm:$0xff]  ;;  %v7227_v54 = vld [vmem:[#allocation53_spill] sm:$0xff]  ;;  %v7228_v2 = vld [vmem:[#allocation82_spill] sm:$0xff] }
 0x37b   :  { %1812 = vmatpush.msrb.mxu1 %v5586_v9  ;;  %1898 = vmatpush.msra.mxu3 %v7224_v48  ;;  %v7230_v9 = vld [vmem:[#allocation23_spill] sm:$0xff]  ;;  %v7232_v3 = vld [vmem:[#allocation45_spill] sm:$0xff]  ;;  %v7235_v48 = vld [vmem:[#allocation74_spill] sm:$0xff] }
 0x37c   :  { %1905 = vmatpush.msra.mxu0 %v7221_v32  ;;  %1832 = vmatpush.msrb.mxu2 %v7226_v42  ;;  %v7231_v32 = vld [vmem:[#allocation69_spill] sm:$0xff]  ;;  %v7237_v42 = vld [vmem:[#allocation83_spill] sm:$0xff] }
 0x37d   :  { %1813 = vmatpush.msrb.mxu1 %v5591_v13  ;;  %1899 = vmatpush.msra.mxu3 %v7227_v54  ;;  %v7234_v13 = vld [vmem:[#allocation81_spill] sm:$0xff]  ;;  %v7238_v54 = vld [vmem:[#allocation52_spill] sm:$0xff] }
 0x37e   :  { %1906 = vmatpush.msra.mxu0 %v7225_v38  ;;  %1833 = vmatpush.msrb.mxu2 %v7229_v37  ;;  %v7236_v38 = vld [vmem:[#allocation48_spill] sm:$0xff]  ;;  %v7240_v37 = vld [vmem:[#allocation86_spill] sm:$0xff] }
 0x37f   :  { %1900 = vmatpush.msra.mxu3 %v7230_v9  ;;  %v5611_v9 = vld [vmem:[#allocation7 + $0x38] sm:$0xff] }
 0x380   :  { %1907 = vmatpush.msra.mxu0 %v7228_v2  ;;  %v7239_v2 = vld [vmem:[#allocation40_spill] sm:$0xff]  ;;  %7241 = vst [vmem:[#allocation72_spill] sm:$0xff] %v5611_v9 }
 0x382   :  { %1908 = vmatpush.msra.mxu0 %v7231_v32  ;;  %v5614_v32 = vld [vmem:[#allocation7 + $0x20] sm:$0xff] }
 0x383   :  { %7242 = vst [vmem:[#allocation25_spill] sm:$0xff] %v5614_v32 }
 0x384   :  { %1909 = vmatpush.msra.mxu0 %v7232_v3 }
 0x386   :  { %1910 = vmatpush.msra.mxu0 %v7233_v62  ;;  %v5617_v62 = vld [vmem:[#allocation7 + $0x8] sm:$0xff] }
 0x387   :  { %7243 = vst [vmem:[#allocation75_spill] sm:$0xff] %v5617_v62 }
 0x388   :  { %1911 = vmatpush.msra.mxu0 %v7234_v13 }
 0x38a   :  { %1912 = vmatpush.msra.mxu0 %v7235_v48  ;;  %v7244_v48 = vld [vmem:[#allocation66_spill] sm:$0xff] }
 0x38c   :  { %1913 = vmatpush.msra.mxu0 %v7236_v38 }
 0x38e   :  { %1914 = vmatpush.msra.mxu0 %v7237_v42  ;;  %v7245_v42 = vld [vmem:[#allocation64_spill] sm:$0xff] }
 0x390   :  { %1915 = vmatpush.msra.mxu0 %v7238_v54 }
 0x392   :  { %1916 = vmatpush.msra.mxu0 %v7239_v2 }
 0x394   :  { %1917 = vmatpush.msra.mxu0 %v7240_v37 }
 0x396   :  { %1918 = vmatpush.msra.mxu0 %v5611_v9  ;;  %v7246_v9 = vld [vmem:[#allocation38_spill] sm:$0xff] }
 0x398   :  { %1919 = vmatpush.msra.mxu0 %v5614_v32 }
 0x39a   :  { %1920 = vmatpush.msra.mxu0 %v5617_v62  ;;  %v7249_v62 = vld [vmem:[#allocation29_spill] sm:$0xff] }
 0x39b   :  { %v295_v36 = vadd.f32 %v7249_v62, %v7248_v12 }
 0x3b8   :  { %v1461_v13 = vpop.f32.mrf.mxu0  ;;  %v1481_v2 = vpop.f32.mrf.mxu1 }
 0x3b9   :  { %v1462_v38 = vadd.f32 %v1461_v13, %v7244_v48  ;;  %v1482_v8 = vadd.f32 %v1481_v2, %v7246_v9  ;;  %v7252_v2 = vld [vmem:[#allocation84_spill] sm:$0xff] }
 0x3bb   :  { %v1521_v3 = vpop.f32.mrf.mxu3 }
 0x3bc   :  { %v1522_v54 = vadd.f32 %v1521_v3, %v7245_v42 }
 0x3be   :  { %v1564_v37 = vadd.f32 %v1522_v54, %v1462_v38 }
 0x3bf   :  { %v1501_v23 = vpop.f32.mrf.mxu2 }
 0x3c0   :  { %v2783_v59 = vmul.f32 -1.442695, %v1564_v37  ;;  %v1541_v53 = vpop.f32.mrf.mxu0  ;;  %v7251_v37 = vld [vmem:[#allocation60_spill] sm:$0xff] }
 0x3c1   :  { %v1542_v39 = vadd.f32 %v1541_v53, %v7247_v40  ;;  %v7253_v40 = vld [vmem:[#allocation39_spill] sm:$0xff] }
 0x3c2   :  { %2886 = vpow2.f32 %v2783_v59 }
 0x3c3   :  { %v1584_v32 = vadd.f32 %v1542_v39, %v1482_v8  ;;  %v1648_v60 = vpop.f32.mrf.mxu3 }
 0x3c4   :  { %v1649_v35 = vadd.f32 %v1648_v60, %v7250_v21  ;;  %v7254_v21 = vld [vmem:[#allocation71_spill] sm:$0xff] }
 0x3c5   :  { %v2784_v13 = vmul.f32 -1.442695, %v1584_v32  ;;  %v1502_v14 = vadd.f32 %v1501_v23, %v7254_v21 }
 0x3c6   :  { %v1691_v48 = vadd.f32 %v1649_v35, %v295_v36 }
 0x3c7   :  { %2888 = vpow2.f32 %v2784_v13  ;;  %v1628_v3 = vpop.f32.mrf.mxu2 }
 0x3c8   :  { %v2887_v38 = vpop.eup %2886  ;;  %v2786_v54 = vmul.f32 -1.442695, %v1691_v48  ;;  %v1629_v42 = vadd.f32 %v1628_v3, %v7251_v37 }
 0x3c9   :  { %v1568_v4 = vadd.f32 1.0, %v2887_v38 }
 0x3ca   :  { %2890 = vpow2.f32 %v2786_v54  ;;  %v1671_v53 = vadd.f32 %v1629_v42, %v7252_v2 }
 0x3cb   :  { %2892 = vrcp.f32 %v1568_v4  ;;  %v1580_v13 = vand.u32 2147483648, %v1568_v4  ;;  %v1578_v42 = vand.u32 2147483647, %v1568_v4  ;;  %vm1574_vm9 = vweird.f32 %v1568_v4 }
 0x3cc   :  { %v2785_v39 = vmul.f32 -1.442695, %v1671_v53  ;;  %v1561_v53 = vpop.f32.mrf.mxu1 }
 0x3cd   :  { %v2889_v8 = vpop.eup %2888  ;;  %v1581_v37 = vor.u32 1.1754944e-38, %v1580_v13  ;;  %v1562_v9 = vadd.f32 %v1561_v53, %v7253_v40  ;;  %vm1579_vm11 = vcmp.eq.f32.partialorder %v1578_v42, 8.507059e+37 }
 0x3ce   :  { %v1588_v59 = vadd.f32 1.0, %v2889_v8  ;;  %2894 = vpow2.f32 %v2785_v39 }
 0x3d0   :  { %v2891_v62 = vpop.eup %2890  ;;  %2896 = vrcp.f32 %v1588_v59  ;;  %vm1594_vm13 = vweird.f32 %v1588_v59 }
 0x3d1   :  { %v2893_v60 = vpop.eup %2892  ;;  %v5629_v32 = vadd.f32 1.0, %v2891_v62 }
 0x3d2   :  { %v1570_v35 = vmul.f32 %v2893_v60, %v1568_v4  ;;  %vm1575_vm8 = vweird.f32 %v2893_v60 }
 0x3d3   :  { %2898 = vrcp.f32 %v5629_v32  ;;  %vm1576_vm10 = vmor %vm1574_vm9, %vm1575_vm8  ;;  %vm1701_vm5 = vweird.f32 %v5629_v32 }
 0x3d4   :  { %v2895_v36 = vpop.eup %2894  ;;  %v1571_v48 = vsub.f32 1.0, %v1570_v35 }
 0x3d5   :  { %v1675_v3 = vadd.f32 1.0, %v2895_v36 }
 0x3d6   :  { %v2897_v38 = vpop.eup %2896  ;;  %v1572_v54 = vmul.f32 %v2893_v60, %v1571_v48 }
 0x3d7   :  { %v1590_v2 = vmul.f32 %v2897_v38, %v1588_v59  ;;  %2900 = vrcp.f32 %v1675_v3  ;;  %vm1595_vm12 = vweird.f32 %v2897_v38  ;;  %v1687_v42 = vand.u32 2147483648, %v1675_v3 }
 0x3d8   :  { %v1573_v39 = vadd.f32 %v2893_v60, %v1572_v54  ;;  %v1600_v54 = vand.u32 2147483648, %v1588_v59  ;;  %vm1596_vm14 = vmor %vm1594_vm13, %vm1595_vm12  ;;  %vm1681_vm1 = vweird.f32 %v1675_v3 }
 0x3d9   :  { %v5632_v8 = vpop.eup %2898  ;;  %v1591_v62 = vsub.f32 1.0, %v1590_v2  ;;  %v1598_v2 = vand.u32 2147483647, %v1588_v59 }
 0x3da   :  { %v1577_v12 = vsel %vm1576_vm10, %v2893_v60, %v1573_v39  ;;  %v1697_v36 = vmul.f32 %v5632_v8, %v5629_v32  ;;  %vm1702_vm3 = vweird.f32 %v5632_v8 }
 0x3db   :  { %v1582_v35 = vsel %vm1579_vm11, %v1581_v37, %v1577_v12  ;;  %v1592_v48 = vmul.f32 %v2897_v38, %v1591_v62  ;;  %v1601_v37 = vor.u32 1.1754944e-38, %v1600_v54  ;;  %vm1599_vm15 = vcmp.eq.f32.partialorder %v1598_v2, 8.507059e+37  ;;  %vm1703_vm6 = vmor %vm1701_vm5, %vm1702_vm3 }
 0x3dc   :  { %v1604_v56 = vmul.f32 %v1582_v35, %v1562_v9  ;;  %v1698_v53 = vsub.f32 1.0, %v1697_v36  ;;  %v1685_v62 = vand.u32 2147483647, %v1675_v3  ;;  %v1668_v35 = vpop.f32.mrf.mxu0 }
 0x3dd   :  { %v2901_v4 = vpop.eup %2900  ;;  %v1593_v27 = vadd.f32 %v2897_v38, %v1592_v48 }
 0x3de   :  { %v1605_v0 = vadd.f32 %v1604_v56, %v1502_v14  ;;  %v1677_v13 = vmul.f32 %v2901_v4, %v1675_v3  ;;  %vm1682_vm0 = vweird.f32 %v2901_v4  ;;  %v1699_v9 = vmul.f32 %v5632_v8, %v1698_v53 }
 0x3df   :  { %v1597_v60 = vsel %vm1596_vm14, %v2897_v38, %v1593_v27  ;;  %vm1683_vm2 = vmor %vm1681_vm1, %vm1682_vm0  ;;  %v1688_v56 = vor.u32 1.1754944e-38, %v1687_v42  ;;  %v1669_v27 = vadd.f32 %v1668_v35, %v4270_v29  ;;  %vm1686_vm4 = vcmp.eq.f32.partialorder %v1685_v62, 8.507059e+37  ;;  %v7276_v35 = vld [vmem:[#allocation37_spill] sm:$0xff] }
 0x3e0   :  { %2902 = vtanh.f32 %v1605_v0  ;;  %v1678_v12 = vsub.f32 1.0, %v1677_v13  ;;  %v1602_v23 = vsel %vm1599_vm15, %v1601_v37, %v1597_v60  ;;  %v1700_v36 = vadd.f32 %v5632_v8, %v1699_v9  ;;  %v7255_v13 = vld [vmem:[#allocation55_spill] sm:$0xff] }
 0x3e1   :  { %v1607_v14 = vsub.f32 1.0, %v1602_v23  ;;  %v1609_v2 = vmul.f32 %v1602_v23, %v5282_v26  ;;  %v336_v53 = vadd.f32 %v7255_v13, %v4274_v51  ;;  %v1707_v3 = vand.u32 2147483648, %v5629_v32  ;;  %v7282_v13 = vld [vmem:[#allocation103_spill] sm:$0xff] }
 0x3e2   :  { %v1679_v39 = vmul.f32 %v2901_v4, %v1678_v12  ;;  %v1705_v12 = vand.u32 2147483647, %v5629_v32  ;;  %v1704_v42 = vsel %vm1703_vm6, %v5632_v8, %v1700_v36  ;;  %v7280_v36 = vld [vmem:[#allocation100_spill] sm:$0xff] }
 0x3e4   :  { %v1680_v48 = vadd.f32 %v2901_v4, %v1679_v39  ;;  %v1708_v39 = vor.u32 1.1754944e-38, %v1707_v3  ;;  %vm1706_vm7 = vcmp.eq.f32.partialorder %v1705_v12, 8.507059e+37  ;;  %v5772_v3 = vld [vmem:[#allocation7 + $0xf0] sm:$0xff] }
 0x3e5   :  { %v5776_v12 = vld [vmem:[#allocation11 + $0x148] sm:$0xff] }
 0x3e6   :  { %v2903_v59 = vpop.eup %2902  ;;  %v1684_v0 = vsel %vm1683_vm2, %v2901_v4, %v1680_v48  ;;  %v1709_v26 = vsel %vm1706_vm7, %v1708_v39, %v1704_v42  ;;  %v5741_v48 = vld [vmem:[#allocation10 + $0x38] sm:$0xff]  ;;  %v7286_v39 = vld [vmem:[#allocation107_spill] sm:$0xff] }
 0x3e7   :  { %v1689_v38 = vsel %vm1686_vm4, %v1688_v56, %v1684_v0  ;;  %v1608_v54 = vmul.f32 %v2903_v59, %v1607_v14  ;;  %v1714_v62 = vsub.f32 1.0, %v1709_v26  ;;  %v1716_v9 = vmul.f32 %v1709_v26, %v5286_v63  ;;  %v7256_v63 = vld [vmem:[#allocation54_spill] sm:$0xff]  ;;  %v5744_v56 = vld [vmem:[#allocation7 + $0x120] sm:$0xff]  ;;  %v7277_v14 = vld [vmem:[#allocation35_spill] sm:$0xff] }
 0x3e8   :  { %v1711_v60 = vmul.f32 %v1689_v38, %v1669_v27  ;;  %v5750_v59 = vld [vmem:[#allocation10 + $0x20] sm:$0xff]  ;;  %v7278_v27 = vld [vmem:[#allocation63_spill] sm:$0xff]  ;;  %v5780_v42 = vld [vmem:[#allocation7 + $0xd8] sm:$0xff] }
 0x3e9   :  { %v5648_v37 = vadd.f32 %v1609_v2, %v1608_v54  ;;  %v7279_v0 = vld [vmem:[#allocation101_spill] sm:$0xff]  ;;  %v5756_v38 = vld [vmem:[#allocation10 + $0x8] sm:$0xff]  ;;  %v5784_v26 = vld [vmem:[#allocation11 + $0x130] sm:$0xff] }
 0x3ea   :  { %v1712_v4 = vadd.f32 %v1711_v60, %v336_v53  ;;  %v5760_v54 = vld [vmem:[#allocation11 + $0x178] sm:$0xff]  ;;  %v5764_v2 = vld [vmem:[#allocation7 + $0x108] sm:$0xff] }
 0x3eb   :  { %1794 = vmatmul.f32.vlgmr.msrb.gmra.mxu0 %v5648_v37  ;;  %v5768_v53 = vld [vmem:[#allocation11 + $0x160] sm:$0xff] }
 0x3ec   :  { %2904 = vtanh.f32 %v1712_v4  ;;  %2032 = vmatpush.msrb.mxu0 %v5288_v41  ;;  %v7257_v41 = vld [vmem:[#allocation76_spill] sm:$0xff]  ;;  %v7284_v60 = vld [vmem:[#allocation105_spill] sm:$0xff]  ;;  %v7285_v4 = vld [vmem:[#allocation106_spill] sm:$0xff] }
 0x3ee   :  { %2033 = vmatpush.msrb.mxu0 %v5306_v16  ;;  %v7262_v16 = vld [vmem:[#allocation44_spill] sm:$0xff] }
 0x3f0   :  { %2034 = vmatpush.msrb.mxu0 %v5328_v46  ;;  %v7267_v46 = vld [vmem:[#allocation88_spill] sm:$0xff] }
 0x3f2   :  { %v2905_v32 = vpop.eup %2904  ;;  %2035 = vmatpush.msrb.mxu0 %v5346_v6  ;;  %v5717_v6 = vld [vmem:[#allocation10 + $0x80] sm:$0xff] }
 0x3f3   :  { %v1715_v23 = vmul.f32 %v2905_v32, %v1714_v62  ;;  %v7287_v62 = vld [vmem:[#allocation108_spill] sm:$0xff]  ;;  %v5788_v32 = vld [vmem:[#allocation7 + $0xc0] sm:$0xff] }
 0x3f4   :  { %2036 = vmatpush.msrb.mxu0 %v5358_v49 }
 0x3f5   :  { %v5658_v8 = vadd.f32 %v1716_v9, %v1715_v23  ;;  %v7288_v23 = vld [vmem:[#allocation109_spill] sm:$0xff] }
 0x3f6   :  { %2037 = vmatpush.msrb.mxu0 %v5370_v61  ;;  %v5792_v9 = vld [vmem:[#allocation11 + $0x118] sm:$0xff] }
 0x3f7   :  { %1734 = vmatmul.f32.vlgmr.msra.gmra.mxu1 %v5658_v8  ;;  %1754 = vmatmul.f32.vlgmr.msra.gmra.mxu2 %v5658_v8 }
 0x3f8   :  { %1774 = vmatmul.f32.vlgmr.msrb.gmra.mxu3 %v5658_v8  ;;  %1921 = vmatmul.f32.vlgmr.msra.gmra.mxu0 %v5658_v8 }
 0x3f9   :  { %1925 = vmatpush.msra.mxu1 %v5294_v31  ;;  %1992 = vmatpush.msra.mxu2 %v5297_v1  ;;  %v7258_v31 = vld [vmem:[#allocation56_spill] sm:$0xff]  ;;  %v7259_v1 = vld [vmem:[#allocation42_spill] sm:$0xff] }
 0x3fa   :  { %2012 = vmatpush.msrb.mxu3 %v5300_v25  ;;  %2038 = vmatpush.msrb.mxu0 %v5382_v50  ;;  %v7260_v25 = vld [vmem:[#allocation62_spill] sm:$0xff] }
 0x3fb   :  { %1926 = vmatpush.msra.mxu1 %v5303_v55  ;;  %1993 = vmatpush.msra.mxu2 %v5309_v43  ;;  %v7261_v55 = vld [vmem:[#allocation78_spill] sm:$0xff]  ;;  %v7263_v43 = vld [vmem:[#allocation67_spill] sm:$0xff] }
 0x3fc   :  { %2013 = vmatpush.msrb.mxu3 %v5312_v7  ;;  %2039 = vmatpush.msrb.mxu0 %v5392_v15  ;;  %v5699_v7 = vld [vmem:[#allocation10 + $0xc8] sm:$0xff]  ;;  %v7273_v15 = vld [vmem:[#allocation33_spill] sm:$0xff] }
 0x3fd   :  { %1927 = vmatpush.msra.mxu1 %v5315_v28  ;;  %1994 = vmatpush.msra.mxu2 %v5319_v24  ;;  %v7264_v28 = vld [vmem:[#allocation57_spill] sm:$0xff]  ;;  %v7265_v24 = vld [vmem:[#allocation46_spill] sm:$0xff] }
 0x3fe   :  { %2014 = vmatpush.msrb.mxu3 %v5322_v58  ;;  %2040 = vmatpush.msrb.mxu0 %v5402_v22  ;;  %v7266_v58 = vld [vmem:[#allocation50_spill] sm:$0xff] }
 0x3ff   :  { %1928 = vmatpush.msra.mxu1 %v5325_v45  ;;  %1834 = vmatmul.f32.vlgmr.msrb.gmra.mxu2 %v5648_v37  ;;  %v5705_v45 = vld [vmem:[#allocation10 + $0xb0] sm:$0xff]  ;;  %v5725_v22 = vld [vmem:[#allocation10 + $0x68] sm:$0xff] }
 0x400   :  { %1814 = vmatmul.f32.vlgmr.msrb.gmra.mxu1 %v5648_v37  ;;  %1901 = vmatmul.f32.vlgmr.msra.gmra.mxu3 %v5658_v8 }
 0x401   :  { %1929 = vmatpush.msra.mxu1 %v5334_v5  ;;  %1995 = vmatpush.msra.mxu2 %v5337_v34  ;;  %v7268_v5 = vld [vmem:[#allocation59_spill] sm:$0xff]  ;;  %v5711_v34 = vld [vmem:[#allocation10 + $0x98] sm:$0xff] }
 0x402   :  { %2015 = vmatpush.msrb.mxu3 %v5340_v57  ;;  %2041 = vmatpush.msrb.mxu0 %v5412_v30  ;;  %v7269_v57 = vld [vmem:[#allocation91_spill] sm:$0xff]  ;;  %v7274_v30 = vld [vmem:[#allocation92_spill] sm:$0xff] }
 0x403   :  { %1930 = vmatpush.msra.mxu1 %v5343_v17  ;;  %1996 = vmatpush.msra.mxu2 %v5349_v52  ;;  %v7270_v17 = vld [vmem:[#allocation70_spill] sm:$0xff] }
 0x404   :  { %2016 = vmatpush.msrb.mxu3 %v5352_v11  ;;  %2042 = vmatpush.msrb.mxu0 %v5422_v10  ;;  %v5720_v52 = vld [vmem:[#allocation7 + $0x168] sm:$0xff]  ;;  %v7271_v11 = vld [vmem:[#allocation73_spill] sm:$0xff]  ;;  %v5733_v10 = vld [vmem:[#allocation10 + $0x50] sm:$0xff] }
 0x405   :  { %1931 = vmatpush.msra.mxu1 %v7256_v63  ;;  %1997 = vmatpush.msra.mxu2 %v7257_v41  ;;  %v7289_v63 = vld [vmem:[#allocation110_spill] sm:$0xff] }
 0x406   :  { %2017 = vmatpush.msrb.mxu3 %v7258_v31  ;;  %2043 = vmatpush.msrb.mxu0 %v5432_v18  ;;  %v5736_v18 = vld [vmem:[#allocation7 + $0x138] sm:$0xff]  ;;  %v5796_v41 = vld [vmem:[#allocation7 + $0xa8] sm:$0xff]  ;;  %v7290_v31 = vld [vmem:[#allocation111_spill] sm:$0xff] }
 0x407   :  { %1932 = vmatpush.msra.mxu1 %v7259_v1  ;;  %1998 = vmatpush.msra.mxu2 %v7260_v25  ;;  %v5800_v1 = vld [vmem:[#allocation11 + $0x100] sm:$0xff]  ;;  %v7291_v25 = vld [vmem:[#allocation112_spill] sm:$0xff] }
 0x408   :  { %2018 = vmatpush.msrb.mxu3 %v7261_v55  ;;  %2044 = vmatpush.msrb.mxu0 %v5442_v33  ;;  %v7275_v33 = vld [vmem:[#allocation90_spill] sm:$0xff]  ;;  %v5804_v55 = vld [vmem:[#allocation7 + $0x90] sm:$0xff] }
 0x409   :  { %1933 = vmatpush.msra.mxu1 %v7262_v16  ;;  %1999 = vmatpush.msra.mxu2 %v7263_v43  ;;  %v7292_v16 = vld [vmem:[#allocation113_spill] sm:$0xff]  ;;  %v5808_v43 = vld [vmem:[#allocation11 + $0xe8] sm:$0xff] }
 0x40a   :  { %2019 = vmatpush.msrb.mxu3 %v5699_v7  ;;  %2045 = vmatpush.msrb.mxu0 %v7264_v28  ;;  %v7293_v28 = vld [vmem:[#allocation114_spill] sm:$0xff] }
 0x40b   :  { %1934 = vmatpush.msra.mxu1 %v7265_v24  ;;  %2000 = vmatpush.msra.mxu2 %v7266_v58  ;;  %v5812_v24 = vld [vmem:[#allocation7 + $0x78] sm:$0xff]  ;;  %v7294_v58 = vld [vmem:[#allocation115_spill] sm:$0xff] }
 0x40c   :  { %2020 = vmatpush.msrb.mxu3 %v5705_v45  ;;  %2046 = vmatpush.msrb.mxu0 %v5466_v44  ;;  %v7272_v44 = vld [vmem:[#allocation65_spill] sm:$0xff] }
 0x40d   :  { %1935 = vmatpush.msra.mxu1 %v7267_v46  ;;  %2001 = vmatpush.msra.mxu2 %v7268_v5  ;;  %v5816_v46 = vld [vmem:[#allocation11 + $0xd0] sm:$0xff] }
 0x40e   :  { %2021 = vmatpush.msrb.mxu3 %v5711_v34  ;;  %2047 = vmatpush.msrb.mxu0 %v5476_v20  ;;  %v5728_v20 = vld [vmem:[#allocation7 + $0x150] sm:$0xff]  ;;  %v7295_v5 = vld [vmem:[#allocation116_spill] sm:$0xff] }
 0x40f   :  { %1936 = vmatpush.msra.mxu1 %v7269_v57  ;;  %2002 = vmatpush.msra.mxu2 %v7270_v17  ;;  %v5820_v57 = vld [vmem:[#allocation7 + $0x60] sm:$0xff] }
 0x410   :  { %2022 = vmatpush.msrb.mxu3 %v5717_v6  ;;  %2159 = vmatpush.msra.mxu0 %v5720_v52  ;;  %v7296_v17 = vld [vmem:[#allocation117_spill] sm:$0xff] }
 0x411   :  { %1937 = vmatpush.msra.mxu1 %v7271_v11  ;;  %2003 = vmatpush.msra.mxu2 %v7272_v44  ;;  %v5824_v11 = vld [vmem:[#allocation11 + $0xb8] sm:$0xff]  ;;  %v7297_v44 = vld [vmem:[#allocation95_spill] sm:$0xff] }
 0x412   :  { %2023 = vmatpush.msrb.mxu3 %v5725_v22  ;;  %2160 = vmatpush.msra.mxu0 %v5728_v20 }
 0x413   :  { %1938 = vmatpush.msra.mxu1 %v7273_v15  ;;  %2004 = vmatpush.msra.mxu2 %v7274_v30  ;;  %v5828_v15 = vld [vmem:[#allocation7 + $0x48] sm:$0xff]  ;;  %v7298_v30 = vld [vmem:[#allocation41_spill] sm:$0xff] }
 0x414   :  { %2024 = vmatpush.msrb.mxu3 %v5733_v10  ;;  %2161 = vmatpush.msra.mxu0 %v5736_v18 }
 0x415   :  { %1939 = vmatpush.msra.mxu1 %v7275_v33  ;;  %2005 = vmatpush.msra.mxu2 %v7276_v35  ;;  %v5832_v33 = vld [vmem:[#allocation11 + $0xa0] sm:$0xff]  ;;  %v7300_v35 = vld [vmem:[#allocation96_spill] sm:$0xff] }
 0x416   :  { %2025 = vmatpush.msrb.mxu3 %v5741_v48  ;;  %2162 = vmatpush.msra.mxu0 %v5744_v56  ;;  %7299 = vst [vmem:[#allocation47_spill] sm:$0xff] %v5832_v33 }
 0x417   :  { %1940 = vmatpush.msra.mxu1 %v7277_v14  ;;  %2006 = vmatpush.msra.mxu2 %v5456_v19  ;;  %v7281_v19 = vld [vmem:[#allocation102_spill] sm:$0xff]  ;;  %v5836_v14 = vld [vmem:[#allocation7 + $0x30] sm:$0xff] }
 0x418   :  { %1941 = vmatmul.f32.vlgmr.msra.gmra.mxu1 %v5658_v8  ;;  %2026 = vmatpush.msrb.mxu3 %v5750_v59 }
 0x419   :  { %2052 = vmatpush.msrb.mxu1 %v7278_v27  ;;  %2007 = vmatpush.msra.mxu2 %v7279_v0  ;;  %v7301_v27 = vld [vmem:[#allocation118_spill] sm:$0xff] }
 0x41a   :  { %2027 = vmatpush.msrb.mxu3 %v5756_v38  ;;  %2163 = vmatpush.msra.mxu0 %v5764_v2  ;;  %v5840_v0 = vld [vmem:[#allocation11 + $0x88] sm:$0xff] }
 0x41b   :  { %2072 = vmatpush.msrb.mxu2 %v5472_v47  ;;  %2053 = vmatpush.msrb.mxu1 %v7280_v36  ;;  %v7283_v47 = vld [vmem:[#allocation104_spill] sm:$0xff]  ;;  %7302 = vst [vmem:[#allocation77_spill] sm:$0xff] %v5840_v0  ;;  %v7303_v36 = vld [vmem:[#allocation97_spill] sm:$0xff] }
 0x41c   :  { %2092 = vmatpush.msra.mxu3 %v5760_v54  ;;  %2164 = vmatpush.msra.mxu0 %v5772_v3 }
 0x41d   :  { %2073 = vmatpush.msrb.mxu2 %v7281_v19  ;;  %2054 = vmatpush.msrb.mxu1 %v7282_v13  ;;  %v5844_v19 = vld [vmem:[#allocation7 + $0x18] sm:$0xff]  ;;  %v7305_v13 = vld [vmem:[#allocation119_spill] sm:$0xff] }
 0x41e   :  { %2093 = vmatpush.msra.mxu3 %v5768_v53  ;;  %2165 = vmatpush.msra.mxu0 %v5780_v42  ;;  %7304 = vst [vmem:[#allocation27_spill] sm:$0xff] %v5844_v19 }
 0x41f   :  { %2074 = vmatpush.msrb.mxu2 %v7283_v47  ;;  %2055 = vmatpush.msrb.mxu1 %v7284_v60  ;;  %v5848_v47 = vld [vmem:[#allocation11 + $0x70] sm:$0xff] }
 0x420   :  { %2094 = vmatpush.msra.mxu3 %v5776_v12  ;;  %2166 = vmatpush.msra.mxu0 %v5788_v32  ;;  %7306 = vst [vmem:[#allocation49_spill] sm:$0xff] %v5848_v47  ;;  %v7307_v60 = vld [vmem:[#allocation24_spill] sm:$0xff] }
 0x421   :  { %2075 = vmatpush.msrb.mxu2 %v7285_v4  ;;  %2056 = vmatpush.msrb.mxu1 %v7286_v39  ;;  %v5852_v4 = vld [vmem:[#allocation7] sm:$0xff]  ;;  %v7309_v39 = vld [vmem:[#allocation98_spill] sm:$0xff] }
 0x422   :  { %2095 = vmatpush.msra.mxu3 %v5784_v26  ;;  %2167 = vmatpush.msra.mxu0 %v5796_v41  ;;  %7308 = vst [vmem:[#allocation51_spill] sm:$0xff] %v5852_v4 }
 0x423   :  { %2076 = vmatpush.msrb.mxu2 %v7287_v62  ;;  %2057 = vmatpush.msrb.mxu1 %v7288_v23  ;;  %v5856_v62 = vld [vmem:[#allocation11 + $0x58] sm:$0xff]  ;;  %v7311_v23 = vld [vmem:[#allocation43_spill] sm:$0xff] }
 0x424   :  { %2096 = vmatpush.msra.mxu3 %v5792_v9  ;;  %2168 = vmatpush.msra.mxu0 %v5804_v55  ;;  %7310 = vst [vmem:[#allocation53_spill] sm:$0xff] %v5856_v62 }
 0x425   :  { %2077 = vmatpush.msrb.mxu2 %v7289_v63  ;;  %2058 = vmatpush.msrb.mxu1 %v7290_v31  ;;  %v7312_v63 = vld [vmem:[#allocation99_spill] sm:$0xff]  ;;  %v5861_v31 = vld [vmem:[#allocation11 + $0x40] sm:$0xff] }
 0x426   :  { %2097 = vmatpush.msra.mxu3 %v5800_v1  ;;  %2169 = vmatpush.msra.mxu0 %v5812_v24  ;;  %7313 = vst [vmem:[#allocation82_spill] sm:$0xff] %v5861_v31 }
 0x427   :  { %2078 = vmatpush.msrb.mxu2 %v7291_v25  ;;  %2059 = vmatpush.msrb.mxu1 %v7292_v16  ;;  %v7314_v25 = vld [vmem:[#allocation26_spill] sm:$0xff]  ;;  %v7315_v16 = vld [vmem:[#allocation79_spill] sm:$0xff] }
 0x428   :  { %2098 = vmatpush.msra.mxu3 %v5808_v43  ;;  %2170 = vmatpush.msra.mxu0 %v5820_v57 }
 0x429   :  { %2079 = vmatpush.msrb.mxu2 %v7293_v28  ;;  %2060 = vmatpush.msrb.mxu1 %v7294_v58  ;;  %v5866_v28 = vld [vmem:[#allocation11 + $0x28] sm:$0xff] }
 0x42a   :  { %2099 = vmatpush.msra.mxu3 %v5816_v46  ;;  %2171 = vmatpush.msra.mxu0 %v5828_v15  ;;  %7316 = vst [vmem:[#allocation30_spill] sm:$0xff] %v5866_v28  ;;  %v5869_v58 = vld [vmem:[#allocation7 + $0x170] sm:$0xff] }
 0x42b   :  { %2080 = vmatpush.msrb.mxu2 %v7295_v5  ;;  %2061 = vmatpush.msrb.mxu1 %v7296_v17  ;;  %7317 = vst [vmem:[#allocation23_spill] sm:$0xff] %v5869_v58  ;;  %v7318_v5 = vld [vmem:[#allocation28_spill] sm:$0xff] }
 0x42c   :  { %2100 = vmatpush.msra.mxu3 %v5824_v11  ;;  %2172 = vmatpush.msra.mxu0 %v5836_v14  ;;  %v5873_v17 = vld [vmem:[#allocation11 + $0x10] sm:$0xff] }
 0x42d   :  { %2081 = vmatpush.msrb.mxu2 %v7297_v44  ;;  %2062 = vmatpush.msrb.mxu1 %v7298_v30  ;;  %7319 = vst [vmem:[#allocation69_spill] sm:$0xff] %v5873_v17  ;;  %v5876_v44 = vld [vmem:[#allocation7 + $0x158] sm:$0xff]  ;;  %v5879_v30 = vld [vmem:[#allocation7 + $0x140] sm:$0xff] }
 0x42e   :  { %2101 = vmatpush.msra.mxu3 %v5832_v33  ;;  %2173 = vmatpush.msra.mxu0 %v5844_v19  ;;  %7320 = vst [vmem:[#allocation45_spill] sm:$0xff] %v5876_v44  ;;  %v7341_v19 = vld [vmem:[#allocation68_spill] sm:$0xff] }
 0x42f   :  { %2082 = vmatpush.msrb.mxu2 %v7300_v35  ;;  %2063 = vmatpush.msrb.mxu1 %v7301_v27  ;;  %7321 = vst [vmem:[#allocation80_spill] sm:$0xff] %v5879_v30  ;;  %v5882_v35 = vld [vmem:[#allocation7 + $0x128] sm:$0xff]  ;;  %v5885_v27 = vld [vmem:[#allocation7 + $0x110] sm:$0xff] }
 0x430   :  { %2102 = vmatpush.msra.mxu3 %v5840_v0  ;;  %2174 = vmatpush.msra.mxu0 %v5852_v4  ;;  %7322 = vst [vmem:[#allocation81_spill] sm:$0xff] %v5882_v35  ;;  %v7340_v4 = vld [vmem:[#allocation38_spill] sm:$0xff] }
 0x431   :  { %2083 = vmatpush.msrb.mxu2 %v7303_v36  ;;  %2064 = vmatpush.msrb.mxu1 %v7305_v13  ;;  %7323 = vst [vmem:[#allocation74_spill] sm:$0xff] %v5885_v27  ;;  %v5888_v36 = vld [vmem:[#allocation7 + $0xf8] sm:$0xff]  ;;  %v5891_v13 = vld [vmem:[#allocation7 + $0xe0] sm:$0xff] }
 0x432   :  { %2103 = vmatpush.msra.mxu3 %v5848_v47  ;;  %7324 = vst [vmem:[#allocation48_spill] sm:$0xff] %v5888_v36 }
 0x433   :  { %2084 = vmatpush.msrb.mxu2 %v7307_v60  ;;  %2065 = vmatpush.msrb.mxu1 %v7309_v39  ;;  %7325 = vst [vmem:[#allocation83_spill] sm:$0xff] %v5891_v13  ;;  %v5894_v60 = vld [vmem:[#allocation7 + $0xc8] sm:$0xff]  ;;  %v5897_v39 = vld [vmem:[#allocation7 + $0xb0] sm:$0xff] }
 0x434   :  { %2104 = vmatpush.msra.mxu3 %v5856_v62  ;;  %7326 = vst [vmem:[#allocation52_spill] sm:$0xff] %v5894_v60 }
 0x435   :  { %2085 = vmatpush.msrb.mxu2 %v7311_v23  ;;  %2066 = vmatpush.msrb.mxu1 %v7312_v63  ;;  %7327 = vst [vmem:[#allocation40_spill] sm:$0xff] %v5897_v39  ;;  %v5900_v23 = vld [vmem:[#allocation7 + $0x98] sm:$0xff]  ;;  %v5903_v63 = vld [vmem:[#allocation7 + $0x80] sm:$0xff] }
 0x436   :  { %2105 = vmatpush.msra.mxu3 %v5861_v31  ;;  %7328 = vst [vmem:[#allocation86_spill] sm:$0xff] %v5900_v23 }
 0x437   :  { %2086 = vmatpush.msrb.mxu2 %v7314_v25  ;;  %2067 = vmatpush.msrb.mxu1 %v7315_v16  ;;  %7329 = vst [vmem:[#allocation29_spill] sm:$0xff] %v5903_v63  ;;  %v5906_v25 = vld [vmem:[#allocation7 + $0x68] sm:$0xff]  ;;  %v5909_v16 = vld [vmem:[#allocation7 + $0x50] sm:$0xff] }
 0x438   :  { %2106 = vmatpush.msra.mxu3 %v5866_v28  ;;  %7330 = vst [vmem:[#allocation84_spill] sm:$0xff] %v5906_v25 }
 0x439   :  { %2179 = vmatpush.msra.mxu1 %v5869_v58  ;;  %2087 = vmatpush.msrb.mxu2 %v7318_v5  ;;  %7331 = vst [vmem:[#allocation55_spill] sm:$0xff] %v5909_v16  ;;  %v7332_v5 = vld [vmem:[#allocation72_spill] sm:$0xff]  ;;  %v7339_v58 = vld [vmem:[#allocation31_spill] sm:$0xff] }
 0x43a   :  { %2107 = vmatpush.msra.mxu3 %v5873_v17 }
 0x43b   :  { %2180 = vmatpush.msra.mxu1 %v5876_v44  ;;  %v7337_v44 = vld [vmem:[#allocation87_spill] sm:$0xff] }
 0x43d   :  { %2181 = vmatpush.msra.mxu1 %v5879_v30 }
 0x43f   :  { %2182 = vmatpush.msra.mxu1 %v5882_v35  ;;  %v7336_v35 = vld [vmem:[#allocation66_spill] sm:$0xff] }
 0x441   :  { %2183 = vmatpush.msra.mxu1 %v5885_v27 }
 0x443   :  { %2184 = vmatpush.msra.mxu1 %v5888_v36  ;;  %v7335_v36 = vld [vmem:[#allocation64_spill] sm:$0xff] }
 0x445   :  { %2185 = vmatpush.msra.mxu1 %v5891_v13 }
 0x447   :  { %2186 = vmatpush.msra.mxu1 %v5894_v60  ;;  %v7333_v60 = vld [vmem:[#allocation25_spill] sm:$0xff] }
 0x449   :  { %2187 = vmatpush.msra.mxu1 %v5897_v39  ;;  %v7334_v39 = vld [vmem:[#allocation75_spill] sm:$0xff] }
 0x44b   :  { %2188 = vmatpush.msra.mxu1 %v5900_v23 }
 0x44d   :  { %2189 = vmatpush.msra.mxu1 %v5903_v63 }
 0x44f   :  { %2190 = vmatpush.msra.mxu1 %v5906_v25  ;;  %v7338_v25 = vld [vmem:[#allocation85_spill] sm:$0xff] }
 0x450   :  { %v298_v28 = vadd.f32 %v7339_v58, %v7338_v25  ;;  %v7342_v58 = vld [vmem:[#allocation60_spill] sm:$0xff] }
 0x451   :  { %2191 = vmatpush.msra.mxu1 %v5909_v16 }
 0x453   :  { %2192 = vmatpush.msra.mxu1 %v7332_v5 }
 0x455   :  { %2193 = vmatpush.msra.mxu1 %v7333_v60 }
 0x457   :  { %2194 = vmatpush.msra.mxu1 %v7334_v39 }
 0x468   :  { %v1795_v13 = vpop.f32.mrf.mxu0 }
 0x469   :  { %v1796_v27 = vadd.f32 %v1795_v13, %v7335_v36 }
 0x474   :  { %v1735_v23 = vpop.f32.mrf.mxu1 }
 0x475   :  { %v1736_v63 = vadd.f32 %v1735_v23, %v7336_v35  ;;  %v1922_v30 = vpop.f32.mrf.mxu0 }
 0x476   :  { %v1923_v17 = vadd.f32 %v1922_v30, %v7337_v44 }
 0x477   :  { %v1838_v31 = vadd.f32 %v1796_v27, %v1736_v63 }
 0x478   :  { %v1965_v62 = vadd.f32 %v1923_v17, %v298_v28  ;;  %v7343_v28 = vld [vmem:[#allocation89_spill] sm:$0xff] }
 0x479   :  { %v2787_v16 = vmul.f32 -1.442695, %v1838_v31 }
 0x47a   :  { %v1755_v5 = vpop.f32.mrf.mxu2  ;;  %v2790_v47 = vmul.f32 -1.442695, %v1965_v62 }
 0x47b   :  { %2906 = vpow2.f32 %v2787_v16  ;;  %v1775_v60 = vpop.f32.mrf.mxu3  ;;  %v1756_v0 = vadd.f32 %v1755_v5, %v7340_v4 }
 0x47c   :  { %2908 = vpow2.f32 %v2790_v47 }
 0x47d   :  { %v1815_v39 = vpop.f32.mrf.mxu1 }
 0x47e   :  { %v1816_v13 = vadd.f32 %v1815_v39, %v7341_v19 }
 0x480   :  { %v1858_v36 = vadd.f32 %v1816_v13, %v1756_v0 }
 0x481   :  { %v2907_v23 = vpop.eup %2906 }
 0x482   :  { %v1842_v35 = vadd.f32 1.0, %v2907_v23  ;;  %v2788_v30 = vmul.f32 -1.442695, %v1858_v36  ;;  %v2909_v31 = vpop.eup %2908  ;;  %v1835_v23 = vpop.f32.mrf.mxu2 }
 0x483   :  { %v1902_v44 = vpop.f32.mrf.mxu3  ;;  %v5924_v16 = vadd.f32 1.0, %v2909_v31 }
 0x484   :  { %2910 = vrcp.f32 %v1842_v35  ;;  %v1903_v27 = vadd.f32 %v1902_v44, %v7342_v58  ;;  %v1854_v47 = vand.u32 2147483648, %v1842_v35  ;;  %v1852_v44 = vand.u32 2147483647, %v1842_v35 }
 0x485   :  { %2912 = vpow2.f32 %v2788_v30  ;;  %vm1848_vm9 = vweird.f32 %v1842_v35  ;;  %vm1975_vm5 = vweird.f32 %v5924_v16 }
 0x486   :  { %v1945_v17 = vadd.f32 %v1903_v27, %v7343_v28  ;;  %v1855_v27 = vor.u32 1.1754944e-38, %v1854_v47  ;;  %v1836_v28 = vadd.f32 %v1835_v23, %v7253_v40  ;;  %vm1853_vm11 = vcmp.eq.f32.partialorder %v1852_v44, 8.507059e+37 }
 0x488   :  { %v2789_v63 = vmul.f32 -1.442695, %v1945_v17 }
 0x48a   :  { %v2911_v62 = vpop.eup %2910  ;;  %2914 = vpow2.f32 %v2789_v63 }
 0x48b   :  { %v1844_v5 = vmul.f32 %v2911_v62, %v1842_v35  ;;  %v2913_v39 = vpop.eup %2912  ;;  %2916 = vrcp.f32 %v5924_v16  ;;  %vm1849_vm8 = vweird.f32 %v2911_v62 }
 0x48c   :  { %v1862_v0 = vadd.f32 1.0, %v2913_v39  ;;  %vm1850_vm10 = vmor %vm1848_vm9, %vm1849_vm8 }
 0x48d   :  { %v1845_v13 = vsub.f32 1.0, %v1844_v5 }
 0x48e   :  { %2918 = vrcp.f32 %v1862_v0  ;;  %v1874_v47 = vand.u32 2147483648, %v1862_v0  ;;  %vm1868_vm13 = vweird.f32 %v1862_v0 }
 0x48f   :  { %v1846_v36 = vmul.f32 %v2911_v62, %v1845_v13  ;;  %v1776_v13 = vadd.f32 %v1775_v60, %v7254_v21 }
 0x490   :  { %v2915_v30 = vpop.eup %2914  ;;  %v1875_v60 = vor.u32 1.1754944e-38, %v1874_v47 }
 0x491   :  { %v1847_v19 = vadd.f32 %v2911_v62, %v1846_v36  ;;  %v1949_v31 = vadd.f32 1.0, %v2915_v30  ;;  %v5928_v63 = vpop.eup %2916 }
 0x492   :  { %v1971_v35 = vmul.f32 %v5928_v63, %v5924_v16  ;;  %vm1976_vm4 = vweird.f32 %v5928_v63 }
 0x493   :  { %v1851_v17 = vsel %vm1850_vm10, %v2911_v62, %v1847_v19  ;;  %2920 = vrcp.f32 %v1949_v31  ;;  %v1872_v19 = vand.u32 2147483647, %v1862_v0  ;;  %vm1955_vm1 = vweird.f32 %v1949_v31  ;;  %vm1977_vm6 = vmor %vm1975_vm5, %vm1976_vm4 }
 0x494   :  { %v1856_v5 = vsel %vm1853_vm11, %v1855_v27, %v1851_v17  ;;  %v2919_v39 = vpop.eup %2918  ;;  %v1972_v44 = vsub.f32 1.0, %v1971_v35 }
 0x495   :  { %v1878_v4 = vmul.f32 %v1856_v5, %v1836_v28  ;;  %v1864_v58 = vmul.f32 %v2919_v39, %v1862_v0  ;;  %vm1869_vm12 = vweird.f32 %v2919_v39  ;;  %v1961_v28 = vand.u32 2147483648, %v1949_v31 }
 0x496   :  { %vm1870_vm14 = vmor %vm1868_vm13, %vm1869_vm12  ;;  %vm1873_vm15 = vcmp.eq.f32.partialorder %v1872_v19, 8.507059e+37  ;;  %v1973_v21 = vmul.f32 %v5928_v63, %v1972_v44  ;;  %v7344_v44 = vld [vmem:[#allocation58_spill] sm:$0xff] }
 0x497   :  { %v1879_v25 = vadd.f32 %v1878_v4, %v1776_v13  ;;  %v1865_v36 = vsub.f32 1.0, %v1864_v58  ;;  %v1959_v58 = vand.u32 2147483647, %v1949_v31  ;;  %v1962_v35 = vor.u32 1.1754944e-38, %v1961_v28  ;;  %v5950_v28 = vld [vmem:[#allocation10 + $0x160] sm:$0xff] }
 0x499   :  { %2922 = vtanh.f32 %v1879_v25  ;;  %v2921_v30 = vpop.eup %2920  ;;  %v1866_v23 = vmul.f32 %v2919_v39, %v1865_v36  ;;  %v1942_v36 = vpop.f32.mrf.mxu1  ;;  %vm1960_vm3 = vcmp.eq.f32.partialorder %v1959_v58, 8.507059e+37 }
 0x49a   :  { %v1951_v62 = vmul.f32 %v2921_v30, %v1949_v31  ;;  %vm1956_vm0 = vweird.f32 %v2921_v30  ;;  %v1943_v47 = vadd.f32 %v1942_v36, %v4270_v29  ;;  %v1981_v31 = vand.u32 2147483648, %v5924_v16 }
 0x49b   :  { %v1867_v27 = vadd.f32 %v2919_v39, %v1866_v23  ;;  %vm1957_vm2 = vmor %vm1955_vm1, %vm1956_vm0 }
 0x49c   :  { %v1952_v17 = vsub.f32 1.0, %v1951_v62  ;;  %v1974_v62 = vadd.f32 %v5928_v63, %v1973_v21 }
 0x49d   :  { %v1871_v5 = vsel %vm1870_vm14, %v2919_v39, %v1867_v27 }
 0x49e   :  { %v1953_v13 = vmul.f32 %v2921_v30, %v1952_v17  ;;  %v1876_v25 = vsel %vm1873_vm15, %v1875_v60, %v1871_v5  ;;  %v339_v17 = vadd.f32 %v7344_v44, %v4274_v51  ;;  %v1978_v21 = vsel %vm1977_vm6, %v5928_v63, %v1974_v62  ;;  %v5999_v62 = vld [vmem:[#allocation10 + $0x140] sm:$0xff] }
 0x49f   :  { %v2923_v4 = vpop.eup %2922  ;;  %v1881_v40 = vsub.f32 1.0, %v1876_v25  ;;  %v1883_v23 = vmul.f32 %v1876_v25, %v5648_v37  ;;  %v6002_v44 = vld [vmem:[#allocation10 + $0xa0] sm:$0xff] }
 0x4a0   :  { %v1954_v33 = vadd.f32 %v2921_v30, %v1953_v13  ;;  %7347 = vst [vmem:[#allocation56_spill] sm:$0xff] %v6002_v44 }
 0x4a1   :  { %v1882_v0 = vmul.f32 %v2923_v4, %v1881_v40  ;;  %v1979_v40 = vand.u32 2147483647, %v5924_v16  ;;  %v5953_v4 = vld [vmem:[#allocation10 + $0x148] sm:$0xff]  ;;  %v5956_v16 = vld [vmem:[#allocation10 + $0x130] sm:$0xff] }
 0x4a2   :  { %v1958_v39 = vsel %vm1957_vm2, %v2921_v30, %v1954_v33  ;;  %v5946_v33 = vld [vmem:[#allocation10 + $0x178] sm:$0xff]  ;;  %v1982_v30 = vor.u32 1.1754944e-38, %v1981_v31 }
 0x4a3   :  { %v1963_v19 = vsel %vm1960_vm3, %v1962_v35, %v1958_v39  ;;  %v5938_v27 = vadd.f32 %v1883_v23, %v1882_v0  ;;  %vm1980_vm7 = vcmp.eq.f32.partialorder %v1979_v40, 8.507059e+37  ;;  %v5969_v35 = vld [vmem:[#allocation7 + $0x178] sm:$0xff]  ;;  %v5993_v39 = vld [vmem:[#allocation7 + $0x148] sm:$0xff] }
 0x4a4   :  { %v1985_v60 = vmul.f32 %v1963_v19, %v1943_v47  ;;  %v1983_v5 = vsel %vm1980_vm7, %v1982_v30, %v1978_v21  ;;  %v5984_v0 = vld [vmem:[#allocation10 + $0x150] sm:$0xff]  ;;  %v5987_v23 = vld [vmem:[#allocation10 + $0x158] sm:$0xff]  ;;  %v6017_v40 = vld [vmem:[#allocation10 + $0x128] sm:$0xff] }
 0x4a5   :  { %2068 = vmatmul.f32.vlgmr.msrb.gmra.mxu1 %v5938_v27  ;;  %v1988_v13 = vsub.f32 1.0, %v1983_v5  ;;  %v1990_v25 = vmul.f32 %v1983_v5, %v5658_v8  ;;  %v5981_v8 = vld [vmem:[#allocation7 + $0x160] sm:$0xff]  ;;  %v6011_v31 = vld [vmem:[#allocation7 + $0x118] sm:$0xff]  ;;  %v6026_v30 = vld [vmem:[#allocation10 + $0x108] sm:$0xff] }
 0x4a6   :  { %v1986_v37 = vadd.f32 %v1985_v60, %v339_v17  ;;  %2306 = vmatpush.msrb.mxu1 %v5946_v33  ;;  %v5990_v47 = vld [vmem:[#allocation10 + $0xb8] sm:$0xff]  ;;  %v6005_v17 = vld [vmem:[#allocation7 + $0x130] sm:$0xff]  ;;  %v6014_v60 = vld [vmem:[#allocation10 + $0x120] sm:$0xff] }
 0x4a7   :  { %7346 = vst [vmem:[#allocation76_spill] sm:$0xff] %v5990_v47  ;;  %v5996_v19 = vld [vmem:[#allocation10 + $0x138] sm:$0xff]  ;;  %v6029_v5 = vld [vmem:[#allocation10 + $0x110] sm:$0xff] }
 0x4a8   :  { %2924 = vtanh.f32 %v1986_v37  ;;  %2307 = vmatpush.msrb.mxu1 %v5950_v28  ;;  %v6020_v37 = vld [vmem:[#allocation10 + $0x88] sm:$0xff]  ;;  %v6023_v21 = vld [vmem:[#allocation7 + $0x100] sm:$0xff] }
 0x4a9   :  { %7348 = vst [vmem:[#allocation42_spill] sm:$0xff] %v6020_v37 }
 0x4aa   :  { %2308 = vmatpush.msrb.mxu1 %v5953_v4 }
 0x4ac   :  { %2309 = vmatpush.msrb.mxu1 %v5956_v16 }
 0x4ae   :  { %v2925_v58 = vpop.eup %2924  ;;  %2310 = vmatpush.msrb.mxu1 %v5358_v49  ;;  %v5972_v49 = vld [vmem:[#allocation10 + $0x168] sm:$0xff] }
 0x4af   :  { %v1989_v63 = vmul.f32 %v2925_v58, %v1988_v13  ;;  %v6032_v13 = vld [vmem:[#allocation10 + $0x70] sm:$0xff]  ;;  %v6035_v58 = vld [vmem:[#allocation7 + $0xe8] sm:$0xff] }
 0x4b0   :  { %2311 = vmatpush.msrb.mxu1 %v5370_v61  ;;  %v5975_v61 = vld [vmem:[#allocation10 + $0x170] sm:$0xff]  ;;  %7349 = vst [vmem:[#allocation62_spill] sm:$0xff] %v6032_v13 }
 0x4b1   :  { %v5962_v36 = vadd.f32 %v1990_v25, %v1989_v63  ;;  %v6038_v63 = vld [vmem:[#allocation10 + $0xf0] sm:$0xff]  ;;  %v6041_v25 = vld [vmem:[#allocation10 + $0xf8] sm:$0xff] }
 0x4b2   :  { %2312 = vmatpush.msrb.mxu1 %v5382_v50  ;;  %v5978_v50 = vld [vmem:[#allocation10 + $0xd0] sm:$0xff]  ;;  %7350 = vst [vmem:[#allocation78_spill] sm:$0xff] %v6041_v25 }
 0x4b3   :  { %2008 = vmatmul.f32.vlgmr.msra.gmra.mxu2 %v5962_v36  ;;  %2028 = vmatmul.f32.vlgmr.msrb.gmra.mxu3 %v5962_v36  ;;  %7345 = vst [vmem:[#allocation54_spill] sm:$0xff] %v5978_v50 }
 0x4b4   :  { %2048 = vmatmul.f32.vlgmr.msrb.gmra.mxu0 %v5962_v36  ;;  %2195 = vmatmul.f32.vlgmr.msra.gmra.mxu1 %v5962_v36 }
 0x4b5   :  { %2199 = vmatpush.msra.mxu2 %v5969_v35  ;;  %2266 = vmatpush.msrb.mxu3 %v5972_v49 }
 0x4b6   :  { %2286 = vmatpush.msrb.mxu0 %v5975_v61  ;;  %2313 = vmatpush.msrb.mxu1 %v5978_v50  ;;  %v6056_v50 = vld [vmem:[#allocation10 + $0x40] sm:$0xff] }
 0x4b7   :  { %2200 = vmatpush.msra.mxu2 %v5981_v8  ;;  %2267 = vmatpush.msrb.mxu3 %v5984_v0  ;;  %7355 = vst [vmem:[#allocation50_spill] sm:$0xff] %v6056_v50 }
 0x4b8   :  { %2287 = vmatpush.msrb.mxu0 %v5987_v23  ;;  %2314 = vmatpush.msrb.mxu1 %v5990_v47  ;;  %v6053_v47 = vld [vmem:[#allocation10 + $0xe0] sm:$0xff] }
 0x4b9   :  { %2201 = vmatpush.msra.mxu2 %v5993_v39  ;;  %2268 = vmatpush.msrb.mxu3 %v5996_v19  ;;  %7354 = vst [vmem:[#allocation46_spill] sm:$0xff] %v6053_v47 }
 0x4ba   :  { %2288 = vmatpush.msrb.mxu0 %v5999_v62  ;;  %2315 = vmatpush.msrb.mxu1 %v6002_v44  ;;  %v6047_v44 = vld [vmem:[#allocation7 + $0xd0] sm:$0xff] }
 0x4bb   :  { %2202 = vmatpush.msra.mxu2 %v6005_v17  ;;  %2108 = vmatmul.f32.vlgmr.msra.gmra.mxu3 %v5938_v27  ;;  %7352 = vst [vmem:[#allocation67_spill] sm:$0xff] %v6047_v44 }
 0x4bc   :  { %2088 = vmatmul.f32.vlgmr.msrb.gmra.mxu2 %v5938_v27  ;;  %2175 = vmatmul.f32.vlgmr.msra.gmra.mxu0 %v5962_v36 }
 0x4bd   :  { %2203 = vmatpush.msra.mxu2 %v6011_v31  ;;  %2269 = vmatpush.msrb.mxu3 %v6014_v60 }
 0x4be   :  { %2289 = vmatpush.msrb.mxu0 %v6017_v40  ;;  %2316 = vmatpush.msrb.mxu1 %v6020_v37  ;;  %v6044_v37 = vld [vmem:[#allocation10 + $0x58] sm:$0xff] }
 0x4bf   :  { %2204 = vmatpush.msra.mxu2 %v6023_v21  ;;  %2270 = vmatpush.msrb.mxu3 %v6026_v30  ;;  %7351 = vst [vmem:[#allocation44_spill] sm:$0xff] %v6044_v37 }
 0x4c0   :  { %2290 = vmatpush.msrb.mxu0 %v6029_v5  ;;  %2317 = vmatpush.msrb.mxu1 %v6032_v13  ;;  %v6050_v13 = vld [vmem:[#allocation10 + $0xd8] sm:$0xff] }
 0x4c1   :  { %2205 = vmatpush.msra.mxu2 %v6035_v58  ;;  %2271 = vmatpush.msrb.mxu3 %v6038_v63  ;;  %7353 = vst [vmem:[#allocation57_spill] sm:$0xff] %v6050_v13 }
 0x4c2   :  { %2291 = vmatpush.msrb.mxu0 %v6041_v25  ;;  %2318 = vmatpush.msrb.mxu1 %v6044_v37  ;;  %v6059_v25 = vld [vmem:[#allocation7 + $0xb8] sm:$0xff]  ;;  %v6062_v37 = vld [vmem:[#allocation10 + $0xc0] sm:$0xff] }
 0x4c3   :  { %2206 = vmatpush.msra.mxu2 %v6047_v44  ;;  %2272 = vmatpush.msrb.mxu3 %v6050_v13  ;;  %7356 = vst [vmem:[#allocation88_spill] sm:$0xff] %v6062_v37  ;;  %v6066_v44 = vld [vmem:[#allocation10 + $0x28] sm:$0xff]  ;;  %v6069_v13 = vld [vmem:[#allocation7 + $0xa0] sm:$0xff] }
 0x4c4   :  { %2292 = vmatpush.msrb.mxu0 %v6053_v47  ;;  %2319 = vmatpush.msrb.mxu1 %v6056_v50  ;;  %7357 = vst [vmem:[#allocation59_spill] sm:$0xff] %v6066_v44  ;;  %v6072_v47 = vld [vmem:[#allocation10 + $0xa8] sm:$0xff]  ;;  %v6076_v50 = vld [vmem:[#allocation10 + $0x10] sm:$0xff] }
 0x4c5   :  { %2207 = vmatpush.msra.mxu2 %v6059_v25  ;;  %2273 = vmatpush.msrb.mxu3 %v6062_v37  ;;  %7358 = vst [vmem:[#allocation91_spill] sm:$0xff] %v6076_v50  ;;  %v6079_v37 = vld [vmem:[#allocation7 + $0x88] sm:$0xff] }
 0x4c6   :  { %2293 = vmatpush.msrb.mxu0 %v5699_v7  ;;  %2320 = vmatpush.msrb.mxu1 %v6066_v44  ;;  %v6082_v7 = vld [vmem:[#allocation10 + $0x90] sm:$0xff] }
 0x4c7   :  { %2208 = vmatpush.msra.mxu2 %v6069_v13  ;;  %2274 = vmatpush.msrb.mxu3 %v6072_v47  ;;  %7359 = vst [vmem:[#allocation70_spill] sm:$0xff] %v6082_v7  ;;  %v6087_v44 = vld [vmem:[#allocation7 + $0x70] sm:$0xff] }
 0x4c8   :  { %2294 = vmatpush.msrb.mxu0 %v5705_v45  ;;  %2321 = vmatpush.msrb.mxu1 %v6076_v50  ;;  %v6090_v45 = vld [vmem:[#allocation10 + $0x78] sm:$0xff] }
 0x4c9   :  { %2209 = vmatpush.msra.mxu2 %v6079_v37  ;;  %2275 = vmatpush.msrb.mxu3 %v6082_v7  ;;  %v6095_v50 = vld [vmem:[#allocation7 + $0x58] sm:$0xff]  ;;  %v6098_v7 = vld [vmem:[#allocation10 + $0x60] sm:$0xff] }
 0x4ca   :  { %2295 = vmatpush.msrb.mxu0 %v5711_v34  ;;  %2433 = vmatpush.msra.mxu1 %v5720_v52  ;;  %v6103_v34 = vld [vmem:[#allocation7 + $0x40] sm:$0xff]  ;;  %v6106_v52 = vld [vmem:[#allocation10 + $0x48] sm:$0xff] }
 0x4cb   :  { %2210 = vmatpush.msra.mxu2 %v6087_v44  ;;  %2276 = vmatpush.msrb.mxu3 %v6090_v45  ;;  %7360 = vst [vmem:[#allocation73_spill] sm:$0xff] %v6106_v52 }
 0x4cc   :  { %2296 = vmatpush.msrb.mxu0 %v5717_v6  ;;  %2434 = vmatpush.msra.mxu1 %v5728_v20  ;;  %v6111_v6 = vld [vmem:[#allocation7 + $0x28] sm:$0xff]  ;;  %v6114_v20 = vld [vmem:[#allocation10 + $0x30] sm:$0xff] }
 0x4cd   :  { %2211 = vmatpush.msra.mxu2 %v6095_v50  ;;  %2277 = vmatpush.msrb.mxu3 %v6098_v7  ;;  %7361 = vst [vmem:[#allocation65_spill] sm:$0xff] %v6111_v6 }
 0x4ce   :  { %2297 = vmatpush.msrb.mxu0 %v5725_v22  ;;  %2435 = vmatpush.msra.mxu1 %v5736_v18  ;;  %7362 = vst [vmem:[#allocation33_spill] sm:$0xff] %v6114_v20  ;;  %v6119_v22 = vld [vmem:[#allocation7 + $0x10] sm:$0xff]  ;;  %v6122_v18 = vld [vmem:[#allocation10 + $0x18] sm:$0xff] }
 0x4cf   :  { %2212 = vmatpush.msra.mxu2 %v6103_v34  ;;  %2278 = vmatpush.msrb.mxu3 %v6106_v52  ;;  %7363 = vst [vmem:[#allocation92_spill] sm:$0xff] %v6119_v22 }
 0x4d0   :  { %2298 = vmatpush.msrb.mxu0 %v5733_v10  ;;  %2436 = vmatpush.msra.mxu1 %v5744_v56  ;;  %7364 = vst [vmem:[#allocation90_spill] sm:$0xff] %v6122_v18  ;;  %v6127_v10 = vld [vmem:[#allocation11 + $0x168] sm:$0xff]  ;;  %v6130_v56 = vld [vmem:[#allocation10] sm:$0xff] }
 0x4d1   :  { %2213 = vmatpush.msra.mxu2 %v6111_v6  ;;  %2279 = vmatpush.msrb.mxu3 %v6114_v20  ;;  %7365 = vst [vmem:[#allocation37_spill] sm:$0xff] %v6127_v10  ;;  %v7431_v6 = vld [vmem:[#allocation71_spill] sm:$0xff] }
 0x4d2   :  { %2299 = vmatpush.msrb.mxu0 %v5741_v48  ;;  %2437 = vmatpush.msra.mxu1 %v5764_v2  ;;  %7366 = vst [vmem:[#allocation35_spill] sm:$0xff] %v6130_v56  ;;  %v6133_v48 = vld [vmem:[#allocation11 + $0x170] sm:$0xff] }
 0x4d3   :  { %2214 = vmatpush.msra.mxu2 %v6119_v22  ;;  %2280 = vmatpush.msrb.mxu3 %v6122_v18  ;;  %7367 = vst [vmem:[#allocation63_spill] sm:$0xff] %v6133_v48  ;;  %v6137_v2 = vld [vmem:[#allocation11 + $0x150] sm:$0xff] }
 0x4d4   :  { %2215 = vmatmul.f32.vlgmr.msra.gmra.mxu2 %v5962_v36  ;;  %2300 = vmatpush.msrb.mxu0 %v5750_v59  ;;  %7368 = vst [vmem:[#allocation101_spill] sm:$0xff] %v6137_v2  ;;  %v6141_v59 = vld [vmem:[#allocation11 + $0x158] sm:$0xff]  ;;  %v7430_v22 = vld [vmem:[#allocation39_spill] sm:$0xff] }
 0x4d5   :  { %2326 = vmatpush.msrb.mxu2 %v6127_v10  ;;  %2281 = vmatpush.msrb.mxu3 %v6130_v56  ;;  %7369 = vst [vmem:[#allocation100_spill] sm:$0xff] %v6141_v59  ;;  %v6145_v10 = vld [vmem:[#allocation11 + $0x138] sm:$0xff] }
 0x4d6   :  { %2301 = vmatpush.msrb.mxu0 %v5756_v38  ;;  %2438 = vmatpush.msra.mxu1 %v5772_v3  ;;  %7370 = vst [vmem:[#allocation102_spill] sm:$0xff] %v6145_v10  ;;  %v6153_v38 = vld [vmem:[#allocation11 + $0x120] sm:$0xff]  ;;  %v6161_v3 = vld [vmem:[#allocation11 + $0x108] sm:$0xff] }
 0x4d7   :  { %2346 = vmatpush.msra.mxu3 %v6133_v48  ;;  %2327 = vmatpush.msrb.mxu2 %v6137_v2  ;;  %v6149_v48 = vld [vmem:[#allocation11 + $0x140] sm:$0xff]  ;;  %7372 = vst [vmem:[#allocation104_spill] sm:$0xff] %v6153_v38 }
 0x4d8   :  { %2366 = vmatpush.msra.mxu0 %v5760_v54  ;;  %7371 = vst [vmem:[#allocation103_spill] sm:$0xff] %v6149_v48  ;;  %2439 = vmatpush.msra.mxu1 %v5780_v42  ;;  %v6157_v54 = vld [vmem:[#allocation11 + $0x128] sm:$0xff]  ;;  %v6169_v42 = vld [vmem:[#allocation11 + $0xf0] sm:$0xff] }
 0x4d9   :  { %2347 = vmatpush.msra.mxu3 %v6141_v59  ;;  %2328 = vmatpush.msrb.mxu2 %v6145_v10  ;;  %7373 = vst [vmem:[#allocation105_spill] sm:$0xff] %v6157_v54  ;;  %v7426_v59 = vld [vmem:[#allocation93_spill] sm:$0xff] }
 0x4da   :  { %2367 = vmatpush.msra.mxu0 %v5768_v53  ;;  %2440 = vmatpush.msra.mxu1 %v5788_v32  ;;  %7374 = vst [vmem:[#allocation106_spill] sm:$0xff] %v6161_v3  ;;  %v6165_v53 = vld [vmem:[#allocation11 + $0x110] sm:$0xff]  ;;  %v6177_v32 = vld [vmem:[#allocation11 + $0xd8] sm:$0xff] }
 0x4db   :  { %2348 = vmatpush.msra.mxu3 %v6149_v48  ;;  %2329 = vmatpush.msrb.mxu2 %v6153_v38  ;;  %7375 = vst [vmem:[#allocation107_spill] sm:$0xff] %v6165_v53 }
 0x4dc   :  { %2368 = vmatpush.msra.mxu0 %v5776_v12  ;;  %2441 = vmatpush.msra.mxu1 %v5796_v41  ;;  %7376 = vst [vmem:[#allocation108_spill] sm:$0xff] %v6169_v42  ;;  %v6173_v12 = vld [vmem:[#allocation11 + $0xf8] sm:$0xff]  ;;  %v6185_v41 = vld [vmem:[#allocation11 + $0xc0] sm:$0xff] }
 0x4dd   :  { %2349 = vmatpush.msra.mxu3 %v6157_v54  ;;  %2330 = vmatpush.msrb.mxu2 %v6161_v3  ;;  %7377 = vst [vmem:[#allocation109_spill] sm:$0xff] %v6173_v12  ;;  %v7424_v54 = vld [vmem:[#allocation66_spill] sm:$0xff] }
 0x4de   :  { %2369 = vmatpush.msra.mxu0 %v5784_v26  ;;  %2442 = vmatpush.msra.mxu1 %v5804_v55  ;;  %7378 = vst [vmem:[#allocation110_spill] sm:$0xff] %v6177_v32  ;;  %v6181_v26 = vld [vmem:[#allocation11 + $0xe0] sm:$0xff]  ;;  %v6193_v55 = vld [vmem:[#allocation11 + $0xa8] sm:$0xff] }
 0x4df   :  { %2350 = vmatpush.msra.mxu3 %v6165_v53  ;;  %2331 = vmatpush.msrb.mxu2 %v6169_v42  ;;  %7379 = vst [vmem:[#allocation111_spill] sm:$0xff] %v6181_v26  ;;  %v7423_v42 = vld [vmem:[#allocation64_spill] sm:$0xff] }
 0x4e0   :  { %2370 = vmatpush.msra.mxu0 %v5792_v9  ;;  %2443 = vmatpush.msra.mxu1 %v5812_v24  ;;  %7380 = vst [vmem:[#allocation112_spill] sm:$0xff] %v6185_v41  ;;  %v6189_v9 = vld [vmem:[#allocation11 + $0xc8] sm:$0xff]  ;;  %v6201_v24 = vld [vmem:[#allocation11 + $0x90] sm:$0xff] }
 0x4e1   :  { %2351 = vmatpush.msra.mxu3 %v6173_v12  ;;  %2332 = vmatpush.msrb.mxu2 %v6177_v32  ;;  %7381 = vst [vmem:[#allocation113_spill] sm:$0xff] %v6189_v9 }
 0x4e2   :  { %2371 = vmatpush.msra.mxu0 %v5800_v1  ;;  %2444 = vmatpush.msra.mxu1 %v5820_v57  ;;  %7382 = vst [vmem:[#allocation114_spill] sm:$0xff] %v6193_v55  ;;  %v6197_v1 = vld [vmem:[#allocation11 + $0xb0] sm:$0xff]  ;;  %v6209_v57 = vld [vmem:[#allocation11 + $0x78] sm:$0xff] }
 0x4e3   :  { %2352 = vmatpush.msra.mxu3 %v6181_v26  ;;  %2333 = vmatpush.msrb.mxu2 %v6185_v41  ;;  %7383 = vst [vmem:[#allocation115_spill] sm:$0xff] %v6197_v1  ;;  %v7416_v26 = vld [vmem:[#allocation86_spill] sm:$0xff]  ;;  %v7420_v41 = vld [vmem:[#allocation85_spill] sm:$0xff] }
 0x4e4   :  { %2372 = vmatpush.msra.mxu0 %v5808_v43  ;;  %2445 = vmatpush.msra.mxu1 %v5828_v15  ;;  %7384 = vst [vmem:[#allocation116_spill] sm:$0xff] %v6201_v24  ;;  %v6205_v43 = vld [vmem:[#allocation11 + $0x98] sm:$0xff]  ;;  %v7389_v15 = vld [vmem:[#allocation27_spill] sm:$0xff] }
 0x4e5   :  { %2353 = vmatpush.msra.mxu3 %v6189_v9  ;;  %2334 = vmatpush.msrb.mxu2 %v6193_v55  ;;  %7385 = vst [vmem:[#allocation117_spill] sm:$0xff] %v6205_v43  ;;  %v7410_v9 = vld [vmem:[#allocation81_spill] sm:$0xff]  ;;  %v7412_v55 = vld [vmem:[#allocation48_spill] sm:$0xff] }
 0x4e6   :  { %2373 = vmatpush.msra.mxu0 %v5816_v46  ;;  %2446 = vmatpush.msra.mxu1 %v5836_v14  ;;  %7386 = vst [vmem:[#allocation95_spill] sm:$0xff] %v6209_v57  ;;  %v7387_v46 = vld [vmem:[#allocation47_spill] sm:$0xff] }
 0x4e7   :  { %2354 = vmatpush.msra.mxu3 %v6197_v1  ;;  %2335 = vmatpush.msrb.mxu2 %v6201_v24  ;;  %v6213_v1 = vld [vmem:[#allocation11 + $0x80] sm:$0xff]  ;;  %v7393_v14 = vld [vmem:[#allocation51_spill] sm:$0xff] }
 0x4e8   :  { %2374 = vmatpush.msra.mxu0 %v5824_v11  ;;  %7388 = vst [vmem:[#allocation41_spill] sm:$0xff] %v6213_v1  ;;  %2447 = vmatpush.msra.mxu1 %v7389_v15  ;;  %v6217_v24 = vld [vmem:[#allocation11 + $0x60] sm:$0xff]  ;;  %v6232_v15 = vld [vmem:[#allocation11 + $0x30] sm:$0xff] }
 0x4e9   :  { %2355 = vmatpush.msra.mxu3 %v6205_v43  ;;  %2336 = vmatpush.msrb.mxu2 %v6209_v57  ;;  %7390 = vst [vmem:[#allocation96_spill] sm:$0xff] %v6217_v24  ;;  %v7391_v11 = vld [vmem:[#allocation77_spill] sm:$0xff]  ;;  %v6221_v43 = vld [vmem:[#allocation11 + $0x68] sm:$0xff] }
 0x4ea   :  { %2375 = vmatpush.msra.mxu0 %v7387_v46  ;;  %7392 = vst [vmem:[#allocation118_spill] sm:$0xff] %v6221_v43  ;;  %2448 = vmatpush.msra.mxu1 %v7393_v14  ;;  %v6225_v57 = vld [vmem:[#allocation11 + $0x48] sm:$0xff]  ;;  %v7395_v46 = vld [vmem:[#allocation49_spill] sm:$0xff] }
 0x4eb   :  { %2356 = vmatpush.msra.mxu3 %v6213_v1  ;;  %2337 = vmatpush.msrb.mxu2 %v6217_v24  ;;  %7394 = vst [vmem:[#allocation97_spill] sm:$0xff] %v6225_v57  ;;  %v6229_v1 = vld [vmem:[#allocation11 + $0x50] sm:$0xff]  ;;  %v6236_v24 = vld [vmem:[#allocation11 + $0x38] sm:$0xff] }
 0x4ec   :  { %2376 = vmatpush.msra.mxu0 %v7391_v11  ;;  %7396 = vst [vmem:[#allocation119_spill] sm:$0xff] %v6229_v1  ;;  %v7398_v11 = vld [vmem:[#allocation53_spill] sm:$0xff] }
 0x4ed   :  { %2357 = vmatpush.msra.mxu3 %v6221_v43  ;;  %2338 = vmatpush.msrb.mxu2 %v6225_v57  ;;  %7397 = vst [vmem:[#allocation24_spill] sm:$0xff] %v6232_v15  ;;  %v6239_v14 = vld [vmem:[#allocation11 + $0x18] sm:$0xff]  ;;  %v7401_v43 = vld [vmem:[#allocation82_spill] sm:$0xff] }
 0x4ee   :  { %2377 = vmatpush.msra.mxu0 %v7395_v46  ;;  %7399 = vst [vmem:[#allocation98_spill] sm:$0xff] %v6236_v24  ;;  %v6243_v46 = vld [vmem:[#allocation11 + $0x20] sm:$0xff]  ;;  %v6251_v57 = vld [vmem:[#allocation11 + $0x8] sm:$0xff] }
 0x4ef   :  { %2358 = vmatpush.msra.mxu3 %v6229_v1  ;;  %2339 = vmatpush.msrb.mxu2 %v6232_v15  ;;  %7400 = vst [vmem:[#allocation43_spill] sm:$0xff] %v6239_v14  ;;  %v6246_v1 = vld [vmem:[#allocation11] sm:$0xff] }
 0x4f0   :  { %2378 = vmatpush.msra.mxu0 %v7398_v11  ;;  %7402 = vst [vmem:[#allocation99_spill] sm:$0xff] %v6243_v46  ;;  %v7404_v15 = vld [vmem:[#allocation30_spill] sm:$0xff]  ;;  %v7405_v11 = vld [vmem:[#allocation23_spill] sm:$0xff] }
 0x4f1   :  { %2359 = vmatpush.msra.mxu3 %v6236_v24  ;;  %2340 = vmatpush.msrb.mxu2 %v6239_v14  ;;  %7403 = vst [vmem:[#allocation26_spill] sm:$0xff] %v6246_v1  ;;  %v7407_v24 = vld [vmem:[#allocation69_spill] sm:$0xff] }
 0x4f2   :  { %2379 = vmatpush.msra.mxu0 %v7401_v43  ;;  %7406 = vst [vmem:[#allocation79_spill] sm:$0xff] %v6251_v57  ;;  %v7408_v14 = vld [vmem:[#allocation45_spill] sm:$0xff]  ;;  %v7409_v43 = vld [vmem:[#allocation80_spill] sm:$0xff] }
 0x4f3   :  { %2360 = vmatpush.msra.mxu3 %v6243_v46  ;;  %2341 = vmatpush.msrb.mxu2 %v6246_v1  ;;  %v7411_v46 = vld [vmem:[#allocation74_spill] sm:$0xff]  ;;  %v7413_v1 = vld [vmem:[#allocation83_spill] sm:$0xff] }
 0x4f4   :  { %2380 = vmatpush.msra.mxu0 %v7404_v15  ;;  %v7414_v15 = vld [vmem:[#allocation52_spill] sm:$0xff] }
 0x4f5   :  { %2453 = vmatpush.msra.mxu2 %v7405_v11  ;;  %2361 = vmatpush.msra.mxu3 %v6251_v57  ;;  %v7415_v11 = vld [vmem:[#allocation40_spill] sm:$0xff]  ;;  %v7417_v57 = vld [vmem:[#allocation29_spill] sm:$0xff] }
 0x4f6   :  { %2381 = vmatpush.msra.mxu0 %v7407_v24  ;;  %v7418_v24 = vld [vmem:[#allocation84_spill] sm:$0xff] }
 0x4f7   :  { %2454 = vmatpush.msra.mxu2 %v7408_v14  ;;  %v7419_v14 = vld [vmem:[#allocation55_spill] sm:$0xff] }
 0x4f9   :  { %2455 = vmatpush.msra.mxu2 %v7409_v43  ;;  %v3377_v43 = vld [vmem:[#allocation7 + $0x38] sm:$0xff] }
 0x4fb   :  { %2456 = vmatpush.msra.mxu2 %v7410_v9  ;;  %v3378_v9 = vld [vmem:[#allocation7 + $0x20] sm:$0xff] }
 0x4fd   :  { %2457 = vmatpush.msra.mxu2 %v7411_v46  ;;  %v3379_v46 = vld [vmem:[#allocation7 + $0x8] sm:$0xff] }
 0x4ff   :  { %2458 = vmatpush.msra.mxu2 %v7412_v55 }
 0x501   :  { %2459 = vmatpush.msra.mxu2 %v7413_v1 }
 0x503   :  { %2460 = vmatpush.msra.mxu2 %v7414_v15 }
 0x505   :  { %2461 = vmatpush.msra.mxu2 %v7415_v11  ;;  %v7421_v11 = vld [vmem:[#allocation32_spill] sm:$0xff] }
 0x506   :  { %v301_v12 = vadd.f32 %v7421_v11, %v7420_v41 }
 0x507   :  { %2462 = vmatpush.msra.mxu2 %v7416_v26  ;;  %v7422_v26 = vld [vmem:[#allocation87_spill] sm:$0xff] }
 0x509   :  { %2463 = vmatpush.msra.mxu2 %v7417_v57 }
 0x50b   :  { %2464 = vmatpush.msra.mxu2 %v7418_v24 }
 0x50d   :  { %2465 = vmatpush.msra.mxu2 %v7419_v14 }
 0x50f   :  { %2466 = vmatpush.msra.mxu2 %v3377_v43 }
 0x511   :  { %2467 = vmatpush.msra.mxu2 %v3378_v9 }
 0x513   :  { %2468 = vmatpush.msra.mxu2 %v3379_v46  ;;  %v7425_v46 = vld [vmem:[#allocation60_spill] sm:$0xff] }
 0x522   :  { %v2069_v55 = vpop.f32.mrf.mxu1 }
 0x523   :  { %v2070_v14 = vadd.f32 %v2069_v55, %v7423_v42  ;;  %v7428_v55 = vld [vmem:[#allocation68_spill] sm:$0xff] }
 0x531   :  { %v6267_v1 = vpop.f32.mrf.mxu0  ;;  %v2196_v15 = vpop.f32.mrf.mxu1 }
 0x532   :  { %v2197_v32 = vadd.f32 %v2196_v15, %v7422_v26  ;;  %v7429_v26 = vld [vmem:[#allocation61_spill] sm:$0xff] }
 0x534   :  { %v2239_v57 = vadd.f32 %v2197_v32, %v301_v12  ;;  %v7427_v32 = vld [vmem:[#allocation38_spill] sm:$0xff] }
 0x536   :  { %v2794_v53 = vmul.f32 -1.442695, %v2239_v57  ;;  %v2009_v24 = vpop.f32.mrf.mxu2  ;;  %v2029_v2 = vpop.f32.mrf.mxu3 }
 0x537   :  { %v2010_v43 = vadd.f32 %v2009_v24, %v7424_v54  ;;  %v2030_v57 = vadd.f32 %v2029_v2, %v7427_v32 }
 0x538   :  { %2926 = vpow2.f32 %v2794_v53 }
 0x539   :  { %v2112_v9 = vadd.f32 %v2070_v14, %v2010_v43  ;;  %v2176_v3 = vpop.f32.mrf.mxu0 }
 0x53a   :  { %v2177_v48 = vadd.f32 %v2176_v3, %v7425_v46  ;;  %v342_v46 = vadd.f32 %v7429_v26, %v4274_v51 }
 0x53b   :  { %v2791_v38 = vmul.f32 -1.442695, %v2112_v9 }
 0x53c   :  { %v2219_v10 = vadd.f32 %v2177_v48, %v7426_v59 }
 0x53d   :  { %2928 = vpow2.f32 %v2791_v38 }
 0x53e   :  { %v2927_v11 = vpop.eup %2926  ;;  %v2793_v41 = vmul.f32 -1.442695, %v2219_v10 }
 0x53f   :  { %v2089_v15 = vpop.f32.mrf.mxu2  ;;  %v6276_v12 = vadd.f32 1.0, %v2927_v11 }
 0x540   :  { %2930 = vpow2.f32 %v2793_v41  ;;  %v2090_v24 = vadd.f32 %v2089_v15, %v7428_v55  ;;  %v2109_v55 = vpop.f32.mrf.mxu3 }
 0x541   :  { %2932 = vrcp.f32 %v6276_v12  ;;  %vm2249_vm14 = vweird.f32 %v6276_v12 }
 0x542   :  { %v2132_v53 = vadd.f32 %v2090_v24, %v2030_v57 }
 0x543   :  { %v2929_v14 = vpop.eup %2928 }
 0x544   :  { %v2116_v3 = vadd.f32 1.0, %v2929_v14  ;;  %v2792_v43 = vmul.f32 -1.442695, %v2132_v53 }
 0x546   :  { %v2931_v9 = vpop.eup %2930  ;;  %2934 = vrcp.f32 %v2116_v3  ;;  %v2128_v24 = vand.u32 2147483648, %v2116_v3  ;;  %vm2122_vm9 = vweird.f32 %v2116_v3 }
 0x547   :  { %v2223_v48 = vadd.f32 1.0, %v2931_v9  ;;  %2936 = vpow2.f32 %v2792_v43  ;;  %v6281_v10 = vpop.eup %2932  ;;  %v2126_v43 = vand.u32 2147483647, %v2116_v3 }
 0x548   :  { %v2245_v2 = vmul.f32 %v6281_v10, %v6276_v12  ;;  %vm2250_vm0 = vweird.f32 %v6281_v10 }
 0x549   :  { %2938 = vrcp.f32 %v2223_v48  ;;  %v2235_v42 = vand.u32 2147483648, %v2223_v48  ;;  %vm2127_vm12 = vcmp.eq.f32.partialorder %v2126_v43, 8.507059e+37  ;;  %vm2229_vm13 = vweird.f32 %v2223_v48  ;;  %vm2251_vm3 = vmor %vm2249_vm14, %vm2250_vm0 }
 0x54a   :  { %v2246_v14 = vsub.f32 1.0, %v2245_v2  ;;  %v2110_v2 = vadd.f32 %v2109_v55, %v7430_v22  ;;  %v2253_v43 = vand.u32 2147483647, %v6276_v12 }
 0x54c   :  { %v2935_v59 = vpop.eup %2934  ;;  %v2247_v18 = vmul.f32 %v6281_v10, %v2246_v14  ;;  %v2236_v14 = vor.u32 1.1754944e-38, %v2235_v42  ;;  %vm2254_vm6 = vcmp.eq.f32.partialorder %v2253_v43, 8.507059e+37  ;;  %v7456_v43 = vld [vmem:[#allocation91_spill] sm:$0xff] }
 0x54d   :  { %v2937_v38 = vpop.eup %2936  ;;  %v2118_v41 = vmul.f32 %v2935_v59, %v2116_v3  ;;  %vm2123_vm8 = vweird.f32 %v2935_v59 }
 0x54e   :  { %v6285_v11 = vadd.f32 1.0, %v2937_v38  ;;  %vm2124_vm10 = vmor %vm2122_vm9, %vm2123_vm8  ;;  %v2129_v38 = vor.u32 1.1754944e-38, %v2128_v24 }
 0x54f   :  { %v2939_v15 = vpop.eup %2938  ;;  %v2119_v57 = vsub.f32 1.0, %v2118_v41  ;;  %v2233_v41 = vand.u32 2147483647, %v2223_v48 }
 0x550   :  { %2940 = vrcp.f32 %v6285_v11  ;;  %v2225_v53 = vmul.f32 %v2939_v15, %v2223_v48  ;;  %vm2230_vm11 = vweird.f32 %v2939_v15  ;;  %v2255_v48 = vand.u32 2147483648, %v6276_v12 }
 0x551   :  { %v2120_v9 = vmul.f32 %v2935_v59, %v2119_v57  ;;  %vm2231_vm15 = vmor %vm2229_vm13, %vm2230_vm11  ;;  %vm2234_vm1 = vcmp.eq.f32.partialorder %v2233_v41, 8.507059e+37  ;;  %vm2142_vm4 = vweird.f32 %v6285_v11 }
 0x552   :  { %v2226_v32 = vsub.f32 1.0, %v2225_v53  ;;  %v2050_v53 = vadd.f32 %v6267_v1, %v7431_v6 }
 0x553   :  { %v2121_v54 = vadd.f32 %v2935_v59, %v2120_v9 }
 0x554   :  { %v2227_v56 = vmul.f32 %v2939_v15, %v2226_v32 }
 0x555   :  { %v2125_v57 = vsel %vm2124_vm10, %v2935_v59, %v2121_v54 }
 0x556   :  { %v2941_v20 = vpop.eup %2940  ;;  %v2130_v52 = vsel %vm2127_vm12, %v2129_v38, %v2125_v57  ;;  %v2228_v26 = vadd.f32 %v2939_v15, %v2227_v56  ;;  %v2248_v56 = vadd.f32 %v6281_v10, %v2247_v18  ;;  %v2148_v38 = vand.u32 2147483648, %v6285_v11 }
 0x557   :  { %v2138_v3 = vmul.f32 %v2941_v20, %v6285_v11  ;;  %v2152_v32 = vmul.f32 %v2130_v52, %v2110_v2  ;;  %v2216_v24 = vpop.f32.mrf.mxu2  ;;  %vm2143_vm2 = vweird.f32 %v2941_v20  ;;  %v2146_v2 = vand.u32 2147483647, %v6285_v11 }
 0x558   :  { %v2217_v54 = vadd.f32 %v2216_v24, %v4270_v29  ;;  %v2232_v55 = vsel %vm2231_vm15, %v2939_v15, %v2228_v26  ;;  %v2252_v18 = vsel %vm2251_vm3, %v6281_v10, %v2248_v56  ;;  %v2256_v57 = vor.u32 1.1754944e-38, %v2255_v48  ;;  %vm2144_vm5 = vmor %vm2142_vm4, %vm2143_vm2  ;;  %v3392_v56 = vld [vmem:[#allocation11 + $0x178] sm:$0xff]  ;;  %v7455_v48 = vld [vmem:[#allocation102_spill] sm:$0xff] }
 0x559   :  { %v2139_v59 = vsub.f32 1.0, %v2138_v3  ;;  %v2153_v1 = vadd.f32 %v2152_v32, %v2050_v53  ;;  %v2237_v9 = vsel %vm2234_vm1, %v2236_v14, %v2232_v55  ;;  %v2149_v53 = vor.u32 1.1754944e-38, %v2148_v38  ;;  %v3393_v38 = vld [vmem:[#allocation11 + $0x160] sm:$0xff] }
 0x55a   :  { %v2259_v52 = vmul.f32 %v2237_v9, %v2217_v54  ;;  %vm2147_vm7 = vcmp.eq.f32.partialorder %v2146_v2, 8.507059e+37  ;;  %v2257_v3 = vsel %vm2254_vm6, %v2256_v57, %v2252_v18  ;;  %v7454_v9 = vld [vmem:[#allocation63_spill] sm:$0xff]  ;;  %v7460_v18 = vld [vmem:[#allocation106_spill] sm:$0xff] }
 0x55b   :  { %2942 = vtanh.f32 %v2153_v1  ;;  %v2140_v42 = vmul.f32 %v2941_v20, %v2139_v59  ;;  %v2262_v54 = vsub.f32 1.0, %v2257_v3  ;;  %v2264_v59 = vmul.f32 %v2257_v3, %v5962_v36  ;;  %v7434_v36 = vld [vmem:[#allocation57_spill] sm:$0xff]  ;;  %v7459_v2 = vld [vmem:[#allocation103_spill] sm:$0xff] }
 0x55c   :  { %v2260_v15 = vadd.f32 %v2259_v52, %v342_v46  ;;  %v7457_v52 = vld [vmem:[#allocation100_spill] sm:$0xff] }
 0x55d   :  { %v2141_v41 = vadd.f32 %v2941_v20, %v2140_v42  ;;  %v7458_v42 = vld [vmem:[#allocation104_spill] sm:$0xff] }
 0x55e   :  { %2944 = vtanh.f32 %v2260_v15  ;;  %v3394_v15 = vld [vmem:[#allocation11 + $0x148] sm:$0xff]  ;;  %v3395_v57 = vld [vmem:[#allocation11 + $0x130] sm:$0xff]  ;;  %v3396_v3 = vld [vmem:[#allocation11 + $0x118] sm:$0xff] }
 0x55f   :  { %v2145_v26 = vsel %vm2144_vm5, %v2941_v20, %v2141_v41  ;;  %v3391_v20 = vld [vmem:[#allocation10 + $0x8] sm:$0xff]  ;;  %v7461_v41 = vld [vmem:[#allocation105_spill] sm:$0xff] }
 0x560   :  { %v2150_v32 = vsel %vm2147_vm7, %v2149_v53, %v2145_v26  ;;  %v7462_v53 = vld [vmem:[#allocation108_spill] sm:$0xff]  ;;  %v7463_v26 = vld [vmem:[#allocation107_spill] sm:$0xff] }
 0x561   :  { %v2943_v24 = vpop.eup %2942  ;;  %v2155_v14 = vsub.f32 1.0, %v2150_v32  ;;  %v2157_v46 = vmul.f32 %v2150_v32, %v5938_v27  ;;  %v3380_v27 = vld [vmem:[#allocation10 + $0x118] sm:$0xff]  ;;  %v7464_v32 = vld [vmem:[#allocation110_spill] sm:$0xff] }
 0x563   :  { %v2156_v12 = vmul.f32 %v2943_v24, %v2155_v14  ;;  %v7465_v24 = vld [vmem:[#allocation109_spill] sm:$0xff] }
 0x564   :  { %v2945_v55 = vpop.eup %2944  ;;  %v3397_v14 = vld [vmem:[#allocation11 + $0x100] sm:$0xff] }
 0x565   :  { %v2263_v10 = vmul.f32 %v2945_v55, %v2262_v54  ;;  %v6312_v11 = vadd.f32 %v2157_v46, %v2156_v12  ;;  %v7466_v54 = vld [vmem:[#allocation112_spill] sm:$0xff]  ;;  %v7467_v12 = vld [vmem:[#allocation111_spill] sm:$0xff]  ;;  %v7468_v55 = vld [vmem:[#allocation114_spill] sm:$0xff] }
 0x566   :  { %v3398_v46 = vld [vmem:[#allocation11 + $0xe8] sm:$0xff] }
 0x567   :  { %v6314_v1 = vadd.f32 %v2264_v59, %v2263_v10  ;;  %2342 = vmatmul.f32.vlgmr.msrb.gmra.mxu2 %v6312_v11  ;;  %v7469_v10 = vld [vmem:[#allocation113_spill] sm:$0xff]  ;;  %v3399_v59 = vld [vmem:[#allocation11 + $0xd0] sm:$0xff] }
 0x568   :  { %2580 = vmatpush.msrb.mxu2 %v5946_v33  ;;  %v7432_v33 = vld [vmem:[#allocation78_spill] sm:$0xff] }
 0x569   :  { %2282 = vmatmul.f32.vlgmr.msrb.gmra.mxu3 %v6314_v1  ;;  %2302 = vmatmul.f32.vlgmr.msrb.gmra.mxu0 %v6314_v1 }
 0x56a   :  { %2322 = vmatmul.f32.vlgmr.msrb.gmra.mxu1 %v6314_v1  ;;  %2473 = vmatpush.msrb.mxu3 %v5969_v35  ;;  %v7435_v35 = vld [vmem:[#allocation46_spill] sm:$0xff] }
 0x56b   :  { %2540 = vmatpush.msrb.mxu0 %v5972_v49  ;;  %2560 = vmatpush.msrb.mxu1 %v5975_v61  ;;  %v7436_v49 = vld [vmem:[#allocation88_spill] sm:$0xff]  ;;  %v3383_v61 = vld [vmem:[#allocation10 + $0xc8] sm:$0xff] }
 0x56c   :  { %2474 = vmatpush.msrb.mxu3 %v5981_v8  ;;  %2581 = vmatpush.msrb.mxu2 %v5950_v28  ;;  %v7433_v28 = vld [vmem:[#allocation67_spill] sm:$0xff]  ;;  %v7437_v8 = vld [vmem:[#allocation54_spill] sm:$0xff] }
 0x56d   :  { %2541 = vmatpush.msrb.mxu0 %v5984_v0  ;;  %2561 = vmatpush.msrb.mxu1 %v5987_v23  ;;  %v3384_v0 = vld [vmem:[#allocation10 + $0xb0] sm:$0xff] }
 0x56e   :  { %2475 = vmatpush.msrb.mxu3 %v5993_v39  ;;  %2582 = vmatpush.msrb.mxu2 %v5953_v4  ;;  %v3381_v4 = vld [vmem:[#allocation10 + $0x100] sm:$0xff]  ;;  %v7438_v23 = vld [vmem:[#allocation76_spill] sm:$0xff] }
 0x56f   :  { %2469 = vmatmul.f32.vlgmr.msra.gmra.mxu2 %v6314_v1  ;;  %2542 = vmatpush.msrb.mxu0 %v5996_v19  ;;  %v7439_v39 = vld [vmem:[#allocation70_spill] sm:$0xff]  ;;  %v3385_v19 = vld [vmem:[#allocation10 + $0x98] sm:$0xff] }
 0x570   :  { %2476 = vmatpush.msrb.mxu3 %v6005_v17  ;;  %2562 = vmatpush.msrb.mxu1 %v5999_v62  ;;  %v7440_v62 = vld [vmem:[#allocation56_spill] sm:$0xff]  ;;  %v3386_v17 = vld [vmem:[#allocation10 + $0x80] sm:$0xff] }
 0x571   :  { %2362 = vmatmul.f32.vlgmr.msra.gmra.mxu3 %v6312_v11  ;;  %2382 = vmatmul.f32.vlgmr.msra.gmra.mxu0 %v6312_v11 }
 0x572   :  { %2449 = vmatmul.f32.vlgmr.msra.gmra.mxu1 %v6314_v1  ;;  %2477 = vmatpush.msrb.mxu3 %v6011_v31  ;;  %v3387_v31 = vld [vmem:[#allocation10 + $0x68] sm:$0xff] }
 0x573   :  { %2543 = vmatpush.msrb.mxu0 %v6014_v60  ;;  %2563 = vmatpush.msrb.mxu1 %v6017_v40  ;;  %v7442_v60 = vld [vmem:[#allocation62_spill] sm:$0xff]  ;;  %v7443_v40 = vld [vmem:[#allocation73_spill] sm:$0xff] }
 0x574   :  { %2478 = vmatpush.msrb.mxu3 %v6023_v21  ;;  %2583 = vmatpush.msrb.mxu2 %v5956_v16  ;;  %v3382_v16 = vld [vmem:[#allocation10 + $0xe8] sm:$0xff]  ;;  %v7445_v21 = vld [vmem:[#allocation44_spill] sm:$0xff] }
 0x575   :  { %2544 = vmatpush.msrb.mxu0 %v6026_v30  ;;  %2564 = vmatpush.msrb.mxu1 %v6029_v5  ;;  %v7446_v30 = vld [vmem:[#allocation33_spill] sm:$0xff]  ;;  %v7447_v5 = vld [vmem:[#allocation92_spill] sm:$0xff] }
 0x576   :  { %2479 = vmatpush.msrb.mxu3 %v6035_v58  ;;  %2584 = vmatpush.msrb.mxu2 %v3380_v27  ;;  %v7449_v58 = vld [vmem:[#allocation90_spill] sm:$0xff]  ;;  %v7470_v27 = vld [vmem:[#allocation116_spill] sm:$0xff] }
 0x577   :  { %2545 = vmatpush.msrb.mxu0 %v6038_v63  ;;  %2565 = vmatpush.msrb.mxu1 %v7432_v33  ;;  %v7450_v63 = vld [vmem:[#allocation37_spill] sm:$0xff]  ;;  %v7471_v33 = vld [vmem:[#allocation115_spill] sm:$0xff] }
 0x578   :  { %2480 = vmatpush.msrb.mxu3 %v7433_v28  ;;  %2585 = vmatpush.msrb.mxu2 %v3381_v4  ;;  %v3400_v28 = vld [vmem:[#allocation11 + $0xb8] sm:$0xff]  ;;  %v7472_v4 = vld [vmem:[#allocation95_spill] sm:$0xff] }
 0x579   :  { %2546 = vmatpush.msrb.mxu0 %v7434_v36  ;;  %2566 = vmatpush.msrb.mxu1 %v7435_v35  ;;  %v7473_v36 = vld [vmem:[#allocation117_spill] sm:$0xff] }
 0x57a   :  { %2481 = vmatpush.msrb.mxu3 %v6059_v25  ;;  %2586 = vmatpush.msrb.mxu2 %v3382_v16  ;;  %v3390_v25 = vld [vmem:[#allocation10 + $0x20] sm:$0xff]  ;;  %v7474_v16 = vld [vmem:[#allocation96_spill] sm:$0xff] }
 0x57b   :  { %2547 = vmatpush.msrb.mxu0 %v7436_v49  ;;  %2567 = vmatpush.msrb.mxu1 %v3383_v61  ;;  %v3401_v35 = vld [vmem:[#allocation11 + $0xa0] sm:$0xff]  ;;  %v3402_v61 = vld [vmem:[#allocation11 + $0x88] sm:$0xff] }
 0x57c   :  { %2482 = vmatpush.msrb.mxu3 %v6069_v13  ;;  %2587 = vmatpush.msrb.mxu2 %v7437_v8  ;;  %v7448_v13 = vld [vmem:[#allocation50_spill] sm:$0xff]  ;;  %v7475_v49 = vld [vmem:[#allocation41_spill] sm:$0xff] }
 0x57d   :  { %2548 = vmatpush.msrb.mxu0 %v6072_v47  ;;  %2568 = vmatpush.msrb.mxu1 %v3384_v0  ;;  %v7441_v47 = vld [vmem:[#allocation42_spill] sm:$0xff]  ;;  %v7476_v8 = vld [vmem:[#allocation97_spill] sm:$0xff] }
 0x57e   :  { %2483 = vmatpush.msrb.mxu3 %v6079_v37  ;;  %2588 = vmatpush.msrb.mxu2 %v7438_v23  ;;  %v7444_v37 = vld [vmem:[#allocation65_spill] sm:$0xff]  ;;  %v7477_v0 = vld [vmem:[#allocation118_spill] sm:$0xff]  ;;  %v3403_v23 = vld [vmem:[#allocation11 + $0x70] sm:$0xff] }
 0x57f   :  { %2549 = vmatpush.msrb.mxu0 %v7439_v39  ;;  %2569 = vmatpush.msrb.mxu1 %v3385_v19  ;;  %v7478_v39 = vld [vmem:[#allocation24_spill] sm:$0xff]  ;;  %v7479_v19 = vld [vmem:[#allocation119_spill] sm:$0xff] }
 0x580   :  { %2484 = vmatpush.msrb.mxu3 %v6087_v44  ;;  %2589 = vmatpush.msrb.mxu2 %v7440_v62  ;;  %v3388_v44 = vld [vmem:[#allocation10 + $0x50] sm:$0xff]  ;;  %v3404_v62 = vld [vmem:[#allocation11 + $0x58] sm:$0xff] }
 0x581   :  { %2550 = vmatpush.msrb.mxu0 %v6090_v45  ;;  %2570 = vmatpush.msrb.mxu1 %v3386_v17  ;;  %v7452_v45 = vld [vmem:[#allocation59_spill] sm:$0xff] }
 0x582   :  { %2485 = vmatpush.msrb.mxu3 %v6095_v50  ;;  %2590 = vmatpush.msrb.mxu2 %v7441_v47  ;;  %v3389_v50 = vld [vmem:[#allocation10 + $0x38] sm:$0xff]  ;;  %v7480_v17 = vld [vmem:[#allocation43_spill] sm:$0xff]  ;;  %v7481_v47 = vld [vmem:[#allocation98_spill] sm:$0xff] }
 0x583   :  { %2551 = vmatpush.msrb.mxu0 %v6098_v7  ;;  %2571 = vmatpush.msrb.mxu1 %v3387_v31  ;;  %v7451_v7 = vld [vmem:[#allocation35_spill] sm:$0xff]  ;;  %v3405_v31 = vld [vmem:[#allocation11 + $0x40] sm:$0xff] }
 0x584   :  { %2486 = vmatpush.msrb.mxu3 %v6103_v34  ;;  %2591 = vmatpush.msrb.mxu2 %v7442_v60  ;;  %v7453_v34 = vld [vmem:[#allocation101_spill] sm:$0xff]  ;;  %v7482_v60 = vld [vmem:[#allocation26_spill] sm:$0xff] }
 0x585   :  { %2552 = vmatpush.msrb.mxu0 %v7443_v40  ;;  %2572 = vmatpush.msrb.mxu1 %v3388_v44  ;;  %v7483_v40 = vld [vmem:[#allocation99_spill] sm:$0xff] }
 0x586   :  { %2487 = vmatpush.msrb.mxu3 %v7444_v37  ;;  %2592 = vmatpush.msrb.mxu2 %v7445_v21  ;;  %v3406_v44 = vld [vmem:[#allocation11 + $0x28] sm:$0xff]  ;;  %v3407_v21 = vld [vmem:[#allocation11 + $0x10] sm:$0xff] }
 0x587   :  { %2553 = vmatpush.msrb.mxu0 %v7446_v30  ;;  %2573 = vmatpush.msrb.mxu1 %v3389_v50  ;;  %v7484_v37 = vld [vmem:[#allocation79_spill] sm:$0xff] }
 0x588   :  { %2488 = vmatpush.msrb.mxu3 %v7447_v5  ;;  %2593 = vmatpush.msrb.mxu2 %v7448_v13  ;;  %v7485_v13 = vld [vmem:[#allocation64_spill] sm:$0xff] }
 0x589   :  { %2489 = vmatmul.f32.vlgmr.msrb.gmra.mxu3 %v6314_v1  ;;  %2554 = vmatpush.msrb.mxu0 %v7449_v58 }
 0x58a   :  { %2600 = vmatpush.msra.mxu3 %v7450_v63  ;;  %2574 = vmatpush.msrb.mxu1 %v3390_v25  ;;  %v7486_v63 = vld [vmem:[#allocation66_spill] sm:$0xff] }
 0x58b   :  { %2555 = vmatpush.msrb.mxu0 %v7451_v7  ;;  %2594 = vmatpush.msrb.mxu2 %v7452_v45 }
 0x58c   :  { %2601 = vmatpush.msra.mxu3 %v7453_v34  ;;  %2575 = vmatpush.msrb.mxu1 %v3391_v20  ;;  %v7487_v34 = vld [vmem:[#allocation60_spill] sm:$0xff] }
 0x58d   :  { %2620 = vmatpush.msra.mxu0 %v7454_v9  ;;  %2595 = vmatpush.msrb.mxu2 %v7456_v43 }
 0x58e   :  { %2640 = vmatpush.msra.mxu1 %v3392_v56  ;;  %2602 = vmatpush.msra.mxu3 %v7455_v48  ;;  %v7488_v48 = vld [vmem:[#allocation94_spill] sm:$0xff] }
 0x58f   :  { %2621 = vmatpush.msra.mxu0 %v7457_v52 }
 0x590   :  { %2641 = vmatpush.msra.mxu1 %v3393_v38  ;;  %2603 = vmatpush.msra.mxu3 %v7458_v42  ;;  %v7489_v38 = vld [vmem:[#allocation85_spill] sm:$0xff]  ;;  %v7490_v42 = vld [vmem:[#allocation34_spill] sm:$0xff] }
 0x591   :  { %2622 = vmatpush.msra.mxu0 %v7459_v2  ;;  %v304_v2 = vadd.f32 %v7490_v42, %v7489_v38 }
 0x592   :  { %2642 = vmatpush.msra.mxu1 %v3394_v15  ;;  %2604 = vmatpush.msra.mxu3 %v7460_v18  ;;  %v7491_v15 = vld [vmem:[#allocation87_spill] sm:$0xff] }
 0x593   :  { %2623 = vmatpush.msra.mxu0 %v7461_v41 }
 0x594   :  { %2643 = vmatpush.msra.mxu1 %v3395_v57  ;;  %2605 = vmatpush.msra.mxu3 %v7462_v53  ;;  %v7492_v53 = vld [vmem:[#allocation38_spill] sm:$0xff] }
 0x595   :  { %2624 = vmatpush.msra.mxu0 %v7463_v26 }
 0x596   :  { %2644 = vmatpush.msra.mxu1 %v3396_v3  ;;  %2606 = vmatpush.msra.mxu3 %v7464_v32  ;;  %v7493_v32 = vld [vmem:[#allocation68_spill] sm:$0xff] }
 0x597   :  { %2625 = vmatpush.msra.mxu0 %v7465_v24 }
 0x598   :  { %2645 = vmatpush.msra.mxu1 %v3397_v14  ;;  %2607 = vmatpush.msra.mxu3 %v7466_v54 }
 0x599   :  { %2626 = vmatpush.msra.mxu0 %v7467_v12 }
 0x59a   :  { %2646 = vmatpush.msra.mxu1 %v3398_v46  ;;  %2608 = vmatpush.msra.mxu3 %v7468_v55 }
 0x59b   :  { %2627 = vmatpush.msra.mxu0 %v7469_v10 }
 0x59c   :  { %2647 = vmatpush.msra.mxu1 %v3399_v59  ;;  %2609 = vmatpush.msra.mxu3 %v7470_v27 }
 0x59d   :  { %2628 = vmatpush.msra.mxu0 %v7471_v33 }
 0x59e   :  { %2648 = vmatpush.msra.mxu1 %v3400_v28  ;;  %2610 = vmatpush.msra.mxu3 %v7472_v4 }
 0x59f   :  { %2629 = vmatpush.msra.mxu0 %v7473_v36 }
 0x5a0   :  { %2649 = vmatpush.msra.mxu1 %v3401_v35  ;;  %2611 = vmatpush.msra.mxu3 %v7474_v16 }
 0x5a1   :  { %2630 = vmatpush.msra.mxu0 %v7475_v49 }
 0x5a2   :  { %2650 = vmatpush.msra.mxu1 %v3402_v61  ;;  %2612 = vmatpush.msra.mxu3 %v7476_v8 }
 0x5a3   :  { %2631 = vmatpush.msra.mxu0 %v7477_v0 }
 0x5a4   :  { %2651 = vmatpush.msra.mxu1 %v3403_v23  ;;  %2613 = vmatpush.msra.mxu3 %v7478_v39 }
 0x5a5   :  { %2632 = vmatpush.msra.mxu0 %v7479_v19 }
 0x5a6   :  { %2652 = vmatpush.msra.mxu1 %v3404_v62  ;;  %2614 = vmatpush.msra.mxu3 %v7480_v17 }
 0x5a7   :  { %2633 = vmatpush.msra.mxu0 %v7481_v47 }
 0x5a8   :  { %2653 = vmatpush.msra.mxu1 %v3405_v31  ;;  %2615 = vmatpush.msra.mxu3 %v7482_v60 }
 0x5a9   :  { %2634 = vmatpush.msra.mxu0 %v7483_v40 }
 0x5aa   :  { %2654 = vmatpush.msra.mxu1 %v3406_v44 }
 0x5ab   :  { %2635 = vmatpush.msra.mxu0 %v7484_v37 }
 0x5ac   :  { %2655 = vmatpush.msra.mxu1 %v3407_v21 }
 0x5e6   :  { %v2303_v56 = vpop.f32.mrf.mxu0 }
 0x5e7   :  { %v2323_v30 = vpop.f32.mrf.mxu1  ;;  %v2304_v26 = vadd.f32 %v2303_v56, %v7492_v53 }
 0x5e8   :  { %v2324_v17 = vadd.f32 %v2323_v30, %v7431_v6 }
 0x5ea   :  { %v2343_v50 = vpop.f32.mrf.mxu2 }
 0x5eb   :  { %v2344_v58 = vadd.f32 %v2343_v50, %v7485_v13 }
 0x5ec   :  { %v2283_v5 = vpop.f32.mrf.mxu3 }
 0x5ed   :  { %v2284_v25 = vadd.f32 %v2283_v5, %v7486_v63 }
 0x5ee   :  { %v2383_v49 = vpop.f32.mrf.mxu0 }
 0x5ef   :  { %v2386_v7 = vadd.f32 %v2344_v58, %v2284_v25  ;;  %v2450_v45 = vpop.f32.mrf.mxu1  ;;  %v2384_v47 = vadd.f32 %v2383_v49, %v7430_v22 }
 0x5f0   :  { %v2451_v20 = vadd.f32 %v2450_v45, %v7487_v34 }
 0x5f1   :  { %v2795_v9 = vmul.f32 -1.442695, %v2386_v7 }
 0x5f2   :  { %v2493_v43 = vadd.f32 %v2451_v20, %v7488_v48  ;;  %v2470_v52 = vpop.f32.mrf.mxu2 }
 0x5f3   :  { %2946 = vpow2.f32 %v2795_v9  ;;  %v2471_v18 = vadd.f32 %v2470_v52, %v7491_v15 }
 0x5f4   :  { %v2797_v41 = vmul.f32 -1.442695, %v2493_v43  ;;  %v2363_v57 = vpop.f32.mrf.mxu3 }
 0x5f5   :  { %v2513_v3 = vadd.f32 %v2471_v18, %v304_v2  ;;  %v2364_v24 = vadd.f32 %v2363_v57, %v7493_v32  ;;  %v7496_v57 = vld [vmem:[#allocation36_spill] sm:$0xff] }
 0x5f6   :  { %2948 = vpow2.f32 %v2797_v41 }
 0x5f7   :  { %v2798_v14 = vmul.f32 -1.442695, %v2513_v3  ;;  %v2406_v54 = vadd.f32 %v2364_v24, %v2304_v26  ;;  %v345_v26 = vadd.f32 %v7496_v57, %v4274_v51 }
 0x5f9   :  { %v2947_v12 = vpop.eup %2946  ;;  %2950 = vpow2.f32 %v2798_v14  ;;  %v2796_v46 = vmul.f32 -1.442695, %v2406_v54 }
 0x5fa   :  { %v2390_v55 = vadd.f32 1.0, %v2947_v12 }
 0x5fb   :  { %2952 = vpow2.f32 %v2796_v46 }
 0x5fc   :  { %v2949_v10 = vpop.eup %2948  ;;  %2954 = vrcp.f32 %v2390_v55  ;;  %v2400_v8 = vand.u32 2147483647, %v2390_v55  ;;  %v2402_v0 = vand.u32 2147483648, %v2390_v55  ;;  %vm2396_vm9 = vweird.f32 %v2390_v55 }
 0x5fd   :  { %v2497_v59 = vadd.f32 1.0, %v2949_v10 }
 0x5fe   :  { %vm2401_vm10 = vcmp.eq.f32.partialorder %v2400_v8, 8.507059e+37  ;;  %v2403_v21 = vor.u32 1.1754944e-38, %v2402_v0 }
 0x5ff   :  { %v2951_v27 = vpop.eup %2950  ;;  %2956 = vrcp.f32 %v2497_v59  ;;  %v2507_v19 = vand.u32 2147483647, %v2497_v59  ;;  %v2509_v60 = vand.u32 2147483648, %v2497_v59  ;;  %vm2503_vm12 = vweird.f32 %v2497_v59 }
 0x600   :  { %v6418_v33 = vadd.f32 1.0, %v2951_v27 }
 0x601   :  { %v2953_v28 = vpop.eup %2952  ;;  %vm6428_vm14 = vcmp.eq.f32.partialorder %v2507_v19, 8.507059e+37  ;;  %v2510_v20 = vor.u32 1.1754944e-38, %v2509_v60  ;;  %v2719_v19 = vld [vmem:[#allocation14 + $0x60] sm:$0xff] }
 0x602   :  { %v2955_v4 = vpop.eup %2954  ;;  %2958 = vrcp.f32 %v6418_v33  ;;  %v6421_v36 = vadd.f32 1.0, %v2953_v28  ;;  %vm2523_vm2 = vweird.f32 %v6418_v33  ;;  %v2527_v14 = vand.u32 2147483647, %v6418_v33 }
 0x603   :  { %v2392_v35 = vmul.f32 %v2955_v4, %v2390_v55  ;;  %vm2397_vm8 = vweird.f32 %v2955_v4 }
 0x604   :  { %2960 = vrcp.f32 %v6421_v36  ;;  %vm2398_vm11 = vmor %vm2396_vm9, %vm2397_vm8  ;;  %v2420_v9 = vand.u32 2147483647, %v6421_v36  ;;  %v2422_v42 = vand.u32 2147483648, %v6421_v36  ;;  %vm2416_vm4 = vweird.f32 %v6421_v36 }
 0x605   :  { %v2957_v16 = vpop.eup %2956  ;;  %v2393_v61 = vsub.f32 1.0, %v2392_v35  ;;  %vm2528_vm7 = vcmp.eq.f32.partialorder %v2527_v14, 8.507059e+37 }
 0x606   :  { %v2499_v23 = vmul.f32 %v2957_v16, %v2497_v59  ;;  %vm2504_vm13 = vweird.f32 %v2957_v16  ;;  %v2423_v46 = vor.u32 1.1754944e-38, %v2422_v42  ;;  %vm2421_vm6 = vcmp.eq.f32.partialorder %v2420_v9, 8.507059e+37  ;;  %v2709_v9 = vld [vmem:[#allocation14 + $0x10] sm:$0xff] }
 0x607   :  { %v2394_v39 = vmul.f32 %v2955_v4, %v2393_v61  ;;  %vm2505_vm15 = vmor %vm2503_vm12, %vm2504_vm13 }
 0x608   :  { %v2959_v62 = vpop.eup %2958  ;;  %v2500_v31 = vsub.f32 1.0, %v2499_v23  ;;  %v2722_v23 = vld [vmem:[#allocation14 + $0x78] sm:$0xff] }
 0x609   :  { %v2395_v40 = vadd.f32 %v2955_v4, %v2394_v39  ;;  %v2519_v44 = vmul.f32 %v2959_v62, %v6418_v33  ;;  %vm2524_vm0 = vweird.f32 %v2959_v62  ;;  %2727 = vmatpush.msra.mxu2 %v2722_v23  ;;  %v2720_v39 = vld [vmem:[#allocation14 + $0x68] sm:$0xff] }
 0x60a   :  { %v2961_v37 = vpop.eup %2960  ;;  %v2501_v50 = vmul.f32 %v2957_v16, %v2500_v31  ;;  %vm6442_vm3 = vmor %vm2523_vm2, %vm2524_vm0 }
 0x60b   :  { %v2399_v5 = vsel %vm2398_vm11, %v2955_v4, %v2395_v40  ;;  %v2520_v58 = vsub.f32 1.0, %v2519_v44  ;;  %v2412_v25 = vmul.f32 %v2961_v37, %v6421_v36  ;;  %vm2417_vm1 = vweird.f32 %v2961_v37  ;;  %v2715_v44 = vld [vmem:[#allocation14 + $0x40] sm:$0xff] }
 0x60c   :  { %v2404_v7 = vsel %vm2401_vm10, %v2403_v21, %v2399_v5  ;;  %v2490_v45 = vpop.f32.mrf.mxu3  ;;  %v2502_v34 = vadd.f32 %v2957_v16, %v2501_v50  ;;  %vm2418_vm5 = vmor %vm2416_vm4, %vm2417_vm1  ;;  %v2714_v50 = vld [vmem:[#allocation14 + $0x38] sm:$0xff] }
 0x60d   :  { %v2426_v56 = vmul.f32 %v2404_v7, %v2384_v47  ;;  %v2521_v48 = vmul.f32 %v2959_v62, %v2520_v58  ;;  %v2413_v43 = vsub.f32 1.0, %v2412_v25  ;;  %v2491_v52 = vadd.f32 %v2490_v45, %v4270_v29  ;;  %v2716_v47 = vld [vmem:[#allocation14 + $0x48] sm:$0xff]  ;;  %v2713_v25 = vld [vmem:[#allocation14 + $0x30] sm:$0xff] }
 0x60e   :  { %v2506_v38 = vsel %vm2505_vm15, %v2957_v16, %v2502_v34  ;;  %v2529_v29 = vand.u32 2147483648, %v6418_v33  ;;  %v2712_v45 = vld [vmem:[#allocation14 + $0x28] sm:$0xff] }
 0x60f   :  { %v2427_v2 = vadd.f32 %v2426_v56, %v2324_v17  ;;  %v2511_v15 = vsel %vm6428_vm14, %v2510_v20, %v2506_v38  ;;  %v2522_v18 = vadd.f32 %v2959_v62, %v2521_v48  ;;  %v2414_v41 = vmul.f32 %v2961_v37, %v2413_v43  ;;  %v2717_v17 = vld [vmem:[#allocation14 + $0x50] sm:$0xff]  ;;  %v2710_v20 = vld [vmem:[#allocation14 + $0x18] sm:$0xff]  ;;  %v2708_v48 = vld [vmem:[#allocation14 + $0x8] sm:$0xff] }
 0x610   :  { %v2533_v3 = vmul.f32 %v2511_v15, %v2491_v52  ;;  %v2530_v10 = vor.u32 1.1754944e-38, %v2529_v29  ;;  %v2707_v52 = vld [vmem:[#allocation14] sm:$0xff] }
 0x611   :  { %2962 = vtanh.f32 %v2427_v2  ;;  %v2415_v54 = vadd.f32 %v2961_v37, %v2414_v41  ;;  %v2526_v51 = vsel %vm6442_vm3, %v2959_v62, %v2522_v18  ;;  %v2718_v62 = vld [vmem:[#allocation14 + $0x58] sm:$0xff] }
 0x612   :  { %v2534_v12 = vadd.f32 %v2533_v3, %v345_v26  ;;  %v2531_v28 = vsel %vm2528_vm7, %v2530_v10, %v2526_v51 }
 0x613   :  { %v2419_v55 = vsel %vm2418_vm5, %v2961_v37, %v2415_v54  ;;  %v2536_v36 = vsub.f32 1.0, %v2531_v28  ;;  %v2538_v8 = vmul.f32 %v2531_v28, %v6314_v1 }
 0x614   :  { %2964 = vtanh.f32 %v2534_v12  ;;  %v2424_v59 = vsel %vm2421_vm6, %v2423_v46, %v2419_v55 }
 0x615   :  { %v2429_v27 = vsub.f32 1.0, %v2424_v59  ;;  %v2431_v35 = vmul.f32 %v2424_v59, %v6312_v11  ;;  %v2721_v11 = vld [vmem:[#allocation14 + $0x70] sm:$0xff] }
 0x616   :  { %2728 = vmatpush.msra.mxu2 %v2721_v11 }
 0x617   :  { %v2963_v4 = vpop.eup %2962 }
 0x618   :  { %v2430_v33 = vmul.f32 %v2963_v4, %v2429_v27  ;;  %2729 = vmatpush.msra.mxu2 %v2720_v39 }
 0x61a   :  { %v2965_v16 = vpop.eup %2964  ;;  %v6452_v49 = vadd.f32 %v2431_v35, %v2430_v33  ;;  %2730 = vmatpush.msra.mxu2 %v2719_v19 }
 0x61b   :  { %v2537_v61 = vmul.f32 %v2965_v16, %v2536_v36 }
 0x61c   :  { %2616 = vmatmul.f32.vlgmr.msra.gmra.mxu3 %v6452_v49  ;;  %2731 = vmatpush.msra.mxu2 %v2718_v62 }
 0x61d   :  { %v2539_v0 = vadd.f32 %v2538_v8, %v2537_v61 }
 0x61e   :  { %2732 = vmatpush.msra.mxu2 %v2717_v17 }
 0x61f   :  { %2556 = vmatmul.f32.vlgmr.msrb.gmra.mxu0 %v2539_v0  ;;  %2576 = vmatmul.f32.vlgmr.msrb.gmra.mxu1 %v2539_v0 }
 0x620   :  { %2596 = vmatmul.f32.vlgmr.msrb.gmra.mxu2 %v2539_v0 }
 0x621   :  { %2733 = vmatpush.msra.mxu2 %v2716_v47 }
 0x623   :  { %2734 = vmatpush.msra.mxu2 %v2715_v44 }
 0x625   :  { %2735 = vmatpush.msra.mxu2 %v2714_v50 }
 0x627   :  { %2636 = vmatmul.f32.vlgmr.msra.gmra.mxu0 %v6452_v49  ;;  %2656 = vmatmul.f32.vlgmr.msra.gmra.mxu1 %v6452_v49 }
 0x628   :  { %2736 = vmatpush.msra.mxu2 %v2713_v25 }
 0x62a   :  { %2737 = vmatpush.msra.mxu2 %v2712_v45 }
 0x69c   :  { %v2557_v1 = vpop.f32.mrf.mxu0  ;;  %v2577_v37 = vpop.f32.mrf.mxu1 }
 0x69d   :  { %v2558_v60 = vadd.f32 %v2557_v1, %v7486_v63  ;;  %v2578_v30 = vadd.f32 %v2577_v37, %v7492_v53  ;;  %v2711_v63 = vld [vmem:[#allocation14 + $0x20] sm:$0xff] }
 0x69e   :  { %2738 = vmatpush.msra.mxu2 %v2711_v63 }
 0x69f   :  { %v2617_v31 = vpop.f32.mrf.mxu3 }
 0x6a0   :  { %v2618_v40 = vadd.f32 %v2617_v31, %v7485_v13  ;;  %2739 = vmatpush.msra.mxu2 %v2710_v20 }
 0x6a2   :  { %v2660_v21 = vadd.f32 %v2618_v40, %v2558_v60  ;;  %2740 = vmatpush.msra.mxu2 %v2709_v9 }
 0x6a3   :  { %v2597_v24 = vpop.f32.mrf.mxu2 }
 0x6a4   :  { %v2799_v5 = vmul.f32 -1.442695, %v2660_v21  ;;  %v2637_v58 = vpop.f32.mrf.mxu0  ;;  %2741 = vmatpush.msra.mxu2 %v2708_v48  ;;  %v2657_v29 = vpop.f32.mrf.mxu1  ;;  %v2598_v10 = vadd.f32 %v2597_v24, %v7431_v6  ;;  %v2815_v6 = vld [vmem:[%s6481_s10] ss:$0 sm:$0xff] }
 0x6a5   :  { %v2638_v7 = vadd.f32 %v2637_v58, %v7493_v32  ;;  %v2658_v12 = vadd.f32 %v2657_v29, %v7430_v22 }
 0x6a6   :  { %2966 = vpow2.f32 %v2799_v5  ;;  %2742 = vmatpush.msra.mxu2 %v2707_v52 }
 0x6a7   :  { %v2680_v34 = vadd.f32 %v2638_v7, %v2578_v30 }
 0x6a9   :  { %v2800_v13 = vmul.f32 -1.442695, %v2680_v34 }
 0x6ab   :  { %2968 = vpow2.f32 %v2800_v13 }
 0x6ac   :  { %v2967_v56 = vpop.eup %2966 }
 0x6ad   :  { %v2664_v43 = vadd.f32 1.0, %v2967_v56 }
 0x6af   :  { %2970 = vrcp.f32 %v2664_v43  ;;  %v2676_v15 = vand.u32 2147483648, %v2664_v43  ;;  %v2674_v57 = vand.u32 2147483647, %v2664_v43  ;;  %vm2670_vm9 = vweird.f32 %v2664_v43 }
 0x6b1   :  { %v2969_v53 = vpop.eup %2968  ;;  %v2677_v54 = vor.u32 1.1754944e-38, %v2676_v15  ;;  %vm2675_vm11 = vcmp.eq.f32.partialorder %v2674_v57, 8.507059e+37 }
 0x6b2   :  { %v2684_v32 = vadd.f32 1.0, %v2969_v53 }
 0x6b4   :  { %2972 = vrcp.f32 %v2684_v32  ;;  %v2696_v59 = vand.u32 2147483648, %v2684_v32  ;;  %vm2690_vm13 = vweird.f32 %v2684_v32  ;;  %v2694_v4 = vand.u32 2147483647, %v2684_v32 }
 0x6b5   :  { %v2971_v38 = vpop.eup %2970 }
 0x6b6   :  { %v2666_v42 = vmul.f32 %v2971_v38, %v2664_v43  ;;  %vm2671_vm8 = vweird.f32 %v2971_v38  ;;  %v2697_v36 = vor.u32 1.1754944e-38, %v2696_v59  ;;  %vm2695_vm15 = vcmp.eq.f32.partialorder %v2694_v4, 8.507059e+37 }
 0x6b7   :  { %vm2672_vm10 = vmor %vm2670_vm9, %vm2671_vm8 }
 0x6b8   :  { %v2667_v2 = vsub.f32 1.0, %v2666_v42 }
 0x6ba   :  { %v2973_v18 = vpop.eup %2972  ;;  %v2668_v41 = vmul.f32 %v2971_v38, %v2667_v2 }
 0x6bb   :  { %v2686_v26 = vmul.f32 %v2973_v18, %v2684_v32  ;;  %vm2691_vm12 = vweird.f32 %v2973_v18 }
 0x6bc   :  { %v2669_v3 = vadd.f32 %v2971_v38, %v2668_v41  ;;  %vm2692_vm14 = vmor %vm2690_vm13, %vm2691_vm12 }
 0x6bd   :  { %v2687_v14 = vsub.f32 1.0, %v2686_v26 }
 0x6be   :  { %v2673_v46 = vsel %vm2672_vm10, %v2971_v38, %v2669_v3 }
 0x6bf   :  { %v2688_v51 = vmul.f32 %v2973_v18, %v2687_v14  ;;  %v2678_v55 = vsel %vm2675_vm11, %v2677_v54, %v2673_v46 }
 0x6c0   :  { %v2700_v27 = vmul.f32 %v2678_v55, %v2658_v12 }
 0x6c1   :  { %v2689_v28 = vadd.f32 %v2973_v18, %v2688_v51 }
 0x6c2   :  { %v2701_v33 = vadd.f32 %v2700_v27, %v2598_v10 }
 0x6c3   :  { %v2693_v35 = vsel %vm2692_vm14, %v2973_v18, %v2689_v28 }
 0x6c4   :  { %2974 = vtanh.f32 %v2701_v33  ;;  %v2698_v16 = vsel %vm2695_vm15, %v2697_v36, %v2693_v35 }
 0x6c5   :  { %v2703_v22 = vsub.f32 1.0, %v2698_v16  ;;  %v2705_v0 = vmul.f32 %v2698_v16, %v6452_v49 }
 0x6ca   :  { %v2975_v61 = vpop.eup %2974 }
 0x6cb   :  { %v2704_v8 = vmul.f32 %v2975_v61, %v2703_v22 }
 0x6cd   :  { %v2706_v23 = vadd.f32 %v2705_v0, %v2704_v8 }
 0x6cf   :  { %2743 = vmatmul.f32.vlgmr.msra.gmra.mxu2 %v2706_v23 }
 0x752   :  { %v2744_v11 = vpop.f32.mrf.mxu2 }
 0x753   :  { %v2745_v39 = vadd.f32 %v2815_v6, %v2744_v11 }
 0x755   :  { %2747 = vst [vmem:[#allocation16] sm:$0xff] %v2745_v39 }
 0x756   :  { %2758 = dma.vmem_to_hbm [thread:$0]  %s2754_s18, 128, %s2756_s20, [#allocation4]  }
 0x757   :  { %3634 = dma.done.wait [#allocation4], 128  }
 0x758   :  { %3635 = vsyncadd [#allocation4], 4294967168 }
 0x759   :  { %2763 = vsyncpa [#allocation3], 1 }
 0x75a   :  { %2764 = vsyncpa [#allocation6], 1 }
 0x75b   :  { %2765 = vsyncpa [#allocation9], 1 }
 0x75c   :  { %2766 = vsyncpa [#allocation12], 1 }
 0x75d   :  { %2767 = vsyncpa [#allocation15], 1 }
 0x75e   :  { %2768 = vsyncpa [#allocation4], 1 }

</bundles_post_ra>
